<compile_context>
chip_gen: v6e
topology: v6e:2x2x1
jax: 0.10.0
libtpu: 0.0.40
codegen_flags: <defaults>
</compile_context>

<pallas_src>
import jax
import jax.numpy as jnp
from jax.experimental import pallas as pl
from jax.experimental.pallas import tpu as pltpu

EPS = 1e-5
VMEM = pltpu.MemorySpace.VMEM
H_LSTM = 128


# ----------------------------------------------------------------------------
# Fused forward kernel
# ----------------------------------------------------------------------------
def fused_forward(team_x, player_x, ball_flat, ball_lengths, params, *, T):
    Bp, team_in = team_x.shape
    _, L, C = player_x.shape
    D = ball_flat.shape[1]
    H = H_LSTM
    L1 = L - 2
    L1p = L1 // 2
    L2 = L1p - 2
    L2p = L2 // 2

    team_p = params["team"]
    player_p = params["player"]
    ball_p = params["ball"]
    head_p = params["head"]
    n_in = 4 + len(team_p) + len(player_p) + len(ball_p) + len(head_p)

    def kernel(team_ref, player_ref, ball_ref, len_ref,
               tw1, tb1, tw2, tb2, tw3, tb3,
               cw1, cb1, cw2, cb2, pfw, pfb,
               wih_f, whh_f, bf, wih_b, whh_b, bb, bfw, bfb,
               hw1, hb1, hw2, hb2, hw3, hb3,
               o_ref):
        f32 = jnp.float32

        # ------------------ Team branch (BN folded into following Linear) ------------------
        t = jnp.maximum(jnp.dot(team_ref[...], tw1[...], preferred_element_type=f32) + tb1[...], 0.0)
        t = jnp.maximum(jnp.dot(t, tw2[...], preferred_element_type=f32) + tb2[...], 0.0)
        t_out = jnp.maximum(jnp.dot(t, tw3[...], preferred_element_type=f32) + tb3[...], 0.0)

        # ------------------ Player branch (BN folded into conv weights) --------------------
        xv = player_ref[...]                                           # (Bp, L, C)
        h = jnp.zeros((Bp, L1, 32), f32) + cb1[...]
        for k in range(3):                                             # conv1, valid, k=3
            xs = xv[:, k:k + L1, :].reshape(Bp * L1, C)
            h = h + jnp.dot(xs, cw1[k], preferred_element_type=f32).reshape(Bp, L1, 32)
        h = jnp.maximum(h, 0.0)                                        # BN folded + ReLU
        h = jnp.max(h.reshape(Bp, L1p, 2, 32), axis=2)                 # MaxPool1d(2)

        h2 = jnp.zeros((Bp, L2, 64), f32) + cb2[...]
        for k in range(3):                                             # conv2
            xs = h[:, k:k + L2, :].reshape(Bp * L2, 32)
            h2 = h2 + jnp.dot(xs, cw2[k], preferred_element_type=f32).reshape(Bp, L2, 64)
        h2 = jnp.maximum(h2, 0.0)
        h2 = jnp.max(h2.reshape(Bp, L2p, 2, 64), axis=2)               # (Bp, L2p, 64)

        # Flatten + fc (PyTorch channel-major flatten is folded into pfw at init as
        # per-position weight slabs).  Kept as a short static loop to avoid a
        # minor-dim-changing reshape; the matmuls are tiny and MXU-bound either way.
        p_out = pfb[...] + jnp.zeros((Bp, 16), f32)
        for l in range(L2p):
            p_out = p_out + jnp.dot(h2[:, l, :], pfw[l], preferred_element_type=f32)
        p_out = jnp.maximum(p_out, 0.0)

        # ------------------ Ball branch (bidirectional LSTM, hidden=128) -------------------
        lens = len_ref[...]                                            # (Bp, 1) int32
        xflat = ball_ref[...]                                          # (T*Bp, D), time-major
        # Hoisted input projections (one matmul per direction instead of T per direction).
        gx_f = jnp.dot(xflat, wih_f[...], preferred_element_type=f32) + bf[...]   # (T*Bp, 4H)
        gx_b = jnp.dot(xflat, wih_b[...], preferred_element_type=f32) + bb[...]
        whhf = whh_f[...]
        whhb = whh_b[...]

        def cell(gates, c_prev):
            i = jax.nn.sigmoid(gates[:, 0 * H:1 * H])
            f = jax.nn.sigmoid(gates[:, 1 * H:2 * H])
            g = jnp.tanh(gates[:, 2 * H:3 * H])
            o = jax.nn.sigmoid(gates[:, 3 * H:4 * H])
            c_new = f * c_prev + i * g
            return o * jnp.tanh(c_new), c_new

        zeros = jnp.zeros((Bp, H), f32)
        h_f, c_f, h_b, c_b = zeros, zeros, zeros, zeros
        # Statically unrolled; forward and backward directions interleaved per step so the
        # two independent h @ W_hh recurrences overlap on the MXU/EUP.
        for s in range(T):
            tr = T - 1 - s                                             # reverse-direction time
            gf = gx_f[s * Bp:(s + 1) * Bp, :] + jnp.dot(h_f, whhf, preferred_element_type=f32)
            gb = gx_b[tr * Bp:(tr + 1) * Bp, :] + jnp.dot(h_b, whhb, preferred_element_type=f32)
            hf_new, cf_new = cell(gf, c_f)
            hb_new, cb_new = cell(gb, c_b)
            valid_f = s < lens                                         # packed-sequence mask
            valid_b = tr < lens
            h_f = jnp.where(valid_f, hf_new, h_f)
            c_f = jnp.where(valid_f, cf_new, c_f)
            h_b = jnp.where(valid_b, hb_new, h_b)
            c_b = jnp.where(valid_b, cb_new, c_b)

        # hn = cat(hn[-2], hn[-1]); Dropout = identity (eval); fc + ReLU (row-block matmuls,
        # no lane concat).
        bfw_v = bfw[...]
        b_out = jnp.maximum(
            jnp.dot(h_f, bfw_v[:H, :], preferred_element_type=f32)
            + jnp.dot(h_b, bfw_v[H:, :], preferred_element_type=f32)
            + bfb[...], 0.0)

        # ------------------ Fusion head -----------------------------------------------------
        hw1_v = hw1[...]
        hh = jnp.maximum(
            jnp.dot(t_out, hw1_v[0:16, :], preferred_element_type=f32)
            + jnp.dot(p_out, hw1_v[16:32, :], preferred_element_type=f32)
            + jnp.dot(b_out, hw1_v[32:48, :], preferred_element_type=f32)
            + hb1[...], 0.0)
        hh = jnp.maximum(jnp.dot(hh, hw2[...], preferred_element_type=f32) + hb2[...], 0.0)
        logits = jnp.dot(hh, hw3[...], preferred_element_type=f32) + hb3[...]
        o_ref[...] = jax.nn.sigmoid(logits)

    return pl.pallas_call(
        kernel,
        out_shape=jax.ShapeDtypeStruct((Bp, 1), jnp.float32),
        in_specs=[pl.BlockSpec(memory_space=VMEM)] * n_in,
        out_specs=pl.BlockSpec(memory_space=VMEM),
    )(team_x, player_x, ball_flat, ball_lengths,
      *team_p, *player_p, *ball_p, *head_p)


# ----------------------------------------------------------------------------
# Parameter init (deterministic, synthetic) with eval-mode BatchNorm folded in
# ----------------------------------------------------------------------------
def init_params(key, team_in, player_in, player_len, ball_in):
    ks = iter(jax.random.split(key, 32))
    inv_std = (1.0 + EPS) ** -0.5   # BN eval: running_mean=0, running_var=1, gamma=1, beta=0

    def lin(fi, fo):
        w = jax.random.normal(next(ks), (fi, fo), jnp.float32) * 0.1
        b = jax.random.normal(next(ks), (1, fo), jnp.float32) * 0.1
        return w, b

    # --- TeamStatsModel: Linear->ReLU->BN->Drop->Linear->ReLU->BN->Drop->Linear->ReLU ---
    # BN sits after the ReLU, so its affine (scale s, shift beta) folds into the NEXT Linear:
    #   (relu*s + beta) @ W + b = relu @ (s[:,None]*W) + (beta @ W + b)
    tw1, tb1 = lin(team_in, 64)
    tw2, tb2 = lin(64, 32)
    tw3, tb3 = lin(32, 16)
    g1, be1 = jnp.ones((64,), jnp.float32), jnp.zeros((64,), jnp.float32)
    g2, be2 = jnp.ones((32,), jnp.float32), jnp.zeros((32,), jnp.float32)
    s1, s2 = g1 * inv_std, g2 * inv_std
    tw2f = s1[:, None] * tw2
    tb2f = be1[None, :] @ tw2 + tb2
    tw3f = s2[:, None] * tw3
    tb3f = be2[None, :] @ tw3 + tb3
    team = (tw1, tb1, tw2f, tb2f, tw3f, tb3f)

    # --- PlayerStatsModel: Conv->BN->ReLU->Pool->Conv->BN->ReLU->Pool->Flatten->FC->ReLU ---
    # BN directly follows the conv, so it folds into the conv weight/bias.
    cw1 = jax.random.normal(next(ks), (3, player_in, 32), jnp.float32) * 0.1   # (k, Cin, Cout)
    cb1 = jax.random.normal(next(ks), (1, 1, 32), jnp.float32) * 0.1
    cw2 = jax.random.normal(next(ks), (3, 32, 64), jnp.float32) * 0.1
    cb2 = jax.random.normal(next(ks), (1, 1, 64), jnp.float32) * 0.1
    cw1f, cb1f = cw1 * inv_std, cb1 * inv_std       # + beta (=0)
    cw2f, cb2f = cw2 * inv_std, cb2 * inv_std
    L2p = ((player_len - 2) // 2 - 2) // 2
    # must match nn.Linear(64 * ((input_size - 4) // 4), 16) in the PyTorch module
    # TODO(synk): the PyTorch module sizes the FC from the channel count (input_size), not the
    # sequence length; this only lines up for shapes where (player_in-4)//4 == L2p, as here.
    assert 64 * L2p == 64 * ((player_in - 4) // 4)
    fcw_torch = jax.random.normal(next(ks), (64 * L2p, 16), jnp.float32) * 0.1  # channel-major rows
    # reorder rows to per-position slabs so the kernel needs no in-kernel transpose
    fcw_per_pos = jnp.transpose(fcw_torch.reshape(64, L2p, 16), (1, 0, 2))      # (L2p, 64, 16)
    fcb = jax.random.normal(next(ks), (1, 16), jnp.float32) * 0.1
    player = (cw1f, cb1f, cw2f, cb2f, fcw_per_pos, fcb)

    # --- BallToBallModel (bidirectional LSTM, hidden=128; b = b_ih + b_hh folded) ---
    def lstm_dir():
        wih = jax.random.normal(next(ks), (ball_in, 4 * H_LSTM), jnp.float32) * 0.1
        whh = jax.random.normal(next(ks), (H_LSTM, 4 * H_LSTM), jnp.float32) * 0.1
        b = jax.random.normal(next(ks), (1, 4 * H_LSTM), jnp.float32) * 0.1
        return wih, whh, b

    wih_f, whh_f, b_f = lstm_dir()
    wih_b, whh_b, b_b = lstm_dir()
    bfw, bfb = lin(2 * H_LSTM, 16)
    ball = (wih_f, whh_f, b_f, wih_b, whh_b, b_b, bfw, bfb)

    # --- fusion head ---
    hw1, hb1 = lin(48, 64)
    hw2, hb2 = lin(64, 32)
    hw3, hb3 = lin(32, 1)
    head = (hw1, hb1, hw2, hb2, hw3, hb3)

    return dict(team=team, player=player, ball=ball, head=head)


# ----------------------------------------------------------------------------
# Wrapper: pad batch to full sublane tiles, flatten ball input time-major, slice back
# ----------------------------------------------------------------------------
def combined_forward(team_x, player_x, ball_x, ball_lengths, params):
    B = team_x.shape[0]
    Bp = ((B + 7) // 8) * 8          # full sublane occupancy + aligned per-step gate slices
    pad_n = Bp - B

    def pad_b(a):
        if pad_n == 0:
            return a
        return jnp.pad(a, ((0, pad_n),) + ((0, 0),) * (a.ndim - 1))

    team_p = pad_b(team_x)
    player_p = pad_b(player_x)
    ball_p = pad_b(ball_x)
    len_p = pad_b(ball_lengths)      # padded rows get length 0 -> LSTM state stays zero

    T, D = ball_p.shape[1], ball_p.shape[2]
    # time-major flatten so per-step gate rows are contiguous, sublane-aligned slices
    ball_flat = jnp.transpose(ball_p, (1, 0, 2)).reshape(T * Bp, D)

    out = fused_forward(team_p, player_p, ball_flat, len_p, params, T=T)   # (Bp, 1)
    return out[:B, 0]                # matches output.squeeze() in PyTorch


if __name__ == "__main__":
    B = 2
    TEAM_IN = 12
    PLAYER_IN = 16    # player feature columns (conv channels)
    PLAYER_LEN = 18   # players per match; chosen so flatten dim == 64*((PLAYER_IN-4)//4)
    BALL_IN = 8       # ball-by-ball feature dim
    BALL_T = 8        # padded sequence length

    key = jax.random.PRNGKey(0)
    keys = jax.random.split(key, 5)
    team_x = jax.random.normal(keys[0], (B, TEAM_IN), jnp.float32)
    player_x = jax.random.normal(keys[1], (B, PLAYER_LEN, PLAYER_IN), jnp.float32)
    ball_x = jax.random.normal(keys[2], (B, BALL_T, BALL_IN), jnp.float32)
    ball_lengths = jnp.array([[BALL_T], [5]], dtype=jnp.int32)  # variable lengths (packed emu)

    params = init_params(keys[3], TEAM_IN, PLAYER_IN, PLAYER_LEN, BALL_IN)

    fwd = jax.jit(combined_forward)
    out = fwd(team_x, player_x, ball_x, ball_lengths, params)
    out = jax.block_until_ready(out)
    assert out.shape == (B,)
    assert bool(jnp.all(jnp.isfinite(out)))
    # TODO(synk): Dropout is identity and BatchNorm uses eval-mode running stats (fresh init);
    # training-mode stochastic dropout / batch statistics are intentionally not reproduced.
    print("KERNEL_OK")
</pallas_src>

<mosaic_0001>
module attributes {stable_mosaic.version = 11 : i64} {
  func.func @kernel(%arg0: memref<8x12xf32, #tpu.memory_space<vmem>>, %arg1: memref<8x18x16xf32, #tpu.memory_space<vmem>>, %arg2: memref<64x8xf32, #tpu.memory_space<vmem>>, %arg3: memref<8x1xi32, #tpu.memory_space<vmem>>, %arg4: memref<12x64xf32, #tpu.memory_space<vmem>>, %arg5: memref<1x64xf32, #tpu.memory_space<vmem>>, %arg6: memref<64x32xf32, #tpu.memory_space<vmem>>, %arg7: memref<1x32xf32, #tpu.memory_space<vmem>>, %arg8: memref<32x16xf32, #tpu.memory_space<vmem>>, %arg9: memref<1x16xf32, #tpu.memory_space<vmem>>, %arg10: memref<3x16x32xf32, #tpu.memory_space<vmem>>, %arg11: memref<1x1x32xf32, #tpu.memory_space<vmem>>, %arg12: memref<3x32x64xf32, #tpu.memory_space<vmem>>, %arg13: memref<1x1x64xf32, #tpu.memory_space<vmem>>, %arg14: memref<3x64x16xf32, #tpu.memory_space<vmem>>, %arg15: memref<1x16xf32, #tpu.memory_space<vmem>>, %arg16: memref<8x512xf32, #tpu.memory_space<vmem>>, %arg17: memref<128x512xf32, #tpu.memory_space<vmem>>, %arg18: memref<1x512xf32, #tpu.memory_space<vmem>>, %arg19: memref<8x512xf32, #tpu.memory_space<vmem>>, %arg20: memref<128x512xf32, #tpu.memory_space<vmem>>, %arg21: memref<1x512xf32, #tpu.memory_space<vmem>>, %arg22: memref<256x16xf32, #tpu.memory_space<vmem>>, %arg23: memref<1x16xf32, #tpu.memory_space<vmem>>, %arg24: memref<48x64xf32, #tpu.memory_space<vmem>>, %arg25: memref<1x64xf32, #tpu.memory_space<vmem>>, %arg26: memref<64x32xf32, #tpu.memory_space<vmem>>, %arg27: memref<1x32xf32, #tpu.memory_space<vmem>>, %arg28: memref<32x1xf32, #tpu.memory_space<vmem>>, %arg29: memref<1x1xf32, #tpu.memory_space<vmem>>, %arg30: memref<8x1xf32, #tpu.memory_space<vmem>>) attributes {dimension_semantics = [], scalar_prefetch = 0 : i64, scratch_operands = 0 : i64, tpu.core_type = #tpu.core_type<tc>} {
    %c0 = arith.constant 0 : index
    %c0_0 = arith.constant 0 : index
    %0 = vector.load %arg0[%c0, %c0_0] : memref<8x12xf32, #tpu.memory_space<vmem>>, vector<8x12xf32>
    %c0_1 = arith.constant 0 : index
    %c0_2 = arith.constant 0 : index
    %1 = vector.load %arg4[%c0_1, %c0_2] : memref<12x64xf32, #tpu.memory_space<vmem>>, vector<12x64xf32>
    %cst = arith.constant dense<0.000000e+00> : vector<8x64xf32>
    %2 = tpu.matmul %0, %1, %cst {dimension_numbers = #tpu.dot_dimension_numbers<[1], [0], [0], [1], [0, 0, 1, 1], [], []>} : vector<8x12xf32>, vector<12x64xf32>, vector<8x64xf32> -> vector<8x64xf32>
    %c0_3 = arith.constant 0 : index
    %c0_4 = arith.constant 0 : index
    %3 = vector.load %arg5[%c0_3, %c0_4] : memref<1x64xf32, #tpu.memory_space<vmem>>, vector<1x64xf32>
    %4 = vector.broadcast %3 : vector<1x64xf32> to vector<8x64xf32>
    %5 = arith.addf %2, %4 : vector<8x64xf32>
    %cst_5 = arith.constant 0.000000e+00 : f32
    %6 = vector.broadcast %cst_5 : f32 to vector<8x64xf32>
    %7 = arith.maximumf %5, %6 : vector<8x64xf32>
    %c0_6 = arith.constant 0 : index
    %c0_7 = arith.constant 0 : index
    %8 = vector.load %arg6[%c0_6, %c0_7] : memref<64x32xf32, #tpu.memory_space<vmem>>, vector<64x32xf32>
    %cst_8 = arith.constant dense<0.000000e+00> : vector<8x32xf32>
    %9 = tpu.matmul %7, %8, %cst_8 {dimension_numbers = #tpu.dot_dimension_numbers<[1], [0], [0], [1], [0, 0, 1, 1], [], []>} : vector<8x64xf32>, vector<64x32xf32>, vector<8x32xf32> -> vector<8x32xf32>
    %c0_9 = arith.constant 0 : index
    %c0_10 = arith.constant 0 : index
    %10 = vector.load %arg7[%c0_9, %c0_10] : memref<1x32xf32, #tpu.memory_space<vmem>>, vector<1x32xf32>
    %11 = vector.broadcast %10 : vector<1x32xf32> to vector<8x32xf32>
    %12 = arith.addf %9, %11 : vector<8x32xf32>
    %cst_11 = arith.constant 0.000000e+00 : f32
    %13 = vector.broadcast %cst_11 : f32 to vector<8x32xf32>
    %14 = arith.maximumf %12, %13 : vector<8x32xf32>
    %c0_12 = arith.constant 0 : index
    %c0_13 = arith.constant 0 : index
    %15 = vector.load %arg8[%c0_12, %c0_13] : memref<32x16xf32, #tpu.memory_space<vmem>>, vector<32x16xf32>
    %cst_14 = arith.constant dense<0.000000e+00> : vector<8x16xf32>
    %16 = tpu.matmul %14, %15, %cst_14 {dimension_numbers = #tpu.dot_dimension_numbers<[1], [0], [0], [1], [0, 0, 1, 1], [], []>} : vector<8x32xf32>, vector<32x16xf32>, vector<8x16xf32> -> vector<8x16xf32>
    %c0_15 = arith.constant 0 : index
    %c0_16 = arith.constant 0 : index
    %17 = vector.load %arg9[%c0_15, %c0_16] : memref<1x16xf32, #tpu.memory_space<vmem>>, vector<1x16xf32>
    %18 = vector.broadcast %17 : vector<1x16xf32> to vector<8x16xf32>
    %19 = arith.addf %16, %18 : vector<8x16xf32>
    %cst_17 = arith.constant 0.000000e+00 : f32
    %20 = vector.broadcast %cst_17 : f32 to vector<8x16xf32>
    %21 = arith.maximumf %19, %20 : vector<8x16xf32>
    %c0_18 = arith.constant 0 : index
    %c0_19 = arith.constant 0 : index
    %c0_20 = arith.constant 0 : index
    %22 = vector.load %arg1[%c0_18, %c0_19, %c0_20] : memref<8x18x16xf32, #tpu.memory_space<vmem>>, vector<8x18x16xf32>
    %cst_21 = arith.constant 0.000000e+00 : f32
    %23 = vector.broadcast %cst_21 : f32 to vector<8x16x32xf32>
    %c0_22 = arith.constant 0 : index
    %c0_23 = arith.constant 0 : index
    %c0_24 = arith.constant 0 : index
    %24 = vector.load %arg11[%c0_22, %c0_23, %c0_24] : memref<1x1x32xf32, #tpu.memory_space<vmem>>, vector<1x1x32xf32>
    %25 = vector.broadcast %24 : vector<1x1x32xf32> to vector<8x16x32xf32>
    %26 = arith.addf %23, %25 : vector<8x16x32xf32>
    %27 = vector.extract_strided_slice %22 {offsets = [0, 0, 0], sizes = [8, 16, 16], strides = [1, 1, 1]} : vector<8x18x16xf32> to vector<8x16x16xf32>
    %28 = vector.shape_cast %27 : vector<8x16x16xf32> to vector<128x16xf32>
    %c0_25 = arith.constant 0 : index
    %c0_26 = arith.constant 0 : index
    %c0_27 = arith.constant 0 : index
    %29 = vector.load %arg10[%c0_25, %c0_26, %c0_27] : memref<3x16x32xf32, #tpu.memory_space<vmem>>, vector<1x16x32xf32>
    %30 = vector.shape_cast %29 : vector<1x16x32xf32> to vector<16x32xf32>
    %cst_28 = arith.constant dense<0.000000e+00> : vector<128x32xf32>
    %31 = tpu.matmul %28, %30, %cst_28 {dimension_numbers = #tpu.dot_dimension_numbers<[1], [0], [0], [1], [0, 0, 1, 1], [], []>} : vector<128x16xf32>, vector<16x32xf32>, vector<128x32xf32> -> vector<128x32xf32>
    %32 = vector.shape_cast %31 : vector<128x32xf32> to vector<8x16x32xf32>
    %33 = arith.addf %26, %32 : vector<8x16x32xf32>
    %34 = vector.extract_strided_slice %22 {offsets = [0, 1, 0], sizes = [8, 16, 16], strides = [1, 1, 1]} : vector<8x18x16xf32> to vector<8x16x16xf32>
    %35 = vector.shape_cast %34 : vector<8x16x16xf32> to vector<128x16xf32>
    %c1 = arith.constant 1 : index
    %c0_29 = arith.constant 0 : index
    %c0_30 = arith.constant 0 : index
    %36 = vector.load %arg10[%c1, %c0_29, %c0_30] : memref<3x16x32xf32, #tpu.memory_space<vmem>>, vector<1x16x32xf32>
    %37 = vector.shape_cast %36 : vector<1x16x32xf32> to vector<16x32xf32>
    %cst_31 = arith.constant dense<0.000000e+00> : vector<128x32xf32>
    %38 = tpu.matmul %35, %37, %cst_31 {dimension_numbers = #tpu.dot_dimension_numbers<[1], [0], [0], [1], [0, 0, 1, 1], [], []>} : vector<128x16xf32>, vector<16x32xf32>, vector<128x32xf32> -> vector<128x32xf32>
    %39 = vector.shape_cast %38 : vector<128x32xf32> to vector<8x16x32xf32>
    %40 = arith.addf %33, %39 : vector<8x16x32xf32>
    %41 = vector.extract_strided_slice %22 {offsets = [0, 2, 0], sizes = [8, 16, 16], strides = [1, 1, 1]} : vector<8x18x16xf32> to vector<8x16x16xf32>
    %42 = vector.shape_cast %41 : vector<8x16x16xf32> to vector<128x16xf32>
    %c2 = arith.constant 2 : index
    %c0_32 = arith.constant 0 : index
    %c0_33 = arith.constant 0 : index
    %43 = vector.load %arg10[%c2, %c0_32, %c0_33] : memref<3x16x32xf32, #tpu.memory_space<vmem>>, vector<1x16x32xf32>
    %44 = vector.shape_cast %43 : vector<1x16x32xf32> to vector<16x32xf32>
    %cst_34 = arith.constant dense<0.000000e+00> : vector<128x32xf32>
    %45 = tpu.matmul %42, %44, %cst_34 {dimension_numbers = #tpu.dot_dimension_numbers<[1], [0], [0], [1], [0, 0, 1, 1], [], []>} : vector<128x16xf32>, vector<16x32xf32>, vector<128x32xf32> -> vector<128x32xf32>
    %46 = vector.shape_cast %45 : vector<128x32xf32> to vector<8x16x32xf32>
    %47 = arith.addf %40, %46 : vector<8x16x32xf32>
    %cst_35 = arith.constant 0.000000e+00 : f32
    %48 = vector.broadcast %cst_35 : f32 to vector<8x16x32xf32>
    %49 = arith.maximumf %47, %48 : vector<8x16x32xf32>
    %50 = vector.shape_cast %49 : vector<8x16x32xf32> to vector<8x8x2x32xf32>
    %cst_36 = arith.constant dense<0xFF800000> : vector<8x8x32xf32>
    %51 = vector.multi_reduction <maximumf>, %50, %cst_36 [2] : vector<8x8x2x32xf32> to vector<8x8x32xf32>
    %cst_37 = arith.constant 0.000000e+00 : f32
    %52 = vector.broadcast %cst_37 : f32 to vector<8x6x64xf32>
    %c0_38 = arith.constant 0 : index
    %c0_39 = arith.constant 0 : index
    %c0_40 = arith.constant 0 : index
    %53 = vector.load %arg13[%c0_38, %c0_39, %c0_40] : memref<1x1x64xf32, #tpu.memory_space<vmem>>, vector<1x1x64xf32>
    %54 = vector.broadcast %53 : vector<1x1x64xf32> to vector<8x6x64xf32>
    %55 = arith.addf %52, %54 : vector<8x6x64xf32>
    %56 = vector.extract_strided_slice %51 {offsets = [0, 0, 0], sizes = [8, 6, 32], strides = [1, 1, 1]} : vector<8x8x32xf32> to vector<8x6x32xf32>
    %57 = vector.shape_cast %56 : vector<8x6x32xf32> to vector<48x32xf32>
    %c0_41 = arith.constant 0 : index
    %c0_42 = arith.constant 0 : index
    %c0_43 = arith.constant 0 : index
    %58 = vector.load %arg12[%c0_41, %c0_42, %c0_43] : memref<3x32x64xf32, #tpu.memory_space<vmem>>, vector<1x32x64xf32>
    %59 = vector.shape_cast %58 : vector<1x32x64xf32> to vector<32x64xf32>
    %cst_44 = arith.constant dense<0.000000e+00> : vector<48x64xf32>
    %60 = tpu.matmul %57, %59, %cst_44 {dimension_numbers = #tpu.dot_dimension_numbers<[1], [0], [0], [1], [0, 0, 1, 1], [], []>} : vector<48x32xf32>, vector<32x64xf32>, vector<48x64xf32> -> vector<48x64xf32>
    %61 = vector.shape_cast %60 : vector<48x64xf32> to vector<8x6x64xf32>
    %62 = arith.addf %55, %61 : vector<8x6x64xf32>
    %63 = vector.extract_strided_slice %51 {offsets = [0, 1, 0], sizes = [8, 6, 32], strides = [1, 1, 1]} : vector<8x8x32xf32> to vector<8x6x32xf32>
    %64 = vector.shape_cast %63 : vector<8x6x32xf32> to vector<48x32xf32>
    %c1_45 = arith.constant 1 : index
    %c0_46 = arith.constant 0 : index
    %c0_47 = arith.constant 0 : index
    %65 = vector.load %arg12[%c1_45, %c0_46, %c0_47] : memref<3x32x64xf32, #tpu.memory_space<vmem>>, vector<1x32x64xf32>
    %66 = vector.shape_cast %65 : vector<1x32x64xf32> to vector<32x64xf32>
    %cst_48 = arith.constant dense<0.000000e+00> : vector<48x64xf32>
    %67 = tpu.matmul %64, %66, %cst_48 {dimension_numbers = #tpu.dot_dimension_numbers<[1], [0], [0], [1], [0, 0, 1, 1], [], []>} : vector<48x32xf32>, vector<32x64xf32>, vector<48x64xf32> -> vector<48x64xf32>
    %68 = vector.shape_cast %67 : vector<48x64xf32> to vector<8x6x64xf32>
    %69 = arith.addf %62, %68 : vector<8x6x64xf32>
    %70 = vector.extract_strided_slice %51 {offsets = [0, 2, 0], sizes = [8, 6, 32], strides = [1, 1, 1]} : vector<8x8x32xf32> to vector<8x6x32xf32>
    %71 = vector.shape_cast %70 : vector<8x6x32xf32> to vector<48x32xf32>
    %c2_49 = arith.constant 2 : index
    %c0_50 = arith.constant 0 : index
    %c0_51 = arith.constant 0 : index
    %72 = vector.load %arg12[%c2_49, %c0_50, %c0_51] : memref<3x32x64xf32, #tpu.memory_space<vmem>>, vector<1x32x64xf32>
    %73 = vector.shape_cast %72 : vector<1x32x64xf32> to vector<32x64xf32>
    %cst_52 = arith.constant dense<0.000000e+00> : vector<48x64xf32>
    %74 = tpu.matmul %71, %73, %cst_52 {dimension_numbers = #tpu.dot_dimension_numbers<[1], [0], [0], [1], [0, 0, 1, 1], [], []>} : vector<48x32xf32>, vector<32x64xf32>, vector<48x64xf32> -> vector<48x64xf32>
    %75 = vector.shape_cast %74 : vector<48x64xf32> to vector<8x6x64xf32>
    %76 = arith.addf %69, %75 : vector<8x6x64xf32>
    %cst_53 = arith.constant 0.000000e+00 : f32
    %77 = vector.broadcast %cst_53 : f32 to vector<8x6x64xf32>
    %78 = arith.maximumf %76, %77 : vector<8x6x64xf32>
    %79 = vector.shape_cast %78 : vector<8x6x64xf32> to vector<8x3x2x64xf32>
    %cst_54 = arith.constant dense<0xFF800000> : vector<8x3x64xf32>
    %80 = vector.multi_reduction <maximumf>, %79, %cst_54 [2] : vector<8x3x2x64xf32> to vector<8x3x64xf32>
    %c0_55 = arith.constant 0 : index
    %c0_56 = arith.constant 0 : index
    %81 = vector.load %arg15[%c0_55, %c0_56] : memref<1x16xf32, #tpu.memory_space<vmem>>, vector<1x16xf32>
    %cst_57 = arith.constant 0.000000e+00 : f32
    %82 = vector.broadcast %cst_57 : f32 to vector<8x16xf32>
    %83 = vector.broadcast %81 : vector<1x16xf32> to vector<8x16xf32>
    %84 = arith.addf %83, %82 : vector<8x16xf32>
    %85 = vector.extract_strided_slice %80 {offsets = [0, 0, 0], sizes = [8, 1, 64], strides = [1, 1, 1]} : vector<8x3x64xf32> to vector<8x1x64xf32>
    %86 = vector.shape_cast %85 : vector<8x1x64xf32> to vector<8x64xf32>
    %c0_58 = arith.constant 0 : index
    %c0_59 = arith.constant 0 : index
    %c0_60 = arith.constant 0 : index
    %87 = vector.load %arg14[%c0_58, %c0_59, %c0_60] : memref<3x64x16xf32, #tpu.memory_space<vmem>>, vector<1x64x16xf32>
    %88 = vector.shape_cast %87 : vector<1x64x16xf32> to vector<64x16xf32>
    %cst_61 = arith.constant dense<0.000000e+00> : vector<8x16xf32>
    %89 = tpu.matmul %86, %88, %cst_61 {dimension_numbers = #tpu.dot_dimension_numbers<[1], [0], [0], [1], [0, 0, 1, 1], [], []>} : vector<8x64xf32>, vector<64x16xf32>, vector<8x16xf32> -> vector<8x16xf32>
    %90 = arith.addf %84, %89 : vector<8x16xf32>
    %91 = vector.extract_strided_slice %80 {offsets = [0, 1, 0], sizes = [8, 1, 64], strides = [1, 1, 1]} : vector<8x3x64xf32> to vector<8x1x64xf32>
    %92 = vector.shape_cast %91 : vector<8x1x64xf32> to vector<8x64xf32>
    %c1_62 = arith.constant 1 : index
    %c0_63 = arith.constant 0 : index
    %c0_64 = arith.constant 0 : index
    %93 = vector.load %arg14[%c1_62, %c0_63, %c0_64] : memref<3x64x16xf32, #tpu.memory_space<vmem>>, vector<1x64x16xf32>
    %94 = vector.shape_cast %93 : vector<1x64x16xf32> to vector<64x16xf32>
    %cst_65 = arith.constant dense<0.000000e+00> : vector<8x16xf32>
    %95 = tpu.matmul %92, %94, %cst_65 {dimension_numbers = #tpu.dot_dimension_numbers<[1], [0], [0], [1], [0, 0, 1, 1], [], []>} : vector<8x64xf32>, vector<64x16xf32>, vector<8x16xf32> -> vector<8x16xf32>
    %96 = arith.addf %90, %95 : vector<8x16xf32>
    %97 = vector.extract_strided_slice %80 {offsets = [0, 2, 0], sizes = [8, 1, 64], strides = [1, 1, 1]} : vector<8x3x64xf32> to vector<8x1x64xf32>
    %98 = vector.shape_cast %97 : vector<8x1x64xf32> to vector<8x64xf32>
    %c2_66 = arith.constant 2 : index
    %c0_67 = arith.constant 0 : index
    %c0_68 = arith.constant 0 : index
    %99 = vector.load %arg14[%c2_66, %c0_67, %c0_68] : memref<3x64x16xf32, #tpu.memory_space<vmem>>, vector<1x64x16xf32>
    %100 = vector.shape_cast %99 : vector<1x64x16xf32> to vector<64x16xf32>
    %cst_69 = arith.constant dense<0.000000e+00> : vector<8x16xf32>
    %101 = tpu.matmul %98, %100, %cst_69 {dimension_numbers = #tpu.dot_dimension_numbers<[1], [0], [0], [1], [0, 0, 1, 1], [], []>} : vector<8x64xf32>, vector<64x16xf32>, vector<8x16xf32> -> vector<8x16xf32>
    %102 = arith.addf %96, %101 : vector<8x16xf32>
    %cst_70 = arith.constant 0.000000e+00 : f32
    %103 = vector.broadcast %cst_70 : f32 to vector<8x16xf32>
    %104 = arith.maximumf %102, %103 : vector<8x16xf32>
    %c0_71 = arith.constant 0 : index
    %c0_72 = arith.constant 0 : index
    %105 = vector.load %arg3[%c0_71, %c0_72] : memref<8x1xi32, #tpu.memory_space<vmem>>, vector<8x1xi32>
    %c0_73 = arith.constant 0 : index
    %c0_74 = arith.constant 0 : index
    %106 = vector.load %arg2[%c0_73, %c0_74] : memref<64x8xf32, #tpu.memory_space<vmem>>, vector<64x8xf32>
    %c0_75 = arith.constant 0 : index
    %c0_76 = arith.constant 0 : index
    %107 = vector.load %arg16[%c0_75, %c0_76] : memref<8x512xf32, #tpu.memory_space<vmem>>, vector<8x512xf32>
    %cst_77 = arith.constant dense<0.000000e+00> : vector<64x512xf32>
    %108 = tpu.matmul %106, %107, %cst_77 {dimension_numbers = #tpu.dot_dimension_numbers<[1], [0], [0], [1], [0, 0, 1, 1], [], []>} : vector<64x8xf32>, vector<8x512xf32>, vector<64x512xf32> -> vector<64x512xf32>
    %c0_78 = arith.constant 0 : index
    %c0_79 = arith.constant 0 : index
    %109 = vector.load %arg18[%c0_78, %c0_79] : memref<1x512xf32, #tpu.memory_space<vmem>>, vector<1x512xf32>
    %110 = vector.broadcast %109 : vector<1x512xf32> to vector<64x512xf32>
    %111 = arith.addf %108, %110 : vector<64x512xf32>
    %c0_80 = arith.constant 0 : index
    %c0_81 = arith.constant 0 : index
    %112 = vector.load %arg19[%c0_80, %c0_81] : memref<8x512xf32, #tpu.memory_space<vmem>>, vector<8x512xf32>
    %cst_82 = arith.constant dense<0.000000e+00> : vector<64x512xf32>
    %113 = tpu.matmul %106, %112, %cst_82 {dimension_numbers = #tpu.dot_dimension_numbers<[1], [0], [0], [1], [0, 0, 1, 1], [], []>} : vector<64x8xf32>, vector<8x512xf32>, vector<64x512xf32> -> vector<64x512xf32>
    %c0_83 = arith.constant 0 : index
    %c0_84 = arith.constant 0 : index
    %114 = vector.load %arg21[%c0_83, %c0_84] : memref<1x512xf32, #tpu.memory_space<vmem>>, vector<1x512xf32>
    %115 = vector.broadcast %114 : vector<1x512xf32> to vector<64x512xf32>
    %116 = arith.addf %113, %115 : vector<64x512xf32>
    %c0_85 = arith.constant 0 : index
    %c0_86 = arith.constant 0 : index
    %117 = vector.load %arg17[%c0_85, %c0_86] : memref<128x512xf32, #tpu.memory_space<vmem>>, vector<128x512xf32>
    %c0_87 = arith.constant 0 : index
    %c0_88 = arith.constant 0 : index
    %118 = vector.load %arg20[%c0_87, %c0_88] : memref<128x512xf32, #tpu.memory_space<vmem>>, vector<128x512xf32>
    %cst_89 = arith.constant 0.000000e+00 : f32
    %119 = vector.broadcast %cst_89 : f32 to vector<8x128xf32>
    %120 = vector.extract_strided_slice %111 {offsets = [0, 0], sizes = [8, 512], strides = [1, 1]} : vector<64x512xf32> to vector<8x512xf32>
    %cst_90 = arith.constant dense<0.000000e+00> : vector<8x512xf32>
    %121 = tpu.matmul %119, %117, %cst_90 {dimension_numbers = #tpu.dot_dimension_numbers<[1], [0], [0], [1], [0, 0, 1, 1], [], []>} : vector<8x128xf32>, vector<128x512xf32>, vector<8x512xf32> -> vector<8x512xf32>
    %122 = arith.addf %120, %121 : vector<8x512xf32>
    %123 = vector.extract_strided_slice %116 {offsets = [56, 0], sizes = [8, 512], strides = [1, 1]} : vector<64x512xf32> to vector<8x512xf32>
    %cst_91 = arith.constant dense<0.000000e+00> : vector<8x512xf32>
    %124 = tpu.matmul %119, %118, %cst_91 {dimension_numbers = #tpu.dot_dimension_numbers<[1], [0], [0], [1], [0, 0, 1, 1], [], []>} : vector<8x128xf32>, vector<128x512xf32>, vector<8x512xf32> -> vector<8x512xf32>
    %125 = arith.addf %123, %124 : vector<8x512xf32>
    %126 = vector.extract_strided_slice %122 {offsets = [0, 0], sizes = [8, 128], strides = [1, 1]} : vector<8x512xf32> to vector<8x128xf32>
    %127 = arith.negf %126 : vector<8x128xf32>
    %128 = math.exp %127 : vector<8x128xf32>
    %cst_92 = arith.constant 1.000000e+00 : f32
    %129 = vector.broadcast %cst_92 : f32 to vector<8x128xf32>
    %130 = arith.addf %129, %128 : vector<8x128xf32>
    %131 = arith.divf %129, %130 : vector<8x128xf32>
    %132 = vector.extract_strided_slice %122 {offsets = [0, 128], sizes = [8, 128], strides = [1, 1]} : vector<8x512xf32> to vector<8x128xf32>
    %133 = arith.negf %132 : vector<8x128xf32>
    %134 = math.exp %133 : vector<8x128xf32>
    %cst_93 = arith.constant 1.000000e+00 : f32
    %135 = vector.broadcast %cst_93 : f32 to vector<8x128xf32>
    %136 = arith.addf %135, %134 : vector<8x128xf32>
    %137 = arith.divf %135, %136 : vector<8x128xf32>
    %138 = vector.extract_strided_slice %122 {offsets = [0, 256], sizes = [8, 128], strides = [1, 1]} : vector<8x512xf32> to vector<8x128xf32>
    %139 = math.tanh %138 : vector<8x128xf32>
    %140 = vector.extract_strided_slice %122 {offsets = [0, 384], sizes = [8, 128], strides = [1, 1]} : vector<8x512xf32> to vector<8x128xf32>
    %141 = arith.negf %140 : vector<8x128xf32>
    %142 = math.exp %141 : vector<8x128xf32>
    %cst_94 = arith.constant 1.000000e+00 : f32
    %143 = vector.broadcast %cst_94 : f32 to vector<8x128xf32>
    %144 = arith.addf %143, %142 : vector<8x128xf32>
    %145 = arith.divf %143, %144 : vector<8x128xf32>
    %146 = arith.mulf %137, %119 : vector<8x128xf32>
    %147 = arith.mulf %131, %139 : vector<8x128xf32>
    %148 = arith.addf %146, %147 : vector<8x128xf32>
    %149 = math.tanh %148 : vector<8x128xf32>
    %150 = arith.mulf %145, %149 : vector<8x128xf32>
    %151 = vector.extract_strided_slice %125 {offsets = [0, 0], sizes = [8, 128], strides = [1, 1]} : vector<8x512xf32> to vector<8x128xf32>
    %152 = arith.negf %151 : vector<8x128xf32>
    %153 = math.exp %152 : vector<8x128xf32>
    %cst_95 = arith.constant 1.000000e+00 : f32
    %154 = vector.broadcast %cst_95 : f32 to vector<8x128xf32>
    %155 = arith.addf %154, %153 : vector<8x128xf32>
    %156 = arith.divf %154, %155 : vector<8x128xf32>
    %157 = vector.extract_strided_slice %125 {offsets = [0, 128], sizes = [8, 128], strides = [1, 1]} : vector<8x512xf32> to vector<8x128xf32>
    %158 = arith.negf %157 : vector<8x128xf32>
    %159 = math.exp %158 : vector<8x128xf32>
    %cst_96 = arith.constant 1.000000e+00 : f32
    %160 = vector.broadcast %cst_96 : f32 to vector<8x128xf32>
    %161 = arith.addf %160, %159 : vector<8x128xf32>
    %162 = arith.divf %160, %161 : vector<8x128xf32>
    %163 = vector.extract_strided_slice %125 {offsets = [0, 256], sizes = [8, 128], strides = [1, 1]} : vector<8x512xf32> to vector<8x128xf32>
    %164 = math.tanh %163 : vector<8x128xf32>
    %165 = vector.extract_strided_slice %125 {offsets = [0, 384], sizes = [8, 128], strides = [1, 1]} : vector<8x512xf32> to vector<8x128xf32>
    %166 = arith.negf %165 : vector<8x128xf32>
    %167 = math.exp %166 : vector<8x128xf32>
    %cst_97 = arith.constant 1.000000e+00 : f32
    %168 = vector.broadcast %cst_97 : f32 to vector<8x128xf32>
    %169 = arith.addf %168, %167 : vector<8x128xf32>
    %170 = arith.divf %168, %169 : vector<8x128xf32>
    %171 = arith.mulf %162, %119 : vector<8x128xf32>
    %172 = arith.mulf %156, %164 : vector<8x128xf32>
    %173 = arith.addf %171, %172 : vector<8x128xf32>
    %174 = math.tanh %173 : vector<8x128xf32>
    %175 = arith.mulf %170, %174 : vector<8x128xf32>
    %c0_i32 = arith.constant 0 : i32
    %176 = vector.broadcast %c0_i32 : i32 to vector<8x1xi32>
    %177 = arith.cmpi sgt, %105, %176 : vector<8x1xi32>
    %c7_i32 = arith.constant 7 : i32
    %178 = vector.broadcast %c7_i32 : i32 to vector<8x1xi32>
    %179 = arith.cmpi sgt, %105, %178 : vector<8x1xi32>
    %180 = vector.shape_cast %177 : vector<8x1xi1> to vector<8x1xi1>
    %181 = vector.broadcast %180 : vector<8x1xi1> to vector<8x128xi1>
    %182 = arith.select %181, %150, %119 : vector<8x128xi1>, vector<8x128xf32>
    %183 = vector.shape_cast %177 : vector<8x1xi1> to vector<8x1xi1>
    %184 = vector.broadcast %183 : vector<8x1xi1> to vector<8x128xi1>
    %185 = arith.select %184, %148, %119 : vector<8x128xi1>, vector<8x128xf32>
    %186 = vector.shape_cast %179 : vector<8x1xi1> to vector<8x1xi1>
    %187 = vector.broadcast %186 : vector<8x1xi1> to vector<8x128xi1>
    %188 = arith.select %187, %175, %119 : vector<8x128xi1>, vector<8x128xf32>
    %189 = vector.shape_cast %179 : vector<8x1xi1> to vector<8x1xi1>
    %190 = vector.broadcast %189 : vector<8x1xi1> to vector<8x128xi1>
    %191 = arith.select %190, %173, %119 : vector<8x128xi1>, vector<8x128xf32>
    %192 = vector.extract_strided_slice %111 {offsets = [8, 0], sizes = [8, 512], strides = [1, 1]} : vector<64x512xf32> to vector<8x512xf32>
    %cst_98 = arith.constant dense<0.000000e+00> : vector<8x512xf32>
    %193 = tpu.matmul %182, %117, %cst_98 {dimension_numbers = #tpu.dot_dimension_numbers<[1], [0], [0], [1], [0, 0, 1, 1], [], []>} : vector<8x128xf32>, vector<128x512xf32>, vector<8x512xf32> -> vector<8x512xf32>
    %194 = arith.addf %192, %193 : vector<8x512xf32>
    %195 = vector.extract_strided_slice %116 {offsets = [48, 0], sizes = [8, 512], strides = [1, 1]} : vector<64x512xf32> to vector<8x512xf32>
    %cst_99 = arith.constant dense<0.000000e+00> : vector<8x512xf32>
    %196 = tpu.matmul %188, %118, %cst_99 {dimension_numbers = #tpu.dot_dimension_numbers<[1], [0], [0], [1], [0, 0, 1, 1], [], []>} : vector<8x128xf32>, vector<128x512xf32>, vector<8x512xf32> -> vector<8x512xf32>
    %197 = arith.addf %195, %196 : vector<8x512xf32>
    %198 = vector.extract_strided_slice %194 {offsets = [0, 0], sizes = [8, 128], strides = [1, 1]} : vector<8x512xf32> to vector<8x128xf32>
    %199 = arith.negf %198 : vector<8x128xf32>
    %200 = math.exp %199 : vector<8x128xf32>
    %cst_100 = arith.constant 1.000000e+00 : f32
    %201 = vector.broadcast %cst_100 : f32 to vector<8x128xf32>
    %202 = arith.addf %201, %200 : vector<8x128xf32>
    %203 = arith.divf %201, %202 : vector<8x128xf32>
    %204 = vector.extract_strided_slice %194 {offsets = [0, 128], sizes = [8, 128], strides = [1, 1]} : vector<8x512xf32> to vector<8x128xf32>
    %205 = arith.negf %204 : vector<8x128xf32>
    %206 = math.exp %205 : vector<8x128xf32>
    %cst_101 = arith.constant 1.000000e+00 : f32
    %207 = vector.broadcast %cst_101 : f32 to vector<8x128xf32>
    %208 = arith.addf %207, %206 : vector<8x128xf32>
    %209 = arith.divf %207, %208 : vector<8x128xf32>
    %210 = vector.extract_strided_slice %194 {offsets = [0, 256], sizes = [8, 128], strides = [1, 1]} : vector<8x512xf32> to vector<8x128xf32>
    %211 = math.tanh %210 : vector<8x128xf32>
    %212 = vector.extract_strided_slice %194 {offsets = [0, 384], sizes = [8, 128], strides = [1, 1]} : vector<8x512xf32> to vector<8x128xf32>
    %213 = arith.negf %212 : vector<8x128xf32>
    %214 = math.exp %213 : vector<8x128xf32>
    %cst_102 = arith.constant 1.000000e+00 : f32
    %215 = vector.broadcast %cst_102 : f32 to vector<8x128xf32>
    %216 = arith.addf %215, %214 : vector<8x128xf32>
    %217 = arith.divf %215, %216 : vector<8x128xf32>
    %218 = arith.mulf %209, %185 : vector<8x128xf32>
    %219 = arith.mulf %203, %211 : vector<8x128xf32>
    %220 = arith.addf %218, %219 : vector<8x128xf32>
    %221 = math.tanh %220 : vector<8x128xf32>
    %222 = arith.mulf %217, %221 : vector<8x128xf32>
    %223 = vector.extract_strided_slice %197 {offsets = [0, 0], sizes = [8, 128], strides = [1, 1]} : vector<8x512xf32> to vector<8x128xf32>
    %224 = arith.negf %223 : vector<8x128xf32>
    %225 = math.exp %224 : vector<8x128xf32>
    %cst_103 = arith.constant 1.000000e+00 : f32
    %226 = vector.broadcast %cst_103 : f32 to vector<8x128xf32>
    %227 = arith.addf %226, %225 : vector<8x128xf32>
    %228 = arith.divf %226, %227 : vector<8x128xf32>
    %229 = vector.extract_strided_slice %197 {offsets = [0, 128], sizes = [8, 128], strides = [1, 1]} : vector<8x512xf32> to vector<8x128xf32>
    %230 = arith.negf %229 : vector<8x128xf32>
    %231 = math.exp %230 : vector<8x128xf32>
    %cst_104 = arith.constant 1.000000e+00 : f32
    %232 = vector.broadcast %cst_104 : f32 to vector<8x128xf32>
    %233 = arith.addf %232, %231 : vector<8x128xf32>
    %234 = arith.divf %232, %233 : vector<8x128xf32>
    %235 = vector.extract_strided_slice %197 {offsets = [0, 256], sizes = [8, 128], strides = [1, 1]} : vector<8x512xf32> to vector<8x128xf32>
    %236 = math.tanh %235 : vector<8x128xf32>
    %237 = vector.extract_strided_slice %197 {offsets = [0, 384], sizes = [8, 128], strides = [1, 1]} : vector<8x512xf32> to vector<8x128xf32>
    %238 = arith.negf %237 : vector<8x128xf32>
    %239 = math.exp %238 : vector<8x128xf32>
    %cst_105 = arith.constant 1.000000e+00 : f32
    %240 = vector.broadcast %cst_105 : f32 to vector<8x128xf32>
    %241 = arith.addf %240, %239 : vector<8x128xf32>
    %242 = arith.divf %240, %241 : vector<8x128xf32>
    %243 = arith.mulf %234, %191 : vector<8x128xf32>
    %244 = arith.mulf %228, %236 : vector<8x128xf32>
    %245 = arith.addf %243, %244 : vector<8x128xf32>
    %246 = math.tanh %245 : vector<8x128xf32>
    %247 = arith.mulf %242, %246 : vector<8x128xf32>
    %c1_i32 = arith.constant 1 : i32
    %248 = vector.broadcast %c1_i32 : i32 to vector<8x1xi32>
    %249 = arith.cmpi sgt, %105, %248 : vector<8x1xi32>
    %c6_i32 = arith.constant 6 : i32
    %250 = vector.broadcast %c6_i32 : i32 to vector<8x1xi32>
    %251 = arith.cmpi sgt, %105, %250 : vector<8x1xi32>
    %252 = vector.shape_cast %249 : vector<8x1xi1> to vector<8x1xi1>
    %253 = vector.broadcast %252 : vector<8x1xi1> to vector<8x128xi1>
    %254 = arith.select %253, %222, %182 : vector<8x128xi1>, vector<8x128xf32>
    %255 = vector.shape_cast %249 : vector<8x1xi1> to vector<8x1xi1>
    %256 = vector.broadcast %255 : vector<8x1xi1> to vector<8x128xi1>
    %257 = arith.select %256, %220, %185 : vector<8x128xi1>, vector<8x128xf32>
    %258 = vector.shape_cast %251 : vector<8x1xi1> to vector<8x1xi1>
    %259 = vector.broadcast %258 : vector<8x1xi1> to vector<8x128xi1>
    %260 = arith.select %259, %247, %188 : vector<8x128xi1>, vector<8x128xf32>
    %261 = vector.shape_cast %251 : vector<8x1xi1> to vector<8x1xi1>
    %262 = vector.broadcast %261 : vector<8x1xi1> to vector<8x128xi1>
    %263 = arith.select %262, %245, %191 : vector<8x128xi1>, vector<8x128xf32>
    %264 = vector.extract_strided_slice %111 {offsets = [16, 0], sizes = [8, 512], strides = [1, 1]} : vector<64x512xf32> to vector<8x512xf32>
    %cst_106 = arith.constant dense<0.000000e+00> : vector<8x512xf32>
    %265 = tpu.matmul %254, %117, %cst_106 {dimension_numbers = #tpu.dot_dimension_numbers<[1], [0], [0], [1], [0, 0, 1, 1], [], []>} : vector<8x128xf32>, vector<128x512xf32>, vector<8x512xf32> -> vector<8x512xf32>
    %266 = arith.addf %264, %265 : vector<8x512xf32>
    %267 = vector.extract_strided_slice %116 {offsets = [40, 0], sizes = [8, 512], strides = [1, 1]} : vector<64x512xf32> to vector<8x512xf32>
    %cst_107 = arith.constant dense<0.000000e+00> : vector<8x512xf32>
    %268 = tpu.matmul %260, %118, %cst_107 {dimension_numbers = #tpu.dot_dimension_numbers<[1], [0], [0], [1], [0, 0, 1, 1], [], []>} : vector<8x128xf32>, vector<128x512xf32>, vector<8x512xf32> -> vector<8x512xf32>
    %269 = arith.addf %267, %268 : vector<8x512xf32>
    %270 = vector.extract_strided_slice %266 {offsets = [0, 0], sizes = [8, 128], strides = [1, 1]} : vector<8x512xf32> to vector<8x128xf32>
    %271 = arith.negf %270 : vector<8x128xf32>
    %272 = math.exp %271 : vector<8x128xf32>
    %cst_108 = arith.constant 1.000000e+00 : f32
    %273 = vector.broadcast %cst_108 : f32 to vector<8x128xf32>
    %274 = arith.addf %273, %272 : vector<8x128xf32>
    %275 = arith.divf %273, %274 : vector<8x128xf32>
    %276 = vector.extract_strided_slice %266 {offsets = [0, 128], sizes = [8, 128], strides = [1, 1]} : vector<8x512xf32> to vector<8x128xf32>
    %277 = arith.negf %276 : vector<8x128xf32>
    %278 = math.exp %277 : vector<8x128xf32>
    %cst_109 = arith.constant 1.000000e+00 : f32
    %279 = vector.broadcast %cst_109 : f32 to vector<8x128xf32>
    %280 = arith.addf %279, %278 : vector<8x128xf32>
    %281 = arith.divf %279, %280 : vector<8x128xf32>
    %282 = vector.extract_strided_slice %266 {offsets = [0, 256], sizes = [8, 128], strides = [1, 1]} : vector<8x512xf32> to vector<8x128xf32>
    %283 = math.tanh %282 : vector<8x128xf32>
    %284 = vector.extract_strided_slice %266 {offsets = [0, 384], sizes = [8, 128], strides = [1, 1]} : vector<8x512xf32> to vector<8x128xf32>
    %285 = arith.negf %284 : vector<8x128xf32>
    %286 = math.exp %285 : vector<8x128xf32>
    %cst_110 = arith.constant 1.000000e+00 : f32
    %287 = vector.broadcast %cst_110 : f32 to vector<8x128xf32>
    %288 = arith.addf %287, %286 : vector<8x128xf32>
    %289 = arith.divf %287, %288 : vector<8x128xf32>
    %290 = arith.mulf %281, %257 : vector<8x128xf32>
    %291 = arith.mulf %275, %283 : vector<8x128xf32>
    %292 = arith.addf %290, %291 : vector<8x128xf32>
    %293 = math.tanh %292 : vector<8x128xf32>
    %294 = arith.mulf %289, %293 : vector<8x128xf32>
    %295 = vector.extract_strided_slice %269 {offsets = [0, 0], sizes = [8, 128], strides = [1, 1]} : vector<8x512xf32> to vector<8x128xf32>
    %296 = arith.negf %295 : vector<8x128xf32>
    %297 = math.exp %296 : vector<8x128xf32>
    %cst_111 = arith.constant 1.000000e+00 : f32
    %298 = vector.broadcast %cst_111 : f32 to vector<8x128xf32>
    %299 = arith.addf %298, %297 : vector<8x128xf32>
    %300 = arith.divf %298, %299 : vector<8x128xf32>
    %301 = vector.extract_strided_slice %269 {offsets = [0, 128], sizes = [8, 128], strides = [1, 1]} : vector<8x512xf32> to vector<8x128xf32>
    %302 = arith.negf %301 : vector<8x128xf32>
    %303 = math.exp %302 : vector<8x128xf32>
    %cst_112 = arith.constant 1.000000e+00 : f32
    %304 = vector.broadcast %cst_112 : f32 to vector<8x128xf32>
    %305 = arith.addf %304, %303 : vector<8x128xf32>
    %306 = arith.divf %304, %305 : vector<8x128xf32>
    %307 = vector.extract_strided_slice %269 {offsets = [0, 256], sizes = [8, 128], strides = [1, 1]} : vector<8x512xf32> to vector<8x128xf32>
    %308 = math.tanh %307 : vector<8x128xf32>
    %309 = vector.extract_strided_slice %269 {offsets = [0, 384], sizes = [8, 128], strides = [1, 1]} : vector<8x512xf32> to vector<8x128xf32>
    %310 = arith.negf %309 : vector<8x128xf32>
    %311 = math.exp %310 : vector<8x128xf32>
    %cst_113 = arith.constant 1.000000e+00 : f32
    %312 = vector.broadcast %cst_113 : f32 to vector<8x128xf32>
    %313 = arith.addf %312, %311 : vector<8x128xf32>
    %314 = arith.divf %312, %313 : vector<8x128xf32>
    %315 = arith.mulf %306, %263 : vector<8x128xf32>
    %316 = arith.mulf %300, %308 : vector<8x128xf32>
    %317 = arith.addf %315, %316 : vector<8x128xf32>
    %318 = math.tanh %317 : vector<8x128xf32>
    %319 = arith.mulf %314, %318 : vector<8x128xf32>
    %c2_i32 = arith.constant 2 : i32
    %320 = vector.broadcast %c2_i32 : i32 to vector<8x1xi32>
    %321 = arith.cmpi sgt, %105, %320 : vector<8x1xi32>
    %c5_i32 = arith.constant 5 : i32
    %322 = vector.broadcast %c5_i32 : i32 to vector<8x1xi32>
    %323 = arith.cmpi sgt, %105, %322 : vector<8x1xi32>
    %324 = vector.shape_cast %321 : vector<8x1xi1> to vector<8x1xi1>
    %325 = vector.broadcast %324 : vector<8x1xi1> to vector<8x128xi1>
    %326 = arith.select %325, %294, %254 : vector<8x128xi1>, vector<8x128xf32>
    %327 = vector.shape_cast %321 : vector<8x1xi1> to vector<8x1xi1>
    %328 = vector.broadcast %327 : vector<8x1xi1> to vector<8x128xi1>
    %329 = arith.select %328, %292, %257 : vector<8x128xi1>, vector<8x128xf32>
    %330 = vector.shape_cast %323 : vector<8x1xi1> to vector<8x1xi1>
    %331 = vector.broadcast %330 : vector<8x1xi1> to vector<8x128xi1>
    %332 = arith.select %331, %319, %260 : vector<8x128xi1>, vector<8x128xf32>
    %333 = vector.shape_cast %323 : vector<8x1xi1> to vector<8x1xi1>
    %334 = vector.broadcast %333 : vector<8x1xi1> to vector<8x128xi1>
    %335 = arith.select %334, %317, %263 : vector<8x128xi1>, vector<8x128xf32>
    %336 = vector.extract_strided_slice %111 {offsets = [24, 0], sizes = [8, 512], strides = [1, 1]} : vector<64x512xf32> to vector<8x512xf32>
    %cst_114 = arith.constant dense<0.000000e+00> : vector<8x512xf32>
    %337 = tpu.matmul %326, %117, %cst_114 {dimension_numbers = #tpu.dot_dimension_numbers<[1], [0], [0], [1], [0, 0, 1, 1], [], []>} : vector<8x128xf32>, vector<128x512xf32>, vector<8x512xf32> -> vector<8x512xf32>
    %338 = arith.addf %336, %337 : vector<8x512xf32>
    %339 = vector.extract_strided_slice %116 {offsets = [32, 0], sizes = [8, 512], strides = [1, 1]} : vector<64x512xf32> to vector<8x512xf32>
    %cst_115 = arith.constant dense<0.000000e+00> : vector<8x512xf32>
    %340 = tpu.matmul %332, %118, %cst_115 {dimension_numbers = #tpu.dot_dimension_numbers<[1], [0], [0], [1], [0, 0, 1, 1], [], []>} : vector<8x128xf32>, vector<128x512xf32>, vector<8x512xf32> -> vector<8x512xf32>
    %341 = arith.addf %339, %340 : vector<8x512xf32>
    %342 = vector.extract_strided_slice %338 {offsets = [0, 0], sizes = [8, 128], strides = [1, 1]} : vector<8x512xf32> to vector<8x128xf32>
    %343 = arith.negf %342 : vector<8x128xf32>
    %344 = math.exp %343 : vector<8x128xf32>
    %cst_116 = arith.constant 1.000000e+00 : f32
    %345 = vector.broadcast %cst_116 : f32 to vector<8x128xf32>
    %346 = arith.addf %345, %344 : vector<8x128xf32>
    %347 = arith.divf %345, %346 : vector<8x128xf32>
    %348 = vector.extract_strided_slice %338 {offsets = [0, 128], sizes = [8, 128], strides = [1, 1]} : vector<8x512xf32> to vector<8x128xf32>
    %349 = arith.negf %348 : vector<8x128xf32>
    %350 = math.exp %349 : vector<8x128xf32>
    %cst_117 = arith.constant 1.000000e+00 : f32
    %351 = vector.broadcast %cst_117 : f32 to vector<8x128xf32>
    %352 = arith.addf %351, %350 : vector<8x128xf32>
    %353 = arith.divf %351, %352 : vector<8x128xf32>
    %354 = vector.extract_strided_slice %338 {offsets = [0, 256], sizes = [8, 128], strides = [1, 1]} : vector<8x512xf32> to vector<8x128xf32>
    %355 = math.tanh %354 : vector<8x128xf32>
    %356 = vector.extract_strided_slice %338 {offsets = [0, 384], sizes = [8, 128], strides = [1, 1]} : vector<8x512xf32> to vector<8x128xf32>
    %357 = arith.negf %356 : vector<8x128xf32>
    %358 = math.exp %357 : vector<8x128xf32>
    %cst_118 = arith.constant 1.000000e+00 : f32
    %359 = vector.broadcast %cst_118 : f32 to vector<8x128xf32>
    %360 = arith.addf %359, %358 : vector<8x128xf32>
    %361 = arith.divf %359, %360 : vector<8x128xf32>
    %362 = arith.mulf %353, %329 : vector<8x128xf32>
    %363 = arith.mulf %347, %355 : vector<8x128xf32>
    %364 = arith.addf %362, %363 : vector<8x128xf32>
    %365 = math.tanh %364 : vector<8x128xf32>
    %366 = arith.mulf %361, %365 : vector<8x128xf32>
    %367 = vector.extract_strided_slice %341 {offsets = [0, 0], sizes = [8, 128], strides = [1, 1]} : vector<8x512xf32> to vector<8x128xf32>
    %368 = arith.negf %367 : vector<8x128xf32>
    %369 = math.exp %368 : vector<8x128xf32>
    %cst_119 = arith.constant 1.000000e+00 : f32
    %370 = vector.broadcast %cst_119 : f32 to vector<8x128xf32>
    %371 = arith.addf %370, %369 : vector<8x128xf32>
    %372 = arith.divf %370, %371 : vector<8x128xf32>
    %373 = vector.extract_strided_slice %341 {offsets = [0, 128], sizes = [8, 128], strides = [1, 1]} : vector<8x512xf32> to vector<8x128xf32>
    %374 = arith.negf %373 : vector<8x128xf32>
    %375 = math.exp %374 : vector<8x128xf32>
    %cst_120 = arith.constant 1.000000e+00 : f32
    %376 = vector.broadcast %cst_120 : f32 to vector<8x128xf32>
    %377 = arith.addf %376, %375 : vector<8x128xf32>
    %378 = arith.divf %376, %377 : vector<8x128xf32>
    %379 = vector.extract_strided_slice %341 {offsets = [0, 256], sizes = [8, 128], strides = [1, 1]} : vector<8x512xf32> to vector<8x128xf32>
    %380 = math.tanh %379 : vector<8x128xf32>
    %381 = vector.extract_strided_slice %341 {offsets = [0, 384], sizes = [8, 128], strides = [1, 1]} : vector<8x512xf32> to vector<8x128xf32>
    %382 = arith.negf %381 : vector<8x128xf32>
    %383 = math.exp %382 : vector<8x128xf32>
    %cst_121 = arith.constant 1.000000e+00 : f32
    %384 = vector.broadcast %cst_121 : f32 to vector<8x128xf32>
    %385 = arith.addf %384, %383 : vector<8x128xf32>
    %386 = arith.divf %384, %385 : vector<8x128xf32>
    %387 = arith.mulf %378, %335 : vector<8x128xf32>
    %388 = arith.mulf %372, %380 : vector<8x128xf32>
    %389 = arith.addf %387, %388 : vector<8x128xf32>
    %390 = math.tanh %389 : vector<8x128xf32>
    %391 = arith.mulf %386, %390 : vector<8x128xf32>
    %c3_i32 = arith.constant 3 : i32
    %392 = vector.broadcast %c3_i32 : i32 to vector<8x1xi32>
    %393 = arith.cmpi sgt, %105, %392 : vector<8x1xi32>
    %c4_i32 = arith.constant 4 : i32
    %394 = vector.broadcast %c4_i32 : i32 to vector<8x1xi32>
    %395 = arith.cmpi sgt, %105, %394 : vector<8x1xi32>
    %396 = vector.shape_cast %393 : vector<8x1xi1> to vector<8x1xi1>
    %397 = vector.broadcast %396 : vector<8x1xi1> to vector<8x128xi1>
    %398 = arith.select %397, %366, %326 : vector<8x128xi1>, vector<8x128xf32>
    %399 = vector.shape_cast %393 : vector<8x1xi1> to vector<8x1xi1>
    %400 = vector.broadcast %399 : vector<8x1xi1> to vector<8x128xi1>
    %401 = arith.select %400, %364, %329 : vector<8x128xi1>, vector<8x128xf32>
    %402 = vector.shape_cast %395 : vector<8x1xi1> to vector<8x1xi1>
    %403 = vector.broadcast %402 : vector<8x1xi1> to vector<8x128xi1>
    %404 = arith.select %403, %391, %332 : vector<8x128xi1>, vector<8x128xf32>
    %405 = vector.shape_cast %395 : vector<8x1xi1> to vector<8x1xi1>
    %406 = vector.broadcast %405 : vector<8x1xi1> to vector<8x128xi1>
    %407 = arith.select %406, %389, %335 : vector<8x128xi1>, vector<8x128xf32>
    %408 = vector.extract_strided_slice %111 {offsets = [32, 0], sizes = [8, 512], strides = [1, 1]} : vector<64x512xf32> to vector<8x512xf32>
    %cst_122 = arith.constant dense<0.000000e+00> : vector<8x512xf32>
    %409 = tpu.matmul %398, %117, %cst_122 {dimension_numbers = #tpu.dot_dimension_numbers<[1], [0], [0], [1], [0, 0, 1, 1], [], []>} : vector<8x128xf32>, vector<128x512xf32>, vector<8x512xf32> -> vector<8x512xf32>
    %410 = arith.addf %408, %409 : vector<8x512xf32>
    %411 = vector.extract_strided_slice %116 {offsets = [24, 0], sizes = [8, 512], strides = [1, 1]} : vector<64x512xf32> to vector<8x512xf32>
    %cst_123 = arith.constant dense<0.000000e+00> : vector<8x512xf32>
    %412 = tpu.matmul %404, %118, %cst_123 {dimension_numbers = #tpu.dot_dimension_numbers<[1], [0], [0], [1], [0, 0, 1, 1], [], []>} : vector<8x128xf32>, vector<128x512xf32>, vector<8x512xf32> -> vector<8x512xf32>
    %413 = arith.addf %411, %412 : vector<8x512xf32>
    %414 = vector.extract_strided_slice %410 {offsets = [0, 0], sizes = [8, 128], strides = [1, 1]} : vector<8x512xf32> to vector<8x128xf32>
    %415 = arith.negf %414 : vector<8x128xf32>
    %416 = math.exp %415 : vector<8x128xf32>
    %cst_124 = arith.constant 1.000000e+00 : f32
    %417 = vector.broadcast %cst_124 : f32 to vector<8x128xf32>
    %418 = arith.addf %417, %416 : vector<8x128xf32>
    %419 = arith.divf %417, %418 : vector<8x128xf32>
    %420 = vector.extract_strided_slice %410 {offsets = [0, 128], sizes = [8, 128], strides = [1, 1]} : vector<8x512xf32> to vector<8x128xf32>
    %421 = arith.negf %420 : vector<8x128xf32>
    %422 = math.exp %421 : vector<8x128xf32>
    %cst_125 = arith.constant 1.000000e+00 : f32
    %423 = vector.broadcast %cst_125 : f32 to vector<8x128xf32>
    %424 = arith.addf %423, %422 : vector<8x128xf32>
    %425 = arith.divf %423, %424 : vector<8x128xf32>
    %426 = vector.extract_strided_slice %410 {offsets = [0, 256], sizes = [8, 128], strides = [1, 1]} : vector<8x512xf32> to vector<8x128xf32>
    %427 = math.tanh %426 : vector<8x128xf32>
    %428 = vector.extract_strided_slice %410 {offsets = [0, 384], sizes = [8, 128], strides = [1, 1]} : vector<8x512xf32> to vector<8x128xf32>
    %429 = arith.negf %428 : vector<8x128xf32>
    %430 = math.exp %429 : vector<8x128xf32>
    %cst_126 = arith.constant 1.000000e+00 : f32
    %431 = vector.broadcast %cst_126 : f32 to vector<8x128xf32>
    %432 = arith.addf %431, %430 : vector<8x128xf32>
    %433 = arith.divf %431, %432 : vector<8x128xf32>
    %434 = arith.mulf %425, %401 : vector<8x128xf32>
    %435 = arith.mulf %419, %427 : vector<8x128xf32>
    %436 = arith.addf %434, %435 : vector<8x128xf32>
    %437 = math.tanh %436 : vector<8x128xf32>
    %438 = arith.mulf %433, %437 : vector<8x128xf32>
    %439 = vector.extract_strided_slice %413 {offsets = [0, 0], sizes = [8, 128], strides = [1, 1]} : vector<8x512xf32> to vector<8x128xf32>
    %440 = arith.negf %439 : vector<8x128xf32>
    %441 = math.exp %440 : vector<8x128xf32>
    %cst_127 = arith.constant 1.000000e+00 : f32
    %442 = vector.broadcast %cst_127 : f32 to vector<8x128xf32>
    %443 = arith.addf %442, %441 : vector<8x128xf32>
    %444 = arith.divf %442, %443 : vector<8x128xf32>
    %445 = vector.extract_strided_slice %413 {offsets = [0, 128], sizes = [8, 128], strides = [1, 1]} : vector<8x512xf32> to vector<8x128xf32>
    %446 = arith.negf %445 : vector<8x128xf32>
    %447 = math.exp %446 : vector<8x128xf32>
    %cst_128 = arith.constant 1.000000e+00 : f32
    %448 = vector.broadcast %cst_128 : f32 to vector<8x128xf32>
    %449 = arith.addf %448, %447 : vector<8x128xf32>
    %450 = arith.divf %448, %449 : vector<8x128xf32>
    %451 = vector.extract_strided_slice %413 {offsets = [0, 256], sizes = [8, 128], strides = [1, 1]} : vector<8x512xf32> to vector<8x128xf32>
    %452 = math.tanh %451 : vector<8x128xf32>
    %453 = vector.extract_strided_slice %413 {offsets = [0, 384], sizes = [8, 128], strides = [1, 1]} : vector<8x512xf32> to vector<8x128xf32>
    %454 = arith.negf %453 : vector<8x128xf32>
    %455 = math.exp %454 : vector<8x128xf32>
    %cst_129 = arith.constant 1.000000e+00 : f32
    %456 = vector.broadcast %cst_129 : f32 to vector<8x128xf32>
    %457 = arith.addf %456, %455 : vector<8x128xf32>
    %458 = arith.divf %456, %457 : vector<8x128xf32>
    %459 = arith.mulf %450, %407 : vector<8x128xf32>
    %460 = arith.mulf %444, %452 : vector<8x128xf32>
    %461 = arith.addf %459, %460 : vector<8x128xf32>
    %462 = math.tanh %461 : vector<8x128xf32>
    %463 = arith.mulf %458, %462 : vector<8x128xf32>
    %c4_i32_130 = arith.constant 4 : i32
    %464 = vector.broadcast %c4_i32_130 : i32 to vector<8x1xi32>
    %465 = arith.cmpi sgt, %105, %464 : vector<8x1xi32>
    %c3_i32_131 = arith.constant 3 : i32
    %466 = vector.broadcast %c3_i32_131 : i32 to vector<8x1xi32>
    %467 = arith.cmpi sgt, %105, %466 : vector<8x1xi32>
    %468 = vector.shape_cast %465 : vector<8x1xi1> to vector<8x1xi1>
    %469 = vector.broadcast %468 : vector<8x1xi1> to vector<8x128xi1>
    %470 = arith.select %469, %438, %398 : vector<8x128xi1>, vector<8x128xf32>
    %471 = vector.shape_cast %465 : vector<8x1xi1> to vector<8x1xi1>
    %472 = vector.broadcast %471 : vector<8x1xi1> to vector<8x128xi1>
    %473 = arith.select %472, %436, %401 : vector<8x128xi1>, vector<8x128xf32>
    %474 = vector.shape_cast %467 : vector<8x1xi1> to vector<8x1xi1>
    %475 = vector.broadcast %474 : vector<8x1xi1> to vector<8x128xi1>
    %476 = arith.select %475, %463, %404 : vector<8x128xi1>, vector<8x128xf32>
    %477 = vector.shape_cast %467 : vector<8x1xi1> to vector<8x1xi1>
    %478 = vector.broadcast %477 : vector<8x1xi1> to vector<8x128xi1>
    %479 = arith.select %478, %461, %407 : vector<8x128xi1>, vector<8x128xf32>
    %480 = vector.extract_strided_slice %111 {offsets = [40, 0], sizes = [8, 512], strides = [1, 1]} : vector<64x512xf32> to vector<8x512xf32>
    %cst_132 = arith.constant dense<0.000000e+00> : vector<8x512xf32>
    %481 = tpu.matmul %470, %117, %cst_132 {dimension_numbers = #tpu.dot_dimension_numbers<[1], [0], [0], [1], [0, 0, 1, 1], [], []>} : vector<8x128xf32>, vector<128x512xf32>, vector<8x512xf32> -> vector<8x512xf32>
    %482 = arith.addf %480, %481 : vector<8x512xf32>
    %483 = vector.extract_strided_slice %116 {offsets = [16, 0], sizes = [8, 512], strides = [1, 1]} : vector<64x512xf32> to vector<8x512xf32>
    %cst_133 = arith.constant dense<0.000000e+00> : vector<8x512xf32>
    %484 = tpu.matmul %476, %118, %cst_133 {dimension_numbers = #tpu.dot_dimension_numbers<[1], [0], [0], [1], [0, 0, 1, 1], [], []>} : vector<8x128xf32>, vector<128x512xf32>, vector<8x512xf32> -> vector<8x512xf32>
    %485 = arith.addf %483, %484 : vector<8x512xf32>
    %486 = vector.extract_strided_slice %482 {offsets = [0, 0], sizes = [8, 128], strides = [1, 1]} : vector<8x512xf32> to vector<8x128xf32>
    %487 = arith.negf %486 : vector<8x128xf32>
    %488 = math.exp %487 : vector<8x128xf32>
    %cst_134 = arith.constant 1.000000e+00 : f32
    %489 = vector.broadcast %cst_134 : f32 to vector<8x128xf32>
    %490 = arith.addf %489, %488 : vector<8x128xf32>
    %491 = arith.divf %489, %490 : vector<8x128xf32>
    %492 = vector.extract_strided_slice %482 {offsets = [0, 128], sizes = [8, 128], strides = [1, 1]} : vector<8x512xf32> to vector<8x128xf32>
    %493 = arith.negf %492 : vector<8x128xf32>
    %494 = math.exp %493 : vector<8x128xf32>
    %cst_135 = arith.constant 1.000000e+00 : f32
    %495 = vector.broadcast %cst_135 : f32 to vector<8x128xf32>
    %496 = arith.addf %495, %494 : vector<8x128xf32>
    %497 = arith.divf %495, %496 : vector<8x128xf32>
    %498 = vector.extract_strided_slice %482 {offsets = [0, 256], sizes = [8, 128], strides = [1, 1]} : vector<8x512xf32> to vector<8x128xf32>
    %499 = math.tanh %498 : vector<8x128xf32>
    %500 = vector.extract_strided_slice %482 {offsets = [0, 384], sizes = [8, 128], strides = [1, 1]} : vector<8x512xf32> to vector<8x128xf32>
    %501 = arith.negf %500 : vector<8x128xf32>
    %502 = math.exp %501 : vector<8x128xf32>
    %cst_136 = arith.constant 1.000000e+00 : f32
    %503 = vector.broadcast %cst_136 : f32 to vector<8x128xf32>
    %504 = arith.addf %503, %502 : vector<8x128xf32>
    %505 = arith.divf %503, %504 : vector<8x128xf32>
    %506 = arith.mulf %497, %473 : vector<8x128xf32>
    %507 = arith.mulf %491, %499 : vector<8x128xf32>
    %508 = arith.addf %506, %507 : vector<8x128xf32>
    %509 = math.tanh %508 : vector<8x128xf32>
    %510 = arith.mulf %505, %509 : vector<8x128xf32>
    %511 = vector.extract_strided_slice %485 {offsets = [0, 0], sizes = [8, 128], strides = [1, 1]} : vector<8x512xf32> to vector<8x128xf32>
    %512 = arith.negf %511 : vector<8x128xf32>
    %513 = math.exp %512 : vector<8x128xf32>
    %cst_137 = arith.constant 1.000000e+00 : f32
    %514 = vector.broadcast %cst_137 : f32 to vector<8x128xf32>
    %515 = arith.addf %514, %513 : vector<8x128xf32>
    %516 = arith.divf %514, %515 : vector<8x128xf32>
    %517 = vector.extract_strided_slice %485 {offsets = [0, 128], sizes = [8, 128], strides = [1, 1]} : vector<8x512xf32> to vector<8x128xf32>
    %518 = arith.negf %517 : vector<8x128xf32>
    %519 = math.exp %518 : vector<8x128xf32>
    %cst_138 = arith.constant 1.000000e+00 : f32
    %520 = vector.broadcast %cst_138 : f32 to vector<8x128xf32>
    %521 = arith.addf %520, %519 : vector<8x128xf32>
    %522 = arith.divf %520, %521 : vector<8x128xf32>
    %523 = vector.extract_strided_slice %485 {offsets = [0, 256], sizes = [8, 128], strides = [1, 1]} : vector<8x512xf32> to vector<8x128xf32>
    %524 = math.tanh %523 : vector<8x128xf32>
    %525 = vector.extract_strided_slice %485 {offsets = [0, 384], sizes = [8, 128], strides = [1, 1]} : vector<8x512xf32> to vector<8x128xf32>
    %526 = arith.negf %525 : vector<8x128xf32>
    %527 = math.exp %526 : vector<8x128xf32>
    %cst_139 = arith.constant 1.000000e+00 : f32
    %528 = vector.broadcast %cst_139 : f32 to vector<8x128xf32>
    %529 = arith.addf %528, %527 : vector<8x128xf32>
    %530 = arith.divf %528, %529 : vector<8x128xf32>
    %531 = arith.mulf %522, %479 : vector<8x128xf32>
    %532 = arith.mulf %516, %524 : vector<8x128xf32>
    %533 = arith.addf %531, %532 : vector<8x128xf32>
    %534 = math.tanh %533 : vector<8x128xf32>
    %535 = arith.mulf %530, %534 : vector<8x128xf32>
    %c5_i32_140 = arith.constant 5 : i32
    %536 = vector.broadcast %c5_i32_140 : i32 to vector<8x1xi32>
    %537 = arith.cmpi sgt, %105, %536 : vector<8x1xi32>
    %c2_i32_141 = arith.constant 2 : i32
    %538 = vector.broadcast %c2_i32_141 : i32 to vector<8x1xi32>
    %539 = arith.cmpi sgt, %105, %538 : vector<8x1xi32>
    %540 = vector.shape_cast %537 : vector<8x1xi1> to vector<8x1xi1>
    %541 = vector.broadcast %540 : vector<8x1xi1> to vector<8x128xi1>
    %542 = arith.select %541, %510, %470 : vector<8x128xi1>, vector<8x128xf32>
    %543 = vector.shape_cast %537 : vector<8x1xi1> to vector<8x1xi1>
    %544 = vector.broadcast %543 : vector<8x1xi1> to vector<8x128xi1>
    %545 = arith.select %544, %508, %473 : vector<8x128xi1>, vector<8x128xf32>
    %546 = vector.shape_cast %539 : vector<8x1xi1> to vector<8x1xi1>
    %547 = vector.broadcast %546 : vector<8x1xi1> to vector<8x128xi1>
    %548 = arith.select %547, %535, %476 : vector<8x128xi1>, vector<8x128xf32>
    %549 = vector.shape_cast %539 : vector<8x1xi1> to vector<8x1xi1>
    %550 = vector.broadcast %549 : vector<8x1xi1> to vector<8x128xi1>
    %551 = arith.select %550, %533, %479 : vector<8x128xi1>, vector<8x128xf32>
    %552 = vector.extract_strided_slice %111 {offsets = [48, 0], sizes = [8, 512], strides = [1, 1]} : vector<64x512xf32> to vector<8x512xf32>
    %cst_142 = arith.constant dense<0.000000e+00> : vector<8x512xf32>
    %553 = tpu.matmul %542, %117, %cst_142 {dimension_numbers = #tpu.dot_dimension_numbers<[1], [0], [0], [1], [0, 0, 1, 1], [], []>} : vector<8x128xf32>, vector<128x512xf32>, vector<8x512xf32> -> vector<8x512xf32>
    %554 = arith.addf %552, %553 : vector<8x512xf32>
    %555 = vector.extract_strided_slice %116 {offsets = [8, 0], sizes = [8, 512], strides = [1, 1]} : vector<64x512xf32> to vector<8x512xf32>
    %cst_143 = arith.constant dense<0.000000e+00> : vector<8x512xf32>
    %556 = tpu.matmul %548, %118, %cst_143 {dimension_numbers = #tpu.dot_dimension_numbers<[1], [0], [0], [1], [0, 0, 1, 1], [], []>} : vector<8x128xf32>, vector<128x512xf32>, vector<8x512xf32> -> vector<8x512xf32>
    %557 = arith.addf %555, %556 : vector<8x512xf32>
    %558 = vector.extract_strided_slice %554 {offsets = [0, 0], sizes = [8, 128], strides = [1, 1]} : vector<8x512xf32> to vector<8x128xf32>
    %559 = arith.negf %558 : vector<8x128xf32>
    %560 = math.exp %559 : vector<8x128xf32>
    %cst_144 = arith.constant 1.000000e+00 : f32
    %561 = vector.broadcast %cst_144 : f32 to vector<8x128xf32>
    %562 = arith.addf %561, %560 : vector<8x128xf32>
    %563 = arith.divf %561, %562 : vector<8x128xf32>
    %564 = vector.extract_strided_slice %554 {offsets = [0, 128], sizes = [8, 128], strides = [1, 1]} : vector<8x512xf32> to vector<8x128xf32>
    %565 = arith.negf %564 : vector<8x128xf32>
    %566 = math.exp %565 : vector<8x128xf32>
    %cst_145 = arith.constant 1.000000e+00 : f32
    %567 = vector.broadcast %cst_145 : f32 to vector<8x128xf32>
    %568 = arith.addf %567, %566 : vector<8x128xf32>
    %569 = arith.divf %567, %568 : vector<8x128xf32>
    %570 = vector.extract_strided_slice %554 {offsets = [0, 256], sizes = [8, 128], strides = [1, 1]} : vector<8x512xf32> to vector<8x128xf32>
    %571 = math.tanh %570 : vector<8x128xf32>
    %572 = vector.extract_strided_slice %554 {offsets = [0, 384], sizes = [8, 128], strides = [1, 1]} : vector<8x512xf32> to vector<8x128xf32>
    %573 = arith.negf %572 : vector<8x128xf32>
    %574 = math.exp %573 : vector<8x128xf32>
    %cst_146 = arith.constant 1.000000e+00 : f32
    %575 = vector.broadcast %cst_146 : f32 to vector<8x128xf32>
    %576 = arith.addf %575, %574 : vector<8x128xf32>
    %577 = arith.divf %575, %576 : vector<8x128xf32>
    %578 = arith.mulf %569, %545 : vector<8x128xf32>
    %579 = arith.mulf %563, %571 : vector<8x128xf32>
    %580 = arith.addf %578, %579 : vector<8x128xf32>
    %581 = math.tanh %580 : vector<8x128xf32>
    %582 = arith.mulf %577, %581 : vector<8x128xf32>
    %583 = vector.extract_strided_slice %557 {offsets = [0, 0], sizes = [8, 128], strides = [1, 1]} : vector<8x512xf32> to vector<8x128xf32>
    %584 = arith.negf %583 : vector<8x128xf32>
    %585 = math.exp %584 : vector<8x128xf32>
    %cst_147 = arith.constant 1.000000e+00 : f32
    %586 = vector.broadcast %cst_147 : f32 to vector<8x128xf32>
    %587 = arith.addf %586, %585 : vector<8x128xf32>
    %588 = arith.divf %586, %587 : vector<8x128xf32>
    %589 = vector.extract_strided_slice %557 {offsets = [0, 128], sizes = [8, 128], strides = [1, 1]} : vector<8x512xf32> to vector<8x128xf32>
    %590 = arith.negf %589 : vector<8x128xf32>
    %591 = math.exp %590 : vector<8x128xf32>
    %cst_148 = arith.constant 1.000000e+00 : f32
    %592 = vector.broadcast %cst_148 : f32 to vector<8x128xf32>
    %593 = arith.addf %592, %591 : vector<8x128xf32>
    %594 = arith.divf %592, %593 : vector<8x128xf32>
    %595 = vector.extract_strided_slice %557 {offsets = [0, 256], sizes = [8, 128], strides = [1, 1]} : vector<8x512xf32> to vector<8x128xf32>
    %596 = math.tanh %595 : vector<8x128xf32>
    %597 = vector.extract_strided_slice %557 {offsets = [0, 384], sizes = [8, 128], strides = [1, 1]} : vector<8x512xf32> to vector<8x128xf32>
    %598 = arith.negf %597 : vector<8x128xf32>
    %599 = math.exp %598 : vector<8x128xf32>
    %cst_149 = arith.constant 1.000000e+00 : f32
    %600 = vector.broadcast %cst_149 : f32 to vector<8x128xf32>
    %601 = arith.addf %600, %599 : vector<8x128xf32>
    %602 = arith.divf %600, %601 : vector<8x128xf32>
    %603 = arith.mulf %594, %551 : vector<8x128xf32>
    %604 = arith.mulf %588, %596 : vector<8x128xf32>
    %605 = arith.addf %603, %604 : vector<8x128xf32>
    %606 = math.tanh %605 : vector<8x128xf32>
    %607 = arith.mulf %602, %606 : vector<8x128xf32>
    %c6_i32_150 = arith.constant 6 : i32
    %608 = vector.broadcast %c6_i32_150 : i32 to vector<8x1xi32>
    %609 = arith.cmpi sgt, %105, %608 : vector<8x1xi32>
    %c1_i32_151 = arith.constant 1 : i32
    %610 = vector.broadcast %c1_i32_151 : i32 to vector<8x1xi32>
    %611 = arith.cmpi sgt, %105, %610 : vector<8x1xi32>
    %612 = vector.shape_cast %609 : vector<8x1xi1> to vector<8x1xi1>
    %613 = vector.broadcast %612 : vector<8x1xi1> to vector<8x128xi1>
    %614 = arith.select %613, %582, %542 : vector<8x128xi1>, vector<8x128xf32>
    %615 = vector.shape_cast %609 : vector<8x1xi1> to vector<8x1xi1>
    %616 = vector.broadcast %615 : vector<8x1xi1> to vector<8x128xi1>
    %617 = arith.select %616, %580, %545 : vector<8x128xi1>, vector<8x128xf32>
    %618 = vector.shape_cast %611 : vector<8x1xi1> to vector<8x1xi1>
    %619 = vector.broadcast %618 : vector<8x1xi1> to vector<8x128xi1>
    %620 = arith.select %619, %607, %548 : vector<8x128xi1>, vector<8x128xf32>
    %621 = vector.shape_cast %611 : vector<8x1xi1> to vector<8x1xi1>
    %622 = vector.broadcast %621 : vector<8x1xi1> to vector<8x128xi1>
    %623 = arith.select %622, %605, %551 : vector<8x128xi1>, vector<8x128xf32>
    %624 = vector.extract_strided_slice %111 {offsets = [56, 0], sizes = [8, 512], strides = [1, 1]} : vector<64x512xf32> to vector<8x512xf32>
    %cst_152 = arith.constant dense<0.000000e+00> : vector<8x512xf32>
    %625 = tpu.matmul %614, %117, %cst_152 {dimension_numbers = #tpu.dot_dimension_numbers<[1], [0], [0], [1], [0, 0, 1, 1], [], []>} : vector<8x128xf32>, vector<128x512xf32>, vector<8x512xf32> -> vector<8x512xf32>
    %626 = arith.addf %624, %625 : vector<8x512xf32>
    %627 = vector.extract_strided_slice %116 {offsets = [0, 0], sizes = [8, 512], strides = [1, 1]} : vector<64x512xf32> to vector<8x512xf32>
    %cst_153 = arith.constant dense<0.000000e+00> : vector<8x512xf32>
    %628 = tpu.matmul %620, %118, %cst_153 {dimension_numbers = #tpu.dot_dimension_numbers<[1], [0], [0], [1], [0, 0, 1, 1], [], []>} : vector<8x128xf32>, vector<128x512xf32>, vector<8x512xf32> -> vector<8x512xf32>
    %629 = arith.addf %627, %628 : vector<8x512xf32>
    %630 = vector.extract_strided_slice %626 {offsets = [0, 0], sizes = [8, 128], strides = [1, 1]} : vector<8x512xf32> to vector<8x128xf32>
    %631 = arith.negf %630 : vector<8x128xf32>
    %632 = math.exp %631 : vector<8x128xf32>
    %cst_154 = arith.constant 1.000000e+00 : f32
    %633 = vector.broadcast %cst_154 : f32 to vector<8x128xf32>
    %634 = arith.addf %633, %632 : vector<8x128xf32>
    %635 = arith.divf %633, %634 : vector<8x128xf32>
    %636 = vector.extract_strided_slice %626 {offsets = [0, 128], sizes = [8, 128], strides = [1, 1]} : vector<8x512xf32> to vector<8x128xf32>
    %637 = arith.negf %636 : vector<8x128xf32>
    %638 = math.exp %637 : vector<8x128xf32>
    %cst_155 = arith.constant 1.000000e+00 : f32
    %639 = vector.broadcast %cst_155 : f32 to vector<8x128xf32>
    %640 = arith.addf %639, %638 : vector<8x128xf32>
    %641 = arith.divf %639, %640 : vector<8x128xf32>
    %642 = vector.extract_strided_slice %626 {offsets = [0, 256], sizes = [8, 128], strides = [1, 1]} : vector<8x512xf32> to vector<8x128xf32>
    %643 = math.tanh %642 : vector<8x128xf32>
    %644 = vector.extract_strided_slice %626 {offsets = [0, 384], sizes = [8, 128], strides = [1, 1]} : vector<8x512xf32> to vector<8x128xf32>
    %645 = arith.negf %644 : vector<8x128xf32>
    %646 = math.exp %645 : vector<8x128xf32>
    %cst_156 = arith.constant 1.000000e+00 : f32
    %647 = vector.broadcast %cst_156 : f32 to vector<8x128xf32>
    %648 = arith.addf %647, %646 : vector<8x128xf32>
    %649 = arith.divf %647, %648 : vector<8x128xf32>
    %650 = arith.mulf %641, %617 : vector<8x128xf32>
    %651 = arith.mulf %635, %643 : vector<8x128xf32>
    %652 = arith.addf %650, %651 : vector<8x128xf32>
    %653 = math.tanh %652 : vector<8x128xf32>
    %654 = arith.mulf %649, %653 : vector<8x128xf32>
    %655 = vector.extract_strided_slice %629 {offsets = [0, 0], sizes = [8, 128], strides = [1, 1]} : vector<8x512xf32> to vector<8x128xf32>
    %656 = arith.negf %655 : vector<8x128xf32>
    %657 = math.exp %656 : vector<8x128xf32>
    %cst_157 = arith.constant 1.000000e+00 : f32
    %658 = vector.broadcast %cst_157 : f32 to vector<8x128xf32>
    %659 = arith.addf %658, %657 : vector<8x128xf32>
    %660 = arith.divf %658, %659 : vector<8x128xf32>
    %661 = vector.extract_strided_slice %629 {offsets = [0, 128], sizes = [8, 128], strides = [1, 1]} : vector<8x512xf32> to vector<8x128xf32>
    %662 = arith.negf %661 : vector<8x128xf32>
    %663 = math.exp %662 : vector<8x128xf32>
    %cst_158 = arith.constant 1.000000e+00 : f32
    %664 = vector.broadcast %cst_158 : f32 to vector<8x128xf32>
    %665 = arith.addf %664, %663 : vector<8x128xf32>
    %666 = arith.divf %664, %665 : vector<8x128xf32>
    %667 = vector.extract_strided_slice %629 {offsets = [0, 256], sizes = [8, 128], strides = [1, 1]} : vector<8x512xf32> to vector<8x128xf32>
    %668 = math.tanh %667 : vector<8x128xf32>
    %669 = vector.extract_strided_slice %629 {offsets = [0, 384], sizes = [8, 128], strides = [1, 1]} : vector<8x512xf32> to vector<8x128xf32>
    %670 = arith.negf %669 : vector<8x128xf32>
    %671 = math.exp %670 : vector<8x128xf32>
    %cst_159 = arith.constant 1.000000e+00 : f32
    %672 = vector.broadcast %cst_159 : f32 to vector<8x128xf32>
    %673 = arith.addf %672, %671 : vector<8x128xf32>
    %674 = arith.divf %672, %673 : vector<8x128xf32>
    %675 = arith.mulf %666, %623 : vector<8x128xf32>
    %676 = arith.mulf %660, %668 : vector<8x128xf32>
    %677 = arith.addf %675, %676 : vector<8x128xf32>
    %678 = math.tanh %677 : vector<8x128xf32>
    %679 = arith.mulf %674, %678 : vector<8x128xf32>
    %c7_i32_160 = arith.constant 7 : i32
    %680 = vector.broadcast %c7_i32_160 : i32 to vector<8x1xi32>
    %681 = arith.cmpi sgt, %105, %680 : vector<8x1xi32>
    %c0_i32_161 = arith.constant 0 : i32
    %682 = vector.broadcast %c0_i32_161 : i32 to vector<8x1xi32>
    %683 = arith.cmpi sgt, %105, %682 : vector<8x1xi32>
    %684 = vector.shape_cast %681 : vector<8x1xi1> to vector<8x1xi1>
    %685 = vector.broadcast %684 : vector<8x1xi1> to vector<8x128xi1>
    %686 = arith.select %685, %654, %614 : vector<8x128xi1>, vector<8x128xf32>
    %687 = vector.shape_cast %683 : vector<8x1xi1> to vector<8x1xi1>
    %688 = vector.broadcast %687 : vector<8x1xi1> to vector<8x128xi1>
    %689 = arith.select %688, %679, %620 : vector<8x128xi1>, vector<8x128xf32>
    %c0_162 = arith.constant 0 : index
    %c0_163 = arith.constant 0 : index
    %690 = vector.load %arg22[%c0_162, %c0_163] : memref<256x16xf32, #tpu.memory_space<vmem>>, vector<256x16xf32>
    %691 = vector.extract_strided_slice %690 {offsets = [0, 0], sizes = [128, 16], strides = [1, 1]} : vector<256x16xf32> to vector<128x16xf32>
    %cst_164 = arith.constant dense<0.000000e+00> : vector<8x16xf32>
    %692 = tpu.matmul %686, %691, %cst_164 {dimension_numbers = #tpu.dot_dimension_numbers<[1], [0], [0], [1], [0, 0, 1, 1], [], []>} : vector<8x128xf32>, vector<128x16xf32>, vector<8x16xf32> -> vector<8x16xf32>
    %693 = vector.extract_strided_slice %690 {offsets = [128, 0], sizes = [128, 16], strides = [1, 1]} : vector<256x16xf32> to vector<128x16xf32>
    %cst_165 = arith.constant dense<0.000000e+00> : vector<8x16xf32>
    %694 = tpu.matmul %689, %693, %cst_165 {dimension_numbers = #tpu.dot_dimension_numbers<[1], [0], [0], [1], [0, 0, 1, 1], [], []>} : vector<8x128xf32>, vector<128x16xf32>, vector<8x16xf32> -> vector<8x16xf32>
    %695 = arith.addf %692, %694 : vector<8x16xf32>
    %c0_166 = arith.constant 0 : index
    %c0_167 = arith.constant 0 : index
    %696 = vector.load %arg23[%c0_166, %c0_167] : memref<1x16xf32, #tpu.memory_space<vmem>>, vector<1x16xf32>
    %697 = vector.broadcast %696 : vector<1x16xf32> to vector<8x16xf32>
    %698 = arith.addf %695, %697 : vector<8x16xf32>
    %cst_168 = arith.constant 0.000000e+00 : f32
    %699 = vector.broadcast %cst_168 : f32 to vector<8x16xf32>
    %700 = arith.maximumf %698, %699 : vector<8x16xf32>
    %c0_169 = arith.constant 0 : index
    %c0_170 = arith.constant 0 : index
    %701 = vector.load %arg24[%c0_169, %c0_170] : memref<48x64xf32, #tpu.memory_space<vmem>>, vector<48x64xf32>
    %702 = vector.extract_strided_slice %701 {offsets = [0, 0], sizes = [16, 64], strides = [1, 1]} : vector<48x64xf32> to vector<16x64xf32>
    %cst_171 = arith.constant dense<0.000000e+00> : vector<8x64xf32>
    %703 = tpu.matmul %21, %702, %cst_171 {dimension_numbers = #tpu.dot_dimension_numbers<[1], [0], [0], [1], [0, 0, 1, 1], [], []>} : vector<8x16xf32>, vector<16x64xf32>, vector<8x64xf32> -> vector<8x64xf32>
    %704 = vector.extract_strided_slice %701 {offsets = [16, 0], sizes = [16, 64], strides = [1, 1]} : vector<48x64xf32> to vector<16x64xf32>
    %cst_172 = arith.constant dense<0.000000e+00> : vector<8x64xf32>
    %705 = tpu.matmul %104, %704, %cst_172 {dimension_numbers = #tpu.dot_dimension_numbers<[1], [0], [0], [1], [0, 0, 1, 1], [], []>} : vector<8x16xf32>, vector<16x64xf32>, vector<8x64xf32> -> vector<8x64xf32>
    %706 = arith.addf %703, %705 : vector<8x64xf32>
    %707 = vector.extract_strided_slice %701 {offsets = [32, 0], sizes = [16, 64], strides = [1, 1]} : vector<48x64xf32> to vector<16x64xf32>
    %cst_173 = arith.constant dense<0.000000e+00> : vector<8x64xf32>
    %708 = tpu.matmul %700, %707, %cst_173 {dimension_numbers = #tpu.dot_dimension_numbers<[1], [0], [0], [1], [0, 0, 1, 1], [], []>} : vector<8x16xf32>, vector<16x64xf32>, vector<8x64xf32> -> vector<8x64xf32>
    %709 = arith.addf %706, %708 : vector<8x64xf32>
    %c0_174 = arith.constant 0 : index
    %c0_175 = arith.constant 0 : index
    %710 = vector.load %arg25[%c0_174, %c0_175] : memref<1x64xf32, #tpu.memory_space<vmem>>, vector<1x64xf32>
    %711 = vector.broadcast %710 : vector<1x64xf32> to vector<8x64xf32>
    %712 = arith.addf %709, %711 : vector<8x64xf32>
    %cst_176 = arith.constant 0.000000e+00 : f32
    %713 = vector.broadcast %cst_176 : f32 to vector<8x64xf32>
    %714 = arith.maximumf %712, %713 : vector<8x64xf32>
    %c0_177 = arith.constant 0 : index
    %c0_178 = arith.constant 0 : index
    %715 = vector.load %arg26[%c0_177, %c0_178] : memref<64x32xf32, #tpu.memory_space<vmem>>, vector<64x32xf32>
    %cst_179 = arith.constant dense<0.000000e+00> : vector<8x32xf32>
    %716 = tpu.matmul %714, %715, %cst_179 {dimension_numbers = #tpu.dot_dimension_numbers<[1], [0], [0], [1], [0, 0, 1, 1], [], []>} : vector<8x64xf32>, vector<64x32xf32>, vector<8x32xf32> -> vector<8x32xf32>
    %c0_180 = arith.constant 0 : index
    %c0_181 = arith.constant 0 : index
    %717 = vector.load %arg27[%c0_180, %c0_181] : memref<1x32xf32, #tpu.memory_space<vmem>>, vector<1x32xf32>
    %718 = vector.broadcast %717 : vector<1x32xf32> to vector<8x32xf32>
    %719 = arith.addf %716, %718 : vector<8x32xf32>
    %cst_182 = arith.constant 0.000000e+00 : f32
    %720 = vector.broadcast %cst_182 : f32 to vector<8x32xf32>
    %721 = arith.maximumf %719, %720 : vector<8x32xf32>
    %c0_183 = arith.constant 0 : index
    %c0_184 = arith.constant 0 : index
    %722 = vector.load %arg28[%c0_183, %c0_184] : memref<32x1xf32, #tpu.memory_space<vmem>>, vector<32x1xf32>
    %cst_185 = arith.constant dense<0.000000e+00> : vector<8x1xf32>
    %723 = tpu.matmul %721, %722, %cst_185 {dimension_numbers = #tpu.dot_dimension_numbers<[1], [0], [0], [1], [0, 0, 1, 1], [], []>} : vector<8x32xf32>, vector<32x1xf32>, vector<8x1xf32> -> vector<8x1xf32>
    %c0_186 = arith.constant 0 : index
    %c0_187 = arith.constant 0 : index
    %724 = vector.load %arg29[%c0_186, %c0_187] : memref<1x1xf32, #tpu.memory_space<vmem>>, vector<1x1xf32>
    %725 = vector.broadcast %724 : vector<1x1xf32> to vector<8x1xf32>
    %726 = arith.addf %723, %725 : vector<8x1xf32>
    %727 = arith.negf %726 : vector<8x1xf32>
    %728 = math.exp %727 : vector<8x1xf32>
    %cst_188 = arith.constant 1.000000e+00 : f32
    %729 = vector.broadcast %cst_188 : f32 to vector<8x1xf32>
    %730 = arith.addf %729, %728 : vector<8x1xf32>
    %731 = arith.divf %729, %730 : vector<8x1xf32>
    %c0_189 = arith.constant 0 : index
    %c0_190 = arith.constant 0 : index
    %732 = vector.load %arg30[%c0_189, %c0_190] : memref<8x1xf32, #tpu.memory_space<vmem>>, vector<8x1xf32>
    tpu.vector_store %arg30[%c0_189, %c0_190], %731 {strides = array<i32>} : memref<8x1xf32, #tpu.memory_space<vmem>>, vector<8x1xf32>,
    return
  }
}

</mosaic_0001>

<bundles_post_ra>
// kernel: combined_forward.1
= control target key start
LH: loop header
LB: loop body
LE: loop exit
PB: predicated region body
PF: predicated region fallthrough
CT: control target
= control target key end

     0   :  { %s9596_s6 = smov 1   ;;  %s9597_s10 = smov 2   ;;  %s14026_s0 = inlined_call_operand.smem [shape: u32[31], index: -1, kind: input, shape index: {}] }
   0x1   :  { %s9648_s5 = sld [smem:[%s14026_s0]]   ;;  %s9598_s14 = smov 3  }
   0x2   :  { %s9653_s9 = sld [smem:[%s14026_s0 + %s9596_s6]]   ;;  %s9599_s18 = smov 4  }
   0x3   :  { %s9658_s13 = sld [smem:[%s14026_s0 + %s9597_s10]]   ;;  %s9600_s22 = smov 5  }
   0x4   :  { %s9663_s17 = sld [smem:[%s14026_s0 + %s9598_s14]]   ;;  %s9601_s26 = smov 6  }
   0x5   :  { %s9668_s21 = sld [smem:[%s14026_s0 + %s9599_s18]]   ;;  %s9602_s30 = smov 7  }
   0x6   :  { %s9673_s25 = sld [smem:[%s14026_s0 + %s9600_s22]]   ;;  %s9603_s4 = smov 8  }
   0x7   :  { %s9678_s29 = sld [smem:[%s14026_s0 + %s9601_s26]]   ;;  %s9604_s10 = smov 9  }
   0x8   :  { %14466 = sst [smem:[#allocation25_spill]] %s9653_s9  ;;  %s9605_s15 = smov 10  }
   0x9   :  { %14467 = sst [smem:[#allocation26_spill]] %s9658_s13  ;;  %s9606_s20 = smov 11  }
   0xa   :  { %14468 = sst [smem:[#allocation27_spill]] %s9663_s17  ;;  %s9607_s26 = smov 12  }
   0xb   :  { %s9683_s3 = sld [smem:[%s14026_s0 + %s9602_s30]]   ;;  %s9608_s1 = smov 13  }
   0xc   :  { %s9688_s8 = sld [smem:[%s14026_s0 + %s9603_s4]]   ;;  %s9609_s7 = smov 14  }
   0xd   :  { %s9693_s14 = sld [smem:[%s14026_s0 + %s9604_s10]]   ;;  %s9611_s22 = smov 16  }
   0xe   :  { %s9698_s19 = sld [smem:[%s14026_s0 + %s9605_s15]]   ;;  %s9610_s15 = smov 15  }
   0xf   :  { %s9703_s24 = sld [smem:[%s14026_s0 + %s9606_s20]]   ;;  %s9612_s28 = smov 17  }
  0x10   :  { %s9708_s30 = sld [smem:[%s14026_s0 + %s9607_s26]]   ;;  %s9625_s10 = smov 30  }
  0x11   :  { %14469 = sst [smem:[#allocation28_spill]] %s9683_s3 }
  0x12   :  { %s9713_s6 = sld [smem:[%s14026_s0 + %s9608_s1]]  }
  0x13   :  { %14470 = sst [smem:[#allocation29_spill]] %s9693_s14 }
  0x14   :  { %14471 = sst [smem:[#allocation30_spill]] %s9698_s19 }
  0x15   :  { %s9718_s12 = sld [smem:[%s14026_s0 + %s9609_s7]]   ;;  %s9613_s7 = smov 18  }
  0x16   :  { %14472 = sst [smem:[#allocation31_spill]] %s9708_s30 }
  0x17   :  { %s9723_s20 = sld [smem:[%s14026_s0 + %s9610_s15]]   ;;  %s9614_s15 = smov 19  }
  0x18   :  { %s9728_s27 = sld [smem:[%s14026_s0 + %s9611_s22]]   ;;  %s9615_s22 = smov 20  }
  0x19   :  { %s9733_s4 = sld [smem:[%s14026_s0 + %s9612_s28]]   ;;  %s9616_s28 = smov 21  }
  0x1a   :  { %s9738_s14 = sld [smem:[%s14026_s0 + %s9613_s7]]   ;;  %s9617_s7 = smov 22  }
  0x1b   :  { %14473 = sst [smem:[#allocation32_spill]] %s9718_s12 }
  0x1c   :  { %s9743_s17 = sld [smem:[%s14026_s0 + %s9614_s15]]   ;;  %s9618_s15 = smov 23  }
  0x1d   :  { %s9748_s13 = sld [smem:[%s14026_s0 + %s9615_s22]]   ;;  %s9619_s22 = smov 24  }
  0x1e   :  { %s9758_s12 = sld [smem:[%s14026_s0 + %s9617_s7]]   ;;  %s9621_s7 = smov 26  }
  0x1f   :  { %14474 = sst [smem:[#allocation33_spill]] %s9733_s4 }
  0x20   :  { %s9753_s4 = sld [smem:[%s14026_s0 + %s9616_s28]]   ;;  %s9620_s28 = smov 25  }
  0x21   :  { %s9763_s30 = sld [smem:[%s14026_s0 + %s9618_s15]]   ;;  %s9622_s15 = smov 27  }
  0x22   :  { %s9773_s3 = sld [smem:[%s14026_s0 + %s9620_s28]]   ;;  %s9624_s28 = smov 29  }
  0x23   :  { %14475 = sst [smem:[#allocation34_spill]] %s9748_s13 }
  0x24   :  { %14476 = sst [smem:[#allocation35_spill]] %s9758_s12 }
  0x25   :  { %s9768_s13 = sld [smem:[%s14026_s0 + %s9619_s22]]   ;;  %s9623_s22 = smov 28  }
  0x26   :  { %s9778_s12 = sld [smem:[%s14026_s0 + %s9621_s7]]  }
  0x27   :  { %s9783_s9 = sld [smem:[%s14026_s0 + %s9622_s15]]  }
  0x28   :  { %s8083_s19 = sld [smem:[%s14026_s0 + %s9624_s28]]  }
  0x2b   :  { %14477 = sst [smem:[#allocation36_spill]] %s9768_s13 }
  0x2c   :  { %14478 = sst [smem:[#allocation37_spill]] %s9778_s12 }
  0x2d   :  { %s9788_s13 = sld [smem:[%s14026_s0 + %s9623_s22]]  }
  0x2e   :  { %s9796_s12 = sld [smem:[%s14026_s0 + %s9625_s10]]   ;;  %v66_v0 = vstv %s8083_s19 }
  0x2f   :  { %67 = vst [vmem:[#allocation2] sm:$0x1] %v66_v0 }
  0x30   :  { %68 = vsyncpa [#allocation4], 0 }
  0x31   :  { %69 = vsyncpa [#allocation6], 0 }
  0x32   :  { %70 = vsyncpa [#allocation9], 0 }
  0x33   :  { %71 = vsyncpa [#allocation12], 0 }
  0x34   :  { %72 = vsyncpa [#allocation15], 0 }
  0x35   :  { %73 = vsyncpa [#allocation18], 0  ;;  %s9626_s15 = smov [#allocation5]   ;;  %s9627_s18 = smov [#allocation8]  }
  0x36   :  { %s114_s16 = sshll.u32 %s9626_s15, 4  ;;  %s136_s22 = sshll.u32 %s9627_s18, 4  ;;  %s115_s16 = int_to_ptr.vmem [resolvable:$true] %s114_s16  ;;  %s137_s22 = int_to_ptr.vmem [resolvable:$true] %s136_s22 }
  0x37   :  { %s9392_s23 = scalar_lea.vmem %s115_s16, 16  ;;  %s9396_s26 = scalar_lea.vmem %s115_s16, 32 }
  0x38   :  { %p9393_p0 = scmp.ne.s32.totalorder %s115_s16, %s9392_s23  ;;  %p9397_p1 = scmp.lt.s32.totalorder %s115_s16, %s115_s16 }
  0x39   :  { %p9398_p2 = scmp.lt.s32.totalorder %s9396_s26, %s9392_s23 }
  0x3b   :  { %p9399_p3 = por %p9398_p2, %p9397_p1 }
  0x3d   :  { %p9400_p4 = pnand %p9399_p3, %p9393_p0 }
  0x3f   :  { %9403 = shalt.err (!%p9400_p4)
}
  0x40   :  { %117 = dma.hbm_to_vmem [thread:$0]  %s9713_s6, 16, %s115_s16, [#allocation6]  }
  0x41   :  { %s9412_s0 = scalar_lea.vmem %s137_s22, 512  ;;  %p9417_p6 = scmp.lt.s32.totalorder %s137_s22, %s137_s22 }
  0x42   :  { %p9413_p5 = scmp.ne.s32.totalorder %s137_s22, %s9412_s0  ;;  %p9418_p7 = scmp.lt.s32.totalorder %s9412_s0, %s9412_s0 }
  0x44   :  { %p9419_p8 = por %p9418_p7, %p9417_p6 }
  0x46   :  { %p9420_p9 = pnand %p9419_p8, %p9413_p5 }
  0x48   :  { %9423 = shalt.err (!%p9420_p9)
}
  0x49   :  { %139 = dma.hbm_to_vmem [thread:$0]  %s9728_s27, 512, %s137_s22, [#allocation9]  }
  0x4a   :  { %s9628_s19 = smov [#allocation11]   ;;  %s9629_s1 = smov [#allocation14]  }
  0x4b   :  { %s158_s28 = sshll.u32 %s9628_s19, 4  ;;  %s182_s2 = sshll.u32 %s9629_s1, 4  ;;  %s159_s28 = int_to_ptr.vmem [resolvable:$true] %s158_s28  ;;  %s183_s2 = int_to_ptr.vmem [resolvable:$true] %s182_s2 }
  0x4c   :  { %s9432_s10 = scalar_lea.vmem %s159_s28, 512  ;;  %p9437_p11 = scmp.lt.s32.totalorder %s159_s28, %s159_s28 }
  0x4d   :  { %p9433_p10 = scmp.ne.s32.totalorder %s159_s28, %s9432_s10  ;;  %p9438_p12 = scmp.lt.s32.totalorder %s9432_s10, %s9432_s10 }
  0x4f   :  { %p9439_p13 = por %p9438_p12, %p9437_p11 }
  0x51   :  { %p9440_p0 = pnand %p9439_p13, %p9433_p10 }
  0x53   :  { %9443 = shalt.err (!%p9440_p0)
}
  0x54   :  { %161 = dma.hbm_to_vmem [thread:$0]  %s9743_s17, 512, %s159_s28, [#allocation12]  }
  0x55   :  { %s9452_s6 = scalar_lea.vmem %s183_s2, 16  ;;  %s9456_s7 = scalar_lea.vmem %s183_s2, 32 }
  0x56   :  { %p9453_p1 = scmp.ne.s32.totalorder %s183_s2, %s9452_s6  ;;  %p9457_p2 = scmp.lt.s32.totalorder %s183_s2, %s183_s2 }
  0x57   :  { %p9458_p3 = scmp.lt.s32.totalorder %s9456_s7, %s9452_s6 }
  0x59   :  { %p9459_p4 = por %p9458_p3, %p9457_p2 }
  0x5b   :  { %p9460_p5 = pnand %p9459_p4, %p9453_p1 }
  0x5d   :  { %9463 = shalt.err (!%p9460_p5)
}
  0x5e   :  { %185 = dma.hbm_to_vmem [thread:$0]  %s9763_s30, 16, %s183_s2, [#allocation15]  }
  0x5f   :  { %s9630_s27 = smov [#allocation3]   ;;  %s9631_s15 = smov [#allocation7]  }
  0x60   :  { %s102_s11 = sshll.u32 %s9630_s27, 4  ;;  %s126_s16 = sshll.u32 %s9631_s15, 4  ;;  %s103_s11 = int_to_ptr.vmem [resolvable:$true] %s102_s11  ;;  %s127_s16 = int_to_ptr.vmem [resolvable:$true] %s126_s16 }
  0x61   :  { %s9472_s18 = scalar_lea.vmem %s103_s11, 16  ;;  %s9476_s22 = scalar_lea.vmem %s103_s11, 32 }
  0x62   :  { %p9473_p6 = scmp.ne.s32.totalorder %s103_s11, %s9472_s18  ;;  %p9477_p7 = scmp.lt.s32.totalorder %s103_s11, %s103_s11 }
  0x63   :  { %p9478_p8 = scmp.lt.s32.totalorder %s9476_s22, %s9472_s18 }
  0x65   :  { %p9479_p9 = por %p9478_p8, %p9477_p7 }
  0x67   :  { %p9480_p10 = pnand %p9479_p9, %p9473_p6 }
  0x69   :  { %9483 = shalt.err (!%p9480_p10)
}
  0x6a   :  { %105 = dma.hbm_to_vmem [thread:$0]  %s9703_s24, 16, %s103_s11, [#allocation4]  }
  0x6b   :  { %s9492_s17 = scalar_lea.vmem %s127_s16, 16  ;;  %s9496_s23 = scalar_lea.vmem %s127_s16, 32 }
  0x6c   :  { %p9493_p11 = scmp.ne.s32.totalorder %s127_s16, %s9492_s17  ;;  %p9497_p12 = scmp.lt.s32.totalorder %s127_s16, %s127_s16 }
  0x6d   :  { %p9498_p13 = scmp.lt.s32.totalorder %s9496_s23, %s9492_s17 }
  0x6f   :  { %p9499_p0 = por %p9498_p13, %p9497_p12 }
  0x71   :  { %p9500_p1 = pnand %p9499_p0, %p9493_p11 }
  0x73   :  { %9503 = shalt.err (!%p9500_p1)
}
  0x74   :  { %129 = dma.hbm_to_vmem [thread:$0]  %s9723_s20, 16, %s127_s16, [#allocation6]  }
  0x75   :  { %s9632_s30 = smov [#allocation10]   ;;  %s9633_s0 = smov [#allocation13]  }
  0x76   :  { %s148_s26 = sshll.u32 %s9632_s30, 4  ;;  %s170_s19 = sshll.u32 %s9633_s0, 4  ;;  %s149_s26 = int_to_ptr.vmem [resolvable:$true] %s148_s26  ;;  %s171_s19 = int_to_ptr.vmem [resolvable:$true] %s170_s19 }
  0x77   :  { %s9512_s28 = scalar_lea.vmem %s149_s26, 64  ;;  %p9517_p3 = scmp.lt.s32.totalorder %s149_s26, %s149_s26 }
  0x78   :  { %p9513_p2 = scmp.ne.s32.totalorder %s149_s26, %s9512_s28  ;;  %p9518_p4 = scmp.lt.s32.totalorder %s9512_s28, %s9512_s28 }
  0x7a   :  { %p9519_p5 = por %p9518_p4, %p9517_p3 }
  0x7c   :  { %p9520_p6 = pnand %p9519_p5, %p9513_p2 }
  0x7e   :  { %9523 = shalt.err (!%p9520_p6)
}
  0x7f   :  { %151 = dma.hbm_to_vmem [thread:$0]  %s9738_s14, 64, %s149_s26, [#allocation9]  }
  0x80   :  { %s9532_s24 = scalar_lea.vmem %s171_s19, 64  ;;  %p9537_p8 = scmp.lt.s32.totalorder %s171_s19, %s171_s19 }
  0x81   :  { %p9533_p7 = scmp.ne.s32.totalorder %s171_s19, %s9532_s24  ;;  %p9538_p9 = scmp.lt.s32.totalorder %s9532_s24, %s9532_s24 }
  0x83   :  { %p9539_p10 = por %p9538_p9, %p9537_p8 }
  0x85   :  { %p9540_p11 = pnand %p9539_p10, %p9533_p7 }
  0x87   :  { %9543 = shalt.err (!%p9540_p11)
}
  0x88   :  { %173 = dma.hbm_to_vmem [thread:$0]  %s9753_s4, 64, %s171_s19, [#allocation12]  }
  0x89   :  { %s9634_s20 = smov [#allocation16]   ;;  %s9635_s2 = smov [#allocation17]  }
  0x8a   :  { %s194_s1 = sshll.u32 %s9634_s20, 4  ;;  %s206_s10 = sshll.u32 %s9635_s2, 4  ;;  %s195_s1 = int_to_ptr.vmem [resolvable:$true] %s194_s1  ;;  %s207_s10 = int_to_ptr.vmem [resolvable:$true] %s206_s10 }
  0x8b   :  { %s9552_s6 = scalar_lea.vmem %s195_s1, 16  ;;  %s9556_s7 = scalar_lea.vmem %s195_s1, 32 }
  0x8c   :  { %p9553_p12 = scmp.ne.s32.totalorder %s195_s1, %s9552_s6  ;;  %p9557_p13 = scmp.lt.s32.totalorder %s195_s1, %s195_s1 }
  0x8d   :  { %p9558_p0 = scmp.lt.s32.totalorder %s9556_s7, %s9552_s6 }
  0x8f   :  { %p9559_p1 = por %p9558_p0, %p9557_p13 }
  0x91   :  { %p9560_p2 = pnand %p9559_p1, %p9553_p12 }
  0x93   :  { %9563 = shalt.err (!%p9560_p2)
}
  0x94   :  { %197 = dma.hbm_to_vmem [thread:$0]  %s9773_s3, 16, %s195_s1, [#allocation15]  }
  0x95   :  { %s9572_s14 = scalar_lea.vmem %s207_s10, 16  ;;  %s9576_s27 = scalar_lea.vmem %s207_s10, 32 }
  0x96   :  { %p9573_p3 = scmp.ne.s32.totalorder %s207_s10, %s9572_s14  ;;  %p9577_p4 = scmp.lt.s32.totalorder %s207_s10, %s207_s10 }
  0x97   :  { %p9578_p5 = scmp.lt.s32.totalorder %s9576_s27, %s9572_s14 }
  0x99   :  { %p9579_p6 = por %p9578_p5, %p9577_p4 }
  0x9b   :  { %p9580_p7 = pnand %p9579_p6, %p9573_p3 }
  0x9d   :  { %9583 = shalt.err (!%p9580_p7)
}
  0x9e   :  { %209 = dma.hbm_to_vmem [thread:$0]  %s9783_s9, 16, %s207_s10, [#allocation18]  }
  0x9f   :  { %9584 = dma.done.wait [#allocation4], 16  }
  0xa0   :  { %9585 = vsyncadd [#allocation4], 4294967280 }
  0xa1   :  { %9586 = dma.done.wait [#allocation6], 32  }
  0xa2   :  { %9587 = vsyncadd [#allocation6], 4294967264 }
  0xa3   :  { %9588 = dma.done.wait [#allocation9], 576  }
  0xa4   :  { %9589 = vsyncadd [#allocation9], 4294966720 }
  0xa5   :  { %9590 = dma.done.wait [#allocation12], 576  }
  0xa6   :  { %9591 = vsyncadd [#allocation12], 4294966720 }
  0xa7   :  { %9592 = dma.done.wait [#allocation15], 32  }
  0xa8   :  { %9593 = vsyncadd [#allocation15], 4294967264 }
  0xa9   :  { %9594 = dma.done.wait [#allocation18], 16  }
  0xaa   :  { %9595 = vsyncadd [#allocation18], 4294967280  ;;  %v14038_v1 = vmov 0.0   ;;  %vm9637_vm0 = vmmov 0   ;;  %vm258_vm1 = vcmask 1043456   ;;  %v245_v3 = vld [vmem:[%s9668_s21] sm:$0xff] }
  0xab   :  { %8471 = vmatprep.subr.mxu1 %v14038_v1  ;;  %8475 = vmatprep.mubr.msk.f32.mxu1 %vm9637_vm0, %v14038_v1  ;;  %v246_v2 = vld [vmem:[%s9668_s21 + $0x8] sm:$0xf]  ;;  %v244_v4 = vld [vmem:[%s9648_s5] sm:$0xff]  ;;  %vm254_vm2 = vcmask 97280   ;;  %v340_v5 = vld [vmem:[%s9678_s29 + $0x38] sm:$0xff]  ;;  %s14479_s5 = sld [smem:[#allocation30_spill]] }
  0xac   :  { %8497 = vmatprep.subr.mxu0 %v14038_v1  ;;  %8505 = vmatprep.mubr.msk.f32.mxu0 %vm9637_vm0, %v14038_v1  ;;  %v339_v6 = vld [vmem:[%s9678_s29 + $0x30] sm:$0xff]  ;;  %v338_v7 = vld [vmem:[%s9678_s29 + $0x28] sm:$0xff]  ;;  %v337_v8 = vld [vmem:[%s9678_s29 + $0x20] sm:$0xff]  ;;  %s14480_s9 = sld [smem:[#allocation25_spill]]  ;;  %vm348_vm3 = vcmask 523264   ;;  %vm761_vm4 = vcmask 1046528  }
  0xad   :  { %8472 = vmatpush3.msk.msra.mxu1 %vm258_vm1, %v246_v2  ;;  %v336_v9 = vld [vmem:[%s9678_s29 + $0x18] sm:$0xff]  ;;  %v335_v10 = vld [vmem:[%s9678_s29 + $0x10] sm:$0xff]  ;;  %v334_v11 = vld [vmem:[%s9678_s29 + $0x8] sm:$0xff]  ;;  %vm543_vm5 = vcmask 130048   ;;  %s14481_s21 = sld [smem:[#allocation28_spill]]  ;;  %vm434_vm6 = vcmask 261120  }
  0xae   :  { %8473 = vmatprep.subr.mxu1 %v14038_v1  ;;  %v333_v12 = vld [vmem:[%s9678_s29] sm:$0xff]  ;;  %v426_v13 = vld [vmem:[%s9688_s8 + $0x18] sm:$0xff]  ;;  %v425_v14 = vld [vmem:[%s9688_s8 + $0x10] sm:$0xff]  ;;  %vm998_vm7 = vcmask 1045504   ;;  %vm1603_vm8 = vcmask 254976   ;;  %vm2112_vm9 = vcmask 1041409  }
  0xaf   :  { %8474 = vmatpush3.msra.mxu1 %v245_v3  ;;  %8498 = vmatpush3.msra.mxu0 %v426_v13  ;;  %v8085_v15 = vld [vmem:[%s9673_s25] ss:$0 sm:$0xff]  ;;  %v424_v20 = vld [vmem:[%s9688_s8 + $0x8] sm:$0xff]  ;;  %s14482_s25 = sld [smem:[#allocation31_spill]]  ;;  %vm2114_vm10 = vcmask 1042434   ;;  %vm2116_vm11 = vcmask 1043459  }
  0xb0   :  { %8476 = vmatmul.mubr.msk.f32.vlgmr.msra.gmra.mxu1 %vm254_vm2, %v244_v4  ;;  %8478 = vmatprep.subr.mxu1 %v14038_v1  ;;  %v423_v21 = vld [vmem:[%s9688_s8] sm:$0xff]  ;;  %vm2118_vm12 = vcmask 1044484   ;;  %vm2120_vm13 = vcmask 1045509   ;;  %vm2122_vm14 = vcmask 1046534   ;;  %vm2124_vm15 = vcmask 1047559   ;;  %s14541_s29 = sld [smem:[#allocation32_spill]] }
  0xb1   :  { %8479 = vmatpush3.msra.mxu1 %v340_v5  ;;  %8494 = vmatprep.mubr.msk.f32.mxu1 %vm9637_vm0, %v14038_v1  ;;  %v9846_v22 = vld [vmem:[%s14479_s5 + $0x8] sm:$0xff]  ;;  %v8110_v23 = vld [vmem:[%s14479_s5 + $0x18] sm:$0xff]  ;;  %v8109_v28 = vld [vmem:[%s14479_s5 + $0x10] sm:$0xff]  ;;  %vm3516_vm1 = vcmask 517120   ;;  %s14544_s3 = sld [smem:[#allocation26_spill]]  ;;  %vm4019_vm2 = vcmask 64512  }
  0xb2   :  { %8480 = vmatprep.subr.mxu1 %v14038_v1  ;;  %8499 = vmatprep.subr.mxu0 %v14038_v1  ;;  %v9851_v24 = vld [vmem:[%s14480_s9] sm:$0xff]  ;;  %v9855_v26 = vld [vmem:[%s14480_s9 + $0x8] sm:$0xff]  ;;  %v9858_v27 = vld [vmem:[%s14480_s9 + $0x10] sm:$0x3]  ;;  %s14545_s8 = sld [smem:[#allocation27_spill]] }
  0xb3   :  { %8481 = vmatpush3.msra.mxu1 %v339_v6  ;;  %8500 = vmatpush3.msra.mxu0 %v425_v14  ;;  %v762_v25 = vrot.slane %v9851_v24, 1  ;;  %v763_v29 = vrot.slane %v9855_v26, 1  ;;  %v765_v30 = vrot.slane %v9858_v27, 1  ;;  %v9866_v33 = vld [vmem:[%s14480_s9 + $0x18] sm:$0xff]  ;;  %v9869_v34 = vld [vmem:[%s14480_s9 + $0x20] sm:$0xff]  ;;  %v9881_v40 = vld [vmem:[%s14480_s9 + $0x30] sm:$0xff] }
  0xb4   :  { %8482 = vmatprep.subr.mxu1 %v14038_v1  ;;  %8501 = vmatprep.subr.mxu0 %v14038_v1  ;;  %v767_v35 = vrot.slane %v9866_v33, 1  ;;  %v768_v36 = vrot.slane %v9869_v34, 1  ;;  %v9875_v37 = vld [vmem:[%s14480_s9 + $0x28] sm:$0x3]  ;;  %v772_v42 = vrot.slane %v9881_v40, 1  ;;  %v9887_v43 = vld [vmem:[%s14480_s9 + $0x38] sm:$0xff] }
  0xb5   :  { %8483 = vmatpush3.msra.mxu1 %v338_v7  ;;  %8502 = vmatpush3.msra.mxu0 %v424_v20  ;;  %v764_v31 = vsel %vm761_vm4, %v762_v25, %v763_v29  ;;  %v766_v32 = vsel %vm761_vm4, %v763_v29, %v765_v30  ;;  %v770_v38 = vrot.slane %v9875_v37, 1  ;;  %v773_v44 = vrot.slane %v9887_v43, 1  ;;  %v9891_v45 = vld [vmem:[%s14480_s9 + $0x40] sm:$0x3]  ;;  %v9897_v48 = vld [vmem:[%s14480_s9 + $0x48] sm:$0xff]  ;;  %v9903_v51 = vld [vmem:[%s14480_s9 + $0x50] sm:$0xff] }
  0xb6   :  { %8484 = vmatprep.subr.mxu1 %v14038_v1  ;;  %8503 = vmatprep.subr.mxu0 %v14038_v1  ;;  %v769_v39 = vsel %vm761_vm4, %v767_v35, %v768_v36  ;;  %v775_v46 = vrot.slane %v9891_v45, 1  ;;  %v777_v50 = vrot.slane %v9897_v48, 1  ;;  %v778_v52 = vrot.slane %v9903_v51, 1  ;;  %v9907_v53 = vld [vmem:[%s14480_s9 + $0x58] sm:$0x3]  ;;  %v9913_v56 = vld [vmem:[%s14480_s9 + $0x60] sm:$0xff] }
  0xb7   :  { %8485 = vmatpush3.msra.mxu1 %v337_v8  ;;  %8504 = vmatpush3.msra.mxu0 %v423_v21  ;;  %v771_v41 = vsel %vm761_vm4, %v768_v36, %v770_v38  ;;  %v774_v47 = vsel %vm761_vm4, %v772_v42, %v773_v44  ;;  %v780_v54 = vrot.slane %v9907_v53, 1  ;;  %v782_v58 = vrot.slane %v9913_v56, 1  ;;  %v9919_v59 = vld [vmem:[%s14480_s9 + $0x68] sm:$0xff]  ;;  %v9923_v61 = vld [vmem:[%s14480_s9 + $0x70] sm:$0x3]  ;;  %v9929_v0 = vld [vmem:[%s14480_s9 + $0x78] sm:$0xff] }
  0xb8   :  { %8486 = vmatprep.subr.mxu1 %v14038_v1  ;;  %8508 = vmatprep.subr.mxu0 %v9846_v22  ;;  %v776_v49 = vsel %vm761_vm4, %v773_v44, %v775_v46  ;;  %v779_v55 = vsel %vm761_vm4, %v777_v50, %v778_v52  ;;  %v783_v60 = vrot.slane %v9919_v59, 1  ;;  %v785_v62 = vrot.slane %v9923_v61, 1  ;;  %v9935_v4 = vld [vmem:[%s14480_s9 + $0x80] sm:$0xff]  ;;  %v9939_v6 = vld [vmem:[%s14480_s9 + $0x88] sm:$0x3]  ;;  %v9967_v20 = vld [vmem:[%s14480_s9 + $0xb0] sm:$0xff] }
  0xb9   :  { %8487 = vmatpush3.msra.mxu1 %v336_v9  ;;  %v781_v57 = vsel %vm761_vm4, %v778_v52, %v780_v54  ;;  %v787_v3 = vrot.slane %v9929_v0, 1  ;;  %v788_v5 = vrot.slane %v9935_v4, 1  ;;  %v790_v7 = vrot.slane %v9939_v6, 1  ;;  %v9945_v9 = vld [vmem:[%s14480_s9 + $0x90] sm:$0xff]  ;;  %v9955_v14 = vld [vmem:[%s14480_s9 + $0xa0] sm:$0x3] }
  0xba   :  { %8488 = vmatprep.subr.mxu1 %v14038_v1  ;;  %v784_v63 = vsel %vm761_vm4, %v782_v58, %v783_v60  ;;  %v786_v2 = vsel %vm761_vm4, %v783_v60, %v785_v62  ;;  %v798_v21 = vrot.slane %v9967_v20, 1  ;;  %v8088_v30 = vld [vmem:[%s14481_s21] ss:$0 sm:$0xff]  ;;  %v1000_v42 = vrot.slane %v9855_v26, 2  ;;  %s14546_s4 = sld [smem:[#allocation33_spill]] }
  0xbb   :  { %8489 = vmatpush3.msra.mxu1 %v335_v10  ;;  %v789_v8 = vsel %vm761_vm4, %v787_v3, %v788_v5  ;;  %v791_v10 = vsel %vm761_vm4, %v788_v5, %v790_v7  ;;  %v541_v38 = vld [vmem:[%s14479_s5] sm:$0xff]  ;;  %v1002_v44 = vrot.slane %v9858_v27, 2  ;;  %v1004_v46 = vrot.slane %v9866_v33, 2  ;;  %s14547_s11 = sld [smem:[#allocation34_spill]] }
  0xbc   :  { %8490 = vmatprep.subr.mxu1 %v14038_v1  ;;  %v1009_v27 = vrot.slane %v9881_v40, 2  ;;  %v1010_v50 = vrot.slane %v9887_v43, 2  ;;  %v1014_v54 = vrot.slane %v9897_v48, 2  ;;  %v1020_v58 = vrot.slane %v9919_v59, 2  ;;  %s15251_s15 = sld [smem:[#allocation35_spill]] }
  0xbd   :  { %8491 = vmatpush3.msra.mxu1 %v334_v11  ;;  %v792_v11 = vrot.slane %v9945_v9, 1  ;;  %v1024_v60 = vrot.slane %v9929_v0, 2  ;;  %v1025_v62 = vrot.slane %v9935_v4, 2  ;;  %v1032_v3 = vrot.slane %v9955_v14, 2  ;;  %s15257_s16 = sld [smem:[#allocation29_spill]] }
  0xbe   :  { %8492 = vmatprep.subr.mxu1 %v14038_v1  ;;  %v1035_v5 = vrot.slane %v9967_v20, 2  ;;  %s15260_s18 = sld [smem:[#allocation36_spill]] }
  0xbf   :  { %8493 = vmatpush3.msra.mxu1 %v333_v12  ;;  %v9951_v12 = vld [vmem:[%s14480_s9 + $0x98] sm:$0xff]  ;;  %s15265_s22 = sld [smem:[#allocation37_spill]] }
  0xc0   :  { %8536 = vmatprep.subr.mxu1 %v8110_v23  ;;  %v793_v13 = vrot.slane %v9951_v12, 1 }
 0x170   :  { %v328_v16 = vpop.f32.mrf.mxu1 }
 0x171   :  { %v329_v17 = vadd.f32 %v8085_v15, %v328_v16  ;;  %v795_v15 = vrot.slane %v9955_v14, 1  ;;  %v794_v16 = vsel %vm761_vm4, %v792_v11, %v793_v13  ;;  %v2063_v14 = vld [vmem:[%s14482_s25 + $0x18] sm:$0xff] }
 0x172   :  { %v8477_v18 = vpop.f32.mrf.mxu1 }
 0x173   :  { %v332_v19 = vmax.f32 %v329_v17, 0.0  ;;  %v9961_v17 = vld [vmem:[%s14480_s9 + $0xa8] sm:$0xff]  ;;  %v796_v18 = vsel %vm761_vm4, %v793_v13, %v795_v15 }
 0x175   :  { %8495 = vmatmul.mubr.msk.f32.vlgmr.msra.gmra.mxu1 %vm348_vm3, %v332_v19  ;;  %v797_v19 = vrot.slane %v9961_v17, 1 }
 0x176   :  { %8537 = vmatpush3.msra.mxu1 %v8110_v23  ;;  %8540 = vmatprep.mubr.msk.f32.mxu1 %vm543_vm5, %v764_v31  ;;  %v9971_v23 = vld [vmem:[%s14480_s9 + $0xb8] sm:$0x3] }
 0x177   :  { %8538 = vmatprep.subr.mxu1 %v8109_v28  ;;  %v800_v25 = vrot.slane %v9971_v23, 1 }
 0x178   :  { %8539 = vmatpush3.msra.mxu1 %v8109_v28  ;;  %v799_v28 = vsel %vm761_vm4, %v797_v19, %v798_v21 }
 0x179   :  { %8541 = vmatmul.mubr.msk.f32.vlgmr.msra.gmra.mxu1 %vm543_vm5, %v766_v32  ;;  %v801_v29 = vsel %vm761_vm4, %v798_v21, %v800_v25  ;;  %8592 = vmatprep.subr.mxu1 %v2063_v14 }
 0x17a   :  { %8543 = vmatprep.mubr.msk.f32.mxu1 %vm543_vm5, %v769_v39  ;;  %v8128_v39 = vld [vmem:[%s14479_s5 + $0x28] sm:$0xff]  ;;  %8593 = vmatpush3.msra.mxu1 %v2063_v14 }
 0x17d   :  { %8544 = vmatmul.mubr.msk.f32.gmra.mxu1 %vm543_vm5, %v771_v41  ;;  %v8127_v41 = vld [vmem:[%s14479_s5 + $0x20] sm:$0xff] }
 0x17e   :  { %8546 = vmatprep.mubr.msk.f32.mxu1 %vm543_vm5, %v774_v47  ;;  %v1005_v47 = vrot.slane %v9869_v34, 2 }
 0x180   :  { %v1006_v52 = vsel %vm998_vm7, %v1004_v46, %v1005_v47 }
 0x181   :  { %8547 = vmatmul.mubr.msk.f32.gmra.mxu1 %vm543_vm5, %v776_v49 }
 0x182   :  { %8549 = vmatprep.mubr.msk.f32.mxu1 %vm543_vm5, %v779_v55  ;;  %v1015_v55 = vrot.slane %v9903_v51, 2 }
 0x185   :  { %8550 = vmatmul.mubr.msk.f32.gmra.mxu1 %vm543_vm5, %v781_v57  ;;  %v1019_v57 = vrot.slane %v9913_v56, 2 }
 0x186   :  { %8552 = vmatprep.mubr.msk.f32.mxu1 %vm543_vm5, %v784_v63  ;;  %v1029_v63 = vrot.slane %v9945_v9, 2 }
 0x189   :  { %8553 = vmatmul.mubr.msk.f32.gmra.mxu1 %vm543_vm5, %v786_v2  ;;  %v1030_v2 = vrot.slane %v9951_v12, 2 }
 0x18a   :  { %8555 = vmatprep.mubr.msk.f32.mxu1 %vm543_vm5, %v789_v8  ;;  %v1037_v8 = vrot.slane %v9971_v23, 2 }
 0x18b   :  { %v1033_v7 = vsel %vm998_vm7, %v1030_v2, %v1032_v3 }
 0x18d   :  { %8556 = vmatmul.mubr.msk.f32.gmra.mxu1 %vm543_vm5, %v791_v10  ;;  %v1038_v10 = vsel %vm998_vm7, %v1035_v5, %v1037_v8 }
 0x18e   :  { %8558 = vmatprep.mubr.msk.f32.mxu1 %vm543_vm5, %v794_v16 }
 0x191   :  { %8559 = vmatmul.mubr.msk.f32.gmra.mxu1 %vm543_vm5, %v796_v18 }
 0x192   :  { %8561 = vmatprep.mubr.msk.f32.mxu1 %vm543_vm5, %v799_v28 }
 0x195   :  { %8562 = vmatmul.mubr.msk.f32.gmra.mxu1 %vm543_vm5, %v801_v29 }
 0x235   :  { %v418_v31 = vpop.f32.mrf.mxu1 }
 0x236   :  { %v419_v32 = vadd.f32 %v8088_v30, %v418_v31 }
 0x237   :  { %v8496_v35 = vpop.f32.mrf.mxu1 }
 0x238   :  { %v422_v36 = vmax.f32 %v419_v32, 0.0 }
 0x239   :  { %v8542_v11 = vpop.f32.mrf.mxu1 }
 0x23a   :  { %8506 = vmatmul.mubr.msk.f32.vlgmr.msra.gmra.mxu0 %vm434_vm6, %v422_v36 }
 0x23b   :  { %8509 = vmatpush3.msra.mxu0 %v9846_v22  ;;  %8512 = vmatprep.mubr.msk.f32.mxu0 %vm543_vm5, %v9851_v24  ;;  %v999_v22 = vrot.slane %v9851_v24, 2  ;;  %v1003_v24 = vsel %vm998_vm7, %v1000_v42, %v1002_v44 }
 0x23c   :  { %8510 = vmatprep.subr.mxu0 %v541_v38 }
 0x23d   :  { %8511 = vmatpush3.msra.mxu0 %v541_v38  ;;  %v1001_v49 = vsel %vm998_vm7, %v999_v22, %v1000_v42  ;;  %v2062_v38 = vld [vmem:[%s14482_s25 + $0x10] sm:$0xff] }
 0x23e   :  { %8564 = vmatprep.subr.mxu0 %v8128_v39  ;;  %8513 = vmatmul.mubr.msk.f32.vlgmr.msra.gmra.mxu0 %vm543_vm5, %v9855_v26  ;;  %v1007_v26 = vrot.slane %v9875_v37, 2  ;;  %v1011_v37 = vsel %vm998_vm7, %v1009_v27, %v1010_v50  ;;  %v8092_v27 = vld [vmem:[#allocation3] ss:$0 sm:$0xff] }
 0x23f   :  { %8565 = vmatpush3.msra.mxu0 %v8128_v39  ;;  %8515 = vmatprep.mubr.msk.f32.mxu0 %vm543_vm5, %v9866_v33 }
 0x240   :  { %8566 = vmatprep.subr.mxu0 %v8127_v41  ;;  %v1008_v33 = vsel %vm998_vm7, %v1005_v47, %v1007_v26  ;;  %8594 = vmatprep.subr.mxu1 %v2062_v38  ;;  %v1271_v26 = vlaneseq }
 0x241   :  { %8567 = vmatpush3.msra.mxu0 %v8127_v41  ;;  %8595 = vmatpush3.msra.mxu1 %v2062_v38 }
 0x242   :  { %8516 = vmatmul.mubr.msk.f32.gmra.mxu0 %vm543_vm5, %v9869_v34  ;;  %8643 = vmatprep.subr.mxu0 %v14038_v1  ;;  %v1012_v34 = vrot.slane %v9891_v45, 2  ;;  %v1016_v45 = vsel %vm998_vm7, %v1014_v54, %v1015_v55 }
 0x243   :  { %8518 = vmatprep.mubr.msk.f32.mxu0 %vm543_vm5, %v9881_v40 }
 0x244   :  { %v1013_v40 = vsel %vm998_vm7, %v1010_v50, %v1012_v34 }
 0x246   :  { %8519 = vmatmul.mubr.msk.f32.gmra.mxu0 %vm543_vm5, %v9887_v43  ;;  %v1017_v43 = vrot.slane %v9907_v53, 2  ;;  %v1021_v53 = vsel %vm998_vm7, %v1019_v57, %v1020_v58 }
 0x247   :  { %8521 = vmatprep.mubr.msk.f32.mxu0 %vm543_vm5, %v9897_v48 }
 0x248   :  { %v1018_v48 = vsel %vm998_vm7, %v1015_v55, %v1017_v43  ;;  %v10080_v55 = vshrl.u32 %v1271_v26, 7 }
 0x24a   :  { %8522 = vmatmul.mubr.msk.f32.gmra.mxu0 %vm543_vm5, %v9903_v51  ;;  %v1022_v51 = vrot.slane %v9923_v61, 2  ;;  %v1026_v61 = vsel %vm998_vm7, %v1024_v60, %v1025_v62  ;;  %14484 = vst [vmem:[#allocation39_spill] sm:$0xff] %v10080_v55 }
 0x24b   :  { %8524 = vmatprep.mubr.msk.f32.mxu0 %vm543_vm5, %v9913_v56 }
 0x24c   :  { %v1023_v56 = vsel %vm998_vm7, %v1020_v58, %v1022_v51 }
 0x24e   :  { %8525 = vmatmul.mubr.msk.f32.gmra.mxu0 %vm543_vm5, %v9919_v59  ;;  %v1027_v59 = vrot.slane %v9939_v6, 2  ;;  %v1031_v6 = vsel %vm998_vm7, %v1029_v63, %v1030_v2 }
 0x24f   :  { %8527 = vmatprep.mubr.msk.f32.mxu0 %vm543_vm5, %v9929_v0 }
 0x250   :  { %v1028_v0 = vsel %vm998_vm7, %v1025_v62, %v1027_v59 }
 0x252   :  { %8528 = vmatmul.mubr.msk.f32.gmra.mxu0 %vm543_vm5, %v9935_v4  ;;  %v1034_v4 = vrot.slane %v9961_v17, 2 }
 0x253   :  { %8530 = vmatprep.mubr.msk.f32.mxu0 %vm543_vm5, %v9945_v9 }
 0x254   :  { %v1036_v9 = vsel %vm998_vm7, %v1034_v4, %v1035_v5 }
 0x256   :  { %8531 = vmatmul.mubr.msk.f32.gmra.mxu0 %vm543_vm5, %v9951_v12  ;;  %v903_v12 = vpop.f32.mrf.mxu1 }
 0x257   :  { %8533 = vmatprep.mubr.msk.f32.mxu0 %vm543_vm5, %v9961_v17 }
 0x258   :  { %v8545_v13 = vpop.f32.mrf.mxu1 }
 0x25a   :  { %8534 = vmatmul.mubr.msk.f32.gmra.mxu0 %vm543_vm5, %v9967_v20  ;;  %v913_v15 = vpop.f32.mrf.mxu1 }
 0x25b   :  { %8568 = vmatprep.mubr.msk.f32.mxu0 %vm543_vm5, %v1001_v49  ;;  %v9638_v49 = vmov 1983009808  }
 0x25c   :  { %v8548_v16 = vpop.f32.mrf.mxu1 }
 0x25e   :  { %8569 = vmatmul.mubr.msk.f32.vlgmr.msra.gmra.mxu0 %vm543_vm5, %v1003_v24  ;;  %v923_v17 = vpop.f32.mrf.mxu1  ;;  %v1269_v24 = vunpack.c.l.s4 %v9638_v49 }
 0x25f   :  { %8571 = vmatprep.mubr.msk.f32.mxu0 %vm543_vm5, %v1006_v52 }
 0x260   :  { %v8551_v20 = vpop.f32.mrf.mxu1  ;;  %v1270_v54 = vunpack.c.0.s8 %v1269_v24 }
 0x262   :  { %8572 = vmatmul.mubr.msk.f32.gmra.mxu0 %vm543_vm5, %v1008_v33  ;;  %v933_v25 = vpop.f32.mrf.mxu1  ;;  %v10083_v62 = vsub.s32 %v1270_v54, %v10080_v55 }
 0x263   :  { %8574 = vmatprep.mubr.msk.f32.mxu0 %vm543_vm5, %v1011_v37 }
 0x264   :  { %v8554_v30 = vpop.f32.mrf.mxu1  ;;  %14485 = vst [vmem:[#allocation40_spill] sm:$0xff] %v10083_v62 }
 0x266   :  { %8575 = vmatmul.mubr.msk.f32.gmra.mxu0 %vm543_vm5, %v1013_v40  ;;  %v943_v35 = vpop.f32.mrf.mxu1 }
 0x267   :  { %8577 = vmatprep.mubr.msk.f32.mxu0 %vm543_vm5, %v1016_v45 }
 0x268   :  { %v8557_v41 = vpop.f32.mrf.mxu1 }
 0x26a   :  { %8578 = vmatmul.mubr.msk.f32.gmra.mxu0 %vm543_vm5, %v1018_v48  ;;  %v953_v44 = vpop.f32.mrf.mxu1 }
 0x26b   :  { %8580 = vmatprep.mubr.msk.f32.mxu0 %vm543_vm5, %v1021_v53 }
 0x26c   :  { %v8560_v50 = vpop.f32.mrf.mxu1 }
 0x26e   :  { %8581 = vmatmul.mubr.msk.f32.gmra.mxu0 %vm543_vm5, %v1023_v56  ;;  %v963_v43 = vpop.f32.mrf.mxu1 }
 0x26f   :  { %8583 = vmatprep.mubr.msk.f32.mxu0 %vm543_vm5, %v1026_v61 }
 0x270   :  { %v8563_v2 = vpop.f32.mrf.mxu1 }
 0x272   :  { %8584 = vmatmul.mubr.msk.f32.gmra.mxu0 %vm543_vm5, %v1028_v0 }
 0x273   :  { %8586 = vmatprep.mubr.msk.f32.mxu0 %vm543_vm5, %v1031_v6 }
 0x276   :  { %8587 = vmatmul.mubr.msk.f32.gmra.mxu0 %vm543_vm5, %v1033_v7 }
 0x277   :  { %8589 = vmatprep.mubr.msk.f32.mxu0 %vm543_vm5, %v1036_v9 }
 0x27a   :  { %8590 = vmatmul.mubr.msk.f32.gmra.mxu0 %vm543_vm5, %v1038_v10 }
 0x27b   :  { %8659 = vmatprep.mubr.msk.f32.mxu0 %vm9637_vm0, %v14038_v1 }
 0x2fa   :  { %v10077_v18 = vpop.f32.mrf.mxu0 }
 0x2fb   :  { %14483 = vst [vmem:[#allocation38_spill] sm:$0xff] %v10077_v18 }
 0x2fc   :  { %v8507_v19 = vpop.f32.mrf.mxu0 }
 0x2fe   :  { %v8514_v21 = vpop.f32.mrf.mxu0 }
 0x2ff   :  { %v738_v33 = vadd.f32 %v8514_v21, %v8092_v27 }
 0x300   :  { %v658_v23 = vpop.f32.mrf.mxu0 }
 0x301   :  { %v737_v37 = vadd.f32 %v8092_v27, %v658_v23  ;;  %v983_v51 = vadd.f32 %v8542_v11, %v738_v33  ;;  %v973_v23 = vpop.f32.mrf.mxu1 }
 0x302   :  { %v8517_v28 = vpop.f32.mrf.mxu0 }
 0x303   :  { %v740_v40 = vadd.f32 %v8517_v28, %v8092_v27  ;;  %v982_v53 = vadd.f32 %v903_v12, %v737_v37 }
 0x304   :  { %v668_v29 = vpop.f32.mrf.mxu0 }
 0x305   :  { %v739_v58 = vadd.f32 %v8092_v27, %v668_v29  ;;  %v985_v56 = vadd.f32 %v8545_v13, %v740_v40 }
 0x306   :  { %v8520_v31 = vpop.f32.mrf.mxu0 }
 0x307   :  { %v742_v45 = vadd.f32 %v8520_v31, %v8092_v27  ;;  %v984_v6 = vadd.f32 %v913_v15, %v739_v58 }
 0x308   :  { %v678_v32 = vpop.f32.mrf.mxu0 }
 0x309   :  { %v741_v48 = vadd.f32 %v8092_v27, %v678_v32  ;;  %v10085_v7 = vadd.f32 %v8548_v16, %v742_v45 }
 0x30a   :  { %v8523_v36 = vpop.f32.mrf.mxu0 }
 0x30b   :  { %v744_v59 = vadd.f32 %v8523_v36, %v8092_v27  ;;  %v10087_v8 = vadd.f32 %v923_v17, %v741_v48 }
 0x30c   :  { %v688_v39 = vpop.f32.mrf.mxu0 }
 0x30d   :  { %v743_v63 = vadd.f32 %v8092_v27, %v688_v39  ;;  %v10089_v13 = vadd.f32 %v8551_v20, %v744_v59 }
 0x30e   :  { %v8526_v22 = vpop.f32.mrf.mxu0 }
 0x30f   :  { %v746_v61 = vadd.f32 %v8526_v22, %v8092_v27  ;;  %v10091_v21 = vadd.f32 %v933_v25, %v743_v63 }
 0x310   :  { %v698_v42 = vpop.f32.mrf.mxu0 }
 0x311   :  { %v745_v0 = vadd.f32 %v8092_v27, %v698_v42  ;;  %v10093_v31 = vadd.f32 %v8554_v30, %v746_v61 }
 0x312   :  { %v8529_v46 = vpop.f32.mrf.mxu0 }
 0x313   :  { %v748_v3 = vadd.f32 %v8529_v46, %v8092_v27  ;;  %v10095_v15 = vadd.f32 %v943_v35, %v745_v0 }
 0x314   :  { %v708_v47 = vpop.f32.mrf.mxu0 }
 0x315   :  { %v747_v4 = vadd.f32 %v8092_v27, %v708_v47  ;;  %v10097_v16 = vadd.f32 %v8557_v41, %v748_v3 }
 0x316   :  { %v8532_v52 = vpop.f32.mrf.mxu0 }
 0x317   :  { %v750_v10 = vadd.f32 %v8532_v52, %v8092_v27  ;;  %v10099_v17 = vadd.f32 %v953_v44, %v747_v4 }
 0x318   :  { %v718_v34 = vpop.f32.mrf.mxu0 }
 0x319   :  { %v749_v11 = vadd.f32 %v8092_v27, %v718_v34  ;;  %v10102_v22 = vadd.f32 %v8560_v50, %v750_v10 }
 0x31a   :  { %v8535_v57 = vpop.f32.mrf.mxu0 }
 0x31b   :  { %v752_v14 = vadd.f32 %v8535_v57, %v8092_v27  ;;  %v10104_v25 = vadd.f32 %v963_v43, %v749_v11 }
 0x31c   :  { %v728_v60 = vpop.f32.mrf.mxu0 }
 0x31d   :  { %v751_v19 = vadd.f32 %v8092_v27, %v728_v60  ;;  %v10106_v42 = vadd.f32 %v8563_v2, %v752_v14 }
 0x31e   :  { %v8570_v5 = vpop.f32.mrf.mxu0 }
 0x31f   :  { %v1220_v9 = vadd.f32 %v8570_v5, %v983_v51  ;;  %v10108_v30 = vadd.f32 %v973_v23, %v751_v19 }
 0x320   :  { %v1140_v12 = vpop.f32.mrf.mxu0 }
 0x321   :  { %v1236_v28 = vmax.f32 %v1220_v9, 0.0  ;;  %v1219_v29 = vadd.f32 %v1140_v12, %v982_v53 }
 0x322   :  { %v8573_v32 = vpop.f32.mrf.mxu0 }
 0x323   :  { %v1284_v36 = vcombine.high %v1236_v28, %v1236_v28  ;;  %v1291_v38 = vrot.slane %v1236_v28, %v10083_v62  ;;  %v1235_v39 = vmax.f32 %v1219_v29, 0.0  ;;  %v1222_v20 = vadd.f32 %v8573_v32, %v985_v56 }
 0x324   :  { %v1150_v35 = vpop.f32.mrf.mxu0 }
 0x325   :  { %v1298_v41 = vrot.slane %v1284_v36, %v10083_v62  ;;  %v1299_v46 = vcombine.high %v1291_v38, %v1291_v38  ;;  %v1632_v44 = vsel %vm1603_vm8, %v1291_v38, -inf  ;;  %v1267_v47 = vcombine.high %v1235_v39, %v1235_v39  ;;  %v2061_v38 = vld [vmem:[%s14482_s25 + $0x8] sm:$0xff] }
 0x326   :  { %v1633_v49 = vrot.slane %v1632_v44, 4  ;;  %v1274_v24 = vrot.slane %v1235_v39, %v10083_v62  ;;  %v10113_v26 = vmax.f32 %v1222_v20, 0.0  ;;  %v10115_v27 = vadd.f32 %v1150_v35, %v984_v6  ;;  %8596 = vmatprep.subr.mxu1 %v2061_v38 }
 0x327   :  { %v1300_v50 = vcombine.high %v1298_v41, %v1298_v41  ;;  %v1639_v52 = vsel %vm1603_vm8, %v1299_v46, -inf  ;;  %v1646_v33 = vsel %vm1603_vm8, %v1298_v41, -inf  ;;  %v1281_v34 = vrot.slane %v1267_v47, %v10083_v62  ;;  %8597 = vmatpush3.msra.mxu1 %v2061_v38 }
 0x328   :  { %v1634_v54 = vmax.f32 %v1632_v44, %v1633_v49  ;;  %v1640_v37 = vrot.slane %v1639_v52, 4  ;;  %v1647_v40 = vrot.slane %v1646_v33, 4  ;;  %v1282_v43 = vcombine.high %v1274_v24, %v1274_v24 }
 0x329   :  { %v1653_v57 = vsel %vm1603_vm8, %v1300_v50, -inf  ;;  %v1283_v58 = vcombine.high %v1281_v34, %v1281_v34  ;;  %v1604_v45 = vsel %vm1603_vm8, %v1274_v24, -inf  ;;  %v1618_v48 = vsel %vm1603_vm8, %v1281_v34, -inf  ;;  %v8576_v24 = vpop.f32.mrf.mxu0  ;;  %v2060_v50 = vld [vmem:[%s14482_s25] sm:$0xff] }
 0x32a   :  { %v1635_v51 = vrot.slane %v1634_v54, 2  ;;  %v1641_v60 = vmax.f32 %v1639_v52, %v1640_v37  ;;  %v1648_v53 = vmax.f32 %v1646_v33, %v1647_v40  ;;  %v1654_v56 = vrot.slane %v1653_v57, 4  ;;  %8598 = vmatprep.subr.mxu1 %v2060_v50 }
 0x32b   :  { %v1605_v59 = vrot.slane %v1604_v45, 4  ;;  %v1611_v63 = vsel %vm1603_vm8, %v1282_v43, -inf  ;;  %v1619_v2 = vrot.slane %v1618_v48, 4  ;;  %v1625_v61 = vsel %vm1603_vm8, %v1283_v58, -inf  ;;  %8599 = vmatpush3.msra.mxu1 %v2060_v50 }
 0x32c   :  { %v1636_v0 = vmax.f32 %v1634_v54, %v1635_v51  ;;  %v1642_v3 = vrot.slane %v1641_v60, 2  ;;  %v1649_v4 = vrot.slane %v1648_v53, 2  ;;  %v1655_v5 = vmax.f32 %v1653_v57, %v1654_v56 }
 0x32d   :  { %v1606_v6 = vmax.f32 %v1604_v45, %v1605_v59  ;;  %v1612_v9 = vrot.slane %v1611_v63, 4  ;;  %v1620_v10 = vmax.f32 %v1618_v48, %v1619_v2  ;;  %v1626_v11 = vrot.slane %v1625_v61, 4 }
 0x32e   :  { %v1637_v14 = vrot.slane %v1636_v0, 1  ;;  %v1643_v19 = vmax.f32 %v1641_v60, %v1642_v3  ;;  %v1650_v12 = vmax.f32 %v1648_v53, %v1649_v4  ;;  %v1656_v23 = vrot.slane %v1655_v5, 2 }
 0x32f   :  { %v1607_v28 = vrot.slane %v1606_v6, 2  ;;  %v1613_v29 = vmax.f32 %v1611_v63, %v1612_v9  ;;  %v1621_v32 = vrot.slane %v1620_v10, 2  ;;  %v1627_v36 = vmax.f32 %v1625_v61, %v1626_v11 }
 0x330   :  { %v10126_v39 = vmax.f32 %v1636_v0, %v1637_v14  ;;  %v1644_v20 = vrot.slane %v1643_v19, 1  ;;  %v1651_v35 = vrot.slane %v1650_v12, 1  ;;  %v10128_v41 = vmax.f32 %v1655_v5, %v1656_v23 }
 0x331   :  { %v1608_v46 = vmax.f32 %v1606_v6, %v1607_v28  ;;  %v1614_v44 = vrot.slane %v1613_v29, 2  ;;  %v1622_v47 = vmax.f32 %v1620_v10, %v1621_v32  ;;  %v1628_v49 = vrot.slane %v1627_v36, 2  ;;  %v10153_v10 = vld [vmem:[%s14482_s25 + $0x38] sm:$0xff] }
 0x332   :  { %14486 = vst [vmem:[#allocation41_spill] sm:$0xff] %v10128_v41  ;;  %v10131_v52 = vmax.f32 %v1643_v19, %v1644_v20  ;;  %v10133_v33 = vmax.f32 %v1650_v12, %v1651_v35  ;;  %v1318_v54 = vcombine.high %v10113_v26, %v10113_v26  ;;  %v1325_v58 = vrot.slane %v10113_v26, %v10083_v62 }
 0x333   :  { %v1609_v37 = vrot.slane %v1608_v46, 1  ;;  %v1615_v40 = vmax.f32 %v1613_v29, %v1614_v44  ;;  %v1623_v43 = vrot.slane %v1622_v47, 1  ;;  %v1629_v57 = vmax.f32 %v1627_v36, %v1628_v49  ;;  %8609 = vmatprep.subr.mxu1 %v10153_v10 }
 0x334   :  { %v1332_v45 = vrot.slane %v1318_v54, %v10083_v62  ;;  %v1237_v48 = vmax.f32 %v10115_v27, 0.0  ;;  %v1224_v51 = vadd.f32 %v8576_v24, %v10085_v7  ;;  %v1333_v63 = vcombine.high %v1325_v58, %v1325_v58 }
 0x335   :  { %v1610_v60 = vmax.f32 %v1608_v46, %v1609_v37  ;;  %v1616_v53 = vrot.slane %v1615_v40, 1  ;;  %v10143_v56 = vmax.f32 %v1622_v47, %v1623_v43  ;;  %v1630_v59 = vrot.slane %v1629_v57, 1 }
 0x336   :  { %v1334_v2 = vcombine.high %v1332_v45, %v1332_v45  ;;  %v1688_v61 = vsel %vm1603_vm8, %v1325_v58, -inf  ;;  %v1702_v0 = vsel %vm1603_vm8, %v1332_v45, -inf  ;;  %v1695_v27 = vsel %vm1603_vm8, %v1333_v63, -inf }
 0x337   :  { %v1617_v3 = vmax.f32 %v1615_v40, %v1616_v53  ;;  %v10147_v26 = vmax.f32 %v1629_v57, %v1630_v59  ;;  %v1689_v4 = vrot.slane %v1688_v61, 4  ;;  %v1703_v5 = vrot.slane %v1702_v0, 4 }
 0x338   :  { %v1709_v7 = vsel %vm1603_vm8, %v1334_v2, -inf  ;;  %v1301_v6 = vcombine.high %v1237_v48, %v1237_v48  ;;  %v1308_v9 = vrot.slane %v1237_v48, %v10083_v62  ;;  %v1696_v23 = vrot.slane %v1695_v27, 4 }
 0x339   :  { %v10156_v11 = vsel %vm2112_vm9, %v1617_v3, %v1610_v60  ;;  %v10160_v14 = vsel %vm2112_vm9, %v10143_v56, %v1617_v3  ;;  %v10165_v19 = vsel %vm2112_vm9, %v10147_v26, %v10143_v56  ;;  %v1690_v12 = vmax.f32 %v1688_v61, %v1689_v4 }
 0x33a   :  { %14487 = vst [vmem:[#allocation42_spill] sm:$0xff] %v10165_v19  ;;  %v1704_v28 = vmax.f32 %v1702_v0, %v1703_v5  ;;  %v1710_v29 = vrot.slane %v1709_v7, 4  ;;  %v1315_v32 = vrot.slane %v1301_v6, %v10083_v62  ;;  %v1316_v38 = vcombine.high %v1308_v9, %v1308_v9  ;;  %v1160_v5 = vpop.f32.mrf.mxu0 }
 0x33b   :  { %v1691_v36 = vrot.slane %v1690_v12, 2  ;;  %v1660_v20 = vsel %vm1603_vm8, %v1308_v9, -inf  ;;  %v1240_v35 = vmax.f32 %v1224_v51, 0.0  ;;  %v1697_v46 = vmax.f32 %v1695_v27, %v1696_v23 }
 0x33c   :  { %v1705_v44 = vrot.slane %v1704_v28, 2  ;;  %v1711_v47 = vmax.f32 %v1709_v7, %v1710_v29  ;;  %v1317_v49 = vcombine.high %v1315_v32, %v1315_v32  ;;  %v1661_v50 = vrot.slane %v1660_v20, 4 }
 0x33d   :  { %v1692_v24 = vmax.f32 %v1690_v12, %v1691_v36  ;;  %v1667_v54 = vsel %vm1603_vm8, %v1316_v38, -inf  ;;  %v1674_v37 = vsel %vm1603_vm8, %v1315_v32, -inf  ;;  %v1698_v40 = vrot.slane %v1697_v46, 2 }
 0x33e   :  { %v1706_v43 = vmax.f32 %v1704_v28, %v1705_v44  ;;  %v1712_v57 = vrot.slane %v1711_v47, 2  ;;  %v1668_v58 = vrot.slane %v1667_v54, 4  ;;  %v1662_v48 = vmax.f32 %v1660_v20, %v1661_v50 }
 0x33f   :  { %v1693_v45 = vrot.slane %v1692_v24, 1  ;;  %v1675_v60 = vrot.slane %v1674_v37, 4  ;;  %v1681_v51 = vsel %vm1603_vm8, %v1317_v49, -inf  ;;  %v1699_v53 = vmax.f32 %v1697_v46, %v1698_v40 }
 0x340   :  { %v1707_v59 = vrot.slane %v1706_v43, 1  ;;  %v1713_v63 = vmax.f32 %v1711_v47, %v1712_v57  ;;  %v10173_v2 = vmax.f32 %v1667_v54, %v1668_v58  ;;  %v1663_v0 = vrot.slane %v1662_v48, 2 }
 0x341   :  { %v1694_v61 = vmax.f32 %v1692_v24, %v1693_v45  ;;  %v1676_v3 = vmax.f32 %v1674_v37, %v1675_v60  ;;  %v1682_v4 = vrot.slane %v1681_v51, 4  ;;  %v1700_v27 = vrot.slane %v1699_v53, 1 }
 0x342   :  { %v10175_v7 = vmax.f32 %v1706_v43, %v1707_v59  ;;  %v1714_v6 = vrot.slane %v1713_v63, 1  ;;  %v1664_v12 = vmax.f32 %v1662_v48, %v1663_v0  ;;  %v1352_v29 = vcombine.high %v1240_v35, %v1240_v35 }
 0x343   :  { %v1677_v23 = vrot.slane %v1676_v3, 2  ;;  %v1683_v28 = vmax.f32 %v1681_v51, %v1682_v4  ;;  %v10178_v32 = vmax.f32 %v1699_v53, %v1700_v27  ;;  %v1359_v38 = vrot.slane %v1240_v35, %v10083_v62 }
 0x344   :  { %v10180_v36 = vmax.f32 %v1713_v63, %v1714_v6  ;;  %v1223_v20 = vadd.f32 %v1160_v5, %v10087_v8  ;;  %v1665_v46 = vrot.slane %v1664_v12, 1  ;;  %v1366_v49 = vrot.slane %v1352_v29, %v10083_v62 }
 0x345   :  { %v1678_v44 = vmax.f32 %v1676_v3, %v1677_v23  ;;  %v1684_v47 = vrot.slane %v1683_v28, 2  ;;  %v2954_v24 = vsel %vm2112_vm9, %v10178_v32, %v1694_v61  ;;  %v1367_v50 = vcombine.high %v1359_v38, %v1359_v38 }
 0x346   :  { %14488 = vst [vmem:[#allocation43_spill] sm:$0xff] %v10180_v36  ;;  %v1744_v54 = vsel %vm1603_vm8, %v1359_v38, -inf  ;;  %v1239_v37 = vmax.f32 %v1223_v20, 0.0  ;;  %v10190_v40 = vsel %vm2114_vm10, %v10175_v7, %v2954_v24  ;;  %v10192_v43 = vmax.f32 %v1664_v12, %v1665_v46  ;;  %v8579_v20 = vpop.f32.mrf.mxu0 }
 0x347   :  { %14489 = vst [vmem:[#allocation44_spill] sm:$0xff] %v10190_v40  ;;  %v1679_v35 = vrot.slane %v1678_v44, 1  ;;  %v1685_v8 = vmax.f32 %v1683_v28, %v1684_v47  ;;  %v1368_v57 = vcombine.high %v1366_v49, %v1366_v49  ;;  %v1745_v58 = vrot.slane %v1744_v54, 4 }
 0x348   :  { %v1751_v45 = vsel %vm1603_vm8, %v1367_v50, -inf  ;;  %v1758_v48 = vsel %vm1603_vm8, %v1366_v49, -inf  ;;  %v1335_v3 = vcombine.high %v1239_v37, %v1239_v37  ;;  %v1342_v4 = vrot.slane %v1239_v37, %v10083_v62 }
 0x349   :  { %v10196_v60 = vmax.f32 %v1678_v44, %v1679_v35  ;;  %v1686_v51 = vrot.slane %v1685_v8, 1  ;;  %v1752_v53 = vrot.slane %v1751_v45, 4  ;;  %v1759_v59 = vrot.slane %v1758_v48, 4 }
 0x34a   :  { %v1746_v63 = vmax.f32 %v1744_v54, %v1745_v58  ;;  %v1765_v0 = vsel %vm1603_vm8, %v1368_v57, -inf  ;;  %v1349_v28 = vrot.slane %v1335_v3, %v10083_v62  ;;  %v1350_v29 = vcombine.high %v1342_v4, %v1342_v4 }
 0x34b   :  { %14490 = vst [vmem:[#allocation45_spill] sm:$0xff] %v10196_v60  ;;  %v10200_v5 = vmax.f32 %v1685_v8, %v1686_v51  ;;  %v1753_v27 = vmax.f32 %v1751_v45, %v1752_v53  ;;  %v1760_v6 = vmax.f32 %v1758_v48, %v1759_v59  ;;  %v1766_v12 = vrot.slane %v1765_v0, 4  ;;  %v1170_v59 = vpop.f32.mrf.mxu0 }
 0x34c   :  { %v1747_v23 = vrot.slane %v1746_v63, 2  ;;  %v1716_v38 = vsel %vm1603_vm8, %v1342_v4, -inf  ;;  %v1351_v37 = vcombine.high %v1349_v28, %v1349_v28  ;;  %v1723_v58 = vsel %vm1603_vm8, %v1350_v29, -inf }
 0x34d   :  { %14491 = vst [vmem:[#allocation46_spill] sm:$0xff] %v10200_v5  ;;  %v2126_v46 = vsel %vm2112_vm9, %v10200_v5, %v10196_v60  ;;  %v10209_v44 = vsel %vm2112_vm9, %v1694_v61, %v10200_v5  ;;  %v1754_v47 = vrot.slane %v1753_v27, 2  ;;  %v1761_v49 = vrot.slane %v1760_v6, 2 }
 0x34e   :  { %v2127_v24 = vsel %vm2114_vm10, %v1694_v61, %v2126_v46  ;;  %v1748_v50 = vmax.f32 %v1746_v63, %v1747_v23  ;;  %v1767_v54 = vmax.f32 %v1765_v0, %v1766_v12  ;;  %v1717_v57 = vrot.slane %v1716_v38, 4 }
 0x34f   :  { %v1755_v35 = vmax.f32 %v1753_v27, %v1754_v47  ;;  %v1762_v8 = vmax.f32 %v1760_v6, %v1761_v49  ;;  %v1724_v51 = vrot.slane %v1723_v58, 4  ;;  %v1730_v53 = vsel %vm1603_vm8, %v1349_v28, -inf }
 0x350   :  { %v1749_v45 = vrot.slane %v1748_v50, 1  ;;  %v1768_v48 = vrot.slane %v1767_v54, 2  ;;  %v1718_v1 = vmax.f32 %v1716_v38, %v1717_v57  ;;  %v1731_v34 = vrot.slane %v1730_v53, 4  ;;  %v8582_v38 = vpop.f32.mrf.mxu0 }
 0x351   :  { %v1756_v3 = vrot.slane %v1755_v35, 1  ;;  %v1763_v4 = vrot.slane %v1762_v8, 1  ;;  %v1725_v63 = vmax.f32 %v1723_v58, %v1724_v51  ;;  %v1737_v0 = vsel %vm1603_vm8, %v1351_v37, -inf }
 0x352   :  { %v10214_v9 = vmax.f32 %v1748_v50, %v1749_v45  ;;  %v1769_v61 = vmax.f32 %v1767_v54, %v1768_v48  ;;  %v1719_v12 = vrot.slane %v1718_v1, 2  ;;  %v1732_v23 = vmax.f32 %v1730_v53, %v1731_v34 }
 0x353   :  { %v10217_v27 = vmax.f32 %v1755_v35, %v1756_v3  ;;  %v1764_v6 = vmax.f32 %v1762_v8, %v1763_v4  ;;  %v1726_v46 = vrot.slane %v1725_v63, 2  ;;  %v1738_v28 = vrot.slane %v1737_v0, 4 }
 0x354   :  { %14492 = vst [vmem:[#allocation47_spill] sm:$0xff] %v10214_v9  ;;  %v1770_v29 = vrot.slane %v1769_v61, 1  ;;  %v2128_v47 = vsel %vm2116_vm11, %v10178_v32, %v2127_v24  ;;  %v1720_v54 = vmax.f32 %v1718_v1, %v1719_v12  ;;  %v1733_v37 = vrot.slane %v1732_v23, 2 }
 0x355   :  { %14493 = vst [vmem:[#allocation48_spill] sm:$0xff] %v10217_v27  ;;  %v10224_v49 = vsel %vm2112_vm9, %v10217_v27, %v10214_v9  ;;  %v10228_v50 = vsel %vm2112_vm9, %v1764_v6, %v10217_v27  ;;  %v1727_v34 = vmax.f32 %v1725_v63, %v1726_v46  ;;  %v1739_v8 = vmax.f32 %v1737_v0, %v1738_v28 }
 0x356   :  { %14494 = vst [vmem:[#allocation49_spill] sm:$0xff] %v10228_v50  ;;  %v1771_v35 = vmax.f32 %v1769_v61, %v1770_v29  ;;  %v1226_v57 = vadd.f32 %v8579_v20, %v10089_v13  ;;  %v1721_v58 = vrot.slane %v1720_v54, 1  ;;  %v1734_v45 = vmax.f32 %v1732_v23, %v1733_v37 }
 0x357   :  { %v1225_v24 = vadd.f32 %v1170_v59, %v10091_v21  ;;  %v1228_v48 = vadd.f32 %v8582_v38, %v10093_v31  ;;  %v1728_v53 = vrot.slane %v1727_v34, 1  ;;  %v1740_v3 = vrot.slane %v1739_v8, 2 }
 0x358   :  { %v10234_v51 = vsel %vm2112_vm9, %v1771_v35, %v1764_v6  ;;  %v1242_v4 = vmax.f32 %v1226_v57, 0.0  ;;  %v1722_v18 = vmax.f32 %v1720_v54, %v1721_v58  ;;  %v1735_v1 = vrot.slane %v1734_v45, 1 }
 0x359   :  { %14495 = vst [vmem:[#allocation50_spill] sm:$0xff] %v10234_v51  ;;  %v1241_v12 = vmax.f32 %v1225_v24, 0.0  ;;  %v1244_v61 = vmax.f32 %v1228_v48, 0.0  ;;  %v10236_v63 = vmax.f32 %v1727_v34, %v1728_v53  ;;  %v10238_v0 = vmax.f32 %v1739_v8, %v1740_v3  ;;  %v1180_v48 = vpop.f32.mrf.mxu0 }
 0x35a   :  { %v1386_v13 = vcombine.high %v1242_v4, %v1242_v4  ;;  %v1393_v20 = vrot.slane %v1242_v4, %v10083_v62  ;;  %v10241_v21 = vmax.f32 %v1734_v45, %v1735_v1  ;;  %v10244_v31 = vsel %vm2118_vm12, %v1722_v18, %v2128_v47 }
 0x35b   :  { %v1369_v59 = vcombine.high %v1241_v12, %v1241_v12  ;;  %v1376_v6 = vrot.slane %v1241_v12, %v10083_v62  ;;  %v1427_v55 = vrot.slane %v1244_v61, %v10083_v62  ;;  %v1227_v27 = vadd.f32 %v1180_v48, %v10095_v15 }
 0x35c   :  { %v1400_v29 = vrot.slane %v1386_v13, %v10083_v62  ;;  %v1401_v46 = vcombine.high %v1393_v20, %v1393_v20  ;;  %v1800_v28 = vsel %vm1603_vm8, %v1393_v20, -inf }
 0x35d   :  { %v1801_v38 = vrot.slane %v1800_v28, 4  ;;  %v1383_v54 = vrot.slane %v1369_v59, %v10083_v62  ;;  %v1384_v37 = vcombine.high %v1376_v6, %v1376_v6  ;;  %v1772_v35 = vsel %vm1603_vm8, %v1376_v6, -inf }
 0x35e   :  { %v1402_v34 = vcombine.high %v1400_v29, %v1400_v29  ;;  %v1807_v18 = vsel %vm1603_vm8, %v1401_v46, -inf  ;;  %v1814_v47 = vsel %vm1603_vm8, %v1400_v29, -inf  ;;  %v1773_v8 = vrot.slane %v1772_v35, 4 }
 0x35f   :  { %v1802_v57 = vmax.f32 %v1800_v28, %v1801_v38  ;;  %v1808_v58 = vrot.slane %v1807_v18, 4  ;;  %v1815_v45 = vrot.slane %v1814_v47, 4  ;;  %v1385_v24 = vcombine.high %v1383_v54, %v1383_v54 }
 0x360   :  { %v1821_v53 = vsel %vm1603_vm8, %v1402_v34, -inf  ;;  %v1774_v3 = vmax.f32 %v1772_v35, %v1773_v8  ;;  %v1779_v4 = vsel %vm1603_vm8, %v1384_v37, -inf  ;;  %v1786_v1 = vsel %vm1603_vm8, %v1383_v54, -inf  ;;  %v8585_v37 = vpop.f32.mrf.mxu0 }
 0x361   :  { %v1803_v12 = vrot.slane %v1802_v57, 2  ;;  %v10257_v13 = vmax.f32 %v1807_v18, %v1808_v58  ;;  %v10259_v20 = vmax.f32 %v1814_v47, %v1815_v45  ;;  %v1822_v59 = vrot.slane %v1821_v53, 4 }
 0x362   :  { %v1775_v6 = vrot.slane %v1774_v3, 2  ;;  %v1780_v29 = vrot.slane %v1779_v4, 4  ;;  %v1787_v46 = vrot.slane %v1786_v1, 4  ;;  %v1793_v28 = vsel %vm1603_vm8, %v1385_v24, -inf }
 0x363   :  { %v1804_v38 = vmax.f32 %v1802_v57, %v1803_v12  ;;  %v10264_v34 = vmax.f32 %v1821_v53, %v1822_v59  ;;  %v1794_v58 = vrot.slane %v1793_v28, 4  ;;  %v1420_v45 = vcombine.high %v1244_v61, %v1244_v61 }
 0x364   :  { %v1776_v54 = vmax.f32 %v1774_v3, %v1775_v6  ;;  %v1781_v8 = vmax.f32 %v1779_v4, %v1780_v29  ;;  %v1788_v18 = vmax.f32 %v1786_v1, %v1787_v46  ;;  %v1435_v59 = vcombine.high %v1427_v55, %v1427_v55  ;;  %v1190_v4 = vpop.f32.mrf.mxu0 }
 0x365   :  { %14496 = vst [vmem:[#allocation51_spill] sm:$0xff] %v10264_v34  ;;  %v1805_v47 = vrot.slane %v1804_v38, 1  ;;  %v1795_v12 = vmax.f32 %v1793_v28, %v1794_v58  ;;  %v1434_v53 = vrot.slane %v1420_v45, %v10083_v62  ;;  %v1856_v3 = vsel %vm1603_vm8, %v1427_v55, -inf }
 0x366   :  { %v1777_v5 = vrot.slane %v1776_v54, 1  ;;  %v1782_v24 = vrot.slane %v1781_v8, 2  ;;  %v1789_v57 = vrot.slane %v1788_v18, 2  ;;  %v1857_v61 = vrot.slane %v1856_v3, 4 }
 0x367   :  { %v10268_v23 = vmax.f32 %v1804_v38, %v1805_v47  ;;  %v1796_v46 = vrot.slane %v1795_v12, 2  ;;  %v1436_v35 = vcombine.high %v1434_v53, %v1434_v53  ;;  %v1863_v15 = vsel %vm1603_vm8, %v1435_v59, -inf }
 0x368   :  { %v1778_v1 = vmax.f32 %v1776_v54, %v1777_v5  ;;  %v1783_v6 = vmax.f32 %v1781_v8, %v1782_v24  ;;  %v1790_v29 = vmax.f32 %v1788_v18, %v1789_v57  ;;  %v1870_v48 = vsel %vm1603_vm8, %v1434_v53, -inf  ;;  %v8588_v8 = vpop.f32.mrf.mxu0 }
 0x369   :  { %v10274_v38 = vmax.f32 %v1795_v12, %v1796_v46  ;;  %v1858_v55 = vmax.f32 %v1856_v3, %v1857_v61  ;;  %v1864_v47 = vrot.slane %v1863_v15, 4  ;;  %v1871_v5 = vrot.slane %v1870_v48, 4 }
 0x36a   :  { %v1784_v51 = vrot.slane %v1783_v6, 1  ;;  %v1791_v28 = vrot.slane %v1790_v29, 1  ;;  %v10278_v58 = vsel %vm2114_vm10, %v1778_v1, %v10224_v49  ;;  %v1877_v54 = vsel %vm1603_vm8, %v1436_v35, -inf }
 0x36b   :  { %v1878_v57 = vrot.slane %v1877_v54, 4  ;;  %v1859_v53 = vrot.slane %v1858_v55, 2  ;;  %v1865_v12 = vmax.f32 %v1863_v15, %v1864_v47  ;;  %v1872_v59 = vmax.f32 %v1870_v48, %v1871_v5 }
 0x36c   :  { %v10281_v18 = vmax.f32 %v1783_v6, %v1784_v51  ;;  %v10283_v45 = vmax.f32 %v1790_v29, %v1791_v28  ;;  %v1243_v46 = vmax.f32 %v1227_v27, 0.0  ;;  %v1230_v49 = vadd.f32 %v8585_v37, %v10097_v16 }
 0x36d   :  { %v1879_v36 = vmax.f32 %v1877_v54, %v1878_v57  ;;  %v1229_v3 = vadd.f32 %v1190_v4, %v10099_v17  ;;  %v10289_v1 = vadd.f32 %v8588_v8, %v10102_v22  ;;  %v1860_v35 = vmax.f32 %v1858_v55, %v1859_v53 }
 0x36e   :  { %v1866_v51 = vrot.slane %v1865_v12, 2  ;;  %v1873_v6 = vrot.slane %v1872_v59, 2  ;;  %v1403_v29 = vcombine.high %v1243_v46, %v1243_v46  ;;  %v1410_v28 = vrot.slane %v1243_v46, %v10083_v62 }
 0x36f   :  { %v1880_v61 = vrot.slane %v1879_v36, 2  ;;  %v1246_v24 = vmax.f32 %v1230_v49, 0.0  ;;  %v10292_v40 = vmax.f32 %v1229_v3, 0.0  ;;  %v1861_v15 = vrot.slane %v1860_v35, 1 }
 0x370   :  { %v1867_v27 = vmax.f32 %v1865_v12, %v1866_v51  ;;  %v1874_v48 = vmax.f32 %v1872_v59, %v1873_v6  ;;  %v1417_v16 = vrot.slane %v1403_v29, %v10083_v62  ;;  %v1418_v17 = vcombine.high %v1410_v28, %v1410_v28 }
 0x371   :  { %v10295_v37 = vmax.f32 %v1879_v36, %v1880_v61  ;;  %v1828_v22 = vsel %vm1603_vm8, %v1410_v28, -inf  ;;  %v1454_v4 = vcombine.high %v1246_v24, %v1246_v24  ;;  %v10298_v55 = vmax.f32 %v1860_v35, %v1861_v15 }
 0x372   :  { %v1868_v47 = vrot.slane %v1867_v27, 1  ;;  %v1875_v5 = vrot.slane %v1874_v48, 1  ;;  %v1419_v54 = vcombine.high %v1417_v16, %v1417_v16  ;;  %v1829_v57 = vrot.slane %v1828_v22, 4 }
 0x373   :  { %14497 = vst [vmem:[#allocation52_spill] sm:$0xff] %v10295_v37  ;;  %v1835_v53 = vsel %vm1603_vm8, %v1418_v17, -inf  ;;  %v1842_v12 = vsel %vm1603_vm8, %v1417_v16, -inf  ;;  %v1461_v51 = vrot.slane %v1246_v24, %v10083_v62  ;;  %v1468_v6 = vrot.slane %v1454_v4, %v10083_v62 }
 0x374   :  { %v10303_v59 = vmax.f32 %v1867_v27, %v1868_v47  ;;  %v10305_v36 = vmax.f32 %v1874_v48, %v1875_v5  ;;  %v1836_v46 = vrot.slane %v1835_v53, 4  ;;  %v1843_v49 = vrot.slane %v1842_v12, 4 }
 0x375   :  { %v1830_v3 = vmax.f32 %v1828_v22, %v1829_v57  ;;  %v1849_v35 = vsel %vm1603_vm8, %v1419_v54, -inf  ;;  %v1437_v15 = vcombine.high %v10292_v40, %v10292_v40  ;;  %v1469_v27 = vcombine.high %v1461_v51, %v1461_v51 }
 0x376   :  { %14498 = vst [vmem:[#allocation53_spill] sm:$0xff] %v10305_v36  ;;  %v1837_v29 = vmax.f32 %v1835_v53, %v1836_v46  ;;  %v1844_v61 = vmax.f32 %v1842_v12, %v1843_v49  ;;  %v1850_v28 = vrot.slane %v1849_v35, 4  ;;  %v1470_v17 = vcombine.high %v1468_v6, %v1468_v6 }
 0x377   :  { %v1831_v16 = vrot.slane %v1830_v3, 2  ;;  %v1912_v48 = vsel %vm1603_vm8, %v1461_v51, -inf  ;;  %v1919_v24 = vsel %vm1603_vm8, %v1469_v27, -inf  ;;  %v1926_v4 = vsel %vm1603_vm8, %v1468_v6, -inf }
 0x378   :  { %v1838_v47 = vrot.slane %v1837_v29, 2  ;;  %v1845_v5 = vrot.slane %v1844_v61, 2  ;;  %v1851_v22 = vmax.f32 %v1849_v35, %v1850_v28  ;;  %v1913_v57 = vrot.slane %v1912_v48, 4 }
 0x379   :  { %v1832_v54 = vmax.f32 %v1830_v3, %v1831_v16  ;;  %v1933_v53 = vsel %vm1603_vm8, %v1470_v17, -inf  ;;  %v1920_v34 = vrot.slane %v1919_v24, 4  ;;  %v1927_v19 = vrot.slane %v1926_v4, 4 }
 0x37a   :  { %v1839_v12 = vmax.f32 %v1837_v29, %v1838_v47  ;;  %v1846_v46 = vmax.f32 %v1844_v61, %v1845_v5  ;;  %v1852_v49 = vrot.slane %v1851_v22, 2  ;;  %v1914_v8 = vmax.f32 %v1912_v48, %v1913_v57 }
 0x37b   :  { %v1833_v37 = vrot.slane %v1832_v54, 1  ;;  %v1934_v41 = vrot.slane %v1933_v53, 4  ;;  %v1921_v3 = vmax.f32 %v1919_v24, %v1920_v34  ;;  %v1928_v16 = vmax.f32 %v1926_v4, %v1927_v19 }
 0x37c   :  { %v1840_v51 = vrot.slane %v1839_v12, 1  ;;  %v1847_v36 = vrot.slane %v1846_v46, 1  ;;  %v1853_v9 = vmax.f32 %v1851_v22, %v1852_v49  ;;  %v1915_v35 = vrot.slane %v1914_v8, 2 }
 0x37d   :  { %v1834_v28 = vmax.f32 %v1832_v54, %v1833_v37  ;;  %v1935_v27 = vmax.f32 %v1933_v53, %v1934_v41  ;;  %v1922_v61 = vrot.slane %v1921_v3, 2  ;;  %v1929_v47 = vrot.slane %v1928_v16, 2 }
 0x37e   :  { %v1841_v60 = vmax.f32 %v1839_v12, %v1840_v51  ;;  %v10316_v6 = vmax.f32 %v1846_v46, %v1847_v36  ;;  %v1854_v17 = vrot.slane %v1853_v9, 1  ;;  %v1916_v29 = vmax.f32 %v1914_v8, %v1915_v35 }
 0x37f   :  { %v1936_v48 = vrot.slane %v1935_v27, 2  ;;  %v1444_v5 = vrot.slane %v10292_v40, %v10083_v62  ;;  %v1923_v34 = vmax.f32 %v1921_v3, %v1922_v61  ;;  %v1930_v37 = vmax.f32 %v1928_v16, %v1929_v47 }
 0x380   :  { %v10320_v57 = vmax.f32 %v1853_v9, %v1854_v17  ;;  %v10323_v22 = vsel %vm2112_vm9, %v1841_v60, %v1834_v28  ;;  %v10327_v19 = vsel %vm2112_vm9, %v10316_v6, %v1841_v60  ;;  %v1917_v41 = vrot.slane %v1916_v29, 1 }
 0x381   :  { %14499 = vst [vmem:[#allocation54_spill] sm:$0xff] %v10327_v19  ;;  %v1937_v36 = vmax.f32 %v1935_v27, %v1936_v48  ;;  %v1451_v8 = vrot.slane %v1437_v15, %v10083_v62  ;;  %v1452_v40 = vcombine.high %v1444_v5, %v1444_v5  ;;  %v1884_v24 = vsel %vm1603_vm8, %v1444_v5, -inf  ;;  %v1200_v27 = vpop.f32.mrf.mxu0 }
 0x382   :  { %v10333_v54 = vsel %vm2112_vm9, %v10320_v57, %v10316_v6  ;;  %v10335_v9 = vmax.f32 %v1916_v29, %v1917_v41  ;;  %v1924_v4 = vrot.slane %v1923_v34, 1  ;;  %v1931_v53 = vrot.slane %v1930_v37, 1 }
 0x383   :  { %14500 = vst [vmem:[#allocation55_spill] sm:$0xff] %v10333_v54  ;;  %v1938_v60 = vrot.slane %v1937_v36, 1  ;;  %v1453_v12 = vcombine.high %v1451_v8, %v1451_v8  ;;  %v1885_v46 = vrot.slane %v1884_v24, 4  ;;  %v1891_v49 = vsel %vm1603_vm8, %v1452_v40, -inf }
 0x384   :  { %v1898_v51 = vsel %vm1603_vm8, %v1451_v8, -inf  ;;  %v1248_v15 = vmax.f32 %v10289_v1, 0.0  ;;  %v10341_v35 = vmax.f32 %v1923_v34, %v1924_v4  ;;  %v10343_v28 = vmax.f32 %v1930_v37, %v1931_v53 }
 0x385   :  { %v10345_v3 = vmax.f32 %v1937_v36, %v1938_v60  ;;  %v1892_v16 = vrot.slane %v1891_v49, 4  ;;  %v1886_v17 = vmax.f32 %v1884_v24, %v1885_v46  ;;  %v1899_v29 = vrot.slane %v1898_v51, 4 }
 0x386   :  { %14501 = vst [vmem:[#allocation56_spill] sm:$0xff] %v10343_v28  ;;  %v1905_v61 = vsel %vm1603_vm8, %v1453_v12, -inf  ;;  %v1488_v47 = vcombine.high %v1248_v15, %v1248_v15  ;;  %v10351_v48 = vsel %vm2112_vm9, %v10341_v35, %v10335_v9  ;;  %v1495_v41 = vrot.slane %v1248_v15, %v10083_v62 }
 0x387   :  { %14502 = vst [vmem:[#allocation57_spill] sm:$0xff] %v10345_v3  ;;  %14503 = vst [vmem:[#allocation58_spill] sm:$0xff] %v10351_v48  ;;  %v10353_v5 = vmax.f32 %v1891_v49, %v1892_v16  ;;  %v1906_v1 = vrot.slane %v1905_v61, 4  ;;  %v1887_v34 = vrot.slane %v1886_v17, 2  ;;  %v1900_v37 = vmax.f32 %v1898_v51, %v1899_v29 }
 0x388   :  { %v1502_v36 = vrot.slane %v1488_v47, %v10083_v62  ;;  %v1231_v8 = vadd.f32 %v1200_v27, %v10104_v25  ;;  %v1503_v4 = vcombine.high %v1495_v41, %v1495_v41  ;;  %v1968_v53 = vsel %vm1603_vm8, %v1495_v41, -inf }
 0x389   :  { %v1907_v24 = vmax.f32 %v1905_v61, %v1906_v1  ;;  %v1888_v60 = vmax.f32 %v1886_v17, %v1887_v34  ;;  %v1901_v12 = vrot.slane %v1900_v37, 2  ;;  %v1969_v49 = vrot.slane %v1968_v53, 4 }
 0x38a   :  { %v1504_v46 = vcombine.high %v1502_v36, %v1502_v36  ;;  %v1975_v3 = vsel %vm1603_vm8, %v1503_v4, -inf  ;;  %v1982_v15 = vsel %vm1603_vm8, %v1502_v36, -inf  ;;  %v1247_v51 = vmax.f32 %v1231_v8, 0.0 }
 0x38b   :  { %v1908_v16 = vrot.slane %v1907_v24, 2  ;;  %v1889_v29 = vrot.slane %v1888_v60, 1  ;;  %v1902_v47 = vmax.f32 %v1900_v37, %v1901_v12  ;;  %v1970_v48 = vmax.f32 %v1968_v53, %v1969_v49 }
 0x38c   :  { %v1976_v25 = vrot.slane %v1975_v3, 4  ;;  %v1983_v40 = vrot.slane %v1982_v15, 4  ;;  %v1989_v61 = vsel %vm1603_vm8, %v1504_v46, -inf  ;;  %v1471_v1 = vcombine.high %v1247_v51, %v1247_v51 }
 0x38d   :  { %v1909_v27 = vmax.f32 %v1907_v24, %v1908_v16  ;;  %v10363_v41 = vmax.f32 %v1888_v60, %v1889_v29  ;;  %v1903_v17 = vrot.slane %v1902_v47, 1  ;;  %v1971_v34 = vrot.slane %v1970_v48, 2 }
 0x38e   :  { %v1977_v54 = vmax.f32 %v1975_v3, %v1976_v25  ;;  %v1984_v19 = vmax.f32 %v1982_v15, %v1983_v40  ;;  %v1990_v4 = vrot.slane %v1989_v61, 4  ;;  %v1478_v36 = vrot.slane %v1247_v51, %v10083_v62 }
 0x38f   :  { %v1910_v28 = vrot.slane %v1909_v27, 1  ;;  %v10366_v8 = vmax.f32 %v1902_v47, %v1903_v17  ;;  %v1972_v37 = vmax.f32 %v1970_v48, %v1971_v34  ;;  %v1485_v24 = vrot.slane %v1471_v1, %v10083_v62  ;;  %v8591_v47 = vpop.f32.mrf.mxu0 }
 0x390   :  { %v1978_v53 = vrot.slane %v1977_v54, 2  ;;  %v1985_v46 = vrot.slane %v1984_v19, 2  ;;  %v1991_v49 = vmax.f32 %v1989_v61, %v1990_v4  ;;  %v1486_v60 = vcombine.high %v1478_v36, %v1478_v36 }
 0x391   :  { %14504 = vst [vmem:[#allocation59_spill] sm:$0xff] %v10366_v8  ;;  %v10369_v12 = vmax.f32 %v1909_v27, %v1910_v28  ;;  %v1973_v16 = vrot.slane %v1972_v37, 1  ;;  %v1487_v50 = vcombine.high %v1485_v24, %v1485_v24  ;;  %v1940_v3 = vsel %vm1603_vm8, %v1478_v36, -inf }
 0x392   :  { %v1979_v29 = vmax.f32 %v1977_v54, %v1978_v53  ;;  %v1986_v15 = vmax.f32 %v1984_v19, %v1985_v46  ;;  %v1992_v48 = vrot.slane %v1991_v49, 2  ;;  %v1941_v51 = vrot.slane %v1940_v3, 4 }
 0x393   :  { %v10375_v40 = vsel %vm2112_vm9, %v10369_v12, %v10366_v8  ;;  %v10377_v25 = vmax.f32 %v1972_v37, %v1973_v16  ;;  %v1947_v27 = vsel %vm1603_vm8, %v1486_v60, -inf  ;;  %v1954_v61 = vsel %vm1603_vm8, %v1485_v24, -inf }
 0x394   :  { %v1980_v28 = vrot.slane %v1979_v29, 1  ;;  %v1987_v54 = vrot.slane %v1986_v15, 1  ;;  %v1993_v1 = vmax.f32 %v1991_v49, %v1992_v48  ;;  %v1942_v17 = vmax.f32 %v1940_v3, %v1941_v51  ;;  %v1210_v48 = vpop.f32.mrf.mxu0 }
 0x395   :  { %14505 = vst [vmem:[#allocation60_spill] sm:$0xff] %v10377_v25  ;;  %v1948_v34 = vrot.slane %v1947_v27, 4  ;;  %v1955_v36 = vrot.slane %v1954_v61, 4  ;;  %v1961_v53 = vsel %vm1603_vm8, %v1487_v50, -inf  ;;  %v1234_v19 = vadd.f32 %v8591_v47, %v10106_v42 }
 0x396   :  { %v10381_v4 = vmax.f32 %v1979_v29, %v1980_v28  ;;  %v1988_v46 = vmax.f32 %v1986_v15, %v1987_v54  ;;  %v1994_v8 = vrot.slane %v1993_v1, 1  ;;  %v1943_v37 = vrot.slane %v1942_v17, 2 }
 0x397   :  { %v1949_v16 = vmax.f32 %v1947_v27, %v1948_v34  ;;  %v1956_v24 = vmax.f32 %v1954_v61, %v1955_v36  ;;  %v1962_v49 = vrot.slane %v1961_v53, 4  ;;  %v1250_v3 = vmax.f32 %v1234_v19, 0.0 }
 0x398   :  { %14506 = vst [vmem:[#allocation61_spill] sm:$0xff] %v10381_v4  ;;  %v10388_v60 = vsel %vm2112_vm9, %v10381_v4, %v10377_v25  ;;  %v1995_v29 = vmax.f32 %v1993_v1, %v1994_v8  ;;  %v10392_v51 = vsel %vm2112_vm9, %v1988_v46, %v10381_v4  ;;  %v1944_v50 = vmax.f32 %v1942_v17, %v1943_v37 }
 0x399   :  { %v1950_v42 = vrot.slane %v1949_v16, 2  ;;  %v1957_v15 = vrot.slane %v1956_v24, 2  ;;  %v10394_v47 = vmax.f32 %v1961_v53, %v1962_v49  ;;  %v1522_v28 = vcombine.high %v1250_v3, %v1250_v3 }
 0x39a   :  { %v1529_v27 = vrot.slane %v1250_v3, %v10083_v62  ;;  %v10398_v54 = vsel %vm2112_vm9, %v1995_v29, %v1988_v46  ;;  %v1945_v61 = vrot.slane %v1944_v50, 1  ;;  %v1233_v36 = vadd.f32 %v1210_v48, %v10108_v30 }
 0x39b   :  { %14507 = vst [vmem:[#allocation62_spill] sm:$0xff] %v10398_v54  ;;  %v1951_v34 = vmax.f32 %v1949_v16, %v1950_v42  ;;  %v10401_v8 = vmax.f32 %v1956_v24, %v1957_v15  ;;  %v1536_v1 = vrot.slane %v1522_v28, %v10083_v62 }
 0x39c   :  { %v1537_v19 = vcombine.high %v1529_v27, %v1529_v27  ;;  %v2024_v17 = vsel %vm1603_vm8, %v1529_v27, -inf  ;;  %v10405_v37 = vmax.f32 %v1944_v50, %v1945_v61  ;;  %v1249_v4 = vmax.f32 %v1233_v36, 0.0 }
 0x39d   :  { %v1952_v53 = vrot.slane %v1951_v34, 1  ;;  %v2025_v49 = vrot.slane %v2024_v17, 4  ;;  %v1538_v46 = vcombine.high %v1536_v1, %v1536_v1  ;;  %v2038_v16 = vsel %vm1603_vm8, %v1536_v1, -inf }
 0x39e   :  { %v2031_v29 = vsel %vm1603_vm8, %v1537_v19, -inf  ;;  %v2039_v42 = vrot.slane %v2038_v16, 4  ;;  %v1505_v28 = vcombine.high %v1249_v4, %v1249_v4  ;;  %v1512_v50 = vrot.slane %v1249_v4, %v10083_v62 }
 0x39f   :  { %v10410_v30 = vmax.f32 %v1951_v34, %v1952_v53  ;;  %v2026_v24 = vmax.f32 %v2024_v17, %v2025_v49  ;;  %v2032_v48 = vrot.slane %v2031_v29, 4  ;;  %v2045_v15 = vsel %vm1603_vm8, %v1538_v46, -inf }
 0x3a0   :  { %v14508_v27 = vrot.slane %v10173_v2, 2  ;;  %v10419_v19 = vmax.f32 %v2038_v16, %v2039_v42  ;;  %v2046_v1 = vrot.slane %v2045_v15, 4  ;;  %v1519_v34 = vrot.slane %v1505_v28, %v10083_v62 }
 0x3a1   :  { %v2027_v36 = vrot.slane %v2026_v24, 2  ;;  %v10417_v3 = vmax.f32 %v2031_v29, %v2032_v48  ;;  %v1520_v17 = vcombine.high %v1512_v50, %v1512_v50  ;;  %v1996_v53 = vsel %vm1603_vm8, %v1512_v50, -inf }
 0x3a2   :  { %v1671_v61 = vmax.f32 %v10173_v2, %v14508_v27  ;;  %v10425_v25 = vmax.f32 %v2045_v15, %v2046_v1  ;;  %v1521_v2 = vcombine.high %v1519_v34, %v1519_v34  ;;  %v1997_v27 = vrot.slane %v1996_v53, 4 }
 0x3a3   :  { %v2028_v46 = vmax.f32 %v2026_v24, %v2027_v36  ;;  %v2003_v29 = vsel %vm1603_vm8, %v1520_v17, -inf  ;;  %v2010_v16 = vsel %vm1603_vm8, %v1519_v34, -inf  ;;  %v2115_v36 = vsel %vm2114_vm10, %v10143_v56, %v10156_v11 }
 0x3a4   :  { %v1672_v49 = vrot.slane %v1671_v61, 1  ;;  %v2004_v42 = vrot.slane %v2003_v29, 4  ;;  %v2011_v28 = vrot.slane %v2010_v16, 4  ;;  %v1998_v50 = vmax.f32 %v1996_v53, %v1997_v27 }
 0x3a5   :  { %v2029_v48 = vrot.slane %v2028_v46, 1  ;;  %v2017_v24 = vsel %vm1603_vm8, %v1521_v2, -inf  ;;  %v2117_v34 = vsel %vm2116_vm11, %v10147_v26, %v2115_v36  ;;  %v14509_v11 = vrot.slane %v10238_v0, 1 }
 0x3a6   :  { %v10429_v62 = vmax.f32 %v1671_v61, %v1672_v49  ;;  %v2005_v1 = vmax.f32 %v2003_v29, %v2004_v42  ;;  %v2012_v4 = vmax.f32 %v2010_v16, %v2011_v28  ;;  %v2018_v17 = vrot.slane %v2017_v24, 4 }
 0x3a7   :  { %v10435_v15 = vmax.f32 %v2028_v46, %v2029_v48  ;;  %v1999_v54 = vrot.slane %v1998_v50, 2  ;;  %v2119_v2 = vsel %vm2118_vm12, %v10126_v39, %v2117_v34  ;;  %v10446_v46 = vmax.f32 %v10238_v0, %v14509_v11 }
 0x3a8   :  { %v2006_v61 = vrot.slane %v2005_v1, 2  ;;  %v2013_v53 = vrot.slane %v2012_v4, 2  ;;  %v2019_v49 = vmax.f32 %v2017_v24, %v2018_v17  ;;  %v2121_v56 = vsel %vm2120_vm13, %v10131_v52, %v2119_v2 }
 0x3a9   :  { %v2000_v27 = vmax.f32 %v1998_v50, %v1999_v54  ;;  %v2130_v29 = vsel %vm2120_vm13, %v10236_v63, %v10244_v31  ;;  %v2123_v28 = vsel %vm2122_vm14, %v10192_v43, %v2121_v56  ;;  %v14510_v0 = vrot.slane %v10274_v38, 1 }
 0x3aa   :  { %v2007_v16 = vmax.f32 %v2005_v1, %v2006_v61  ;;  %v2014_v48 = vmax.f32 %v2012_v4, %v2013_v53  ;;  %v2020_v42 = vrot.slane %v2019_v49, 2  ;;  %v2125_v50 = vsel %vm2124_vm15, %v10429_v62, %v2123_v28  ;;  %v8154_v1 = vld [vmem:[%s14482_s25 + $0x30] sm:$0xff] }
 0x3ab   :  { %v2001_v54 = vrot.slane %v2000_v27, 1  ;;  %v2131_v24 = vsel %vm2122_vm14, %v10241_v21, %v2130_v29  ;;  %v10460_v36 = vmax.f32 %v10274_v38, %v14510_v0  ;;  %8600 = vmatprep.mubr.msk.f32.mxu1 %vm434_vm6, %v2125_v50  ;;  %v14511_v61 = vrot.slane %v10257_v13, 2  ;;  %v8152_v50 = vld [vmem:[%s14482_s25 + $0x20] sm:$0xff] }
 0x3ac   :  { %v2008_v17 = vrot.slane %v2007_v16, 1  ;;  %v2015_v31 = vrot.slane %v2014_v48, 1  ;;  %v2021_v4 = vmax.f32 %v2019_v49, %v2020_v42  ;;  %v2132_v43 = vsel %vm2124_vm15, %v10446_v46, %v2131_v24 }
 0x3ad   :  { %v2002_v34 = vmax.f32 %v2000_v27, %v2001_v54  ;;  %8601 = vmatmul.mubr.msk.f32.vlgmr.msra.gmra.mxu1 %vm434_vm6, %v2132_v43  ;;  %v1811_v53 = vmax.f32 %v10257_v13, %v14511_v61  ;;  %v2135_v38 = vsel %vm2116_vm11, %v10281_v18, %v10278_v58  ;;  %v14512_v2 = vrot.slane %v10353_v5, 2  ;;  %v8153_v13 = vld [vmem:[%s14482_s25 + $0x28] sm:$0xff] }
 0x3ae   :  { %v10476_v56 = vmax.f32 %v2007_v16, %v2008_v17  ;;  %v10478_v11 = vmax.f32 %v2014_v48, %v2015_v31  ;;  %v2022_v27 = vrot.slane %v2021_v4, 1  ;;  %v2136_v29 = vsel %vm2118_vm12, %v10283_v45, %v2135_v38  ;;  %8610 = vmatpush3.msra.mxu1 %v10153_v10 }
 0x3af   :  { %v1895_v49 = vmax.f32 %v10353_v5, %v14512_v2  ;;  %v2155_v42 = vsel %vm2114_vm10, %v2002_v34, %v10388_v60  ;;  %v1812_v58 = vrot.slane %v1811_v53, 1  ;;  %v2137_v28 = vsel %vm2120_vm13, %v10460_v36, %v2136_v29  ;;  %8611 = vmatprep.subr.mxu1 %v8154_v1 }
 0x3b0   :  { %v2138_v16 = vsel %vm2122_vm14, %v10268_v23, %v2137_v28  ;;  %v2141_v48 = vsel %vm2114_vm10, %v10316_v6, %v10323_v22  ;;  %8612 = vmatpush3.msra.mxu1 %v8154_v1  ;;  %v14513_v10 = vrot.slane %v10401_v8, 1  ;;  %v1964_v60 = vrot.slane %v10394_v47, 2  ;;  %v8165_v1 = vld [vmem:[%s14482_s25 + $0x58] sm:$0xff] }
 0x3b1   :  { %v1896_v5 = vrot.slane %v1895_v49, 1  ;;  %v10500_v24 = vmax.f32 %v1811_v53, %v1812_v58  ;;  %v2142_v17 = vsel %vm2116_vm11, %v10320_v57, %v2141_v48  ;;  %v2148_v6 = vsel %vm2114_vm10, %v10335_v9, %v10375_v40  ;;  %8613 = vmatprep.subr.mxu1 %v8153_v13 }
 0x3b2   :  { %v10496_v54 = vmax.f32 %v10401_v8, %v14513_v10  ;;  %v2143_v22 = vsel %vm2118_vm12, %v10298_v55, %v2142_v17  ;;  %v1965_v8 = vmax.f32 %v10394_v47, %v1964_v60  ;;  %v2149_v31 = vsel %vm2116_vm11, %v10341_v35, %v2148_v6  ;;  %8614 = vmatpush3.msra.mxu1 %v8153_v13  ;;  %v14516_v17 = vld [vmem:[#allocation49_spill] sm:$0xff] }
 0x3b3   :  { %v10502_v0 = vmax.f32 %v1895_v49, %v1896_v5  ;;  %v10514_v43 = vmax.f32 %v2021_v4, %v2022_v27  ;;  %v2139_v34 = vsel %vm2124_vm15, %v10500_v24, %v2138_v16  ;;  %v2144_v61 = vsel %vm2120_vm13, %v10303_v59, %v2143_v22  ;;  %8615 = vmatprep.subr.mxu1 %v8152_v50 }
 0x3b4   :  { %v2150_v40 = vsel %vm2118_vm12, %v10405_v37, %v2149_v31  ;;  %v14514_v53 = vrot.slane %v10417_v3, 2  ;;  %8603 = vmatprep.mubr.msk.f32.mxu1 %vm434_vm6, %v2139_v34  ;;  %v2145_v4 = vsel %vm2122_vm14, %v10363_v41, %v2144_v61  ;;  %v1966_v38 = vrot.slane %v1965_v8, 1  ;;  %8616 = vmatpush3.msra.mxu1 %v8152_v50  ;;  %v14517_v31 = vld [vmem:[#allocation45_spill] sm:$0xff]  ;;  %v14518_v61 = vld [vmem:[#allocation47_spill] sm:$0xff] }
 0x3b5   :  { %v2151_v2 = vsel %vm2120_vm13, %v10410_v30, %v2150_v40  ;;  %v2156_v49 = vsel %vm2116_vm11, %v10476_v56, %v2155_v42  ;;  %v2146_v37 = vsel %vm2124_vm15, %v10502_v0, %v2145_v4  ;;  %8626 = vmatprep.subr.mxu1 %v8165_v1  ;;  %v2534_v42 = vsel %vm2114_vm10, %v10147_v26, %v10160_v14 }
 0x3b6   :  { %v2035_v47 = vmax.f32 %v10417_v3, %v14514_v53  ;;  %v2152_v3 = vsel %vm2122_vm14, %v10496_v54, %v2151_v2  ;;  %v2157_v29 = vsel %vm2118_vm12, %v10478_v11, %v2156_v49  ;;  %8604 = vmatmul.mubr.msk.f32.gmra.mxu1 %vm434_vm6, %v2146_v37  ;;  %v10540_v41 = vmax.f32 %v1965_v8, %v1966_v38  ;;  %v14519_v53 = vld [vmem:[#allocation54_spill] sm:$0xff] }
 0x3b7   :  { %v2158_v13 = vsel %vm2120_vm13, %v10514_v43, %v2157_v29  ;;  %v2541_v58 = vsel %vm2114_vm10, %v10178_v32, %v10209_v44  ;;  %v2535_v16 = vsel %vm2116_vm11, %v10126_v39, %v2534_v42  ;;  %v14515_v32 = vrot.slane %v10259_v20, 2  ;;  %v8164_v37 = vld [vmem:[%s14482_s25 + $0x50] sm:$0xff] }
 0x3b8   :  { %v2036_v27 = vrot.slane %v2035_v47, 1  ;;  %v2159_v5 = vsel %vm2122_vm14, %v10435_v15, %v2158_v13  ;;  %v2542_v48 = vsel %vm2116_vm11, %v10175_v7, %v2541_v58  ;;  %v2153_v10 = vsel %vm2124_vm15, %v10540_v41, %v2152_v3  ;;  %v14522_v58 = vld [vmem:[#allocation56_spill] sm:$0xff] }
 0x3b9   :  { %v2536_v26 = vsel %vm2118_vm12, %v10131_v52, %v2535_v16  ;;  %v2543_v14 = vsel %vm2118_vm12, %v10236_v63, %v2542_v48  ;;  %v1818_v44 = vmax.f32 %v10259_v20, %v14515_v32  ;;  %8606 = vmatprep.mubr.msk.f32.mxu1 %vm434_vm6, %v2153_v10  ;;  %v2548_v6 = vsel %vm2114_vm10, %v10281_v18, %v14516_v17  ;;  %v8163_v48 = vld [vmem:[%s14482_s25 + $0x48] sm:$0xff]  ;;  %v14526_v17 = vld [vmem:[#allocation42_spill] sm:$0xff] }
 0x3ba   :  { %v10550_v28 = vmax.f32 %v2035_v47, %v2036_v27  ;;  %v2537_v7 = vsel %vm2120_vm13, %v10133_v33, %v2536_v26  ;;  %v2544_v50 = vsel %vm2120_vm13, %v10241_v21, %v2543_v14  ;;  %v2549_v8 = vsel %vm2116_vm11, %v10283_v45, %v2548_v6  ;;  %v14523_v14 = vld [vmem:[#allocation59_spill] sm:$0xff] }
 0x3bb   :  { %v2538_v63 = vsel %vm2122_vm14, %v10429_v62, %v2537_v7  ;;  %v2545_v20 = vsel %vm2122_vm14, %v10446_v46, %v2544_v50  ;;  %v1819_v22 = vrot.slane %v1818_v44, 1  ;;  %v2550_v18 = vsel %vm2118_vm12, %v10460_v36, %v2549_v8  ;;  %v8162_v50 = vld [vmem:[%s14482_s25 + $0x40] sm:$0xff] }
 0x3bc   :  { %v2160_v60 = vsel %vm2124_vm15, %v10550_v28, %v2159_v5  ;;  %v2539_v34 = vsel %vm2124_vm15, %v14517_v31, %v2538_v63  ;;  %v2546_v40 = vsel %vm2124_vm15, %v14518_v61, %v2545_v20  ;;  %v2555_v62 = vsel %vm2114_vm10, %v10320_v57, %v14519_v53  ;;  %v14527_v63 = vld [vmem:[#allocation60_spill] sm:$0xff] }
 0x3bd   :  { %8607 = vmatmul.mubr.msk.f32.gmra.mxu1 %vm434_vm6, %v2160_v60  ;;  %v10594_v47 = vmax.f32 %v1818_v44, %v1819_v22  ;;  %v2551_v4 = vsel %vm2120_vm13, %v10268_v23, %v2550_v18  ;;  %v2556_v38 = vsel %vm2116_vm11, %v10298_v55, %v2555_v62  ;;  %v2561_v2 = vsel %vm2112_vm9, %v10335_v9, %v10369_v12  ;;  %v14521_v9 = vld [vmem:[#allocation53_spill] sm:$0xff]  ;;  %v14529_v53 = vld [vmem:[#allocation44_spill] sm:$0xff]  ;;  %v14530_v62 = vld [vmem:[#allocation43_spill] sm:$0xff] }
 0x3be   :  { %8617 = vmatprep.mubr.msk.f32.mxu1 %vm434_vm6, %v2539_v34  ;;  %v2552_v49 = vsel %vm2122_vm14, %v10500_v24, %v2551_v4  ;;  %v2557_v57 = vsel %vm2118_vm12, %v10303_v59, %v2556_v38  ;;  %v2562_v3 = vsel %vm2114_vm10, %v10341_v35, %v2561_v2  ;;  %v14520_v27 = vrot.slane %v10419_v19, 2  ;;  %v14528_v34 = vld [vmem:[#allocation51_spill] sm:$0xff] }
 0x3bf   :  { %v2553_v13 = vsel %vm2124_vm15, %v10594_v47, %v2552_v49  ;;  %v2558_v42 = vsel %vm2120_vm13, %v14521_v9, %v2557_v57  ;;  %v2563_v5 = vsel %vm2116_vm11, %v14522_v58, %v2562_v3  ;;  %v2569_v16 = vsel %vm2114_vm10, %v10476_v56, %v10392_v51 }
 0x3c0   :  { %v2042_v29 = vmax.f32 %v10419_v19, %v14520_v27  ;;  %v2559_v35 = vsel %vm2122_vm14, %v10502_v0, %v2558_v42  ;;  %v2564_v19 = vsel %vm2118_vm12, %v10410_v30, %v2563_v5  ;;  %v2570_v26 = vsel %vm2116_vm11, %v10478_v11, %v2569_v16  ;;  %v14534_v42 = vld [vmem:[#allocation46_spill] sm:$0xff] }
 0x3c1   :  { %8618 = vmatmul.mubr.msk.f32.vlgmr.msra.gmra.mxu1 %vm434_vm6, %v2546_v40  ;;  %v2560_v32 = vsel %vm2124_vm15, %v14523_v14, %v2559_v35  ;;  %v2565_v51 = vsel %vm2120_vm13, %v10496_v54, %v2564_v19  ;;  %v2571_v56 = vsel %vm2118_vm12, %v10514_v43, %v2570_v26  ;;  %v2948_v6 = vsel %vm2114_vm10, %v10126_v39, %v14526_v17  ;;  %v14538_v26 = vld [vmem:[#allocation58_spill] sm:$0xff] }
 0x3c2   :  { %8627 = vmatpush3.msra.mxu1 %v8165_v1  ;;  %8620 = vmatprep.mubr.msk.f32.mxu1 %vm434_vm6, %v2553_v13  ;;  %v2043_v10 = vrot.slane %v2042_v29, 1  ;;  %v14524_v1 = vld [vmem:[#allocation41_spill] sm:$0xff]  ;;  %v2566_v30 = vsel %vm2122_vm14, %v10540_v41, %v2565_v51  ;;  %v2572_v7 = vsel %vm2120_vm13, %v10435_v15, %v2571_v56  ;;  %v2949_v8 = vsel %vm2116_vm11, %v10131_v52, %v2948_v6 }
 0x3c3   :  { %8628 = vmatprep.subr.mxu1 %v8164_v37  ;;  %v14525_v0 = vrot.slane %v14524_v1, 1  ;;  %v2567_v20 = vsel %vm2124_vm15, %v14527_v63, %v2566_v30  ;;  %v2573_v22 = vsel %vm2122_vm14, %v10550_v28, %v2572_v7  ;;  %v1824_v40 = vrot.slane %v14528_v34, 2  ;;  %v14539_v56 = vld [vmem:[#allocation57_spill] sm:$0xff] }
 0x3c4   :  { %8629 = vmatpush3.msra.mxu1 %v8164_v37  ;;  %v2044_v60 = vmax.f32 %v2042_v29, %v2043_v10  ;;  %v2950_v39 = vsel %vm2118_vm12, %v10133_v33, %v2949_v8  ;;  %v2956_v4 = vsel %vm2116_vm11, %v14530_v62, %v14529_v53  ;;  %v2048_v38 = vrot.slane %v10425_v25, 2  ;;  %v14531_v37 = vld [vmem:[#allocation50_spill] sm:$0xff]  ;;  %v14532_v29 = vld [vmem:[#allocation52_spill] sm:$0xff] }
 0x3c5   :  { %v1659_v44 = vmax.f32 %v14524_v1, %v14525_v0  ;;  %8621 = vmatmul.mubr.msk.f32.gmra.mxu1 %vm434_vm6, %v2560_v32  ;;  %8630 = vmatprep.subr.mxu1 %v8163_v48  ;;  %v2957_v52 = vsel %vm2118_vm12, %v10241_v21, %v2956_v4  ;;  %v1825_v49 = vmax.f32 %v14528_v34, %v1824_v40  ;;  %v14533_v13 = vrot.slane %v14532_v29, 1  ;;  %v3696_v8 = vld [vmem:[%s14541_s29 + $0x18] sm:$0xff]  ;;  %v8179_v34 = vld [vmem:[%s14541_s29 + $0x68] sm:$0xff]  ;;  %v8178_v40 = vld [vmem:[%s14541_s29 + $0x60] sm:$0xff] }
 0x3c6   :  { %8623 = vmatprep.mubr.msk.f32.mxu1 %vm434_vm6, %v2567_v20  ;;  %8631 = vmatpush3.msra.mxu1 %v8163_v48  ;;  %v2574_v18 = vsel %vm2124_vm15, %v2044_v60, %v2573_v22  ;;  %v2962_v57 = vsel %vm2114_vm10, %v10283_v45, %v14531_v37  ;;  %v2958_v3 = vsel %vm2120_vm13, %v10446_v46, %v2957_v52  ;;  %v14535_v46 = vmov 0.0   ;;  %v14537_v48 = vld [vmem:[#allocation55_spill] sm:$0xff]  ;;  %v8180_v20 = vld [vmem:[%s14541_s29 + $0x70] sm:$0xff]  ;;  %v3694_v53 = vld [vmem:[%s14541_s29 + $0x8] sm:$0xff] }
 0x3c7   :  { %8632 = vmatprep.subr.mxu1 %v8162_v50  ;;  %v2951_v2 = vsel %vm2120_vm13, %v1659_v44, %v2950_v39  ;;  %v2963_v27 = vsel %vm2116_vm11, %v10460_v36, %v2962_v57  ;;  %v1883_v21 = vmax.f32 %v14532_v29, %v14533_v13  ;;  %v2959_v45 = vsel %vm2122_vm14, %v14518_v61, %v2958_v3  ;;  %v14536_v36 = vld [vmem:[#allocation48_spill] sm:$0xff]  ;;  %v14540_v44 = vld [vmem:[#allocation62_spill] sm:$0xff] }
 0x3c8   :  { %8633 = vmatpush3.msra.mxu1 %v8162_v50  ;;  %v2952_v33 = vsel %vm2122_vm14, %v14517_v31, %v2951_v2  ;;  %v1826_v16 = vrot.slane %v1825_v49, 1  ;;  %v2964_v31 = vsel %vm2118_vm12, %v10268_v23, %v2963_v27  ;;  %v2960_v35 = vsel %vm2124_vm15, %v14536_v36, %v2959_v45  ;;  %v14542_v50 = vld [vmem:[#allocation61_spill] sm:$0xff]  ;;  %v3697_v22 = vld [vmem:[%s14541_s29 + $0x20] sm:$0xff]  ;;  %v8177_v39 = vld [vmem:[%s14541_s29 + $0x58] sm:$0xff] }
 0x3c9   :  { %8624 = vmatmul.mubr.msk.f32.gmra.mxu1 %vm434_vm6, %v2574_v18  ;;  %v2953_v5 = vsel %vm2124_vm15, %v14534_v42, %v2952_v33  ;;  %8662 = vmatprep.subr.mxu1 %v14535_v46  ;;  %v2965_v19 = vsel %vm2120_vm13, %v10500_v24, %v2964_v31  ;;  %v2969_v10 = vsel %vm2114_vm10, %v10298_v55, %v14537_v48  ;;  %v3695_v18 = vld [vmem:[%s14541_s29 + $0x10] sm:$0xff]  ;;  %v3693_v4 = vld [vmem:[%s14541_s29] sm:$0xff] }
 0x3ca   :  { %8634 = vmatprep.mubr.msk.f32.mxu1 %vm434_vm6, %v2953_v5  ;;  %v2976_v61 = vsel %vm2114_vm10, %v14522_v58, %v14538_v26  ;;  %v1827_v32 = vmax.f32 %v1825_v49, %v1826_v16  ;;  %v2966_v23 = vsel %vm2122_vm14, %v10594_v47, %v2965_v19  ;;  %v2970_v51 = vsel %vm2116_vm11, %v10303_v59, %v2969_v10  ;;  %v8176_v62 = vld [vmem:[%s14541_s29 + $0x50] sm:$0xff]  ;;  %v8174_v2 = vld [vmem:[%s14541_s29 + $0x40] sm:$0xff] }
 0x3cb   :  { %v2977_v1 = vsel %vm2116_vm11, %v14539_v56, %v2976_v61  ;;  %v2971_v24 = vsel %vm2118_vm12, %v14521_v9, %v2970_v51  ;;  %v2049_v0 = vmax.f32 %v10425_v25, %v2048_v38  ;;  %v2983_v58 = vsel %vm2114_vm10, %v10478_v11, %v14540_v44  ;;  %v8175_v38 = vld [vmem:[%s14541_s29 + $0x48] sm:$0xff] }
 0x3cc   :  { %v2978_v55 = vsel %vm2118_vm12, %v10496_v54, %v2977_v1  ;;  %v2967_v47 = vsel %vm2124_vm15, %v1827_v32, %v2966_v23  ;;  %v2972_v59 = vsel %vm2120_vm13, %v1883_v21, %v2971_v24  ;;  %v2984_v9 = vsel %vm2116_vm11, %v10514_v43, %v2983_v58  ;;  %v3994_v52 = vld [vmem:[#allocation8 + $0x8] sm:$0xff]  ;;  %v14543_v33 = vld [vmem:[#allocation40_spill] sm:$0xff] }
 0x3cd   :  { %8635 = vmatmul.mubr.msk.f32.vlgmr.msra.gmra.mxu1 %vm434_vm6, %v2960_v35  ;;  %v2979_v30 = vsel %vm2120_vm13, %v10540_v41, %v2978_v55  ;;  %v2973_v25 = vsel %vm2122_vm14, %v14523_v14, %v2972_v59  ;;  %v2050_v54 = vrot.slane %v2049_v0, 1  ;;  %v2985_v7 = vsel %vm2118_vm12, %v10435_v15, %v2984_v9 }
 0x3ce   :  { %8637 = vmatprep.mubr.msk.f32.mxu1 %vm434_vm6, %v2967_v47  ;;  %v2980_v11 = vsel %vm2122_vm14, %v14527_v63, %v2979_v30  ;;  %v2986_v41 = vsel %vm2120_vm13, %v10550_v28, %v2985_v7  ;;  %v2974_v43 = vsel %vm2124_vm15, %v10369_v12, %v2973_v25  ;;  %v3700_v12 = vld [vmem:[%s14541_s29 + $0x38] sm:$0xff]  ;;  %v3699_v28 = vld [vmem:[%s14541_s29 + $0x30] sm:$0xff]  ;;  %v3698_v63 = vld [vmem:[%s14541_s29 + $0x28] sm:$0xff] }
 0x3cf   :  { %v2981_v14 = vsel %vm2124_vm15, %v14542_v50, %v2980_v11  ;;  %v2987_v17 = vsel %vm2122_vm14, %v2044_v60, %v2986_v41  ;;  %v2051_v6 = vmax.f32 %v2049_v0, %v2050_v54  ;;  %8644 = vmatpush3.msra.mxu0 %v3700_v12  ;;  %v8181_v60 = vld [vmem:[%s14541_s29 + $0x78] sm:$0xff] }
 0x3d0   :  { %8645 = vmatprep.subr.mxu0 %v14535_v46  ;;  %8663 = vmatpush3.msra.mxu1 %v8181_v60 }
 0x3d1   :  { %8638 = vmatmul.mubr.msk.f32.gmra.mxu1 %vm434_vm6, %v2974_v43  ;;  %v2988_v15 = vsel %vm2124_vm15, %v2051_v6, %v2987_v17  ;;  %8646 = vmatpush3.msra.mxu0 %v3699_v28 }
 0x3d2   :  { %8640 = vmatprep.mubr.msk.f32.mxu1 %vm434_vm6, %v2981_v14  ;;  %8647 = vmatprep.subr.mxu0 %v14535_v46  ;;  %v10791_v14 = vld [vmem:[#allocation5] ss:$0 sm:$0xff] }
 0x3d3   :  { %8648 = vmatpush3.msra.mxu0 %v3698_v63  ;;  %8664 = vmatprep.subr.mxu1 %v14535_v46 }
 0x3d4   :  { %8649 = vmatprep.subr.mxu0 %v14535_v46  ;;  %8665 = vmatpush3.msra.mxu1 %v8180_v20 }
 0x3d5   :  { %8641 = vmatmul.mubr.msk.f32.gmra.mxu1 %vm434_vm6, %v2988_v15  ;;  %8650 = vmatpush3.msra.mxu0 %v3697_v22 }
 0x3d6   :  { %8678 = vmatprep.mubr.msk.f32.mxu1 %vm9637_vm0, %v14535_v46  ;;  %8666 = vmatprep.subr.mxu1 %v14535_v46 }
 0x3d7   :  { %8651 = vmatprep.subr.mxu0 %v14535_v46  ;;  %8667 = vmatpush3.msra.mxu1 %v8179_v34 }
 0x3d8   :  { %8652 = vmatpush3.msra.mxu0 %v3696_v8  ;;  %8668 = vmatprep.subr.mxu1 %v14535_v46 }
 0x3d9   :  { %8653 = vmatprep.subr.mxu0 %v14535_v46  ;;  %8669 = vmatpush3.msra.mxu1 %v8178_v40 }
 0x3da   :  { %8654 = vmatpush3.msra.mxu0 %v3695_v18  ;;  %8670 = vmatprep.subr.mxu1 %v14535_v46 }
 0x3db   :  { %8671 = vmatpush3.msra.mxu1 %v8177_v39  ;;  %8655 = vmatprep.subr.mxu0 %v14535_v46 }
 0x3dc   :  { %8672 = vmatprep.subr.mxu1 %v14535_v46  ;;  %8656 = vmatpush3.msra.mxu0 %v3694_v53 }
 0x3dd   :  { %8673 = vmatpush3.msra.mxu1 %v8176_v62  ;;  %8657 = vmatprep.subr.mxu0 %v14535_v46 }
 0x3de   :  { %8674 = vmatprep.subr.mxu1 %v14535_v46  ;;  %8658 = vmatpush3.msra.mxu0 %v3693_v4 }
 0x3df   :  { %8675 = vmatpush3.msra.mxu1 %v8175_v38  ;;  %8681 = vmatprep.subr.mxu0 %v14535_v46 }
 0x3e0   :  { %8676 = vmatprep.subr.mxu1 %v14535_v46 }
 0x3e1   :  { %8677 = vmatpush3.msra.mxu1 %v8174_v2 }
 0x3e2   :  { %4074 = vmatprep.subr.mxu1 %v3994_v52 }
 0x46d   :  { %v8602_v49 = vpop.f32.mrf.mxu1 }
 0x46e   :  { %v2291_v27 = vcombine.high %v8602_v49, %v8602_v49  ;;  %v2298_v5 = vrot.slane %v8602_v49, %v14543_v33 }
 0x46f   :  { %v2239_v37 = vpop.f32.mrf.mxu1 }
 0x470   :  { %v2274_v57 = vcombine.high %v2239_v37, %v2239_v37  ;;  %v2281_v3 = vrot.slane %v2239_v37, %v14543_v33  ;;  %v2305_v45 = vrot.slane %v2291_v27, %v14543_v33  ;;  %v2306_v32 = vcombine.high %v2298_v5, %v2298_v5 }
 0x472   :  { %v2288_v13 = vrot.slane %v2274_v57, %v14543_v33  ;;  %v2289_v21 = vcombine.high %v2281_v3, %v2281_v3  ;;  %v2307_v23 = vcombine.high %v2305_v45, %v2305_v45  ;;  %v2406_v25 = vrot.slane %v2306_v32, %v14543_v33 }
 0x474   :  { %v2290_v31 = vcombine.high %v2288_v13, %v2288_v13  ;;  %v2376_v36 = vcombine.low %v2281_v3, %v2289_v21  ;;  %v2390_v47 = vrot.slane %v2288_v13, %v14543_v33  ;;  %v2408_v11 = vcombine.low %v2305_v45, %v2307_v23 }
 0x476   :  { %v8605_v29 = vpop.f32.mrf.mxu1  ;;  %v2383_v56 = vrot.slane %v2376_v36, %v14543_v33  ;;  %v2392_v1 = vcombine.low %v2290_v31, %v2298_v5  ;;  %v2415_v8 = vrot.slane %v2408_v11, %v14543_v33 }
 0x477   :  { %v2332_v35 = vrot.slane %v8605_v29, %v14543_v33  ;;  %v2325_v24 = vcombine.high %v8605_v29, %v8605_v29 }
 0x478   :  { %v2249_v42 = vpop.f32.mrf.mxu1  ;;  %v2391_v7 = vcombine.low %v2383_v56, %v2390_v47  ;;  %v2399_v41 = vrot.slane %v2392_v1, %v14543_v33 }
 0x479   :  { %v2308_v19 = vcombine.high %v2249_v42, %v2249_v42  ;;  %v2315_v10 = vrot.slane %v2249_v42, %v14543_v33  ;;  %v2340_v55 = vcombine.high %v2332_v35, %v2332_v35  ;;  %v2339_v43 = vrot.slane %v2325_v24, %v14543_v33 }
 0x47a   :  { %v2407_v39 = vcombine.low %v2399_v41, %v2406_v25  ;;  %v10801_v53 = vadd.f32 %v10791_v14, %v2391_v7 }
 0x47b   :  { %v2322_v0 = vrot.slane %v2308_v19, %v14543_v33  ;;  %v2323_v59 = vcombine.high %v2315_v10, %v2315_v10  ;;  %v2440_v17 = vcombine.low %v2332_v35, %v2340_v55  ;;  %v2422_v62 = vrot.slane %v2315_v10, %v14543_v33 }
 0x47c   :  { %v2341_v2 = vcombine.high %v2339_v43, %v2339_v43  ;;  %v10815_v45 = vadd.f32 %v10791_v14, %v2407_v39 }
 0x47d   :  { %v8608_v16 = vpop.f32.mrf.mxu1  ;;  %v2324_v6 = vcombine.high %v2322_v0, %v2322_v0  ;;  %v2424_v60 = vcombine.low %v2323_v59, %v2322_v0  ;;  %v2447_v38 = vrot.slane %v2440_v17, %v14543_v33  ;;  %v2423_v31 = vcombine.low %v2415_v8, %v2422_v62 }
 0x47e   :  { %v2359_v26 = vcombine.high %v8608_v16, %v8608_v16  ;;  %v10778_v61 = vrot.slane %v8608_v16, %v14543_v33  ;;  %v2454_v16 = vrot.slane %v2339_v43, %v14543_v33 }
 0x47f   :  { %v2259_v48 = vpop.f32.mrf.mxu1  ;;  %v2431_v37 = vrot.slane %v2424_v60, %v14543_v33  ;;  %v2438_v57 = vrot.slane %v2324_v6, %v14543_v33 }
 0x480   :  { %v2342_v44 = vcombine.high %v2259_v48, %v2259_v48  ;;  %v2373_v30 = vrot.slane %v2359_v26, %v14543_v33  ;;  %v2374_v9 = vcombine.high %v10778_v61, %v10778_v61  ;;  %v2349_v34 = vrot.slane %v2259_v48, %v14543_v33 }
 0x481   :  { %v8619_v51 = vpop.f32.mrf.mxu1  ;;  %v2455_v26 = vcombine.low %v2447_v38, %v2454_v16  ;;  %v2439_v32 = vcombine.low %v2431_v37, %v2438_v57 }
 0x482   :  { %v2705_v50 = vcombine.high %v8619_v51, %v8619_v51  ;;  %v2356_v15 = vrot.slane %v2342_v44, %v14543_v33  ;;  %v2375_v63 = vcombine.high %v2373_v30, %v2373_v30  ;;  %v2488_v20 = vcombine.low %v2374_v9, %v2373_v30 }
 0x483   :  { %v2653_v58 = vpop.f32.mrf.mxu1  ;;  %v2357_v13 = vcombine.high %v2349_v34, %v2349_v34  ;;  %v2456_v21 = vcombine.low %v2341_v2, %v2349_v34  ;;  %v2712_v19 = vrot.slane %v8619_v51, %v14543_v33  ;;  %v2486_v51 = vrot.slane %v10778_v61, %v14543_v33 }
 0x484   :  { %v2688_v12 = vcombine.high %v2653_v58, %v2653_v58  ;;  %v2695_v22 = vrot.slane %v2653_v58, %v14543_v33  ;;  %v2719_v4 = vrot.slane %v2705_v50, %v14543_v33  ;;  %v2358_v52 = vcombine.high %v2356_v15, %v2356_v15 }
 0x485   :  { %v10787_v54 = vpop.f32.mrf.mxu1  ;;  %v2495_v3 = vrot.slane %v2488_v20, %v14543_v33  ;;  %v2502_v27 = vrot.slane %v2375_v63, %v14543_v33  ;;  %v2463_v24 = vrot.slane %v2456_v21, %v14543_v33  ;;  %v2470_v55 = vrot.slane %v2357_v13, %v14543_v33 }
 0x486   :  { %v2702_v40 = vrot.slane %v2688_v12, %v14543_v33  ;;  %v2703_v49 = vcombine.high %v2695_v22, %v2695_v22  ;;  %v2746_v5 = vrot.slane %v10787_v54, %v14543_v33  ;;  %v2721_v36 = vcombine.high %v2719_v4, %v2719_v4 }
 0x487   :  { %v2663_v28 = vpop.f32.mrf.mxu1  ;;  %v2472_v35 = vcombine.low %v2356_v15, %v2358_v52  ;;  %v2503_v23 = vcombine.low %v2495_v3, %v2502_v27  ;;  %v2739_v56 = vcombine.high %v10787_v54, %v10787_v54  ;;  %v10824_v58 = vadd.f32 %v10791_v14, %v2423_v31 }
 0x488   :  { %v2704_v42 = vcombine.high %v2702_v40, %v2702_v40  ;;  %v2790_v48 = vcombine.low %v2695_v22, %v2703_v49  ;;  %v2722_v10 = vcombine.high %v2663_v28, %v2663_v28  ;;  %v2754_v44 = vcombine.high %v2746_v5, %v2746_v5 }
 0x489   :  { %v10798_v18 = vpop.f32.mrf.mxu1  ;;  %v2822_v47 = vcombine.low %v2719_v4, %v2721_v36  ;;  %v2729_v59 = vrot.slane %v2663_v28, %v14543_v33  ;;  %v2479_v30 = vrot.slane %v2472_v35, %v14543_v33  ;;  %v2720_v9 = vcombine.high %v2712_v19, %v2712_v19 }
 0x48a   :  { %v2806_v0 = vcombine.low %v2704_v42, %v2712_v19  ;;  %v2797_v25 = vrot.slane %v2790_v48, %v14543_v33  ;;  %v2736_v11 = vrot.slane %v2722_v10, %v14543_v33  ;;  %v10833_v54 = vadd.f32 %v10791_v14, %v2455_v26 }
 0x48b   :  { %v10810_v29 = vpop.f32.mrf.mxu1  ;;  %v10836_v7 = vadd.f32 %v10791_v14, %v2439_v32  ;;  %v10839_v41 = vadd.f32 %v10791_v14, %v2503_v23  ;;  %v10842_v61 = vrot.slane %v2739_v56, %v14543_v33  ;;  %v10844_v50 = vcombine.low %v2463_v24, %v2470_v55 }
 0x48c   :  { %v2804_v17 = vrot.slane %v2702_v40, %v14543_v33  ;;  %v2813_v6 = vrot.slane %v2806_v0, %v14543_v33  ;;  %v2854_v15 = vcombine.low %v2746_v5, %v2754_v44  ;;  %v2737_v12 = vcombine.high %v2729_v59, %v2729_v59 }
 0x48d   :  { %v8636_v1 = vpop.f32.mrf.mxu1  ;;  %v2829_v28 = vrot.slane %v2822_v47, %v14543_v33  ;;  %v2836_v60 = vrot.slane %v2729_v59, %v14543_v33  ;;  %v10850_v20 = vcombine.low %v2479_v30, %v2486_v51  ;;  %v2820_v22 = vrot.slane %v2720_v9, %v14543_v33 }
 0x48e   :  { %v3119_v63 = vcombine.high %v8636_v1, %v8636_v1  ;;  %v2805_v8 = vcombine.low %v2797_v25, %v2804_v17  ;;  %v2738_v34 = vcombine.high %v2736_v11, %v2736_v11  ;;  %v2868_v39 = vrot.slane %v10842_v61, %v14543_v33 }
 0x48f   :  { %v3067_v43 = vpop.f32.mrf.mxu1  ;;  %v2773_v40 = vcombine.high %v10798_v18, %v10798_v18  ;;  %v3126_v62 = vrot.slane %v8636_v1, %v14543_v33  ;;  %v2821_v2 = vcombine.low %v2813_v6, %v2820_v22  ;;  %v2861_v52 = vrot.slane %v2854_v15, %v14543_v33 }
 0x490   :  { %v3102_v4 = vcombine.high %v3067_v43, %v3067_v43  ;;  %v10861_v49 = vrot.slane %v10798_v18, %v14543_v33  ;;  %v3109_v37 = vrot.slane %v3067_v43, %v14543_v33  ;;  %v2837_v57 = vcombine.low %v2829_v28, %v2836_v60 }
 0x491   :  { %v8639_v38 = vpop.f32.mrf.mxu1  ;;  %v2838_v3 = vcombine.low %v2737_v12, %v2736_v11  ;;  %v3133_v27 = vrot.slane %v3119_v63, %v14543_v33  ;;  %v2926_v21 = vadd.f32 %v2805_v8, %v10801_v53  ;;  %v2852_v42 = vrot.slane %v2738_v34, %v14543_v33 }
 0x492   :  { %v3116_v13 = vrot.slane %v3102_v4, %v14543_v33  ;;  %v3117_v5 = vcombine.high %v3109_v37, %v3109_v37  ;;  %v3153_v16 = vcombine.high %v8639_v38, %v8639_v38  ;;  %v10869_v31 = vrot.slane %v2773_v40, %v14543_v33 }
 0x493   :  { %v3134_v36 = vcombine.high %v3126_v62, %v3126_v62  ;;  %v3160_v35 = vrot.slane %v8639_v38, %v14543_v33  ;;  %v3077_v19 = vpop.f32.mrf.mxu1  ;;  %v2927_v48 = vadd.f32 %v2821_v2, %v10815_v45  ;;  %v2788_v10 = vcombine.high %v10861_v49, %v10861_v49 }
 0x494   :  { %v3118_v18 = vcombine.high %v3116_v13, %v3116_v13  ;;  %v2756_v53 = vcombine.high %v10810_v29, %v10810_v29  ;;  %v3204_v26 = vcombine.low %v3109_v37, %v3117_v5  ;;  %v3135_v32 = vcombine.high %v3133_v27, %v3133_v27 }
 0x495   :  { %v10878_v56 = vrot.slane %v3153_v16, %v14543_v33  ;;  %v3168_v1 = vcombine.high %v3160_v35, %v3160_v35  ;;  %v3218_v55 = vrot.slane %v3116_v13, %v14543_v33  ;;  %v3136_v0 = vcombine.high %v3077_v19, %v3077_v19 }
 0x496   :  { %v3220_v23 = vcombine.low %v3118_v18, %v3126_v62  ;;  %v3211_v24 = vrot.slane %v3204_v26, %v14543_v33  ;;  %v3143_v45 = vrot.slane %v3077_v19, %v14543_v33  ;;  %v2869_v44 = vcombine.low %v2861_v52, %v2868_v39 }
 0x497   :  { %v3234_v51 = vrot.slane %v3134_v36, %v14543_v33  ;;  %v3268_v59 = vcombine.low %v3160_v35, %v3168_v1  ;;  %v2845_v30 = vrot.slane %v2838_v3, %v14543_v33  ;;  %v2928_v9 = vadd.f32 %v2837_v57, %v10824_v58 }
 0x498   :  { %v3227_v47 = vrot.slane %v3220_v23, %v14543_v33  ;;  %v2770_v25 = vrot.slane %v2756_v53, %v14543_v33  ;;  %v3219_v11 = vcombine.low %v3211_v24, %v3218_v55  ;;  %v3236_v43 = vcombine.low %v3133_v27, %v3135_v32 }
 0x499   :  { %v3275_v6 = vrot.slane %v3268_v59, %v14543_v33  ;;  %v3282_v15 = vrot.slane %v10878_v56, %v14543_v33  ;;  %v2763_v12 = vrot.slane %v10810_v29, %v14543_v33  ;;  %v3150_v60 = vrot.slane %v3136_v0, %v14543_v33 }
 0x49a   :  { %v3235_v17 = vcombine.low %v3227_v47, %v3234_v51  ;;  %v3340_v28 = vadd.f32 %v3219_v11, %v2926_v21  ;;  %v3151_v63 = vcombine.high %v3143_v45, %v3143_v45  ;;  %v2789_v58 = vcombine.high %v10869_v31, %v10869_v31 }
 0x49b   :  { %v2902_v22 = vcombine.low %v2788_v10, %v10869_v31  ;;  %v3283_v34 = vcombine.low %v3275_v6, %v3282_v15  ;;  %v2930_v39 = vadd.f32 %v2869_v44, %v10833_v54  ;;  %v2755_v40 = vcombine.high %v10842_v61, %v10842_v61 }
 0x49c   :  { %v3341_v8 = vadd.f32 %v3235_v17, %v2927_v48  ;;  %v2772_v62 = vcombine.high %v2770_v25, %v2770_v25  ;;  %v3348_v4 = vmax.f32 %v3340_v28, 0.0  ;;  %v2853_v38 = vcombine.low %v2845_v30, %v2852_v42  ;;  %v8642_v48 = vpop.f32.mrf.mxu1 }
 0x49d   :  { %v3243_v2 = vrot.slane %v3236_v43, %v14543_v33  ;;  %v3250_v52 = vrot.slane %v3143_v45, %v14543_v33  ;;  %v2870_v37 = vcombine.low %v2755_v40, %v2763_v12  ;;  %v3252_v27 = vcombine.low %v3151_v63, %v3150_v60 }
 0x49e   :  { %v3349_v29 = vmax.f32 %v3341_v8, 0.0  ;;  %v3364_v57 = vcombine.high %v3348_v4, %v3348_v4  ;;  %v3371_v3 = vrot.slane %v3348_v4, %v14543_v33  ;;  %v2909_v13 = vrot.slane %v2902_v22, %v14543_v33 }
 0x49f   :  { %v3344_v21 = vadd.f32 %v3283_v34, %v2930_v39  ;;  %v3152_v5 = vcombine.high %v3150_v60, %v3150_v60  ;;  %v2771_v61 = vcombine.high %v2763_v12, %v2763_v12  ;;  %v2886_v16 = vcombine.low %v2770_v25, %v2772_v62 }
 0x4a0   :  { %v3387_v54 = vrot.slane %v3349_v29, %v14543_v33  ;;  %v3379_v31 = vcombine.high %v3371_v3, %v3371_v3  ;;  %v3517_v42 = vsel %vm3516_vm1, %v3371_v3, -inf  ;;  %v3378_v36 = vrot.slane %v3364_v57, %v14543_v33 }
 0x4a1   :  { %v3380_v18 = vcombine.high %v3349_v29, %v3349_v29  ;;  %v3251_v19 = vcombine.low %v3243_v2, %v3250_v52  ;;  %v2916_v10 = vrot.slane %v2789_v58, %v14543_v33  ;;  %v2877_v53 = vrot.slane %v2870_v37, %v14543_v33 }
 0x4a2   :  { %v3538_v35 = vsel %vm3516_vm1, %v3387_v54, -inf  ;;  %v3518_v26 = vrot.slane %v3517_v42, 4  ;;  %v3259_v32 = vrot.slane %v3252_v27, %v14543_v33  ;;  %v3395_v23 = vcombine.high %v3387_v54, %v3387_v54 }
 0x4a3   :  { %v3524_v1 = vsel %vm3516_vm1, %v3379_v31, -inf  ;;  %v10912_v24 = vmax.f32 %v3344_v21, 0.0  ;;  %v3266_v55 = vrot.slane %v3152_v5, %v14543_v33  ;;  %v2884_v0 = vrot.slane %v2771_v61, %v14543_v33 }
 0x4a4   :  { %v3539_v45 = vrot.slane %v3538_v35, 4  ;;  %v3187_v44 = vcombine.high %v8642_v48, %v8642_v48  ;;  %v10917_v51 = vrot.slane %v8642_v48, %v14543_v33  ;;  %v2893_v47 = vrot.slane %v2886_v16, %v14543_v33 }
 0x4a5   :  { %v3394_v59 = vrot.slane %v3380_v18, %v14543_v33  ;;  %v3531_v30 = vsel %vm3516_vm1, %v3378_v36, -inf  ;;  %v3342_v25 = vadd.f32 %v3251_v19, %v2928_v9  ;;  %v2929_v11 = vadd.f32 %v2853_v38, %v10836_v7 }
 0x4a6   :  { %v2900_v43 = vrot.slane %v10861_v49, %v14543_v33  ;;  %v3519_v17 = vmax.f32 %v3517_v42, %v3518_v26  ;;  %v3525_v6 = vrot.slane %v3524_v1, 4  ;;  %v2917_v15 = vcombine.low %v2909_v13, %v2916_v10 }
 0x4a7   :  { %v3545_v12 = vsel %vm3516_vm1, %v3395_v23, -inf  ;;  %v3435_v28 = vrot.slane %v10912_v24, %v14543_v33  ;;  %v3267_v60 = vcombine.low %v3259_v32, %v3266_v55  ;;  %v3532_v63 = vrot.slane %v3531_v30, 4 }
 0x4a8   :  { %v3540_v58 = vmax.f32 %v3538_v35, %v3539_v45  ;;  %v3201_v22 = vrot.slane %v3187_v44, %v14543_v33  ;;  %v3202_v9 = vcombine.high %v10917_v51, %v10917_v51  ;;  %v2885_v7 = vcombine.low %v2877_v53, %v2884_v0 }
 0x4a9   :  { %v2901_v8 = vcombine.low %v2893_v47, %v2900_v43  ;;  %v3552_v49 = vsel %vm3516_vm1, %v3394_v59, -inf  ;;  %v3350_v34 = vmax.f32 %v3342_v25, 0.0  ;;  %v2517_v39 = vadd.f32 %v10791_v14, %v10844_v50 }
 0x4aa   :  { %v3520_v40 = vrot.slane %v3519_v17, 2  ;;  %v3526_v62 = vmax.f32 %v3524_v1, %v3525_v6  ;;  %v3546_v4 = vrot.slane %v3545_v12, 4  ;;  %v2518_v38 = vadd.f32 %v10791_v14, %v10850_v20 }
 0x4ab   :  { %v2933_v29 = vadd.f32 %v2917_v15, %v10839_v41  ;;  %v3443_v2 = vcombine.high %v3435_v28, %v3435_v28  ;;  %v3343_v52 = vadd.f32 %v3267_v60, %v2929_v11  ;;  %v3533_v37 = vmax.f32 %v3531_v30, %v3532_v63 }
 0x4ac   :  { %v3541_v57 = vrot.slane %v3540_v58, 2  ;;  %v3553_v3 = vrot.slane %v3552_v49, 4  ;;  %v3316_v27 = vcombine.low %v3202_v9, %v3201_v22  ;;  %v10937_v13 = vadd.f32 %v2885_v7, %v2517_v39  ;;  %v3087_v39 = vpop.f32.mrf.mxu1 }
 0x4ad   :  { %v10939_v54 = vadd.f32 %v2901_v8, %v2518_v38  ;;  %v3396_v21 = vcombine.high %v3350_v34, %v3350_v34  ;;  %v3203_v50 = vcombine.high %v3201_v22, %v3201_v22  ;;  %v3521_v5 = vmax.f32 %v3519_v17, %v3520_v40 }
 0x4ae   :  { %v3527_v61 = vrot.slane %v3526_v62, 2  ;;  %v3547_v16 = vmax.f32 %v3545_v12, %v3546_v4  ;;  %v3428_v14 = vcombine.high %v10912_v24, %v10912_v24  ;;  %v3601_v41 = vsel %vm3516_vm1, %v3435_v28, -inf }
 0x4af   :  { %v3608_v20 = vsel %vm3516_vm1, %v3443_v2, -inf  ;;  %v3351_v31 = vmax.f32 %v3343_v52, 0.0  ;;  %v3403_v42 = vrot.slane %v3350_v34, %v14543_v33  ;;  %v3534_v36 = vrot.slane %v3533_v37, 2 }
 0x4b0   :  { %v3542_v18 = vmax.f32 %v3540_v58, %v3541_v57  ;;  %v3554_v35 = vmax.f32 %v3552_v49, %v3553_v3  ;;  %v3323_v19 = vrot.slane %v3316_v27, %v14543_v33  ;;  %v3330_v26 = vrot.slane %v3203_v50, %v14543_v33 }
 0x4b1   :  { %v3411_v48 = vcombine.high %v3403_v42, %v3403_v42  ;;  %v3419_v10 = vrot.slane %v3351_v31, %v14543_v33  ;;  %v3559_v53 = vsel %vm3516_vm1, %v3403_v42, -inf  ;;  %v3548_v32 = vrot.slane %v3547_v16, 2 }
 0x4b2   :  { %v3602_v23 = vrot.slane %v3601_v41, 4  ;;  %v3609_v1 = vrot.slane %v3608_v20, 4  ;;  %v3314_v24 = vrot.slane %v10917_v51, %v14543_v33  ;;  %v3522_v55 = vrot.slane %v3521_v5, 1 }
 0x4b3   :  { %v3528_v0 = vmax.f32 %v3526_v62, %v3527_v61  ;;  %v3442_v45 = vrot.slane %v3428_v14, %v14543_v33  ;;  %v3427_v44 = vcombine.high %v3419_v10, %v3419_v10  ;;  %v3535_v47 = vmax.f32 %v3533_v37, %v3534_v36 }
 0x4b4   :  { %v3543_v59 = vrot.slane %v3542_v18, 1  ;;  %v3555_v30 = vrot.slane %v3554_v35, 2  ;;  %v3560_v25 = vrot.slane %v3559_v53, 4  ;;  %v3410_v11 = vrot.slane %v3396_v21, %v14543_v33 }
 0x4b5   :  { %v3566_v43 = vsel %vm3516_vm1, %v3411_v48, -inf  ;;  %v3580_v17 = vsel %vm3516_vm1, %v3419_v10, -inf  ;;  %v3331_v6 = vcombine.low %v3323_v19, %v3330_v26  ;;  %v3549_v15 = vmax.f32 %v3547_v16, %v3548_v32 }
 0x4b6   :  { %v3603_v12 = vmax.f32 %v3601_v41, %v3602_v23  ;;  %v3610_v28 = vmax.f32 %v3608_v20, %v3609_v1  ;;  %v3581_v60 = vrot.slane %v3580_v17, 4  ;;  %v10956_v63 = vmax.f32 %v3521_v5, %v3522_v55 }
 0x4b7   :  { %v3412_v58 = vcombine.high %v3351_v31, %v3351_v31  ;;  %v3587_v22 = vsel %vm3516_vm1, %v3427_v44, -inf  ;;  %v3347_v9 = vadd.f32 %v3331_v6, %v2933_v29  ;;  %v3529_v7 = vrot.slane %v3528_v0, 1 }
 0x4b8   :  { %v3536_v8 = vrot.slane %v3535_v47, 1  ;;  %v3561_v49 = vmax.f32 %v3559_v53, %v3560_v25  ;;  %v3567_v34 = vrot.slane %v3566_v43, 4  ;;  %v10959_v40 = vmax.f32 %v3554_v35, %v3555_v30 }
 0x4b9   :  { %v3615_v62 = vsel %vm3516_vm1, %v3442_v45, -inf  ;;  %v3573_v4 = vsel %vm3516_vm1, %v3410_v11, -inf  ;;  %v10963_v38 = vmax.f32 %v3347_v9, 0.0  ;;  %v3604_v2 = vrot.slane %v3603_v12, 2 }
 0x4ba   :  { %v3611_v52 = vrot.slane %v3610_v28, 2  ;;  %v3582_v37 = vmax.f32 %v3580_v17, %v3581_v60  ;;  %v3588_v57 = vrot.slane %v3587_v22, 4  ;;  %v3544_v3 = vmax.f32 %v3542_v18, %v3543_v59 }
 0x4bb   :  { %v3550_v27 = vrot.slane %v3549_v15, 1  ;;  %v3426_v29 = vrot.slane %v3412_v58, %v14543_v33  ;;  %v3170_v21 = vcombine.high %v3087_v39, %v3087_v39  ;;  %v3616_v50 = vrot.slane %v3615_v62, 4 }
 0x4bc   :  { %v3562_v5 = vrot.slane %v3561_v49, 2  ;;  %v3568_v61 = vmax.f32 %v3566_v43, %v3567_v34  ;;  %v3574_v16 = vrot.slane %v3573_v4, 4  ;;  %v10966_v14 = vmax.f32 %v3528_v0, %v3529_v7 }
 0x4bd   :  { %v10968_v41 = vmax.f32 %v3535_v47, %v3536_v8  ;;  %v3557_v20 = vrot.slane %v10959_v40, 1  ;;  %v3483_v31 = vrot.slane %v10963_v38, %v14543_v33  ;;  %v3605_v42 = vmax.f32 %v3603_v12, %v3604_v2 }
 0x4be   :  { %v3612_v36 = vmax.f32 %v3610_v28, %v3611_v52  ;;  %v3583_v18 = vrot.slane %v3582_v37, 2  ;;  %v3589_v35 = vmax.f32 %v3587_v22, %v3588_v57  ;;  %v3594_v19 = vsel %vm3516_vm1, %v3426_v29, -inf }
 0x4bf   :  { %v3169_v48 = vcombine.high %v10878_v56, %v10878_v56  ;;  %v3177_v10 = vrot.slane %v3087_v39, %v14543_v33  ;;  %v3184_v53 = vrot.slane %v3170_v21, %v14543_v33  ;;  %v10978_v26 = vmax.f32 %v3615_v62, %v3616_v50 }
 0x4c0   :  { %v3563_v32 = vmax.f32 %v3561_v49, %v3562_v5  ;;  %v3569_v23 = vrot.slane %v3568_v61, 2  ;;  %v3575_v1 = vmax.f32 %v3573_v4, %v3574_v16  ;;  %v3491_v55 = vcombine.high %v3483_v31, %v3483_v31 }
 0x4c1   :  { %v3185_v0 = vcombine.high %v3177_v10, %v3177_v10  ;;  %v3186_v45 = vcombine.high %v3184_v53, %v3184_v53  ;;  %v3284_v44 = vcombine.low %v3169_v48, %v3177_v10  ;;  %v3606_v47 = vrot.slane %v3605_v42, 1 }
 0x4c2   :  { %v3584_v59 = vmax.f32 %v3582_v37, %v3583_v18  ;;  %v3590_v30 = vrot.slane %v3589_v35, 2  ;;  %v3595_v25 = vrot.slane %v3594_v19, 4  ;;  %v3664_v11 = vsel %vm3516_vm1, %v3483_v31, -inf }
 0x4c3   :  { %v3291_v56 = vrot.slane %v3284_v44, %v14543_v33  ;;  %v3298_v43 = vrot.slane %v3185_v0, %v14543_v33  ;;  %v3300_v17 = vcombine.low %v3184_v53, %v3186_v45  ;;  %v3551_v6 = vmax.f32 %v3549_v15, %v3550_v27 }
 0x4c4   :  { %v3613_v12 = vrot.slane %v3612_v36, 1  ;;  %v3570_v28 = vmax.f32 %v3568_v61, %v3569_v23  ;;  %v3576_v60 = vrot.slane %v3575_v1, 2  ;;  %v3564_v58 = vrot.slane %v3563_v32, 1 }
 0x4c5   :  { %v3299_v22 = vcombine.low %v3291_v56, %v3298_v43  ;;  %v3307_v9 = vrot.slane %v3300_v17, %v14543_v33  ;;  %v3671_v7 = vsel %vm3516_vm1, %v3491_v55, -inf  ;;  %v3585_v8 = vrot.slane %v3584_v59, 1 }
 0x4c6   :  { %v3591_v49 = vmax.f32 %v3589_v35, %v3590_v30  ;;  %v10985_v34 = vmax.f32 %v3594_v19, %v3595_v25  ;;  %v3665_v39 = vrot.slane %v3664_v11, 4  ;;  %v3607_v62 = vmax.f32 %v3605_v42, %v3606_v47 }
 0x4c7   :  { %v3618_v4 = vrot.slane %v10978_v26, 2  ;;  %v3315_v15 = vcombine.low %v3307_v9, %v3314_v24  ;;  %v3345_v2 = vadd.f32 %v3299_v22, %v10937_v13  ;;  %v3571_v52 = vrot.slane %v3570_v28, 1 }
 0x4c8   :  { %v3476_v37 = vcombine.high %v10963_v38, %v10963_v38  ;;  %v3709_v57 = vsel %vm2112_vm9, %v3544_v3, %v10956_v63  ;;  %v3672_v27 = vrot.slane %v3671_v7, 4  ;;  %v3565_v29 = vmax.f32 %v3563_v32, %v3564_v58 }
 0x4c9   :  { %v10996_v21 = vmax.f32 %v3575_v1, %v3576_v60  ;;  %v3346_v50 = vadd.f32 %v3315_v15, %v10939_v54  ;;  %v3353_v5 = vmax.f32 %v3345_v2, 0.0  ;;  %v3586_v61 = vmax.f32 %v3584_v59, %v3585_v8 }
 0x4ca   :  { %v3592_v16 = vrot.slane %v3591_v49, 1  ;;  %v3597_v51 = vrot.slane %v10985_v34, 2  ;;  %v3666_v24 = vmax.f32 %v3664_v11, %v3665_v39  ;;  %v3710_v38 = vsel %vm2114_vm10, %v3565_v29, %v3709_v57 }
 0x4cb   :  { %v3354_v13 = vmax.f32 %v3346_v50, 0.0  ;;  %v3444_v31 = vcombine.high %v3353_v5, %v3353_v5  ;;  %v3451_v42 = vrot.slane %v3353_v5, %v14543_v33  ;;  %v3572_v18 = vmax.f32 %v3570_v28, %v3571_v52 }
 0x4cc   :  { %v3490_v63 = vrot.slane %v3476_v37, %v14543_v33  ;;  %v3614_v3 = vmax.f32 %v3612_v36, %v3613_v12  ;;  %v3673_v35 = vmax.f32 %v3671_v7, %v3672_v27  ;;  %v3667_v32 = vrot.slane %v3666_v24, 2 }
 0x4cd   :  { %v3458_v19 = vrot.slane %v3444_v31, %v14543_v33  ;;  %v3459_v54 = vcombine.high %v3451_v42, %v3451_v42  ;;  %v3460_v48 = vcombine.high %v3354_v13, %v3354_v13  ;;  %v3467_v10 = vrot.slane %v3354_v13, %v14543_v33 }
 0x4ce   :  { %v3622_v53 = vsel %vm3516_vm1, %v3451_v42, -inf  ;;  %v3711_v23 = vsel %vm2116_vm11, %v3586_v61, %v3710_v38  ;;  %v3593_v1 = vmax.f32 %v3591_v49, %v3592_v16  ;;  %v3806_v30 = vsel %vm2112_vm9, %v3551_v6, %v10966_v14 }
 0x4cf   :  { %v3474_v55 = vrot.slane %v3460_v48, %v14543_v33  ;;  %v3475_v0 = vcombine.high %v3467_v10, %v3467_v10  ;;  %v3623_v45 = vrot.slane %v3622_v53, 4  ;;  %v3629_v44 = vsel %vm3516_vm1, %v3459_v54, -inf }
 0x4d0   :  { %v3630_v36 = vrot.slane %v3629_v44, 4  ;;  %v3636_v47 = vsel %vm3516_vm1, %v3458_v19, -inf  ;;  %v3643_v59 = vsel %vm3516_vm1, %v3467_v10, -inf  ;;  %v3674_v43 = vrot.slane %v3673_v35, 2 }
 0x4d1   :  { %v3624_v25 = vmax.f32 %v3622_v53, %v3623_v45  ;;  %v3644_v11 = vrot.slane %v3643_v59, 4  ;;  %v3650_v56 = vsel %vm3516_vm1, %v3475_v0, -inf  ;;  %v3637_v12 = vrot.slane %v3636_v47, 4  ;;  %v8190_v0 = vld [vmem:[%s14541_s29 + $0xb8] sm:$0xff] }
 0x4d2   :  { %v3631_v17 = vmax.f32 %v3629_v44, %v3630_v36  ;;  %v3651_v33 = vrot.slane %v3650_v56, 4  ;;  %v3657_v28 = vsel %vm3516_vm1, %v3474_v55, -inf  ;;  %v3807_v22 = vsel %vm2114_vm10, %v3572_v18, %v3806_v30  ;;  %v3993_v36 = vld [vmem:[#allocation8] sm:$0xff] }
 0x4d3   :  { %v3625_v60 = vrot.slane %v3624_v25, 2  ;;  %v3645_v58 = vmax.f32 %v3643_v59, %v3644_v11  ;;  %v3658_v9 = vrot.slane %v3657_v28, 4  ;;  %v3668_v8 = vmax.f32 %v3666_v24, %v3667_v32  ;;  %v8189_v11 = vld [vmem:[%s14541_s29 + $0xb0] sm:$0xff] }
 0x4d4   :  { %v3632_v7 = vrot.slane %v3631_v17, 2  ;;  %v3712_v49 = vsel %vm2118_vm12, %v3607_v62, %v3711_v23  ;;  %v3652_v14 = vmax.f32 %v3650_v56, %v3651_v33  ;;  %v3675_v15 = vmax.f32 %v3673_v35, %v3674_v43  ;;  %v4270_v33 = vld [vmem:[#allocation11] sm:$0xff] }
 0x4d5   :  { %v3626_v6 = vmax.f32 %v3624_v25, %v3625_v60  ;;  %v3646_v39 = vrot.slane %v3645_v58, 2  ;;  %v3678_v2 = vsel %vm3516_vm1, %v3490_v63, -inf  ;;  %v3638_v37 = vmax.f32 %v3636_v47, %v3637_v12  ;;  %v8187_v60 = vld [vmem:[%s14541_s29 + $0xa0] sm:$0xff] }
 0x4d6   :  { %v3633_v52 = vmax.f32 %v3631_v17, %v3632_v7  ;;  %v3653_v57 = vrot.slane %v3652_v14, 2  ;;  %v3808_v27 = vsel %vm2116_vm11, %v3593_v1, %v3807_v22  ;;  %v3598_v5 = vmax.f32 %v10985_v34, %v3597_v51  ;;  %v8188_v17 = vld [vmem:[%s14541_s29 + $0xa8] sm:$0xff]  ;;  %v8186_v7 = vld [vmem:[%s14541_s29 + $0x98] sm:$0xff] }
 0x4d7   :  { %v3627_v29 = vrot.slane %v3626_v6, 1  ;;  %v3647_v50 = vmax.f32 %v3645_v58, %v3646_v39  ;;  %v3659_v61 = vmax.f32 %v3657_v28, %v3658_v9  ;;  %v3669_v16 = vrot.slane %v3668_v8, 1  ;;  %v8185_v39 = vld [vmem:[%s14541_s29 + $0x90] sm:$0xff] }
 0x4d8   :  { %v3634_v24 = vrot.slane %v3633_v52, 1  ;;  %v3654_v13 = vmax.f32 %v3652_v14, %v3653_v57  ;;  %v3679_v62 = vrot.slane %v3678_v2, 4  ;;  %v3676_v38 = vrot.slane %v3675_v15, 1  ;;  %v11059_v14 = vld [vmem:[%s14545_s8] sm:$0xff]  ;;  %v8184_v57 = vld [vmem:[%s14541_s29 + $0x88] sm:$0xff] }
 0x4d9   :  { %v3628_v31 = vmax.f32 %v3626_v6, %v3627_v29  ;;  %v3648_v42 = vrot.slane %v3647_v50, 1  ;;  %v3558_v18 = vmax.f32 %v10959_v40, %v3557_v20  ;;  %v3809_v19 = vsel %vm2118_vm12, %v3614_v3, %v3808_v27  ;;  %v11077_v27 = vld [vmem:[%s14544_s3 + $0x10] sm:$0xff] }
 0x4da   :  { %v3635_v63 = vmax.f32 %v3633_v52, %v3634_v24  ;;  %v3655_v35 = vrot.slane %v3654_v13, 1  ;;  %v3639_v54 = vrot.slane %v3638_v37, 2  ;;  %v3578_v34 = vrot.slane %v10996_v21, 1  ;;  %v11068_v52 = vld [vmem:[%s14546_s4 + $0x1e8] sm:$0xff] }
 0x4db   :  { %v3649_v51 = vmax.f32 %v3647_v50, %v3648_v42  ;;  %v3599_v48 = vrot.slane %v3598_v5, 1  ;;  %v3660_v10 = vrot.slane %v3659_v61, 2  ;;  %v3670_v53 = vmax.f32 %v3668_v8, %v3669_v16  ;;  %v11056_v8 = vld [vmem:[%s14544_s3 + $0x8] sm:$0xff]  ;;  %v8183_v50 = vld [vmem:[%s14541_s29 + $0x80] sm:$0xff] }
 0x4dc   :  { %v3713_v32 = vsel %vm2120_vm13, %v3628_v31, %v3712_v49  ;;  %v3656_v23 = vmax.f32 %v3654_v13, %v3655_v35  ;;  %v3680_v1 = vmax.f32 %v3678_v2, %v3679_v62  ;;  %v3677_v40 = vmax.f32 %v3675_v15, %v3676_v38  ;;  %v3996_v13 = vld [vmem:[#allocation8 + $0x18] sm:$0xff]  ;;  %v3995_v31 = vld [vmem:[#allocation8 + $0x10] sm:$0xff] }
 0x4dd   :  { %v3714_v55 = vsel %vm2122_vm14, %v3649_v51, %v3713_v32  ;;  %v3810_v20 = vsel %vm2120_vm13, %v3635_v63, %v3809_v19  ;;  %v3619_v3 = vmax.f32 %v10978_v26, %v3618_v4  ;;  %v3640_v47 = vmax.f32 %v3638_v37, %v3639_v54  ;;  %v4271_v26 = vld [vmem:[#allocation11 + $0x8] sm:$0xff]  ;;  %v4273_v38 = vld [vmem:[#allocation11 + $0x18] sm:$0xff]  ;;  %v4272_v35 = vld [vmem:[#allocation11 + $0x10] sm:$0xff] }
 0x4de   :  { %v3715_v45 = vsel %vm2124_vm15, %v3670_v53, %v3714_v55  ;;  %v3811_v44 = vsel %vm2122_vm14, %v3656_v23, %v3810_v20  ;;  %v3903_v59 = vsel %vm2112_vm9, %v3558_v18, %v10968_v41  ;;  %v3579_v30 = vmax.f32 %v10996_v21, %v3578_v34  ;;  %v11044_v41 = vld [vmem:[%s14544_s3] sm:$0xff]  ;;  %v11092_v62 = vld [vmem:[%s14544_s3 + $0x18] sm:$0xff]  ;;  %v11117_v34 = vld [vmem:[%s14544_s3 + $0x28] sm:$0xff] }
 0x4df   :  { %8660 = vmatmul.mubr.msk.f32.vlgmr.msra.gmra.mxu0 %vm348_vm3, %v3715_v45  ;;  %v3812_v25 = vsel %vm2124_vm15, %v3677_v40, %v3811_v44  ;;  %v3661_v56 = vmax.f32 %v3659_v61, %v3660_v10  ;;  %v3600_v4 = vmax.f32 %v3598_v5, %v3599_v48  ;;  %v3681_v43 = vrot.slane %v3680_v1, 2  ;;  %v11103_v63 = vld [vmem:[%s14544_s3 + $0x20] sm:$0xff]  ;;  %v11108_v19 = vld [vmem:[%s14546_s4 + $0x1f8] sm:$0xff]  ;;  %v11127_v51 = vld [vmem:[%s14544_s3 + $0x30] sm:$0xff] }
 0x4e0   :  { %8682 = vmatpush3.msra.mxu0 %v8190_v0  ;;  %8679 = vmatmul.mubr.msk.f32.vlgmr.msra.gmra.mxu1 %vm348_vm3, %v3812_v25  ;;  %v3620_v21 = vrot.slane %v3619_v3, 1  ;;  %v3904_v12 = vsel %vm2114_vm10, %v3579_v30, %v3903_v59  ;;  %v3641_v28 = vrot.slane %v3640_v47, 1  ;;  %vm4990_vm4 = vcmp.gt.s32.totalorder %v11059_v14, 0  ;;  %v11136_v48 = vld [vmem:[%s14544_s3 + $0x38] sm:$0xff]  ;;  %v11145_v10 = vld [vmem:[%s14546_s4 + $0x1e0] sm:$0xff]  ;;  %v11150_v53 = vld [vmem:[%s14546_s4 + $0x1c8] sm:$0xff] }
 0x4e1   :  { %8683 = vmatprep.subr.mxu0 %v14535_v46  ;;  %4075 = vmatpush1.msra.mxu1 %v3993_v36  ;;  %v3662_v58 = vrot.slane %v3661_v56, 1  ;;  %v3682_v22 = vmax.f32 %v3680_v1, %v3681_v43  ;;  %v3905_v9 = vsel %vm2116_vm11, %v3600_v4, %v3904_v12  ;;  %v14062_v61 = vmov 0   ;;  %v11156_v32 = vld [vmem:[%s14546_s4 + $0x1c0] sm:$0xff]  ;;  %v11161_v23 = vld [vmem:[%s14546_s4 + $0x1a8] sm:$0xff]  ;;  %v11222_v59 = vld [vmem:[%s14546_s4 + $0x1f0] sm:$0xff] }
 0x4e2   :  { %8684 = vmatpush3.msra.mxu0 %v8189_v11  ;;  %4108 = vmatprep.mubr.f32.mxu1 %v14535_v46  ;;  %v3621_v49 = vmax.f32 %v3619_v3, %v3620_v21  ;;  %v3642_v6 = vmax.f32 %v3640_v47, %v3641_v28  ;;  %v4992_v16 = vsel %vm4990_vm4, 1, %v14062_v61  ;;  %vm4991_vm7 = vcmp.gt.s32.totalorder %v11059_v14, 7  ;;  %v11168_v1 = vld [vmem:[%s14546_s4 + $0x1a0] sm:$0xff]  ;;  %v11173_v55 = vld [vmem:[%s14546_s4 + $0x188] sm:$0xff]  ;;  %v11229_v25 = vld [vmem:[%s14546_s4 + $0x1d8] sm:$0xff] }
 0x4e3   :  { %8685 = vmatprep.subr.mxu0 %v14535_v46  ;;  %4326 = vmatprep.subr.mxu1 %v4271_v26  ;;  %v3663_v15 = vmax.f32 %v3661_v56, %v3662_v58  ;;  %v3683_v37 = vrot.slane %v3682_v22, 1  ;;  %v4999_v18 = vsel %vm4991_vm7, 1, %v14062_v61  ;;  %vm5702_vm8 = vcmp.gt.s32.totalorder %v11059_v14, 2  ;;  %v11178_v0 = vld [vmem:[%s14546_s4 + $0x180] sm:$0xff]  ;;  %v11183_v40 = vld [vmem:[%s14546_s4 + $0x168] sm:$0xff]  ;;  %v11239_v56 = vld [vmem:[%s14546_s4 + $0x1d0] sm:$0xff] }
 0x4e4   :  { %8686 = vmatpush3.msra.mxu0 %v8188_v17  ;;  %8192 = vmatmul.mubr.msk.f32.vlgmr.msra.gmra.mxu1 %vm4019_vm2, %v11044_v41  ;;  %v3906_v2 = vsel %vm2118_vm12, %v3621_v49, %v3905_v9  ;;  %v5704_v54 = vsel %vm5702_vm8, 1, %v14062_v61  ;;  %v11189_v20 = vld [vmem:[%s14546_s4 + $0x160] sm:$0xff]  ;;  %v11194_v3 = vld [vmem:[%s14546_s4 + $0x148] sm:$0xff]  ;;  %v11249_v4 = vld [vmem:[%s14546_s4 + $0x1b8] sm:$0xff]  ;;  %vm6058_vm9 = vcmp.gt.s32.totalorder %v11059_v14, 3 }
 0x4e5   :  { %8687 = vmatprep.subr.mxu0 %v14535_v46  ;;  %4327 = vmatpush1.msra.mxu1 %v4270_v33  ;;  %v3907_v29 = vsel %vm2120_vm13, %v3642_v6, %v3906_v2  ;;  %v3684_v24 = vmax.f32 %v3682_v22, %v3683_v37  ;;  %v11200_v45 = vld [vmem:[%s14546_s4 + $0x140] sm:$0xff]  ;;  %v11205_v44 = vld [vmem:[%s14546_s4 + $0x128] sm:$0xff]  ;;  %v11258_v17 = vld [vmem:[%s14546_s4 + $0x1b0] sm:$0xff] }
 0x4e6   :  { %8688 = vmatpush3.msra.mxu0 %v8187_v60  ;;  %4114 = vmatprep.mubr.f32.mxu1 %v14535_v46  ;;  %v3908_v5 = vsel %vm2122_vm14, %v3663_v15, %v3907_v29  ;;  %v11211_v36 = vld [vmem:[%s14546_s4 + $0x120] sm:$0xff]  ;;  %v11216_v47 = vld [vmem:[%s14546_s4 + $0x108] sm:$0xff]  ;;  %v11266_v21 = vld [vmem:[%s14546_s4 + $0x198] sm:$0xff] }
 0x4e7   :  { %8689 = vmatprep.subr.mxu0 %v14535_v46  ;;  %8697 = vmatprep.mubr.msk.f32.mxu0 %vm9637_vm0, %v14535_v46  ;;  %v3909_v42 = vsel %vm2124_vm15, %v3684_v24, %v3908_v5  ;;  %v11225_v30 = vld [vmem:[%s14546_s4 + $0x100] sm:$0xff]  ;;  %v11233_v11 = vld [vmem:[%s14546_s4 + $0xe8] sm:$0xff]  ;;  %v11277_v33 = vld [vmem:[%s14546_s4 + $0x190] sm:$0xff] }
 0x4e8   :  { %8690 = vmatpush3.msra.mxu0 %v8186_v7  ;;  %8193 = vmatmul.mubr.msk.f32.gmra.mxu1 %vm4019_vm2, %v11056_v8  ;;  %v11244_v26 = vld [vmem:[%s14546_s4 + $0xe0] sm:$0xff]  ;;  %v11255_v43 = vld [vmem:[%s14546_s4 + $0xc8] sm:$0xff]  ;;  %v11287_v60 = vld [vmem:[%s14546_s4 + $0x178] sm:$0xff] }
 0x4e9   :  { %8691 = vmatprep.subr.mxu0 %v14535_v46  ;;  %4120 = vmatprep.mubr.f32.mxu1 %v14535_v46  ;;  %v11272_v12 = vld [vmem:[%s14546_s4 + $0xa8] sm:$0xff]  ;;  %v11282_v28 = vld [vmem:[%s14546_s4 + $0xa0] sm:$0xff]  ;;  %v11296_v22 = vld [vmem:[%s14546_s4 + $0x170] sm:$0xff] }
 0x4ea   :  { %8692 = vmatpush3.msra.mxu0 %v8185_v39  ;;  %4650 = vmatprep.subr.mxu1 %v11068_v52  ;;  %v11293_v58 = vld [vmem:[%s14546_s4 + $0x88] sm:$0xff]  ;;  %v11301_v9 = vld [vmem:[%s14546_s4 + $0x80] sm:$0xff]  ;;  %v11304_v7 = vld [vmem:[%s14546_s4 + $0x158] sm:$0xff] }
 0x4eb   :  { %8693 = vmatprep.subr.mxu0 %v14535_v46  ;;  %8865 = vset.pattern.permute.xlu0 %v14062_v61  ;;  %v11315_v49 = vld [vmem:[%s14546_s4 + $0x150] sm:$0xff]  ;;  %v11320_v6 = vld [vmem:[%s14546_s4 + $0x60] sm:$0xff]  ;;  %v11325_v39 = vld [vmem:[%s14546_s4 + $0x138] sm:$0xff] }
 0x4ec   :  { %8694 = vmatpush3.msra.mxu0 %v8184_v57  ;;  %8194 = vmatmul.mubr.msk.f32.gmra.mxu1 %vm4019_vm2, %v11077_v27  ;;  %v11331_v15 = vld [vmem:[%s14546_s4 + $0x48] sm:$0xff]  ;;  %v11334_v2 = vld [vmem:[%s14546_s4 + $0x130] sm:$0xff]  ;;  %v11339_v37 = vld [vmem:[%s14546_s4 + $0x40] sm:$0xff] }
 0x4ed   :  { %8695 = vmatprep.subr.mxu0 %v14535_v46  ;;  %4126 = vmatprep.mubr.f32.mxu1 %v14535_v46  ;;  %v11342_v57 = vld [vmem:[%s14546_s4 + $0x118] sm:$0xff]  ;;  %v11353_v29 = vld [vmem:[%s14546_s4 + $0x110] sm:$0xff] }
 0x4ee   :  { %8696 = vmatpush3.msra.mxu0 %v8183_v50  ;;  %4994 = vperm.xlu0 %8865, %v4992_v16   ;;  %v11358_v50 = vld [vmem:[%s14546_s4 + $0x20] sm:$0xff]  ;;  %v11363_v5 = vld [vmem:[%s14546_s4 + $0xf8] sm:$0xff]  ;;  %v11369_v16 = vld [vmem:[%s14546_s4 + $0x8] sm:$0xff] }
 0x4ef   :  { %8698 = vmatmul.mubr.msk.f32.vlgmr.msra.gmra.mxu0 %vm348_vm3, %v3909_v42  ;;  %4187 = vmatprep.subr.mxu0 %v3996_v13  ;;  %14548 = vst [vmem:[#allocation49_spill] sm:$0xff] %v11369_v16  ;;  %v11372_v24 = vld [vmem:[%s14546_s4 + $0xf0] sm:$0xff]  ;;  %v11377_v13 = vld [vmem:[%s14546_s4] sm:$0xff]  ;;  %v11391_v42 = vld [vmem:[%s14547_s11 + $0x1e8] sm:$0xff] }
 0x4f0   :  { %8195 = vmatmul.mubr.msk.f32.gmra.mxu1 %vm4019_vm2, %v11092_v62  ;;  %4188 = vmatpush1.msra.mxu0 %v3995_v31  ;;  %14549 = vst [vmem:[#allocation45_spill] sm:$0xff] %v11377_v13  ;;  %v11386_v31 = vld [vmem:[%s14546_s4 + $0xd0] sm:$0xff]  ;;  %14550 = vst [vmem:[#allocation47_spill] sm:$0xff] %v11391_v42  ;;  %v11663_v14 = vld [vmem:[%s14547_s11 + $0xb8] sm:$0xff] }
 0x4f1   :  { %4221 = vmatprep.mubr.f32.mxu0 %v14535_v46  ;;  %4132 = vmatprep.mubr.f32.mxu1 %v14535_v46  ;;  %14609 = vst [vmem:[#allocation101_spill] sm:$0xff] %v11663_v14 }
 0x4f2   :  { %4439 = vmatprep.subr.mxu0 %v4273_v38  ;;  %5001 = vperm.xlu0 %8865, %v4999_v18   ;;  %v11396_v38 = vld [vmem:[%s14546_s4 + $0xb8] sm:$0xff]  ;;  %v11401_v18 = vld [vmem:[%s14547_s11 + $0x1e0] sm:$0xff] }
 0x4f3   :  { %8200 = vmatmul.mubr.msk.f32.vlgmr.msra.gmra.mxu0 %vm4019_vm2, %v11044_v41  ;;  %8866 = vset.pattern.permute.xlu1 %v14062_v61  ;;  %14551 = vst [vmem:[#allocation54_spill] sm:$0xff] %v11401_v18  ;;  %v11417_v61 = vld [vmem:[%s14547_s11 + $0x1c0] sm:$0xff] }
 0x4f4   :  { %8196 = vmatmul.mubr.msk.f32.gmra.mxu1 %vm4019_vm2, %v11103_v63  ;;  %4227 = vmatprep.mubr.f32.mxu0 %v14535_v46  ;;  %14554 = vst [vmem:[#allocation59_spill] sm:$0xff] %v11417_v61 }
 0x4f5   :  { %4440 = vmatpush1.msra.mxu0 %v4272_v35  ;;  %4138 = vmatprep.mubr.f32.mxu1 %v14535_v46  ;;  %v11409_v35 = vld [vmem:[%s14547_s11 + $0x1c8] sm:$0xff] }
 0x4f6   :  { %4721 = vmatprep.subr.mxu0 %v11108_v19  ;;  %5706 = vperm.xlu0 %8865, %v5704_v54   ;;  %14553 = vst [vmem:[#allocation56_spill] sm:$0xff] %v11409_v35  ;;  %v11414_v54 = vld [vmem:[%s14546_s4 + $0x98] sm:$0xff] }
 0x4f7   :  { %8201 = vmatmul.mubr.msk.f32.gmra.mxu0 %vm4019_vm2, %v11056_v8 }
 0x4f8   :  { %8197 = vmatmul.mubr.msk.f32.gmra.mxu1 %vm4019_vm2, %v11117_v34  ;;  %4233 = vmatprep.mubr.f32.mxu0 %v14535_v46 }
 0x4f9   :  { %4144 = vmatprep.mubr.f32.mxu1 %v14535_v46 }
 0x4fb   :  { %8202 = vmatmul.mubr.msk.f32.gmra.mxu0 %vm4019_vm2, %v11077_v27 }
 0x4fc   :  { %8198 = vmatmul.mubr.msk.f32.gmra.mxu1 %vm4019_vm2, %v11127_v51  ;;  %4239 = vmatprep.mubr.f32.mxu0 %v14535_v46 }
 0x4fd   :  { %4150 = vmatprep.mubr.f32.mxu1 %v14535_v46 }
 0x4ff   :  { %8203 = vmatmul.mubr.msk.f32.gmra.mxu0 %vm4019_vm2, %v11092_v62 }
 0x500   :  { %8199 = vmatmul.mubr.msk.f32.gmra.mxu1 %vm4019_vm2, %v11136_v48  ;;  %4245 = vmatprep.mubr.f32.mxu0 %v14535_v46 }
 0x501   :  { %4360 = vmatprep.mubr.f32.mxu1 %v14535_v46 }
 0x503   :  { %8204 = vmatmul.mubr.msk.f32.gmra.mxu0 %vm4019_vm2, %v11103_v63 }
 0x504   :  { %4251 = vmatprep.mubr.f32.mxu0 %v14535_v46  ;;  %8208 = vmatmul.mubr.msk.f32.vlgmr.msra.gmra.mxu1 %vm4019_vm2, %v11044_v41 }
 0x505   :  { %4651 = vmatpush1.msra.mxu1 %v11145_v10  ;;  %4366 = vmatprep.mubr.f32.mxu1 %v14535_v46 }
 0x506   :  { %4652 = vmatprep.subr.mxu1 %v11150_v53 }
 0x507   :  { %8205 = vmatmul.mubr.msk.f32.gmra.mxu0 %vm4019_vm2, %v11117_v34  ;;  %4653 = vmatpush1.msra.mxu1 %v11156_v32 }
 0x508   :  { %4654 = vmatprep.subr.mxu1 %v11161_v23  ;;  %4257 = vmatprep.mubr.f32.mxu0 %v14535_v46 }
 0x509   :  { %8209 = vmatmul.mubr.msk.f32.gmra.mxu1 %vm4019_vm2, %v11056_v8 }
 0x50a   :  { %4655 = vmatpush1.msra.mxu1 %v11168_v1  ;;  %4372 = vmatprep.mubr.f32.mxu1 %v14535_v46 }
 0x50b   :  { %8206 = vmatmul.mubr.msk.f32.gmra.mxu0 %vm4019_vm2, %v11127_v51  ;;  %4656 = vmatprep.subr.mxu1 %v11173_v55 }
 0x50c   :  { %4657 = vmatpush1.msra.mxu1 %v11178_v0  ;;  %4263 = vmatprep.mubr.f32.mxu0 %v14535_v46 }
 0x50d   :  { %4658 = vmatprep.subr.mxu1 %v11183_v40  ;;  %8210 = vmatmul.mubr.msk.f32.gmra.mxu1 %vm4019_vm2, %v11077_v27 }
 0x50e   :  { %4659 = vmatpush1.msra.mxu1 %v11189_v20  ;;  %4378 = vmatprep.mubr.f32.mxu1 %v14535_v46 }
 0x50f   :  { %8207 = vmatmul.mubr.msk.f32.gmra.mxu0 %vm4019_vm2, %v11136_v48  ;;  %4660 = vmatprep.subr.mxu1 %v11194_v3 }
 0x510   :  { %4661 = vmatpush1.msra.mxu1 %v11200_v45  ;;  %4473 = vmatprep.mubr.f32.mxu0 %v14535_v46 }
 0x511   :  { %4662 = vmatprep.subr.mxu1 %v11205_v44  ;;  %8211 = vmatmul.mubr.msk.f32.gmra.mxu1 %vm4019_vm2, %v11092_v62 }
 0x512   :  { %4663 = vmatpush1.msra.mxu1 %v11211_v36  ;;  %4384 = vmatprep.mubr.f32.mxu1 %v14535_v46 }
 0x513   :  { %8216 = vmatmul.mubr.msk.f32.vlgmr.msra.gmra.mxu0 %vm4019_vm2, %v11044_v41  ;;  %4664 = vmatprep.subr.mxu1 %v11216_v47  ;;  %v11263_v41 = vld [vmem:[%s14546_s4 + $0xc0] sm:$0xff] }
 0x514   :  { %4722 = vmatpush1.msra.mxu0 %v11222_v59  ;;  %4665 = vmatpush1.msra.mxu1 %v11225_v30 }
 0x515   :  { %4723 = vmatprep.subr.mxu0 %v11229_v25  ;;  %4666 = vmatprep.subr.mxu1 %v11233_v11 }
 0x516   :  { %4724 = vmatpush1.msra.mxu0 %v11239_v56  ;;  %8212 = vmatmul.mubr.msk.f32.gmra.mxu1 %vm4019_vm2, %v11103_v63 }
 0x517   :  { %4479 = vmatprep.mubr.f32.mxu0 %v14535_v46  ;;  %4667 = vmatpush1.msra.mxu1 %v11244_v26 }
 0x518   :  { %4725 = vmatprep.subr.mxu0 %v11249_v4  ;;  %8217 = vmatmul.mubr.msk.f32.gmra.mxu0 %vm4019_vm2, %v11056_v8  ;;  %v11310_v8 = vld [vmem:[%s14546_s4 + $0x68] sm:$0xff] }
 0x519   :  { %4668 = vmatprep.subr.mxu1 %v11255_v43  ;;  %4726 = vmatpush1.msra.mxu0 %v11258_v17 }
 0x51a   :  { %4669 = vmatpush1.msra.mxu1 %v11263_v41  ;;  %4727 = vmatprep.subr.mxu0 %v11266_v21 }
 0x51b   :  { %4390 = vmatprep.mubr.f32.mxu1 %v14535_v46  ;;  %4670 = vmatprep.subr.mxu1 %v11272_v12 }
 0x51c   :  { %4728 = vmatpush1.msra.mxu0 %v11277_v33  ;;  %8213 = vmatmul.mubr.msk.f32.gmra.mxu1 %vm4019_vm2, %v11117_v34 }
 0x51d   :  { %4485 = vmatprep.mubr.f32.mxu0 %v14535_v46  ;;  %4671 = vmatpush1.msra.mxu1 %v11282_v28 }
 0x51e   :  { %4729 = vmatprep.subr.mxu0 %v11287_v60  ;;  %8218 = vmatmul.mubr.msk.f32.gmra.mxu0 %vm4019_vm2, %v11077_v27  ;;  %v11348_v27 = vld [vmem:[%s14546_s4 + $0x28] sm:$0xff] }
 0x51f   :  { %4672 = vmatprep.subr.mxu1 %v11293_v58  ;;  %4730 = vmatpush1.msra.mxu0 %v11296_v22 }
 0x520   :  { %4673 = vmatpush1.msra.mxu1 %v11301_v9  ;;  %4731 = vmatprep.subr.mxu0 %v11304_v7 }
 0x521   :  { %4396 = vmatprep.mubr.f32.mxu1 %v14535_v46  ;;  %4674 = vmatprep.subr.mxu1 %v11310_v8 }
 0x522   :  { %4732 = vmatpush1.msra.mxu0 %v11315_v49  ;;  %8214 = vmatmul.mubr.msk.f32.gmra.mxu1 %vm4019_vm2, %v11127_v51 }
 0x523   :  { %4491 = vmatprep.mubr.f32.mxu0 %v14535_v46  ;;  %4675 = vmatpush1.msra.mxu1 %v11320_v6 }
 0x524   :  { %4733 = vmatprep.subr.mxu0 %v11325_v39  ;;  %8219 = vmatmul.mubr.msk.f32.gmra.mxu0 %vm4019_vm2, %v11092_v62  ;;  %v11380_v62 = vld [vmem:[%s14546_s4 + $0xd8] sm:$0xff] }
 0x525   :  { %4676 = vmatprep.subr.mxu1 %v11331_v15  ;;  %4734 = vmatpush1.msra.mxu0 %v11334_v2 }
 0x526   :  { %4677 = vmatpush1.msra.mxu1 %v11339_v37  ;;  %4735 = vmatprep.subr.mxu0 %v11342_v57 }
 0x527   :  { %4402 = vmatprep.mubr.f32.mxu1 %v14535_v46  ;;  %4678 = vmatprep.subr.mxu1 %v11348_v27 }
 0x528   :  { %4736 = vmatpush1.msra.mxu0 %v11353_v29  ;;  %8215 = vmatmul.mubr.msk.f32.gmra.mxu1 %vm4019_vm2, %v11136_v48 }
 0x529   :  { %4497 = vmatprep.mubr.f32.mxu0 %v14535_v46  ;;  %4679 = vmatpush1.msra.mxu1 %v11358_v50 }
 0x52a   :  { %4737 = vmatprep.subr.mxu0 %v11363_v5  ;;  %8220 = vmatmul.mubr.msk.f32.gmra.mxu0 %vm4019_vm2, %v11103_v63  ;;  %v11406_v63 = vld [vmem:[%s14546_s4 + $0xb0] sm:$0xff] }
 0x52b   :  { %4680 = vmatprep.subr.mxu1 %v11369_v16  ;;  %4738 = vmatpush1.msra.mxu0 %v11372_v24  ;;  %14552 = vst [vmem:[#allocation53_spill] sm:$0xff] %v11406_v63  ;;  %v11431_v16 = vld [vmem:[%s14546_s4 + $0x78] sm:$0xff] }
 0x52c   :  { %4681 = vmatpush1.msra.mxu1 %v11377_v13  ;;  %4739 = vmatprep.subr.mxu0 %v11380_v62  ;;  %v11426_v13 = vld [vmem:[%s14547_s11 + $0x1a8] sm:$0xff]  ;;  %14557 = vst [vmem:[#allocation60_spill] sm:$0xff] %v11431_v16 }
 0x52d   :  { %4714 = vmatprep.mubr.f32.mxu1 %v14535_v46  ;;  %4740 = vmatpush1.msra.mxu0 %v11386_v31  ;;  %14556 = vst [vmem:[#allocation42_spill] sm:$0xff] %v11426_v13 }
 0x52e   :  { %4796 = vmatprep.subr.mxu1 %v11391_v42  ;;  %4503 = vmatprep.mubr.f32.mxu0 %v14535_v46  ;;  %v11423_v42 = vld [vmem:[%s14546_s4 + $0x90] sm:$0xff] }
 0x52f   :  { %4715 = vmatmul.mubr.f32.vlgmr.msra.gmra.mxu1 %v14535_v46  ;;  %4741 = vmatprep.subr.mxu0 %v11396_v38  ;;  %14555 = vst [vmem:[#allocation41_spill] sm:$0xff] %v11423_v42 }
 0x530   :  { %4797 = vmatpush1.msra.mxu1 %v11401_v18  ;;  %8221 = vmatmul.mubr.msk.f32.gmra.mxu0 %vm4019_vm2, %v11117_v34  ;;  %v11436_v18 = vld [vmem:[%s14547_s11 + $0x1a0] sm:$0xff]  ;;  %v11441_v34 = vld [vmem:[%s14546_s4 + $0x70] sm:$0xff] }
 0x531   :  { %4742 = vmatpush1.msra.mxu0 %v11406_v63  ;;  %4798 = vmatprep.subr.mxu1 %v11409_v35  ;;  %14558 = vst [vmem:[#allocation51_spill] sm:$0xff] %v11436_v18  ;;  %14559 = vst [vmem:[#allocation44_spill] sm:$0xff] %v11441_v34  ;;  %v11444_v63 = vld [vmem:[%s14547_s11 + $0x188] sm:$0xff]  ;;  %v11449_v35 = vld [vmem:[%s14546_s4 + $0x58] sm:$0xff] }
 0x532   :  { %4743 = vmatprep.subr.mxu0 %v11414_v54  ;;  %4799 = vmatpush1.msra.mxu1 %v11417_v61  ;;  %14560 = vst [vmem:[#allocation43_spill] sm:$0xff] %v11444_v63  ;;  %14561 = vst [vmem:[#allocation50_spill] sm:$0xff] %v11449_v35  ;;  %v11452_v61 = vld [vmem:[%s14547_s11 + $0x180] sm:$0xff] }
 0x533   :  { %4744 = vmatpush1.msra.mxu0 %v11423_v42  ;;  %4800 = vmatprep.subr.mxu1 %v11426_v13  ;;  %14562 = vst [vmem:[#allocation52_spill] sm:$0xff] %v11452_v61  ;;  %v11458_v13 = vld [vmem:[%s14546_s4 + $0x50] sm:$0xff]  ;;  %v11461_v42 = vld [vmem:[%s14547_s11 + $0x168] sm:$0xff] }
 0x534   :  { %4509 = vmatprep.mubr.f32.mxu0 %v14535_v46  ;;  %4745 = vmatprep.subr.mxu0 %v11431_v16  ;;  %14563 = vst [vmem:[#allocation46_spill] sm:$0xff] %v11458_v13  ;;  %14564 = vst [vmem:[#allocation48_spill] sm:$0xff] %v11461_v42  ;;  %v11466_v16 = vld [vmem:[%s14546_s4 + $0x38] sm:$0xff] }
 0x535   :  { %4801 = vmatpush1.msra.mxu1 %v11436_v18  ;;  %8222 = vmatmul.mubr.msk.f32.gmra.mxu0 %vm4019_vm2, %v11127_v51  ;;  %14565 = vst [vmem:[#allocation55_spill] sm:$0xff] %v11466_v16  ;;  %v11471_v18 = vld [vmem:[%s14547_s11 + $0x160] sm:$0xff]  ;;  %v11476_v51 = vld [vmem:[%s14546_s4 + $0x30] sm:$0xff] }
 0x536   :  { %4746 = vmatpush1.msra.mxu0 %v11441_v34  ;;  %4802 = vmatprep.subr.mxu1 %v11444_v63  ;;  %14566 = vst [vmem:[#allocation58_spill] sm:$0xff] %v11471_v18  ;;  %14567 = vst [vmem:[#allocation57_spill] sm:$0xff] %v11476_v51  ;;  %v11479_v34 = vld [vmem:[%s14547_s11 + $0x148] sm:$0xff]  ;;  %v11484_v63 = vld [vmem:[%s14546_s4 + $0x18] sm:$0xff] }
 0x537   :  { %4747 = vmatprep.subr.mxu0 %v11449_v35  ;;  %4803 = vmatpush1.msra.mxu1 %v11452_v61  ;;  %14568 = vst [vmem:[#allocation62_spill] sm:$0xff] %v11479_v34  ;;  %14569 = vst [vmem:[#allocation61_spill] sm:$0xff] %v11484_v63  ;;  %v11487_v61 = vld [vmem:[%s14547_s11 + $0x140] sm:$0xff]  ;;  %v11546_v35 = vld [vmem:[%s14547_s11 + $0x1b0] sm:$0xff] }
 0x538   :  { %4748 = vmatpush1.msra.mxu0 %v11458_v13  ;;  %4804 = vmatprep.subr.mxu1 %v11461_v42  ;;  %14570 = vst [vmem:[#allocation40_spill] sm:$0xff] %v11487_v61  ;;  %v11493_v42 = vld [vmem:[%s14546_s4 + $0x10] sm:$0xff]  ;;  %v11496_v13 = vld [vmem:[%s14547_s11 + $0x128] sm:$0xff]  ;;  %14584 = vst [vmem:[#allocation76_spill] sm:$0xff] %v11546_v35 }
 0x539   :  { %4515 = vmatprep.mubr.f32.mxu0 %v14535_v46  ;;  %4749 = vmatprep.subr.mxu0 %v11466_v16  ;;  %14571 = vst [vmem:[#allocation63_spill] sm:$0xff] %v11493_v42  ;;  %14572 = vst [vmem:[#allocation64_spill] sm:$0xff] %v11496_v13  ;;  %v11501_v16 = vld [vmem:[%s14547_s11 + $0x120] sm:$0xff] }
 0x53a   :  { %4805 = vmatpush1.msra.mxu1 %v11471_v18  ;;  %8223 = vmatmul.mubr.msk.f32.gmra.mxu0 %vm4019_vm2, %v11136_v48  ;;  %14573 = vst [vmem:[#allocation65_spill] sm:$0xff] %v11501_v16  ;;  %v11506_v18 = vld [vmem:[%s14547_s11 + $0x1f8] sm:$0xff]  ;;  %v11511_v48 = vld [vmem:[%s14547_s11 + $0x108] sm:$0xff] }
 0x53b   :  { %4750 = vmatpush1.msra.mxu0 %v11476_v51  ;;  %4806 = vmatprep.subr.mxu1 %v11479_v34  ;;  %14574 = vst [vmem:[#allocation66_spill] sm:$0xff] %v11506_v18  ;;  %14575 = vst [vmem:[#allocation67_spill] sm:$0xff] %v11511_v48  ;;  %v11514_v51 = vld [vmem:[%s14547_s11 + $0x1f0] sm:$0xff]  ;;  %v11519_v34 = vld [vmem:[%s14547_s11 + $0x100] sm:$0xff] }
 0x53c   :  { %4751 = vmatprep.subr.mxu0 %v11484_v63  ;;  %4807 = vmatpush1.msra.mxu1 %v11487_v61  ;;  %14576 = vst [vmem:[#allocation68_spill] sm:$0xff] %v11514_v51  ;;  %14577 = vst [vmem:[#allocation69_spill] sm:$0xff] %v11519_v34  ;;  %v11522_v61 = vld [vmem:[%s14547_s11 + $0x1d8] sm:$0xff] }
 0x53d   :  { %4752 = vmatpush1.msra.mxu0 %v11493_v42  ;;  %4808 = vmatprep.subr.mxu1 %v11496_v13  ;;  %14578 = vst [vmem:[#allocation70_spill] sm:$0xff] %v11522_v61  ;;  %v11527_v13 = vld [vmem:[%s14547_s11 + $0xe8] sm:$0xff]  ;;  %v11530_v42 = vld [vmem:[%s14547_s11 + $0x1d0] sm:$0xff]  ;;  %v11538_v63 = vld [vmem:[%s14547_s11 + $0x1b8] sm:$0xff] }
 0x53e   :  { %4785 = vmatprep.mubr.f32.mxu0 %v14535_v46  ;;  %4809 = vmatpush1.msra.mxu1 %v11501_v16  ;;  %14579 = vst [vmem:[#allocation71_spill] sm:$0xff] %v11527_v13  ;;  %14580 = vst [vmem:[#allocation72_spill] sm:$0xff] %v11530_v42  ;;  %v11535_v16 = vld [vmem:[%s14547_s11 + $0xe0] sm:$0xff] }
 0x53f   :  { %4867 = vmatprep.subr.mxu0 %v11506_v18  ;;  %4786 = vmatmul.mubr.f32.vlgmr.msra.gmra.mxu0 %v14535_v46  ;;  %14581 = vst [vmem:[#allocation73_spill] sm:$0xff] %v11535_v16  ;;  %14582 = vst [vmem:[#allocation74_spill] sm:$0xff] %v11538_v63  ;;  %v11543_v18 = vld [vmem:[%s14547_s11 + $0xc8] sm:$0xff] }
 0x540   :  { %4810 = vmatprep.subr.mxu1 %v11511_v48  ;;  %4868 = vmatpush1.msra.mxu0 %v11514_v51  ;;  %14583 = vst [vmem:[#allocation75_spill] sm:$0xff] %v11543_v18  ;;  %v11551_v48 = vld [vmem:[%s14547_s11 + $0xc0] sm:$0xff]  ;;  %v11554_v51 = vld [vmem:[%s14547_s11 + $0x198] sm:$0xff] }
 0x541   :  { %4811 = vmatpush1.msra.mxu1 %v11519_v34  ;;  %4869 = vmatprep.subr.mxu0 %v11522_v61  ;;  %14585 = vst [vmem:[#allocation77_spill] sm:$0xff] %v11551_v48  ;;  %14586 = vst [vmem:[#allocation78_spill] sm:$0xff] %v11554_v51  ;;  %v11559_v34 = vld [vmem:[%s14547_s11 + $0xa8] sm:$0xff]  ;;  %v11562_v61 = vld [vmem:[%s14547_s11 + $0x190] sm:$0xff] }
 0x542   :  { %4812 = vmatprep.subr.mxu1 %v11527_v13  ;;  %4870 = vmatpush1.msra.mxu0 %v11530_v42  ;;  %14587 = vst [vmem:[#allocation79_spill] sm:$0xff] %v11559_v34  ;;  %14588 = vst [vmem:[#allocation80_spill] sm:$0xff] %v11562_v61  ;;  %v11567_v13 = vld [vmem:[%s14547_s11 + $0xa0] sm:$0xff]  ;;  %v11570_v42 = vld [vmem:[%s14547_s11 + $0x178] sm:$0xff] }
 0x543   :  { %4813 = vmatpush1.msra.mxu1 %v11535_v16  ;;  %4871 = vmatprep.subr.mxu0 %v11538_v63  ;;  %14589 = vst [vmem:[#allocation81_spill] sm:$0xff] %v11567_v13  ;;  %14590 = vst [vmem:[#allocation82_spill] sm:$0xff] %v11570_v42  ;;  %v11575_v16 = vld [vmem:[%s14547_s11 + $0x88] sm:$0xff]  ;;  %v11578_v63 = vld [vmem:[%s14547_s11 + $0x170] sm:$0xff] }
 0x544   :  { %4814 = vmatprep.subr.mxu1 %v11543_v18  ;;  %4872 = vmatpush1.msra.mxu0 %v11546_v35  ;;  %14591 = vst [vmem:[#allocation83_spill] sm:$0xff] %v11575_v16  ;;  %14592 = vst [vmem:[#allocation84_spill] sm:$0xff] %v11578_v63  ;;  %v11583_v18 = vld [vmem:[%s14547_s11 + $0x80] sm:$0xff]  ;;  %v11586_v35 = vld [vmem:[%s14547_s11 + $0x158] sm:$0xff] }
 0x545   :  { %4815 = vmatpush1.msra.mxu1 %v11551_v48  ;;  %4873 = vmatprep.subr.mxu0 %v11554_v51  ;;  %14593 = vst [vmem:[#allocation85_spill] sm:$0xff] %v11583_v18  ;;  %14594 = vst [vmem:[#allocation86_spill] sm:$0xff] %v11586_v35  ;;  %v11591_v48 = vld [vmem:[%s14547_s11 + $0x68] sm:$0xff]  ;;  %v11594_v51 = vld [vmem:[%s14547_s11 + $0x150] sm:$0xff] }
 0x546   :  { %4816 = vmatprep.subr.mxu1 %v11559_v34  ;;  %4874 = vmatpush1.msra.mxu0 %v11562_v61  ;;  %14595 = vst [vmem:[#allocation87_spill] sm:$0xff] %v11591_v48  ;;  %14596 = vst [vmem:[#allocation88_spill] sm:$0xff] %v11594_v51  ;;  %v11599_v34 = vld [vmem:[%s14547_s11 + $0x60] sm:$0xff]  ;;  %v11602_v61 = vld [vmem:[%s14547_s11 + $0x138] sm:$0xff] }
 0x547   :  { %4817 = vmatpush1.msra.mxu1 %v11567_v13  ;;  %4875 = vmatprep.subr.mxu0 %v11570_v42  ;;  %14597 = vst [vmem:[#allocation89_spill] sm:$0xff] %v11599_v34  ;;  %14598 = vst [vmem:[#allocation90_spill] sm:$0xff] %v11602_v61  ;;  %v11607_v13 = vld [vmem:[%s14547_s11 + $0x48] sm:$0xff]  ;;  %v11610_v42 = vld [vmem:[%s14547_s11 + $0x130] sm:$0xff] }
 0x548   :  { %4818 = vmatprep.subr.mxu1 %v11575_v16  ;;  %4876 = vmatpush1.msra.mxu0 %v11578_v63  ;;  %14599 = vst [vmem:[#allocation91_spill] sm:$0xff] %v11607_v13  ;;  %v11615_v16 = vld [vmem:[%s14547_s11 + $0x40] sm:$0xff]  ;;  %v11618_v63 = vld [vmem:[%s14547_s11 + $0x118] sm:$0xff] }
 0x549   :  { %4819 = vmatpush1.msra.mxu1 %v11583_v18  ;;  %4877 = vmatprep.subr.mxu0 %v11586_v35  ;;  %14600 = vst [vmem:[#allocation92_spill] sm:$0xff] %v11615_v16  ;;  %v11623_v18 = vld [vmem:[%s14547_s11 + $0x28] sm:$0xff]  ;;  %v11626_v35 = vld [vmem:[%s14547_s11 + $0x110] sm:$0xff] }
 0x54a   :  { %4820 = vmatprep.subr.mxu1 %v11591_v48  ;;  %4878 = vmatpush1.msra.mxu0 %v11594_v51  ;;  %14601 = vst [vmem:[#allocation93_spill] sm:$0xff] %v11623_v18  ;;  %14602 = vst [vmem:[#allocation94_spill] sm:$0xff] %v11626_v35  ;;  %v11631_v48 = vld [vmem:[%s14547_s11 + $0x20] sm:$0xff]  ;;  %v11634_v51 = vld [vmem:[%s14547_s11 + $0xf8] sm:$0xff] }
 0x54b   :  { %4821 = vmatpush1.msra.mxu1 %v11599_v34  ;;  %4879 = vmatprep.subr.mxu0 %v11602_v61  ;;  %14603 = vst [vmem:[#allocation95_spill] sm:$0xff] %v11631_v48  ;;  %v11639_v34 = vld [vmem:[%s14547_s11 + $0x8] sm:$0xff]  ;;  %v11642_v61 = vld [vmem:[%s14547_s11 + $0xf0] sm:$0xff] }
 0x54c   :  { %4822 = vmatprep.subr.mxu1 %v11607_v13  ;;  %4880 = vmatpush1.msra.mxu0 %v11610_v42  ;;  %14604 = vst [vmem:[#allocation96_spill] sm:$0xff] %v11639_v34  ;;  %14605 = vst [vmem:[#allocation97_spill] sm:$0xff] %v11642_v61  ;;  %v11647_v13 = vld [vmem:[%s14547_s11] sm:$0xff] }
 0x54d   :  { %4823 = vmatpush1.msra.mxu1 %v11615_v16  ;;  %4881 = vmatprep.subr.mxu0 %v11618_v63  ;;  %14606 = vst [vmem:[#allocation98_spill] sm:$0xff] %v11647_v13  ;;  %v11653_v16 = vld [vmem:[%s14547_s11 + $0xd8] sm:$0xff] }
 0x54e   :  { %4824 = vmatprep.subr.mxu1 %v11623_v18  ;;  %4882 = vmatpush1.msra.mxu0 %v11626_v35  ;;  %14607 = vst [vmem:[#allocation99_spill] sm:$0xff] %v11653_v16  ;;  %v11658_v18 = vld [vmem:[%s14547_s11 + $0xd0] sm:$0xff] }
 0x54f   :  { %4825 = vmatpush1.msra.mxu1 %v11631_v48  ;;  %4883 = vmatprep.subr.mxu0 %v11634_v51  ;;  %14608 = vst [vmem:[#allocation100_spill] sm:$0xff] %v11658_v18  ;;  %v14610_v48 = vmov 0  }
 0x550   :  { %4826 = vmatprep.subr.mxu1 %v11639_v34  ;;  %4884 = vmatpush1.msra.mxu0 %v11642_v61  ;;  %v6060_v35 = vsel %vm6058_vm9, 1, %v14610_v48  ;;  %v11669_v34 = vld [vmem:[%s14547_s11 + $0xb0] sm:$0xff]  ;;  %v11673_v61 = vld [vmem:[%s14547_s11 + $0x98] sm:$0xff] }
 0x551   :  { %4827 = vmatpush1.msra.mxu1 %v11647_v13  ;;  %4860 = vmatprep.mubr.f32.mxu1 %v14535_v46  ;;  %v11678_v13 = vld [vmem:[%s14547_s11 + $0x90] sm:$0xff] }
 0x552   :  { %4885 = vmatprep.subr.mxu0 %v11653_v16  ;;  %4861 = vmatmul.mubr.f32.vlgmr.msra.gmra.mxu1 %v14535_v46  ;;  %v11682_v16 = vld [vmem:[%s14547_s11 + $0x78] sm:$0xff] }
 0x553   :  { %4886 = vmatpush1.msra.mxu0 %v11658_v18  ;;  %4931 = vmatprep.mubr.f32.mxu0 %v14535_v46  ;;  %v11687_v18 = vld [vmem:[%s14547_s11 + $0x70] sm:$0xff] }
 0x554   :  { %4887 = vmatprep.subr.mxu0 %v11663_v14  ;;  %6062 = vperm.xlu0 %8865, %v6060_v35   ;;  %v11692_v14 = vld [vmem:[%s14547_s11 + $0x58] sm:$0xff]  ;;  %v11697_v35 = vld [vmem:[%s14547_s11 + $0x50] sm:$0xff] }
 0x555   :  { %4888 = vmatpush1.msra.mxu0 %v11669_v34  ;;  %5006 = vmatprep.subr.mxu1 %v11068_v52  ;;  %v11702_v52 = vld [vmem:[%s14547_s11 + $0x38] sm:$0xff] }
 0x556   :  { %4889 = vmatprep.subr.mxu0 %v11673_v61  ;;  %5007 = vmatpush1.msra.mxu1 %v11145_v10  ;;  %v11707_v10 = vld [vmem:[%s14547_s11 + $0x30] sm:$0xff] }
 0x557   :  { %4890 = vmatpush1.msra.mxu0 %v11678_v13  ;;  %5008 = vmatprep.subr.mxu1 %v11150_v53  ;;  %v11712_v53 = vld [vmem:[%s14547_s11 + $0x18] sm:$0xff] }
 0x558   :  { %4891 = vmatprep.subr.mxu0 %v11682_v16  ;;  %5009 = vmatpush1.msra.mxu1 %v11156_v32  ;;  %v11717_v32 = vld [vmem:[%s14547_s11 + $0x10] sm:$0xff] }
 0x559   :  { %4892 = vmatpush1.msra.mxu0 %v11687_v18  ;;  %5010 = vmatprep.subr.mxu1 %v11161_v23  ;;  %v14612_v23 = vld [vmem:[#allocation53_spill] sm:$0xff] }
 0x55a   :  { %4893 = vmatprep.subr.mxu0 %v11692_v14  ;;  %5011 = vmatpush1.msra.mxu1 %v11168_v1  ;;  %v14613_v1 = vld [vmem:[#allocation45_spill] sm:$0xff] }
 0x55b   :  { %4894 = vmatpush1.msra.mxu0 %v11697_v35  ;;  %5012 = vmatprep.subr.mxu1 %v11173_v55  ;;  %v14614_v55 = vld [vmem:[#allocation41_spill] sm:$0xff] }
 0x55c   :  { %4895 = vmatprep.subr.mxu0 %v11702_v52  ;;  %5013 = vmatpush1.msra.mxu1 %v11178_v0  ;;  %v14615_v0 = vld [vmem:[#allocation60_spill] sm:$0xff] }
 0x55d   :  { %4896 = vmatpush1.msra.mxu0 %v11707_v10  ;;  %5014 = vmatprep.subr.mxu1 %v11183_v40  ;;  %v14616_v40 = vld [vmem:[#allocation47_spill] sm:$0xff] }
 0x55e   :  { %4897 = vmatprep.subr.mxu0 %v11712_v53  ;;  %5015 = vmatpush1.msra.mxu1 %v11189_v20  ;;  %v14617_v20 = vld [vmem:[#allocation44_spill] sm:$0xff] }
 0x55f   :  { %4898 = vmatpush1.msra.mxu0 %v11717_v32  ;;  %5016 = vmatprep.subr.mxu1 %v11194_v3  ;;  %v14618_v3 = vld [vmem:[#allocation50_spill] sm:$0xff] }
 0x560   :  { %4932 = vmatmul.mubr.f32.vlgmr.msra.gmra.mxu0 %v14535_v46  ;;  %5077 = vmatprep.subr.mxu0 %v11108_v19  ;;  %v14611_v19 = vld [vmem:[#allocation49_spill] sm:$0xff] }
 0x561   :  { %5078 = vmatpush1.msra.mxu0 %v11222_v59  ;;  %5017 = vmatpush1.msra.mxu1 %v11200_v45  ;;  %v14619_v45 = vld [vmem:[#allocation46_spill] sm:$0xff]  ;;  %v14623_v59 = vld [vmem:[#allocation63_spill] sm:$0xff] }
 0x562   :  { %5079 = vmatprep.subr.mxu0 %v11229_v25  ;;  %5018 = vmatprep.subr.mxu1 %v11205_v44  ;;  %v14620_v44 = vld [vmem:[#allocation55_spill] sm:$0xff]  ;;  %v8172_v25 = vld [vmem:[#allocation7] ss:$0 sm:$0xff] }
 0x563   :  { %5080 = vmatpush1.msra.mxu0 %v11239_v56  ;;  %5019 = vmatpush1.msra.mxu1 %v11211_v36  ;;  %v14621_v36 = vld [vmem:[#allocation57_spill] sm:$0xff] }
 0x564   :  { %5081 = vmatprep.subr.mxu0 %v11249_v4  ;;  %5020 = vmatprep.subr.mxu1 %v11216_v47  ;;  %v14622_v47 = vld [vmem:[#allocation61_spill] sm:$0xff] }
 0x565   :  { %5082 = vmatpush1.msra.mxu0 %v11258_v17  ;;  %5021 = vmatpush1.msra.mxu1 %v11225_v30  ;;  %v14624_v30 = vld [vmem:[#allocation66_spill] sm:$0xff] }
 0x566   :  { %5083 = vmatprep.subr.mxu0 %v11266_v21  ;;  %5022 = vmatprep.subr.mxu1 %v11233_v11 }
 0x567   :  { %5084 = vmatpush1.msra.mxu0 %v11277_v33  ;;  %5023 = vmatpush1.msra.mxu1 %v11244_v26 }
 0x568   :  { %5085 = vmatprep.subr.mxu0 %v11287_v60  ;;  %5024 = vmatprep.subr.mxu1 %v11255_v43 }
 0x569   :  { %5086 = vmatpush1.msra.mxu0 %v11296_v22  ;;  %5025 = vmatpush1.msra.mxu1 %v11263_v41  ;;  %v14625_v41 = vld [vmem:[#allocation39_spill] sm:$0xff] }
 0x56a   :  { %5087 = vmatprep.subr.mxu0 %v11304_v7  ;;  %5026 = vmatprep.subr.mxu1 %v11272_v12  ;;  %v4001_v21 = vsub.s32 0, %v14625_v41  ;;  %v3997_v12 = vld [vmem:[#allocation10] sm:$0xf] }
 0x56b   :  { %5088 = vmatpush1.msra.mxu0 %v11315_v49  ;;  %5027 = vmatpush1.msra.mxu1 %v11282_v28  ;;  %v4005_v28 = vsub.s32 1, %v14625_v41 }
 0x56c   :  { %5089 = vmatprep.subr.mxu0 %v11325_v39  ;;  %5028 = vmatprep.subr.mxu1 %v11293_v58  ;;  %v11790_v58 = vrot.slane %v3997_v12, %v4001_v21 }
 0x56d   :  { %5090 = vmatpush1.msra.mxu0 %v11334_v2  ;;  %5029 = vmatpush1.msra.mxu1 %v11301_v9  ;;  %v11792_v9 = vrot.slane %v3997_v12, %v4005_v28 }
 0x56e   :  { %5091 = vmatprep.subr.mxu0 %v11342_v57  ;;  %5030 = vmatprep.subr.mxu1 %v11310_v8 }
 0x56f   :  { %5092 = vmatpush1.msra.mxu0 %v11353_v29  ;;  %5031 = vmatpush1.msra.mxu1 %v11320_v6 }
 0x570   :  { %5093 = vmatprep.subr.mxu0 %v11363_v5  ;;  %5032 = vmatprep.subr.mxu1 %v11331_v15  ;;  %v14127_v5 = vsub.s32 2, %v14625_v41 }
 0x571   :  { %5094 = vmatpush1.msra.mxu0 %v11372_v24  ;;  %5033 = vmatpush1.msra.mxu1 %v11339_v37 }
 0x572   :  { %5095 = vmatprep.subr.mxu0 %v11380_v62  ;;  %5034 = vmatprep.subr.mxu1 %v11348_v27 }
 0x573   :  { %5096 = vmatpush1.msra.mxu0 %v11386_v31  ;;  %5035 = vmatpush1.msra.mxu1 %v11358_v50 }
 0x574   :  { %5097 = vmatprep.subr.mxu0 %v11396_v38  ;;  %5036 = vmatprep.subr.mxu1 %v14611_v19  ;;  %v14126_v38 = vsub.s32 3, %v14625_v41 }
 0x575   :  { %5098 = vmatpush1.msra.mxu0 %v14612_v23  ;;  %5037 = vmatpush1.msra.mxu1 %v14613_v1  ;;  %v11825_v1 = vrot.slane %v3997_v12, %v14127_v5 }
 0x576   :  { %5099 = vmatprep.subr.mxu0 %v11414_v54  ;;  %5070 = vmatprep.mubr.f32.mxu1 %v14535_v46 }
 0x577   :  { %5100 = vmatpush1.msra.mxu0 %v14614_v55  ;;  %5141 = vmatprep.mubr.f32.mxu0 %v14535_v46 }
 0x578   :  { %5101 = vmatprep.subr.mxu0 %v14615_v0  ;;  %5152 = vmatprep.subr.mxu1 %v14616_v40 }
 0x579   :  { %5102 = vmatpush1.msra.mxu0 %v14617_v20  ;;  %v11832_v20 = vrot.slane %v3997_v12, %v14126_v38  ;;  %v4274_v12 = vld [vmem:[#allocation13] sm:$0xf] }
 0x57a   :  { %5103 = vmatprep.subr.mxu0 %v14618_v3 }
 0x57b   :  { %5104 = vmatpush1.msra.mxu0 %v14619_v45 }
 0x57c   :  { %5105 = vmatprep.subr.mxu0 %v14620_v44 }
 0x57d   :  { %5106 = vmatpush1.msra.mxu0 %v14621_v36 }
 0x57e   :  { %5107 = vmatprep.subr.mxu0 %v14622_v47 }
 0x57f   :  { %5108 = vmatpush1.msra.mxu0 %v14623_v59 }
 0x580   :  { %5223 = vmatprep.subr.mxu0 %v14624_v30 }
 0x59f   :  { %v3784_v11 = vpop.f32.mrf.mxu0 }
 0x5a0   :  { %v3788_v56 = vadd.f32 %v8172_v25, %v3784_v11  ;;  %v3881_v26 = vpop.f32.mrf.mxu1 }
 0x5a1   :  { %v8661_v4 = vpop.f32.mrf.mxu0 }
 0x5a2   :  { %v3885_v43 = vadd.f32 %v3881_v26, %v3788_v56  ;;  %v8680_v17 = vpop.f32.mrf.mxu1 }
 0x5a4   :  { %v11785_v33 = vpop.f32.mrf.mxu1 }
 0x5a6   :  { %v11788_v60 = vpop.f32.mrf.mxu1 }
 0x5a8   :  { %v4116_v22 = vpop.f32.mrf.mxu1 }
 0x5a9   :  { %v11795_v7 = vadd.f32 %v4116_v22, %v11790_v58 }
 0x5aa   :  { %v4118_v8 = vpop.f32.mrf.mxu1 }
 0x5ab   :  { %v11798_v49 = vadd.f32 %v4118_v8, %v11792_v9 }
 0x5ac   :  { %v4122_v6 = vpop.f32.mrf.mxu1 }
 0x5ad   :  { %v11801_v39 = vadd.f32 %v4122_v6, %v11790_v58 }
 0x5ae   :  { %v4124_v15 = vpop.f32.mrf.mxu1 }
 0x5af   :  { %14626 = vst [vmem:[#allocation49_spill] sm:$0xff] %v11801_v39  ;;  %v3978_v2 = vpop.f32.mrf.mxu0  ;;  %v11804_v37 = vadd.f32 %v4124_v15, %v11792_v9  ;;  %v12292_v39 = vld [vmem:[%s14546_s4 + $0x68] sm:$0xff] }
 0x5b0   :  { %v11806_v57 = vadd.f32 %v3978_v2, %v3885_v43  ;;  %v4128_v27 = vpop.f32.mrf.mxu1 }
 0x5b1   :  { %14627 = vst [vmem:[#allocation53_spill] sm:$0xff] %v11804_v37  ;;  %v8699_v29 = vpop.f32.mrf.mxu0  ;;  %v11809_v50 = vadd.f32 %v4128_v27, %v11790_v58  ;;  %v12288_v37 = vld [vmem:[%s14546_s4 + $0x90] sm:$0xff] }
 0x5b2   :  { %14628 = vst [vmem:[#allocation45_spill] sm:$0xff] %v11806_v57  ;;  %v4130_v24 = vpop.f32.mrf.mxu1  ;;  %v11864_v29 = vrot.slane %v4274_v12, %v4001_v21 }
 0x5b3   :  { %14629 = vst [vmem:[#allocation41_spill] sm:$0xff] %v11809_v50  ;;  %v11812_v62 = vpop.f32.mrf.mxu0  ;;  %v11815_v31 = vadd.f32 %v4130_v24, %v11792_v9  ;;  %v12260_v50 = vld [vmem:[%s14546_s4 + $0xa8] sm:$0xff] }
 0x5b4   :  { %v4134_v54 = vpop.f32.mrf.mxu1 }
 0x5b5   :  { %14630 = vst [vmem:[#allocation60_spill] sm:$0xff] %v11815_v31  ;;  %v11818_v19 = vpop.f32.mrf.mxu0  ;;  %v11821_v23 = vadd.f32 %v4134_v54, %v11790_v58  ;;  %v12256_v31 = vld [vmem:[%s14546_s4 + $0xd0] sm:$0xff] }
 0x5b6   :  { %v4136_v55 = vpop.f32.mrf.mxu1 }
 0x5b7   :  { %14631 = vst [vmem:[#allocation47_spill] sm:$0xff] %v11821_v23  ;;  %v4229_v0 = vpop.f32.mrf.mxu0  ;;  %v11828_v40 = vadd.f32 %v4136_v55, %v11792_v9 }
 0x5b8   :  { %v11835_v3 = vadd.f32 %v4229_v0, %v11825_v1  ;;  %v4140_v45 = vpop.f32.mrf.mxu1 }
 0x5b9   :  { %14632 = vst [vmem:[#allocation44_spill] sm:$0xff] %v11828_v40  ;;  %v4231_v44 = vpop.f32.mrf.mxu0  ;;  %v11838_v36 = vadd.f32 %v4140_v45, %v11790_v58  ;;  %v11872_v45 = vrot.slane %v4274_v12, %v4005_v28 }
 0x5ba   :  { %v11841_v47 = vadd.f32 %v4231_v44, %v11832_v20  ;;  %v4142_v59 = vpop.f32.mrf.mxu1 }
 0x5bb   :  { %14633 = vst [vmem:[#allocation50_spill] sm:$0xff] %v11838_v36  ;;  %v4235_v30 = vpop.f32.mrf.mxu0  ;;  %v11844_v25 = vadd.f32 %v4142_v59, %v11792_v9 }
 0x5bc   :  { %v11847_v11 = vadd.f32 %v4235_v30, %v11825_v1  ;;  %v4146_v56 = vpop.f32.mrf.mxu1 }
 0x5bd   :  { %14634 = vst [vmem:[#allocation46_spill] sm:$0xff] %v11844_v25  ;;  %v4237_v26 = vpop.f32.mrf.mxu0  ;;  %v11850_v4 = vadd.f32 %v4146_v56, %v11790_v58 }
 0x5be   :  { %14635 = vst [vmem:[#allocation55_spill] sm:$0xff] %v11847_v11  ;;  %v11853_v43 = vadd.f32 %v4237_v26, %v11832_v20  ;;  %v4148_v17 = vpop.f32.mrf.mxu1  ;;  %v12280_v11 = vld [vmem:[%s14546_s4 + $0x98] sm:$0xff] }
 0x5bf   :  { %14636 = vst [vmem:[#allocation57_spill] sm:$0xff] %v11850_v4  ;;  %v4241_v22 = vpop.f32.mrf.mxu0  ;;  %v11856_v8 = vadd.f32 %v4148_v17, %v11792_v9 }
 0x5c0   :  { %14637 = vst [vmem:[#allocation61_spill] sm:$0xff] %v11853_v43  ;;  %v11859_v6 = vadd.f32 %v4241_v22, %v11825_v1  ;;  %v4152_v15 = vpop.f32.mrf.mxu1  ;;  %v12284_v43 = vld [vmem:[%s14546_s4 + $0x80] sm:$0xff] }
 0x5c1   :  { %14638 = vst [vmem:[#allocation63_spill] sm:$0xff] %v11856_v8  ;;  %v4243_v2 = vpop.f32.mrf.mxu0  ;;  %v11862_v27 = vadd.f32 %v4152_v15, %v11790_v58 }
 0x5c2   :  { %14639 = vst [vmem:[#allocation66_spill] sm:$0xff] %v11859_v6  ;;  %v11867_v24 = vadd.f32 %v4243_v2, %v11832_v20  ;;  %v4154_v54 = vpop.f32.mrf.mxu1  ;;  %v12248_v6 = vld [vmem:[%s14546_s4 + $0xd8] sm:$0xff] }
 0x5c3   :  { %14640 = vst [vmem:[#allocation39_spill] sm:$0xff] %v11862_v27  ;;  %v4247_v55 = vpop.f32.mrf.mxu0  ;;  %v11870_v0 = vadd.f32 %v4154_v54, %v11792_v9 }
 0x5c4   :  { %14641 = vst [vmem:[#allocation102_spill] sm:$0xff] %v11867_v24  ;;  %v11875_v44 = vadd.f32 %v4247_v55, %v11825_v1  ;;  %v4362_v59 = vpop.f32.mrf.mxu1  ;;  %v12252_v24 = vld [vmem:[%s14546_s4 + $0xc0] sm:$0xff] }
 0x5c5   :  { %14642 = vst [vmem:[#allocation103_spill] sm:$0xff] %v11870_v0  ;;  %v4249_v30 = vpop.f32.mrf.mxu0  ;;  %v11878_v56 = vadd.f32 %v4362_v59, %v11864_v29 }
 0x5c6   :  { %14643 = vst [vmem:[#allocation104_spill] sm:$0xff] %v11875_v44  ;;  %v11881_v21 = vadd.f32 %v4249_v30, %v11832_v20  ;;  %v4364_v26 = vpop.f32.mrf.mxu1 }
 0x5c7   :  { %14644 = vst [vmem:[#allocation105_spill] sm:$0xff] %v11878_v56  ;;  %v4253_v17 = vpop.f32.mrf.mxu0  ;;  %v11884_v22 = vadd.f32 %v4364_v26, %v11872_v45  ;;  %v9127_v26 = vld [vmem:[%s14545_s8] sm:$0xff] }
 0x5c8   :  { %14645 = vst [vmem:[#allocation106_spill] sm:$0xff] %v11881_v21  ;;  %v11887_v28 = vadd.f32 %v4253_v17, %v11825_v1  ;;  %vm5346_vm10 = vcmp.gt.s32.totalorder %v9127_v26, 1  ;;  %vm5347_vm11 = vcmp.gt.s32.totalorder %v9127_v26, 6  ;;  %vm5703_vm12 = vcmp.gt.s32.totalorder %v9127_v26, 5 }
 0x5c9   :  { %14646 = vst [vmem:[#allocation107_spill] sm:$0xff] %v11884_v22  ;;  %v4255_v15 = vpop.f32.mrf.mxu0  ;;  %v4368_v2 = vpop.f32.mrf.mxu1  ;;  %v5348_v22 = vsel %vm5346_vm10, 1, %v14610_v48  ;;  %v5355_v0 = vsel %vm5347_vm11, 1, %v14610_v48  ;;  %v5711_v8 = vsel %vm5703_vm12, 1, %v14610_v48  ;;  %vm6059_vm13 = vcmp.gt.s32.totalorder %v9127_v26, 4 }
 0x5ca   :  { %14647 = vst [vmem:[#allocation108_spill] sm:$0xff] %v11887_v28  ;;  %v11890_v54 = vadd.f32 %v4255_v15, %v11832_v20  ;;  %v11893_v55 = vadd.f32 %v4368_v2, %v11864_v29  ;;  %5350 = vperm.xlu1 %8866, %v5348_v22  }
 0x5cb   :  { %v4259_v59 = vpop.f32.mrf.mxu0  ;;  %v4370_v38 = vpop.f32.mrf.mxu1 }
 0x5cc   :  { %14648 = vst [vmem:[#allocation109_spill] sm:$0xff] %v11890_v54  ;;  %14649 = vst [vmem:[#allocation110_spill] sm:$0xff] %v11893_v55  ;;  %v11896_v30 = vadd.f32 %v4259_v59, %v11825_v1  ;;  %v11899_v5 = vadd.f32 %v4370_v38, %v11872_v45 }
 0x5cd   :  { %v4261_v17 = vpop.f32.mrf.mxu0  ;;  %v4374_v57 = vpop.f32.mrf.mxu1 }
 0x5ce   :  { %14650 = vst [vmem:[#allocation111_spill] sm:$0xff] %v11896_v30  ;;  %14651 = vst [vmem:[#allocation112_spill] sm:$0xff] %v11899_v5  ;;  %v11904_v15 = vadd.f32 %v4261_v17, %v11832_v20  ;;  %v11907_v2 = vadd.f32 %v4374_v57, %v11864_v29  ;;  %v14656_v5 = vsub.s32 2, %v14625_v41  ;;  %5357 = vperm.xlu1 %8866, %v5355_v0  }
 0x5cf   :  { %v4265_v56 = vpop.f32.mrf.mxu0  ;;  %v4376_v59 = vpop.f32.mrf.mxu1 }
 0x5d0   :  { %14652 = vst [vmem:[#allocation113_spill] sm:$0xff] %v11904_v15  ;;  %14653 = vst [vmem:[#allocation114_spill] sm:$0xff] %v11907_v2  ;;  %v11911_v38 = vadd.f32 %v4265_v56, %v11825_v1  ;;  %v11914_v27 = vadd.f32 %v4376_v59, %v11872_v45  ;;  %v11918_v55 = vrot.slane %v4274_v12, %v14656_v5  ;;  %v14659_v15 = vsub.s32 3, %v14625_v41 }
 0x5d1   :  { %v4267_v17 = vpop.f32.mrf.mxu0  ;;  %v4380_v30 = vpop.f32.mrf.mxu1 }
 0x5d2   :  { %14654 = vst [vmem:[#allocation115_spill] sm:$0xff] %v11911_v38  ;;  %14655 = vst [vmem:[#allocation116_spill] sm:$0xff] %v11914_v27  ;;  %v11921_v57 = vadd.f32 %v4267_v17, %v11832_v20  ;;  %v11924_v22 = vadd.f32 %v4380_v30, %v11864_v29  ;;  %v11928_v56 = vrot.slane %v4274_v12, %v14659_v15  ;;  %5713 = vperm.xlu1 %8866, %v5711_v8  }
 0x5d3   :  { %v4475_v59 = vpop.f32.mrf.mxu0  ;;  %v4382_v38 = vpop.f32.mrf.mxu1  ;;  %v6067_v12 = vsel %vm6059_vm13, 1, %v14610_v48 }
 0x5d4   :  { %14657 = vst [vmem:[#allocation117_spill] sm:$0xff] %v11921_v57  ;;  %14658 = vst [vmem:[#allocation118_spill] sm:$0xff] %v11924_v22  ;;  %v11932_v5 = vadd.f32 %v4475_v59, %v11918_v55  ;;  %v11935_v4 = vadd.f32 %v4382_v38, %v11872_v45 }
 0x5d5   :  { %v4477_v17 = vpop.f32.mrf.mxu0 }
 0x5d6   :  { %14660 = vst [vmem:[#allocation119_spill] sm:$0xff] %v11932_v5  ;;  %14661 = vst [vmem:[#allocation120_spill] sm:$0xff] %v11935_v4  ;;  %v11938_v30 = vadd.f32 %v4477_v17, %v11928_v56  ;;  %v4386_v57 = vpop.f32.mrf.mxu1  ;;  %6069 = vperm.xlu1 %8866, %v6067_v12  }
 0x5d7   :  { %v11941_v41 = vadd.f32 %v4386_v57, %v11864_v29 }
 0x5d8   :  { %14662 = vst [vmem:[#allocation121_spill] sm:$0xff] %v11938_v30  ;;  %v4481_v0 = vpop.f32.mrf.mxu0  ;;  %v4388_v15 = vpop.f32.mrf.mxu1 }
 0x5d9   :  { %14663 = vst [vmem:[#allocation122_spill] sm:$0xff] %v11941_v41  ;;  %v11945_v59 = vadd.f32 %v4481_v0, %v11918_v55  ;;  %v11948_v38 = vadd.f32 %v4388_v15, %v11872_v45  ;;  %v12244_v41 = vld [vmem:[%s14546_s4 + $0xc8] sm:$0xff] }
 0x5da   :  { %v4483_v26 = vpop.f32.mrf.mxu0 }
 0x5db   :  { %14664 = vst [vmem:[#allocation123_spill] sm:$0xff] %v11945_v59  ;;  %14665 = vst [vmem:[#allocation124_spill] sm:$0xff] %v11948_v38  ;;  %v11951_v17 = vadd.f32 %v4483_v26, %v11928_v56  ;;  %v12240_v38 = vld [vmem:[%s14546_s4 + $0xf0] sm:$0xff] }
 0x5dc   :  { %v4392_v5 = vpop.f32.mrf.mxu1 }
 0x5dd   :  { %14666 = vst [vmem:[#allocation125_spill] sm:$0xff] %v11951_v17  ;;  %v11954_v8 = vadd.f32 %v4392_v5, %v11864_v29 }
 0x5de   :  { %v4487_v57 = vpop.f32.mrf.mxu0  ;;  %v4394_v30 = vpop.f32.mrf.mxu1 }
 0x5df   :  { %14667 = vst [vmem:[#allocation126_spill] sm:$0xff] %v11954_v8  ;;  %v11957_v48 = vadd.f32 %v4487_v57, %v11918_v55  ;;  %v11960_v0 = vadd.f32 %v4394_v30, %v11872_v45  ;;  %v12276_v8 = vld [vmem:[%s14546_s4 + $0x88] sm:$0xff] }
 0x5e0   :  { %v4489_v59 = vpop.f32.mrf.mxu0 }
 0x5e1   :  { %14668 = vst [vmem:[#allocation127_spill] sm:$0xff] %v11957_v48  ;;  %14669 = vst [vmem:[#allocation128_spill] sm:$0xff] %v11960_v0  ;;  %v11963_v15 = vadd.f32 %v4489_v59, %v11928_v56  ;;  %v12272_v0 = vld [vmem:[%s14546_s4 + $0xb0] sm:$0xff] }
 0x5e2   :  { %v4398_v12 = vpop.f32.mrf.mxu1 }
 0x5e3   :  { %14670 = vst [vmem:[#allocation129_spill] sm:$0xff] %v11963_v15  ;;  %v11966_v26 = vadd.f32 %v4398_v12, %v11864_v29 }
 0x5e4   :  { %v4493_v17 = vpop.f32.mrf.mxu0  ;;  %v4400_v27 = vpop.f32.mrf.mxu1 }
 0x5e5   :  { %v11969_v5 = vadd.f32 %v4493_v17, %v11918_v55  ;;  %v11972_v2 = vadd.f32 %v4400_v27, %v11872_v45  ;;  %v4111_v17 = vadd.f32 %v11785_v33, %v11790_v58  ;;  %v4113_v27 = vadd.f32 %v11788_v60, %v11792_v9 }
 0x5e6   :  { %v4495_v57 = vpop.f32.mrf.mxu0 }
 0x5e7   :  { %14671 = vst [vmem:[#allocation130_spill] sm:$0xff] %v11969_v5  ;;  %v11975_v30 = vadd.f32 %v4495_v57, %v11928_v56 }
 0x5e8   :  { %v4404_v48 = vpop.f32.mrf.mxu1 }
 0x5e9   :  { %14672 = vst [vmem:[#allocation131_spill] sm:$0xff] %v11975_v30 }
 0x5ea   :  { %v4499_v28 = vpop.f32.mrf.mxu0  ;;  %v4406_v15 = vpop.f32.mrf.mxu1 }
 0x5eb   :  { %v11978_v59 = vadd.f32 %v4499_v28, %v11918_v55 }
 0x5ec   :  { %v4501_v12 = vpop.f32.mrf.mxu0 }
 0x5ed   :  { %14673 = vst [vmem:[#allocation132_spill] sm:$0xff] %v11978_v59  ;;  %v11981_v54 = vadd.f32 %v4501_v12, %v11928_v56 }
 0x5ef   :  { %14674 = vst [vmem:[#allocation133_spill] sm:$0xff] %v11981_v54  ;;  %v4716_v25 = vpop.f32.mrf.mxu1 }
 0x5f0   :  { %v4792_v36 = vadd.f32 %v4716_v25, %v4111_v17  ;;  %v4505_v57 = vpop.f32.mrf.mxu0 }
 0x5f1   :  { %v11988_v5 = vadd.f32 %v4505_v57, %v11918_v55  ;;  %v4718_v30 = vpop.f32.mrf.mxu1 }
 0x5f2   :  { %v8224_v28 = vmul.f32 -1.442695, %v4792_v36  ;;  %v4793_v4 = vadd.f32 %v4718_v30, %v4113_v27  ;;  %v4507_v22 = vpop.f32.mrf.mxu0  ;;  %v4224_v36 = vadd.f32 %v11812_v62, %v11825_v1  ;;  %v4405_v62 = vadd.f32 %v4404_v48, %v11864_v29 }
 0x5f3   :  { %14675 = vst [vmem:[#allocation134_spill] sm:$0xff] %v11988_v5  ;;  %v11991_v44 = vadd.f32 %v4507_v22, %v11928_v56  ;;  %v4226_v22 = vadd.f32 %v11818_v19, %v11832_v20  ;;  %v4407_v19 = vadd.f32 %v4406_v15, %v11872_v45  ;;  %v12010_v15 = vpop.permute.xlu0 %4994  ;;  %v12264_v5 = vld [vmem:[%s14546_s4 + $0xb8] sm:$0xff] }
 0x5f4   :  { %8867 = vpow2.f32 %v8224_v28  ;;  %v8225_v12 = vmul.f32 -1.442695, %v4793_v4  ;;  %14677 = vst [vmem:[#allocation136_spill] sm:$0xff] %v12010_v15  ;;  %vm4996_vm14 = vcmp.eq.s32.totalorder %v12010_v15, 1 }
 0x5f5   :  { %14676 = vst [vmem:[#allocation135_spill] sm:$0xff] %v11991_v44  ;;  %v4511_v21 = vpop.f32.mrf.mxu0  ;;  %v12268_v44 = vld [vmem:[%s14546_s4 + $0xa0] sm:$0xff] }
 0x5f6   :  { %8869 = vpow2.f32 %v8225_v12  ;;  %v11994_v33 = vadd.f32 %v4511_v21, %v11918_v55 }
 0x5f7   :  { %v4513_v60 = vpop.f32.mrf.mxu0 }
 0x5f8   :  { %v11997_v58 = vadd.f32 %v4513_v60, %v11928_v56 }
 0x5fa   :  { %v4517_v9 = vpop.f32.mrf.mxu0 }
 0x5fb   :  { %v4518_v29 = vadd.f32 %v4517_v9, %v11918_v55  ;;  %v14678_v55 = vld [vmem:[#allocation54_spill] sm:$0xff]  ;;  %v14680_v9 = vld [vmem:[#allocation56_spill] sm:$0xff] }
 0x5fc   :  { %v4519_v25 = vpop.f32.mrf.mxu0 }
 0x5ff   :  { %v4787_v30 = vpop.f32.mrf.mxu0 }
 0x600   :  { %v4794_v17 = vadd.f32 %v4787_v30, %v4224_v36 }
 0x601   :  { %v8868_v4 = vpop.eup %8867  ;;  %v4789_v27 = vpop.f32.mrf.mxu0 }
 0x602   :  { %v4945_v57 = vadd.f32 1.0, %v8868_v4  ;;  %v4795_v28 = vadd.f32 %v4789_v27, %v4226_v22  ;;  %8871 = vtanh.f32 %v4794_v17 }
 0x603   :  { %v8870_v21 = vpop.eup %8869 }
 0x604   :  { %8873 = vrcp.f32 %v4945_v57  ;;  %v4951_v12 = vadd.f32 1.0, %v8870_v21  ;;  %v8226_v60 = vmul.f32 -1.442695, %v4795_v28 }
 0x606   :  { %8875 = vrcp.f32 %v4951_v12 }
 0x607   :  { %8877 = vpow2.f32 %v8226_v60 }
 0x60f   :  { %v8872_v40 = vpop.eup %8871 }
 0x611   :  { %v8874_v23 = vpop.eup %8873 }
 0x612   :  { %v4962_v1 = vmul.f32 %v8874_v23, %v8872_v40  ;;  %v4862_v59 = vpop.f32.mrf.mxu1  ;;  %v4520_v40 = vadd.f32 %v4519_v25, %v11928_v56  ;;  %v14679_v56 = vld [vmem:[#allocation68_spill] sm:$0xff]  ;;  %v14681_v25 = vld [vmem:[#allocation70_spill] sm:$0xff] }
 0x613   :  { %v8876_v54 = vpop.eup %8875  ;;  %v4938_v20 = vadd.f32 %v4862_v59, %v4405_v62 }
 0x614   :  { %v8878_v36 = vpop.eup %8877  ;;  %v4961_v30 = vmul.f32 0.0, %v8876_v54  ;;  %v4864_v22 = vpop.f32.mrf.mxu1 }
 0x615   :  { %v4958_v4 = vadd.f32 1.0, %v8878_v36  ;;  %v8227_v17 = vmul.f32 -1.442695, %v4938_v20  ;;  %v4939_v27 = vadd.f32 %v4864_v22, %v4407_v19  ;;  %v14682_v36 = vld [vmem:[#allocation59_spill] sm:$0xff]  ;;  %v14684_v22 = vld [vmem:[#allocation42_spill] sm:$0xff] }
 0x616   :  { %v12005_v57 = vadd.f32 %v4962_v1, %v4961_v30  ;;  %v14683_v30 = vld [vmem:[#allocation72_spill] sm:$0xff] }
 0x617   :  { %8879 = vrcp.f32 %v4958_v4  ;;  %v8228_v28 = vmul.f32 -1.442695, %v4939_v27  ;;  %v14685_v4 = vld [vmem:[#allocation74_spill] sm:$0xff]  ;;  %v14687_v27 = vld [vmem:[#allocation76_spill] sm:$0xff] }
 0x618   :  { %8881 = vtanh.f32 %v12005_v57 }
 0x619   :  { %8883 = vpow2.f32 %v8227_v17  ;;  %v14686_v17 = vld [vmem:[#allocation51_spill] sm:$0xff] }
 0x61a   :  { %8885 = vpow2.f32 %v8228_v28  ;;  %v14688_v28 = vld [vmem:[#allocation43_spill] sm:$0xff] }
 0x620   :  { %v4933_v23 = vpop.f32.mrf.mxu0 }
 0x621   :  { %v4940_v59 = vadd.f32 %v4933_v23, %v4518_v29  ;;  %v14689_v23 = vld [vmem:[#allocation78_spill] sm:$0xff]  ;;  %v14691_v29 = vld [vmem:[#allocation80_spill] sm:$0xff] }
 0x622   :  { %v4935_v45 = vpop.f32.mrf.mxu0 }
 0x623   :  { %v4941_v48 = vadd.f32 %v4935_v45, %v4520_v40  ;;  %v14690_v40 = vld [vmem:[#allocation52_spill] sm:$0xff] }
 0x624   :  { %v8880_v54 = vpop.eup %8879  ;;  %v14692_v45 = vld [vmem:[#allocation48_spill] sm:$0xff] }
 0x625   :  { %v8882_v21 = vpop.eup %8881  ;;  %v8229_v12 = vmul.f32 -1.442695, %v4941_v48  ;;  %v14693_v48 = vld [vmem:[#allocation82_spill] sm:$0xff]  ;;  %14740 = vst [vmem:[#allocation48_spill] sm:$0xff] %v12240_v38 }
 0x626   :  { %v8884_v60 = vpop.eup %8883  ;;  %v12012_v62 = vmul.f32 %v8882_v21, %v8880_v54  ;;  %v14694_v54 = vld [vmem:[#allocation58_spill] sm:$0xff]  ;;  %14741 = vst [vmem:[#allocation82_spill] sm:$0xff] %v12244_v41 }
 0x627   :  { %v8886_v1 = vpop.eup %8885  ;;  %v4969_v19 = vadd.f32 1.0, %v8884_v60  ;;  %8887 = vpow2.f32 %v8229_v12  ;;  %v14696_v21 = vld [vmem:[#allocation62_spill] sm:$0xff]  ;;  %v14698_v60 = vld [vmem:[#allocation40_spill] sm:$0xff]  ;;  %14742 = vst [vmem:[#allocation58_spill] sm:$0xff] %v12248_v6 }
 0x628   :  { %v4975_v20 = vadd.f32 1.0, %v8886_v1  ;;  %8889 = vtanh.f32 %v4940_v59  ;;  %8230 = vmatmul.mubr.msk.f32.vlgmr.msra.gmra.mxu1 %vm4996_vm14, %v12012_v62  ;;  %8231 = vmatmul.mubr.msk.f32.vlgmr.msra.gmra.mxu0 %vm4996_vm14, %v12012_v62  ;;  %v14695_v59 = vld [vmem:[#allocation84_spill] sm:$0xff]  ;;  %v14697_v12 = vld [vmem:[#allocation86_spill] sm:$0xff]  ;;  %14744 = vst [vmem:[#allocation62_spill] sm:$0xff] %v12256_v31  ;;  %14746 = vst [vmem:[#allocation40_spill] sm:$0xff] %v12264_v5 }
 0x629   :  { %8891 = vrcp.f32 %v4969_v19  ;;  %5153 = vmatpush1.msra.mxu1 %v14678_v55  ;;  %5224 = vmatpush1.msra.mxu0 %v14679_v56  ;;  %v14699_v1 = vld [vmem:[#allocation88_spill] sm:$0xff]  ;;  %v14701_v55 = vld [vmem:[#allocation90_spill] sm:$0xff]  ;;  %14743 = vst [vmem:[#allocation84_spill] sm:$0xff] %v12252_v24  ;;  %14745 = vst [vmem:[#allocation86_spill] sm:$0xff] %v12260_v50 }
 0x62a   :  { %8893 = vrcp.f32 %v4975_v20  ;;  %5154 = vmatprep.subr.mxu1 %v14680_v9  ;;  %5225 = vmatprep.subr.mxu0 %v14681_v25  ;;  %v14700_v20 = vld [vmem:[#allocation64_spill] sm:$0xff]  ;;  %v14702_v9 = vld [vmem:[#allocation65_spill] sm:$0xff]  ;;  %14747 = vst [vmem:[#allocation88_spill] sm:$0xff] %v12268_v44  ;;  %14749 = vst [vmem:[#allocation90_spill] sm:$0xff] %v12276_v8 }
 0x62b   :  { %5155 = vmatpush1.msra.mxu1 %v14682_v36  ;;  %5226 = vmatpush1.msra.mxu0 %v14683_v30  ;;  %v14703_v36 = vld [vmem:[#allocation67_spill] sm:$0xff]  ;;  %14748 = vst [vmem:[#allocation64_spill] sm:$0xff] %v12272_v0  ;;  %14750 = vst [vmem:[#allocation65_spill] sm:$0xff] %v12280_v11 }
 0x62c   :  { %5156 = vmatprep.subr.mxu1 %v14684_v22  ;;  %5227 = vmatprep.subr.mxu0 %v14685_v4  ;;  %v14704_v4 = vld [vmem:[#allocation69_spill] sm:$0xff]  ;;  %14751 = vst [vmem:[#allocation67_spill] sm:$0xff] %v12284_v43 }
 0x62d   :  { %5157 = vmatpush1.msra.mxu1 %v14686_v17  ;;  %5228 = vmatpush1.msra.mxu0 %v14687_v27  ;;  %v14705_v17 = vld [vmem:[#allocation94_spill] sm:$0xff]  ;;  %14752 = vst [vmem:[#allocation69_spill] sm:$0xff] %v12288_v37 }
 0x62e   :  { %5158 = vmatprep.subr.mxu1 %v14688_v28  ;;  %5229 = vmatprep.subr.mxu0 %v14689_v23  ;;  %v14706_v23 = vld [vmem:[#allocation71_spill] sm:$0xff]  ;;  %14753 = vst [vmem:[#allocation94_spill] sm:$0xff] %v12292_v39 }
 0x62f   :  { %5159 = vmatpush1.msra.mxu1 %v14690_v40  ;;  %5230 = vmatpush1.msra.mxu0 %v14691_v29  ;;  %v14707_v40 = vld [vmem:[#allocation73_spill] sm:$0xff] }
 0x630   :  { %5160 = vmatprep.subr.mxu1 %v14692_v45  ;;  %5231 = vmatprep.subr.mxu0 %v14693_v48  ;;  %v14709_v45 = vld [vmem:[#allocation75_spill] sm:$0xff]  ;;  %v14711_v48 = vld [vmem:[#allocation77_spill] sm:$0xff] }
 0x631   :  { %5161 = vmatpush1.msra.mxu1 %v14694_v54  ;;  %5232 = vmatpush1.msra.mxu0 %v14695_v59  ;;  %v14712_v54 = vld [vmem:[#allocation100_spill] sm:$0xff]  ;;  %v14713_v59 = vld [vmem:[#allocation79_spill] sm:$0xff] }
 0x632   :  { %5162 = vmatprep.subr.mxu1 %v14696_v21  ;;  %5233 = vmatprep.subr.mxu0 %v14697_v12  ;;  %v14715_v21 = vld [vmem:[#allocation81_spill] sm:$0xff]  ;;  %v14716_v12 = vld [vmem:[#allocation83_spill] sm:$0xff] }
 0x633   :  { %5163 = vmatpush1.msra.mxu1 %v14698_v60  ;;  %5234 = vmatpush1.msra.mxu0 %v14699_v1  ;;  %v14717_v60 = vld [vmem:[#allocation85_spill] sm:$0xff]  ;;  %v14718_v1 = vld [vmem:[#allocation87_spill] sm:$0xff] }
 0x634   :  { %v8888_v19 = vpop.eup %8887  ;;  %5164 = vmatprep.subr.mxu1 %v14700_v20  ;;  %5235 = vmatprep.subr.mxu0 %v14701_v55  ;;  %v14720_v20 = vld [vmem:[#allocation91_spill] sm:$0xff] }
 0x635   :  { %v8890_v56 = vpop.eup %8889  ;;  %5165 = vmatpush1.msra.mxu1 %v14702_v9  ;;  %5236 = vmatpush1.msra.mxu0 %v11610_v42  ;;  %v4982_v22 = vadd.f32 1.0, %v8888_v19  ;;  %v14708_v42 = vld [vmem:[#allocation97_spill] sm:$0xff] }
 0x636   :  { %v8892_v25 = vpop.eup %8891  ;;  %5166 = vmatprep.subr.mxu1 %v14703_v36  ;;  %5237 = vmatprep.subr.mxu0 %v11618_v63  ;;  %v14710_v63 = vld [vmem:[#allocation99_spill] sm:$0xff]  ;;  %v14719_v19 = vld [vmem:[#allocation89_spill] sm:$0xff] }
 0x637   :  { %v8894_v30 = vpop.eup %8893  ;;  %5167 = vmatpush1.msra.mxu1 %v14704_v4  ;;  %5238 = vmatpush1.msra.mxu0 %v14705_v17  ;;  %v4986_v28 = vmul.f32 %v8892_v25, %v8890_v56  ;;  %8895 = vrcp.f32 %v4982_v22  ;;  %v12112_v56 = vld [vmem:[%s14546_s4 + $0x1f0] sm:$0xff]  ;;  %v12116_v9 = vld [vmem:[%s14546_s4 + $0x1c8] sm:$0xff]  ;;  %v12120_v25 = vld [vmem:[%s14546_s4 + $0x1d8] sm:$0xff] }
 0x638   :  { %v4985_v27 = vmul.f32 0.0, %v8894_v30  ;;  %5168 = vmatprep.subr.mxu1 %v14706_v23  ;;  %5239 = vmatprep.subr.mxu0 %v11634_v51  ;;  %v14714_v51 = vld [vmem:[#allocation101_spill] sm:$0xff]  ;;  %v12124_v36 = vld [vmem:[%s14546_s4 + $0x1c0] sm:$0xff]  ;;  %v12136_v4 = vld [vmem:[%s14546_s4 + $0x1b8] sm:$0xff] }
 0x639   :  { %5169 = vmatpush1.msra.mxu1 %v14707_v40  ;;  %5240 = vmatpush1.msra.mxu0 %v14708_v42  ;;  %v12128_v30 = vld [vmem:[%s14546_s4 + $0x1d0] sm:$0xff]  ;;  %v12132_v22 = vld [vmem:[%s14546_s4 + $0x1a8] sm:$0xff]  ;;  %v12140_v17 = vld [vmem:[%s14546_s4 + $0x1a0] sm:$0xff] }
 0x63a   :  { %v12055_v29 = vadd.f32 %v4986_v28, %v4985_v27  ;;  %5170 = vmatprep.subr.mxu1 %v14709_v45  ;;  %5241 = vmatprep.subr.mxu0 %v14710_v63  ;;  %v12144_v27 = vld [vmem:[%s14546_s4 + $0x1b0] sm:$0xff]  ;;  %v12148_v28 = vld [vmem:[%s14546_s4 + $0x188] sm:$0xff]  ;;  %v12152_v23 = vld [vmem:[%s14546_s4 + $0x198] sm:$0xff] }
 0x63b   :  { %5171 = vmatpush1.msra.mxu1 %v14711_v48  ;;  %5242 = vmatpush1.msra.mxu0 %v14712_v54  ;;  %v12156_v40 = vld [vmem:[%s14546_s4 + $0x180] sm:$0xff]  ;;  %v12160_v42 = vld [vmem:[%s14546_s4 + $0x190] sm:$0xff]  ;;  %v12164_v45 = vld [vmem:[%s14546_s4 + $0x168] sm:$0xff] }
 0x63c   :  { %8897 = vtanh.f32 %v12055_v29  ;;  %5172 = vmatprep.subr.mxu1 %v14713_v59  ;;  %5243 = vmatprep.subr.mxu0 %v14714_v51  ;;  %v12168_v63 = vld [vmem:[%s14546_s4 + $0x178] sm:$0xff]  ;;  %v12172_v48 = vld [vmem:[%s14546_s4 + $0x160] sm:$0xff]  ;;  %v12176_v54 = vld [vmem:[%s14546_s4 + $0x170] sm:$0xff] }
 0x63d   :  { %5173 = vmatpush1.msra.mxu1 %v14715_v21  ;;  %5244 = vmatpush1.msra.mxu0 %v11669_v34  ;;  %v14721_v34 = vld [vmem:[#allocation92_spill] sm:$0xff]  ;;  %v12184_v51 = vld [vmem:[%s14546_s4 + $0x158] sm:$0xff] }
 0x63e   :  { %5174 = vmatprep.subr.mxu1 %v14716_v12  ;;  %5245 = vmatprep.subr.mxu0 %v11673_v61  ;;  %v14722_v61 = vld [vmem:[#allocation93_spill] sm:$0xff]  ;;  %v12188_v21 = vld [vmem:[%s14546_s4 + $0x140] sm:$0xff] }
 0x63f   :  { %5175 = vmatpush1.msra.mxu1 %v14717_v60  ;;  %5246 = vmatpush1.msra.mxu0 %v11678_v13  ;;  %v14723_v13 = vld [vmem:[#allocation95_spill] sm:$0xff]  ;;  %v12180_v59 = vld [vmem:[%s14546_s4 + $0x148] sm:$0xff]  ;;  %14727 = vst [vmem:[#allocation68_spill] sm:$0xff] %v12188_v21  ;;  %v12192_v12 = vld [vmem:[%s14546_s4 + $0x150] sm:$0xff] }
 0x640   :  { %5176 = vmatprep.subr.mxu1 %v14718_v1  ;;  %5247 = vmatprep.subr.mxu0 %v11682_v16  ;;  %v14724_v16 = vld [vmem:[#allocation96_spill] sm:$0xff]  ;;  %14728 = vst [vmem:[#allocation56_spill] sm:$0xff] %v12192_v12  ;;  %v12200_v1 = vld [vmem:[%s14546_s4 + $0x138] sm:$0xff] }
 0x641   :  { %5177 = vmatpush1.msra.mxu1 %v14719_v19  ;;  %5248 = vmatpush1.msra.mxu0 %v11687_v18  ;;  %v14725_v18 = vld [vmem:[#allocation98_spill] sm:$0xff]  ;;  %v12196_v60 = vld [vmem:[%s14546_s4 + $0x128] sm:$0xff]  ;;  %14730 = vst [vmem:[#allocation59_spill] sm:$0xff] %v12200_v1  ;;  %v12204_v19 = vld [vmem:[%s14546_s4 + $0x120] sm:$0xff] }
 0x642   :  { %5178 = vmatprep.subr.mxu1 %v14720_v20  ;;  %5249 = vmatprep.subr.mxu0 %v11692_v14  ;;  %14729 = vst [vmem:[#allocation70_spill] sm:$0xff] %v12196_v60  ;;  %14731 = vst [vmem:[#allocation72_spill] sm:$0xff] %v12204_v19  ;;  %v12208_v20 = vld [vmem:[%s14546_s4 + $0x130] sm:$0xff] }
 0x643   :  { %5179 = vmatpush1.msra.mxu1 %v14721_v34  ;;  %5250 = vmatpush1.msra.mxu0 %v11697_v35  ;;  %14732 = vst [vmem:[#allocation42_spill] sm:$0xff] %v12208_v20  ;;  %v12212_v34 = vld [vmem:[%s14546_s4 + $0x108] sm:$0xff] }
 0x644   :  { %5180 = vmatprep.subr.mxu1 %v14722_v61  ;;  %5251 = vmatprep.subr.mxu0 %v11702_v52  ;;  %v8896_v14 = vpop.eup %8895  ;;  %v12089_v52 = vld [vmem:[%s14546_s4 + $0x1e8] sm:$0xff]  ;;  %14733 = vst [vmem:[#allocation74_spill] sm:$0xff] %v12212_v34  ;;  %v12216_v61 = vld [vmem:[%s14546_s4 + $0x118] sm:$0xff] }
 0x645   :  { %5181 = vmatpush1.msra.mxu1 %v14723_v13  ;;  %5252 = vmatpush1.msra.mxu0 %v11707_v10  ;;  %v12093_v10 = vld [vmem:[%s14546_s4 + $0x1f8] sm:$0xff]  ;;  %14734 = vst [vmem:[#allocation51_spill] sm:$0xff] %v12216_v61  ;;  %v12220_v13 = vld [vmem:[%s14546_s4 + $0x100] sm:$0xff] }
 0x646   :  { %5182 = vmatprep.subr.mxu1 %v14724_v16  ;;  %5253 = vmatprep.subr.mxu0 %v11712_v53  ;;  %v12096_v53 = vpop.permute.xlu0 %5001  ;;  %14735 = vst [vmem:[#allocation76_spill] sm:$0xff] %v12220_v13  ;;  %v12224_v16 = vld [vmem:[%s14546_s4 + $0x110] sm:$0xff] }
 0x647   :  { %5183 = vmatpush1.msra.mxu1 %v14725_v18  ;;  %5216 = vmatprep.mubr.f32.mxu1 %v14535_v46  ;;  %14726 = vst [vmem:[#allocation54_spill] sm:$0xff] %v12096_v53  ;;  %vm5003_vm15 = vcmp.eq.s32.totalorder %v12096_v53, 1  ;;  %14736 = vst [vmem:[#allocation43_spill] sm:$0xff] %v12224_v16  ;;  %v12228_v18 = vld [vmem:[%s14546_s4 + $0xe8] sm:$0xff]  ;;  %v14823_v53 = vld [vmem:[#allocation62_spill] sm:$0xff] }
 0x648   :  { %5254 = vmatpush1.msra.mxu0 %v11717_v32  ;;  %5287 = vmatprep.mubr.f32.mxu0 %v14535_v46  ;;  %v12108_v32 = vld [vmem:[%s14546_s4 + $0x1e0] sm:$0xff]  ;;  %14737 = vst [vmem:[#allocation78_spill] sm:$0xff] %v12228_v18 }
 0x649   :  { %v8898_v35 = vpop.eup %8897  ;;  %5362 = vmatprep.subr.mxu1 %v12089_v52  ;;  %5433 = vmatprep.subr.mxu0 %v12093_v10 }
 0x64a   :  { %v12098_v55 = vmul.f32 %v8898_v35, %v8896_v14  ;;  %v12232_v14 = vld [vmem:[%s14546_s4 + $0xf8] sm:$0xff]  ;;  %v12236_v35 = vld [vmem:[%s14546_s4 + $0xe0] sm:$0xff] }
 0x64b   :  { %14738 = vst [vmem:[#allocation52_spill] sm:$0xff] %v12232_v14  ;;  %14739 = vst [vmem:[#allocation80_spill] sm:$0xff] %v12236_v35 }
 0x64c   :  { %8232 = vmatmul.mubr.msk.f32.vlgmr.msra.gmra.mxu1 %vm5003_vm15, %v12098_v55  ;;  %8233 = vmatmul.mubr.msk.f32.vlgmr.msra.gmra.mxu0 %vm5003_vm15, %v12098_v55 }
 0x64d   :  { %5363 = vmatpush1.msra.mxu1 %v12108_v32  ;;  %5434 = vmatpush1.msra.mxu0 %v12112_v56 }
 0x64e   :  { %5364 = vmatprep.subr.mxu1 %v12116_v9  ;;  %5435 = vmatprep.subr.mxu0 %v12120_v25 }
 0x64f   :  { %5365 = vmatpush1.msra.mxu1 %v12124_v36  ;;  %5436 = vmatpush1.msra.mxu0 %v12128_v30 }
 0x650   :  { %5366 = vmatprep.subr.mxu1 %v12132_v22  ;;  %5437 = vmatprep.subr.mxu0 %v12136_v4 }
 0x651   :  { %5367 = vmatpush1.msra.mxu1 %v12140_v17  ;;  %5438 = vmatpush1.msra.mxu0 %v12144_v27 }
 0x652   :  { %5368 = vmatprep.subr.mxu1 %v12148_v28  ;;  %5439 = vmatprep.subr.mxu0 %v12152_v23 }
 0x653   :  { %5369 = vmatpush1.msra.mxu1 %v12156_v40  ;;  %5440 = vmatpush1.msra.mxu0 %v12160_v42 }
 0x654   :  { %5370 = vmatprep.subr.mxu1 %v12164_v45  ;;  %5441 = vmatprep.subr.mxu0 %v12168_v63 }
 0x655   :  { %5371 = vmatpush1.msra.mxu1 %v12172_v48  ;;  %5442 = vmatpush1.msra.mxu0 %v12176_v54 }
 0x656   :  { %5372 = vmatprep.subr.mxu1 %v12180_v59  ;;  %5443 = vmatprep.subr.mxu0 %v12184_v51 }
 0x657   :  { %5373 = vmatpush1.msra.mxu1 %v12188_v21  ;;  %5444 = vmatpush1.msra.mxu0 %v12192_v12 }
 0x658   :  { %5374 = vmatprep.subr.mxu1 %v12196_v60  ;;  %5445 = vmatprep.subr.mxu0 %v12200_v1 }
 0x659   :  { %5375 = vmatpush1.msra.mxu1 %v12204_v19  ;;  %5446 = vmatpush1.msra.mxu0 %v12208_v20 }
 0x65a   :  { %5376 = vmatprep.subr.mxu1 %v12212_v34  ;;  %5447 = vmatprep.subr.mxu0 %v12216_v61 }
 0x65b   :  { %5377 = vmatpush1.msra.mxu1 %v12220_v13  ;;  %5448 = vmatpush1.msra.mxu0 %v12224_v16 }
 0x65c   :  { %5378 = vmatprep.subr.mxu1 %v12228_v18  ;;  %5449 = vmatprep.subr.mxu0 %v12232_v14 }
 0x65d   :  { %5379 = vmatpush1.msra.mxu1 %v12236_v35  ;;  %5450 = vmatpush1.msra.mxu0 %v12240_v38  ;;  %v12369_v35 = vpop.permute.xlu1 %5350 }
 0x65e   :  { %5380 = vmatprep.subr.mxu1 %v12244_v41  ;;  %5451 = vmatprep.subr.mxu0 %v12248_v6  ;;  %14771 = vst [vmem:[#allocation95_spill] sm:$0xff] %v12369_v35  ;;  %vm5352_vm1 = vcmp.eq.s32.totalorder %v12369_v35, 1  ;;  %v12473_v35 = vld [vmem:[%s14547_s11 + $0x140] sm:$0xff] }
 0x65f   :  { %5381 = vmatpush1.msra.mxu1 %v12252_v24  ;;  %5452 = vmatpush1.msra.mxu0 %v12256_v31  ;;  %14778 = vst [vmem:[#allocation141_spill] sm:$0xff] %v12473_v35 }
 0x660   :  { %5382 = vmatprep.subr.mxu1 %v12260_v50  ;;  %5453 = vmatprep.subr.mxu0 %v12264_v5 }
 0x661   :  { %5383 = vmatpush1.msra.mxu1 %v12268_v44  ;;  %5454 = vmatpush1.msra.mxu0 %v12272_v0  ;;  %v12340_v0 = vld [vmem:[%s14546_s4 + $0x8] sm:$0xff] }
 0x662   :  { %5384 = vmatprep.subr.mxu1 %v12276_v8  ;;  %5455 = vmatprep.subr.mxu0 %v12280_v11  ;;  %v12296_v8 = vld [vmem:[%s14546_s4 + $0x78] sm:$0xff]  ;;  %v12300_v11 = vld [vmem:[%s14546_s4 + $0x60] sm:$0xff]  ;;  %14765 = vst [vmem:[#allocation85_spill] sm:$0xff] %v12340_v0 }
 0x663   :  { %5385 = vmatpush1.msra.mxu1 %v12284_v43  ;;  %5456 = vmatpush1.msra.mxu0 %v12288_v37  ;;  %14754 = vst [vmem:[#allocation71_spill] sm:$0xff] %v12296_v8  ;;  %14755 = vst [vmem:[#allocation73_spill] sm:$0xff] %v12300_v11  ;;  %v12304_v43 = vld [vmem:[%s14546_s4 + $0x70] sm:$0xff]  ;;  %v12308_v37 = vld [vmem:[%s14546_s4 + $0x48] sm:$0xff] }
 0x664   :  { %5386 = vmatprep.subr.mxu1 %v12292_v39  ;;  %5457 = vmatprep.subr.mxu0 %v12296_v8  ;;  %14756 = vst [vmem:[#allocation97_spill] sm:$0xff] %v12304_v43  ;;  %14757 = vst [vmem:[#allocation75_spill] sm:$0xff] %v12308_v37  ;;  %v12312_v39 = vld [vmem:[%s14546_s4 + $0x58] sm:$0xff]  ;;  %v12316_v8 = vld [vmem:[%s14546_s4 + $0x40] sm:$0xff] }
 0x665   :  { %5387 = vmatpush1.msra.mxu1 %v12300_v11  ;;  %5458 = vmatpush1.msra.mxu0 %v12304_v43  ;;  %14758 = vst [vmem:[#allocation99_spill] sm:$0xff] %v12312_v39  ;;  %14759 = vst [vmem:[#allocation77_spill] sm:$0xff] %v12316_v8  ;;  %v12320_v11 = vld [vmem:[%s14546_s4 + $0x50] sm:$0xff]  ;;  %v12324_v43 = vld [vmem:[%s14546_s4 + $0x28] sm:$0xff] }
 0x666   :  { %5388 = vmatprep.subr.mxu1 %v12308_v37  ;;  %5459 = vmatprep.subr.mxu0 %v12312_v39  ;;  %14760 = vst [vmem:[#allocation100_spill] sm:$0xff] %v12320_v11  ;;  %14761 = vst [vmem:[#allocation79_spill] sm:$0xff] %v12324_v43  ;;  %v12328_v37 = vld [vmem:[%s14546_s4 + $0x38] sm:$0xff]  ;;  %v12332_v39 = vld [vmem:[%s14546_s4 + $0x20] sm:$0xff] }
 0x667   :  { %5389 = vmatpush1.msra.mxu1 %v12316_v8  ;;  %5460 = vmatpush1.msra.mxu0 %v12320_v11  ;;  %14762 = vst [vmem:[#allocation101_spill] sm:$0xff] %v12328_v37  ;;  %14763 = vst [vmem:[#allocation81_spill] sm:$0xff] %v12332_v39  ;;  %v12336_v8 = vld [vmem:[%s14546_s4 + $0x30] sm:$0xff]  ;;  %v12344_v11 = vld [vmem:[%s14546_s4 + $0x18] sm:$0xff] }
 0x668   :  { %5390 = vmatprep.subr.mxu1 %v12324_v43  ;;  %5461 = vmatprep.subr.mxu0 %v12328_v37  ;;  %14764 = vst [vmem:[#allocation83_spill] sm:$0xff] %v12336_v8  ;;  %14766 = vst [vmem:[#allocation87_spill] sm:$0xff] %v12344_v11  ;;  %v12348_v43 = vld [vmem:[%s14546_s4] sm:$0xff]  ;;  %v12352_v37 = vld [vmem:[%s14546_s4 + $0x10] sm:$0xff] }
 0x669   :  { %5391 = vmatpush1.msra.mxu1 %v12332_v39  ;;  %5462 = vmatpush1.msra.mxu0 %v12336_v8  ;;  %14767 = vst [vmem:[#allocation89_spill] sm:$0xff] %v12348_v43  ;;  %14768 = vst [vmem:[#allocation91_spill] sm:$0xff] %v12352_v37  ;;  %v12358_v8 = vld [vmem:[%s14547_s11 + $0x1e8] sm:$0xff] }
 0x66a   :  { %5392 = vmatprep.subr.mxu1 %v12340_v0  ;;  %5463 = vmatprep.subr.mxu0 %v12344_v11  ;;  %14769 = vst [vmem:[#allocation92_spill] sm:$0xff] %v12358_v8  ;;  %v12362_v0 = vld [vmem:[%s14547_s11 + $0x1f8] sm:$0xff] }
 0x66b   :  { %5393 = vmatpush1.msra.mxu1 %v12348_v43  ;;  %5464 = vmatpush1.msra.mxu0 %v12352_v37  ;;  %14770 = vst [vmem:[#allocation93_spill] sm:$0xff] %v12362_v0 }
 0x66c   :  { %5426 = vmatprep.mubr.f32.mxu1 %v14535_v46  ;;  %5497 = vmatprep.mubr.f32.mxu0 %v14535_v46 }
 0x66d   :  { %5508 = vmatprep.subr.mxu1 %v12358_v8  ;;  %5579 = vmatprep.subr.mxu0 %v12362_v0 }
 0x6e8   :  { %v5072_v11 = vpop.f32.mrf.mxu1  ;;  %v5143_v37 = vpop.f32.mrf.mxu0 }
 0x6e9   :  { %v5148_v39 = vadd.f32 %v5072_v11, %v11795_v7  ;;  %v5150_v8 = vadd.f32 %v5143_v37, %v11835_v3  ;;  %v4998_v37 = vsel %vm4996_vm14, %v12005_v57, 0.0 }
 0x6ea   :  { %v5074_v43 = vpop.f32.mrf.mxu1  ;;  %v5145_v31 = vpop.f32.mrf.mxu0 }
 0x6eb   :  { %v8234_v44 = vmul.f32 -1.442695, %v5148_v39  ;;  %v5149_v5 = vadd.f32 %v5074_v43, %v11798_v49  ;;  %v5151_v24 = vadd.f32 %v5145_v31, %v11841_v47 }
 0x6ed   :  { %8899 = vpow2.f32 %v8234_v44  ;;  %v8235_v50 = vmul.f32 -1.442695, %v5149_v5  ;;  %v8236_v6 = vmul.f32 -1.442695, %v5151_v24 }
 0x6ef   :  { %8901 = vpow2.f32 %v8235_v50 }
 0x6f0   :  { %8903 = vtanh.f32 %v5150_v8 }
 0x6f1   :  { %8905 = vpow2.f32 %v8236_v6 }
 0x6fa   :  { %v8900_v41 = vpop.eup %8899 }
 0x6fb   :  { %v5301_v38 = vadd.f32 1.0, %v8900_v41 }
 0x6fc   :  { %v8902_v0 = vpop.eup %8901 }
 0x6fd   :  { %8907 = vrcp.f32 %v5301_v38  ;;  %v5307_v7 = vadd.f32 1.0, %v8902_v0  ;;  %v8904_v39 = vpop.eup %8903 }
 0x6fe   :  { %v8906_v49 = vpop.eup %8905 }
 0x6ff   :  { %8909 = vrcp.f32 %v5307_v7  ;;  %v5314_v50 = vadd.f32 1.0, %v8906_v49 }
 0x701   :  { %8911 = vrcp.f32 %v5314_v50 }
 0x70a   :  { %v8908_v11 = vpop.eup %8907 }
 0x70b   :  { %v5318_v43 = vmul.f32 %v8908_v11, %v8904_v39 }
 0x70c   :  { %v8910_v44 = vpop.eup %8909  ;;  %v5218_v5 = vpop.f32.mrf.mxu1 }
 0x70d   :  { %v5294_v31 = vadd.f32 %v5218_v5, %v11966_v26  ;;  %v5317_v3 = vmul.f32 %v8910_v44, %v4998_v37  ;;  %v5289_v38 = vpop.f32.mrf.mxu0 }
 0x70e   :  { %v5220_v47 = vpop.f32.mrf.mxu1  ;;  %v5296_v7 = vadd.f32 %v5289_v38, %v11994_v33  ;;  %v4997_v33 = vsel %vm4996_vm14, %v12012_v62, 0.0  ;;  %v12401_v62 = vld [vmem:[%s14547_s11 + $0x1c8] sm:$0xff]  ;;  %v12425_v38 = vld [vmem:[%s14547_s11 + $0x1a0] sm:$0xff] }
 0x70f   :  { %v8237_v6 = vmul.f32 -1.442695, %v5294_v31  ;;  %v5295_v24 = vadd.f32 %v5220_v47, %v11972_v2  ;;  %v5319_v41 = vadd.f32 %v5318_v43, %v5317_v3  ;;  %v5291_v57 = vpop.f32.mrf.mxu0  ;;  %v8912_v2 = vpop.eup %8911  ;;  %v12397_v31 = vld [vmem:[%s14547_s11 + $0x1f0] sm:$0xff]  ;;  %v12405_v3 = vld [vmem:[%s14547_s11 + $0x1d8] sm:$0xff]  ;;  %v12409_v47 = vld [vmem:[%s14547_s11 + $0x1c0] sm:$0xff] }
 0x710   :  { %v5297_v26 = vadd.f32 %v5291_v57, %v11997_v58  ;;  %v12433_v57 = vld [vmem:[%s14547_s11 + $0x188] sm:$0xff] }
 0x711   :  { %8913 = vpow2.f32 %v8237_v6  ;;  %v8238_v8 = vmul.f32 -1.442695, %v5295_v24  ;;  %v12379_v0 = vsel %vm5352_vm1, %v5319_v41, %v4998_v37  ;;  %v12393_v37 = vld [vmem:[%s14547_s11 + $0x1e0] sm:$0xff]  ;;  %v12413_v6 = vld [vmem:[%s14547_s11 + $0x1d0] sm:$0xff]  ;;  %v12417_v24 = vld [vmem:[%s14547_s11 + $0x1a8] sm:$0xff] }
 0x712   :  { %8915 = vtanh.f32 %v5319_v41  ;;  %v8239_v39 = vmul.f32 -1.442695, %v5297_v26  ;;  %v12421_v41 = vld [vmem:[%s14547_s11 + $0x1b8] sm:$0xff] }
 0x713   :  { %8917 = vpow2.f32 %v8238_v8  ;;  %v12429_v8 = vld [vmem:[%s14547_s11 + $0x1b0] sm:$0xff]  ;;  %v12437_v26 = vld [vmem:[%s14547_s11 + $0x198] sm:$0xff] }
 0x714   :  { %8919 = vtanh.f32 %v5296_v7  ;;  %v12441_v7 = vld [vmem:[%s14547_s11 + $0x180] sm:$0xff] }
 0x715   :  { %8921 = vpow2.f32 %v8239_v39  ;;  %v12445_v39 = vld [vmem:[%s14547_s11 + $0x190] sm:$0xff] }
 0x71e   :  { %v8914_v49 = vpop.eup %8913 }
 0x71f   :  { %v8916_v11 = vpop.eup %8915  ;;  %v5325_v43 = vadd.f32 1.0, %v8914_v49  ;;  %v12453_v49 = vld [vmem:[%s14547_s11 + $0x178] sm:$0xff] }
 0x720   :  { %v8918_v44 = vpop.eup %8917  ;;  %v5321_v50 = vmul.f32 %v8916_v11, %v8912_v2  ;;  %v12449_v2 = vld [vmem:[%s14547_s11 + $0x168] sm:$0xff]  ;;  %14773 = vst [vmem:[#allocation98_spill] sm:$0xff] %v12453_v49 }
 0x721   :  { %8923 = vrcp.f32 %v5325_v43  ;;  %v5331_v5 = vadd.f32 1.0, %v8918_v44  ;;  %14772 = vst [vmem:[#allocation96_spill] sm:$0xff] %v12449_v2  ;;  %v8920_v11 = vpop.eup %8919  ;;  %v12457_v43 = vld [vmem:[%s14547_s11 + $0x160] sm:$0xff]  ;;  %v12461_v44 = vld [vmem:[%s14547_s11 + $0x170] sm:$0xff] }
 0x722   :  { %v12388_v58 = vsel %vm5352_vm1, %v5321_v50, %v4997_v33  ;;  %14774 = vst [vmem:[#allocation137_spill] sm:$0xff] %v12457_v43  ;;  %14775 = vst [vmem:[#allocation138_spill] sm:$0xff] %v12461_v44  ;;  %v8922_v50 = vpop.eup %8921  ;;  %v12469_v33 = vld [vmem:[%s14547_s11 + $0x158] sm:$0xff] }
 0x723   :  { %8925 = vrcp.f32 %v5331_v5  ;;  %5427 = vmatmul.mubr.f32.vlgmr.msra.gmra.mxu1 %v12388_v58  ;;  %5498 = vmatmul.mubr.f32.vlgmr.msra.gmra.mxu0 %v12388_v58  ;;  %v12465_v5 = vld [vmem:[%s14547_s11 + $0x148] sm:$0xff]  ;;  %14777 = vst [vmem:[#allocation140_spill] sm:$0xff] %v12469_v33 }
 0x724   :  { %5509 = vmatpush1.msra.mxu1 %v12393_v37  ;;  %5580 = vmatpush1.msra.mxu0 %v12397_v31  ;;  %14776 = vst [vmem:[#allocation139_spill] sm:$0xff] %v12465_v5 }
 0x725   :  { %5510 = vmatprep.subr.mxu1 %v12401_v62  ;;  %5581 = vmatprep.subr.mxu0 %v12405_v3 }
 0x726   :  { %5511 = vmatpush1.msra.mxu1 %v12409_v47  ;;  %5582 = vmatpush1.msra.mxu0 %v12413_v6 }
 0x727   :  { %5512 = vmatprep.subr.mxu1 %v12417_v24  ;;  %5583 = vmatprep.subr.mxu0 %v12421_v41 }
 0x728   :  { %5513 = vmatpush1.msra.mxu1 %v12425_v38  ;;  %5584 = vmatpush1.msra.mxu0 %v12429_v8 }
 0x729   :  { %5514 = vmatprep.subr.mxu1 %v12433_v57  ;;  %5585 = vmatprep.subr.mxu0 %v12437_v26 }
 0x72a   :  { %5515 = vmatpush1.msra.mxu1 %v12441_v7  ;;  %5586 = vmatpush1.msra.mxu0 %v12445_v39 }
 0x72b   :  { %5516 = vmatprep.subr.mxu1 %v12449_v2  ;;  %5587 = vmatprep.subr.mxu0 %v12453_v49  ;;  %v12481_v49 = vld [vmem:[%s14547_s11 + $0x128] sm:$0xff]  ;;  %v5338_v2 = vadd.f32 1.0, %v8922_v50  ;;  %v12504_v50 = vld [vmem:[%s14547_s11 + $0x118] sm:$0xff] }
 0x72c   :  { %5517 = vmatpush1.msra.mxu1 %v12457_v43  ;;  %5588 = vmatpush1.msra.mxu0 %v12461_v44  ;;  %v12477_v43 = vld [vmem:[%s14547_s11 + $0x150] sm:$0xff]  ;;  %14780 = vst [vmem:[#allocation143_spill] sm:$0xff] %v12481_v49  ;;  %14785 = vst [vmem:[#allocation148_spill] sm:$0xff] %v12504_v50 }
 0x72d   :  { %5518 = vmatprep.subr.mxu1 %v12465_v5  ;;  %5589 = vmatprep.subr.mxu0 %v12469_v33  ;;  %14779 = vst [vmem:[#allocation142_spill] sm:$0xff] %v12477_v43  ;;  %v12485_v5 = vld [vmem:[%s14547_s11 + $0x138] sm:$0xff]  ;;  %8927 = vrcp.f32 %v5338_v2  ;;  %v12539_v2 = vld [vmem:[%s14547_s11 + $0xc8] sm:$0xff] }
 0x72e   :  { %v8924_v15 = vpop.eup %8923  ;;  %5519 = vmatpush1.msra.mxu1 %v12473_v35  ;;  %5590 = vmatpush1.msra.mxu0 %v12477_v43  ;;  %14781 = vst [vmem:[#allocation144_spill] sm:$0xff] %v12485_v5  ;;  %v5005_v35 = vsel %vm5003_vm15, %v12055_v29, 0.0  ;;  %v12492_v43 = vld [vmem:[%s14547_s11 + $0x120] sm:$0xff]  ;;  %14793 = vst [vmem:[#allocation156_spill] sm:$0xff] %v12539_v2 }
 0x72f   :  { %v5342_v44 = vmul.f32 %v8924_v15, %v8920_v11  ;;  %5520 = vmatprep.subr.mxu1 %v12481_v49  ;;  %5591 = vmatprep.subr.mxu0 %v12485_v5  ;;  %14782 = vst [vmem:[#allocation145_spill] sm:$0xff] %v12492_v43  ;;  %v12496_v15 = vld [vmem:[%s14547_s11 + $0x130] sm:$0xff]  ;;  %v12500_v49 = vld [vmem:[%s14547_s11 + $0x108] sm:$0xff]  ;;  %v12508_v29 = vld [vmem:[%s14547_s11 + $0x100] sm:$0xff] }
 0x730   :  { %v8926_v33 = vpop.eup %8925  ;;  %5521 = vmatpush1.msra.mxu1 %v12492_v43  ;;  %14783 = vst [vmem:[#allocation146_spill] sm:$0xff] %v12496_v15  ;;  %5592 = vmatpush1.msra.mxu0 %v12496_v15  ;;  %14784 = vst [vmem:[#allocation147_spill] sm:$0xff] %v12500_v49  ;;  %v12512_v43 = vld [vmem:[%s14547_s11 + $0x110] sm:$0xff]  ;;  %v12518_v5 = vld [vmem:[%s14547_s11 + $0xe8] sm:$0xff] }
 0x731   :  { %v5341_v11 = vmul.f32 %v8926_v33, %v5005_v35  ;;  %5522 = vmatprep.subr.mxu1 %v12500_v49  ;;  %5593 = vmatprep.subr.mxu0 %v12504_v50  ;;  %14786 = vst [vmem:[#allocation149_spill] sm:$0xff] %v12508_v29  ;;  %14787 = vst [vmem:[#allocation150_spill] sm:$0xff] %v12512_v43  ;;  %v12515_v33 = vpop.permute.xlu1 %5357  ;;  %v12522_v49 = vld [vmem:[%s14547_s11 + $0xf8] sm:$0xff] }
 0x732   :  { %5523 = vmatpush1.msra.mxu1 %v12508_v29  ;;  %5594 = vmatpush1.msra.mxu0 %v12512_v43  ;;  %14788 = vst [vmem:[#allocation151_spill] sm:$0xff] %v12515_v33  ;;  %14789 = vst [vmem:[#allocation152_spill] sm:$0xff] %v12518_v5  ;;  %vm5359_vm2 = vcmp.eq.s32.totalorder %v12515_v33, 1  ;;  %v12527_v29 = vld [vmem:[%s14547_s11 + $0xe0] sm:$0xff]  ;;  %v14824_v33 = vld [vmem:[#allocation86_spill] sm:$0xff] }
 0x733   :  { %v5343_v15 = vadd.f32 %v5342_v44, %v5341_v11  ;;  %5524 = vmatprep.subr.mxu1 %v12518_v5  ;;  %14790 = vst [vmem:[#allocation153_spill] sm:$0xff] %v12522_v49  ;;  %5595 = vmatprep.subr.mxu0 %v12522_v49  ;;  %14791 = vst [vmem:[#allocation154_spill] sm:$0xff] %v12527_v29  ;;  %v12531_v44 = vld [vmem:[%s14547_s11 + $0xf0] sm:$0xff]  ;;  %v12543_v49 = vld [vmem:[%s14547_s11 + $0xd8] sm:$0xff] }
 0x734   :  { %5525 = vmatpush1.msra.mxu1 %v12527_v29  ;;  %14792 = vst [vmem:[#allocation155_spill] sm:$0xff] %v12531_v44  ;;  %5596 = vmatpush1.msra.mxu0 %v12531_v44  ;;  %14794 = vst [vmem:[#allocation157_spill] sm:$0xff] %v12543_v49  ;;  %v12547_v29 = vld [vmem:[%s14547_s11 + $0xc0] sm:$0xff]  ;;  %v12551_v44 = vld [vmem:[%s14547_s11 + $0xd0] sm:$0xff] }
 0x735   :  { %8929 = vtanh.f32 %v5343_v15  ;;  %v12536_v11 = vsel %vm5359_vm2, %v5343_v15, %v5005_v35  ;;  %5526 = vmatprep.subr.mxu1 %v12539_v2  ;;  %5597 = vmatprep.subr.mxu0 %v12543_v49  ;;  %14795 = vst [vmem:[#allocation158_spill] sm:$0xff] %v12547_v29  ;;  %14796 = vst [vmem:[#allocation159_spill] sm:$0xff] %v12551_v44  ;;  %v12555_v35 = vld [vmem:[%s14547_s11 + $0xa8] sm:$0xff]  ;;  %v12559_v15 = vld [vmem:[%s14547_s11 + $0xb8] sm:$0xff] }
 0x736   :  { %5527 = vmatpush1.msra.mxu1 %v12547_v29  ;;  %5598 = vmatpush1.msra.mxu0 %v12551_v44  ;;  %14797 = vst [vmem:[#allocation160_spill] sm:$0xff] %v12555_v35  ;;  %14798 = vst [vmem:[#allocation161_spill] sm:$0xff] %v12559_v15  ;;  %v12563_v49 = vld [vmem:[%s14547_s11 + $0xa0] sm:$0xff]  ;;  %v12567_v29 = vld [vmem:[%s14547_s11 + $0xb0] sm:$0xff] }
 0x737   :  { %5528 = vmatprep.subr.mxu1 %v12555_v35  ;;  %5599 = vmatprep.subr.mxu0 %v12559_v15  ;;  %14799 = vst [vmem:[#allocation162_spill] sm:$0xff] %v12563_v49  ;;  %14800 = vst [vmem:[#allocation163_spill] sm:$0xff] %v12567_v29  ;;  %v12571_v44 = vld [vmem:[%s14547_s11 + $0x88] sm:$0xff]  ;;  %v12575_v35 = vld [vmem:[%s14547_s11 + $0x98] sm:$0xff] }
 0x738   :  { %5529 = vmatpush1.msra.mxu1 %v12563_v49  ;;  %5600 = vmatpush1.msra.mxu0 %v12567_v29  ;;  %14801 = vst [vmem:[#allocation164_spill] sm:$0xff] %v12571_v44  ;;  %14802 = vst [vmem:[#allocation165_spill] sm:$0xff] %v12575_v35  ;;  %v12579_v15 = vld [vmem:[%s14547_s11 + $0x80] sm:$0xff]  ;;  %v12583_v49 = vld [vmem:[%s14547_s11 + $0x90] sm:$0xff] }
 0x739   :  { %5530 = vmatprep.subr.mxu1 %v12571_v44  ;;  %5601 = vmatprep.subr.mxu0 %v12575_v35  ;;  %14803 = vst [vmem:[#allocation166_spill] sm:$0xff] %v12579_v15  ;;  %14804 = vst [vmem:[#allocation167_spill] sm:$0xff] %v12583_v49  ;;  %v12587_v29 = vld [vmem:[%s14547_s11 + $0x68] sm:$0xff]  ;;  %v12591_v44 = vld [vmem:[%s14547_s11 + $0x78] sm:$0xff] }
 0x73a   :  { %5531 = vmatpush1.msra.mxu1 %v12579_v15  ;;  %5602 = vmatpush1.msra.mxu0 %v12583_v49  ;;  %14805 = vst [vmem:[#allocation168_spill] sm:$0xff] %v12587_v29  ;;  %14806 = vst [vmem:[#allocation169_spill] sm:$0xff] %v12591_v44  ;;  %v12595_v35 = vld [vmem:[%s14547_s11 + $0x60] sm:$0xff]  ;;  %v12599_v15 = vld [vmem:[%s14547_s11 + $0x70] sm:$0xff] }
 0x73b   :  { %5532 = vmatprep.subr.mxu1 %v12587_v29  ;;  %5603 = vmatprep.subr.mxu0 %v12591_v44  ;;  %14807 = vst [vmem:[#allocation170_spill] sm:$0xff] %v12595_v35  ;;  %14808 = vst [vmem:[#allocation171_spill] sm:$0xff] %v12599_v15  ;;  %v12603_v49 = vld [vmem:[%s14547_s11 + $0x48] sm:$0xff]  ;;  %v12607_v29 = vld [vmem:[%s14547_s11 + $0x58] sm:$0xff] }
 0x73c   :  { %5533 = vmatpush1.msra.mxu1 %v12595_v35  ;;  %5604 = vmatpush1.msra.mxu0 %v12599_v15  ;;  %14809 = vst [vmem:[#allocation172_spill] sm:$0xff] %v12603_v49  ;;  %14810 = vst [vmem:[#allocation173_spill] sm:$0xff] %v12607_v29  ;;  %v12611_v44 = vld [vmem:[%s14547_s11 + $0x40] sm:$0xff]  ;;  %v12615_v35 = vld [vmem:[%s14547_s11 + $0x50] sm:$0xff] }
 0x73d   :  { %5534 = vmatprep.subr.mxu1 %v12603_v49  ;;  %5605 = vmatprep.subr.mxu0 %v12607_v29  ;;  %14811 = vst [vmem:[#allocation174_spill] sm:$0xff] %v12611_v44  ;;  %14812 = vst [vmem:[#allocation175_spill] sm:$0xff] %v12615_v35  ;;  %v12619_v15 = vld [vmem:[%s14547_s11 + $0x28] sm:$0xff]  ;;  %v12623_v49 = vld [vmem:[%s14547_s11 + $0x38] sm:$0xff] }
 0x73e   :  { %5535 = vmatpush1.msra.mxu1 %v12611_v44  ;;  %5606 = vmatpush1.msra.mxu0 %v12615_v35  ;;  %14813 = vst [vmem:[#allocation176_spill] sm:$0xff] %v12619_v15  ;;  %v12627_v29 = vld [vmem:[%s14547_s11 + $0x20] sm:$0xff]  ;;  %v12631_v2 = vld [vmem:[%s14547_s11 + $0x30] sm:$0xff]  ;;  %v8928_v44 = vpop.eup %8927  ;;  %v12635_v5 = vld [vmem:[%s14547_s11 + $0x8] sm:$0xff] }
 0x73f   :  { %5536 = vmatprep.subr.mxu1 %v12619_v15  ;;  %5607 = vmatprep.subr.mxu0 %v12623_v49  ;;  %14814 = vst [vmem:[#allocation177_spill] sm:$0xff] %v12627_v29  ;;  %14815 = vst [vmem:[#allocation178_spill] sm:$0xff] %v12631_v2  ;;  %v12639_v35 = vld [vmem:[%s14547_s11 + $0x18] sm:$0xff]  ;;  %v12643_v43 = vld [vmem:[%s14547_s11] sm:$0xff] }
 0x740   :  { %5537 = vmatpush1.msra.mxu1 %v12627_v29  ;;  %5608 = vmatpush1.msra.mxu0 %v12631_v2  ;;  %14816 = vst [vmem:[#allocation179_spill] sm:$0xff] %v12635_v5  ;;  %14817 = vst [vmem:[#allocation180_spill] sm:$0xff] %v12643_v43  ;;  %v12648_v29 = vld [vmem:[%s14547_s11 + $0x10] sm:$0xff] }
 0x741   :  { %5538 = vmatprep.subr.mxu1 %v12635_v5  ;;  %5609 = vmatprep.subr.mxu0 %v12639_v35  ;;  %v5004_v5 = vsel %vm5003_vm15, %v12098_v55, 0.0  ;;  %v14818_v55 = vld [vmem:[#allocation80_spill] sm:$0xff] }
 0x742   :  { %v8930_v15 = vpop.eup %8929  ;;  %5539 = vmatpush1.msra.mxu1 %v12643_v43  ;;  %5572 = vmatprep.mubr.f32.mxu1 %v14535_v46 }
 0x743   :  { %5610 = vmatpush1.msra.mxu0 %v12648_v29  ;;  %5643 = vmatprep.mubr.f32.mxu0 %v14535_v46  ;;  %v5345_v2 = vmul.f32 %v8930_v15, %v8928_v44  ;;  %v14820_v44 = vld [vmem:[#allocation82_spill] sm:$0xff]  ;;  %v14822_v15 = vld [vmem:[#allocation84_spill] sm:$0xff] }
 0x744   :  { %5718 = vmatprep.subr.mxu1 %v12089_v52  ;;  %5789 = vmatprep.subr.mxu0 %v12093_v10 }
 0x745   :  { %v12659_v43 = vsel %vm5359_vm2, %v5345_v2, %v5004_v5  ;;  %v14819_v5 = vld [vmem:[#allocation48_spill] sm:$0xff]  ;;  %v14821_v2 = vld [vmem:[#allocation58_spill] sm:$0xff] }
 0x746   :  { %5573 = vmatmul.mubr.f32.vlgmr.msra.gmra.mxu1 %v12659_v43  ;;  %5644 = vmatmul.mubr.f32.vlgmr.msra.gmra.mxu0 %v12659_v43 }
 0x747   :  { %5719 = vmatpush1.msra.mxu1 %v12108_v32  ;;  %5790 = vmatpush1.msra.mxu0 %v12112_v56 }
 0x748   :  { %5720 = vmatprep.subr.mxu1 %v12116_v9  ;;  %5791 = vmatprep.subr.mxu0 %v12120_v25 }
 0x749   :  { %5721 = vmatpush1.msra.mxu1 %v12124_v36  ;;  %5792 = vmatpush1.msra.mxu0 %v12128_v30 }
 0x74a   :  { %5722 = vmatprep.subr.mxu1 %v12132_v22  ;;  %5793 = vmatprep.subr.mxu0 %v12136_v4 }
 0x74b   :  { %5723 = vmatpush1.msra.mxu1 %v12140_v17  ;;  %5794 = vmatpush1.msra.mxu0 %v12144_v27 }
 0x74c   :  { %5724 = vmatprep.subr.mxu1 %v12148_v28  ;;  %5795 = vmatprep.subr.mxu0 %v12152_v23 }
 0x74d   :  { %5725 = vmatpush1.msra.mxu1 %v12156_v40  ;;  %5796 = vmatpush1.msra.mxu0 %v12160_v42 }
 0x74e   :  { %5726 = vmatprep.subr.mxu1 %v12164_v45  ;;  %5797 = vmatprep.subr.mxu0 %v12168_v63 }
 0x74f   :  { %5727 = vmatpush1.msra.mxu1 %v12172_v48  ;;  %5798 = vmatpush1.msra.mxu0 %v12176_v54 }
 0x750   :  { %5728 = vmatprep.subr.mxu1 %v12180_v59  ;;  %5799 = vmatprep.subr.mxu0 %v12184_v51 }
 0x751   :  { %5729 = vmatpush1.msra.mxu1 %v12188_v21  ;;  %5800 = vmatpush1.msra.mxu0 %v12192_v12  ;;  %v14854_v21 = vld [vmem:[#allocation126_spill] sm:$0xff] }
 0x752   :  { %5730 = vmatprep.subr.mxu1 %v12196_v60  ;;  %5801 = vmatprep.subr.mxu0 %v12200_v1  ;;  %v14853_v1 = vld [vmem:[#allocation55_spill] sm:$0xff] }
 0x753   :  { %5731 = vmatpush1.msra.mxu1 %v12204_v19  ;;  %5802 = vmatpush1.msra.mxu0 %v12208_v20 }
 0x754   :  { %5732 = vmatprep.subr.mxu1 %v12212_v34  ;;  %5803 = vmatprep.subr.mxu0 %v12216_v61  ;;  %v14852_v34 = vld [vmem:[#allocation61_spill] sm:$0xff] }
 0x755   :  { %5733 = vmatpush1.msra.mxu1 %v12220_v13  ;;  %5804 = vmatpush1.msra.mxu0 %v12224_v16  ;;  %v14825_v13 = vld [vmem:[#allocation40_spill] sm:$0xff] }
 0x756   :  { %5734 = vmatprep.subr.mxu1 %v12228_v18  ;;  %5805 = vmatprep.subr.mxu0 %v12232_v14  ;;  %v14826_v16 = vld [vmem:[#allocation88_spill] sm:$0xff]  ;;  %v14828_v14 = vld [vmem:[#allocation90_spill] sm:$0xff] }
 0x757   :  { %5735 = vmatpush1.msra.mxu1 %v14818_v55  ;;  %5806 = vmatpush1.msra.mxu0 %v14819_v5  ;;  %v14827_v18 = vld [vmem:[#allocation64_spill] sm:$0xff]  ;;  %v14829_v55 = vld [vmem:[#allocation65_spill] sm:$0xff]  ;;  %v14830_v5 = vld [vmem:[#allocation67_spill] sm:$0xff] }
 0x758   :  { %5736 = vmatprep.subr.mxu1 %v14820_v44  ;;  %5807 = vmatprep.subr.mxu0 %v14821_v2  ;;  %v14831_v44 = vld [vmem:[#allocation69_spill] sm:$0xff]  ;;  %v14832_v2 = vld [vmem:[#allocation94_spill] sm:$0xff] }
 0x759   :  { %5737 = vmatpush1.msra.mxu1 %v14822_v15  ;;  %5808 = vmatpush1.msra.mxu0 %v14823_v53  ;;  %v14833_v15 = vld [vmem:[#allocation71_spill] sm:$0xff]  ;;  %v14834_v53 = vld [vmem:[#allocation73_spill] sm:$0xff] }
 0x75a   :  { %5738 = vmatprep.subr.mxu1 %v14824_v33  ;;  %5809 = vmatprep.subr.mxu0 %v14825_v13  ;;  %v14835_v33 = vld [vmem:[#allocation97_spill] sm:$0xff]  ;;  %v14836_v13 = vld [vmem:[#allocation75_spill] sm:$0xff] }
 0x75b   :  { %5739 = vmatpush1.msra.mxu1 %v14826_v16  ;;  %5810 = vmatpush1.msra.mxu0 %v14827_v18  ;;  %v14837_v16 = vld [vmem:[#allocation99_spill] sm:$0xff]  ;;  %v14838_v18 = vld [vmem:[#allocation77_spill] sm:$0xff] }
 0x75c   :  { %5740 = vmatprep.subr.mxu1 %v14828_v14  ;;  %5811 = vmatprep.subr.mxu0 %v14829_v55  ;;  %v14839_v14 = vld [vmem:[#allocation100_spill] sm:$0xff]  ;;  %v14840_v55 = vld [vmem:[#allocation79_spill] sm:$0xff] }
 0x75d   :  { %5741 = vmatpush1.msra.mxu1 %v14830_v5  ;;  %5812 = vmatpush1.msra.mxu0 %v14831_v44  ;;  %v14841_v5 = vld [vmem:[#allocation101_spill] sm:$0xff] }
 0x75e   :  { %5742 = vmatprep.subr.mxu1 %v14832_v2  ;;  %5813 = vmatprep.subr.mxu0 %v14833_v15  ;;  %v14842_v44 = vld [vmem:[#allocation81_spill] sm:$0xff]  ;;  %v14843_v2 = vld [vmem:[#allocation83_spill] sm:$0xff] }
 0x75f   :  { %5743 = vmatpush1.msra.mxu1 %v14834_v53  ;;  %5814 = vmatpush1.msra.mxu0 %v14835_v33  ;;  %v14844_v15 = vld [vmem:[#allocation85_spill] sm:$0xff]  ;;  %v14845_v53 = vld [vmem:[#allocation87_spill] sm:$0xff] }
 0x760   :  { %5744 = vmatprep.subr.mxu1 %v14836_v13  ;;  %5815 = vmatprep.subr.mxu0 %v14837_v16  ;;  %v14846_v33 = vld [vmem:[#allocation89_spill] sm:$0xff]  ;;  %v14847_v13 = vld [vmem:[#allocation91_spill] sm:$0xff] }
 0x761   :  { %5745 = vmatpush1.msra.mxu1 %v14838_v18  ;;  %5816 = vmatpush1.msra.mxu0 %v14839_v14  ;;  %v14848_v14 = vld [vmem:[#allocation92_spill] sm:$0xff] }
 0x762   :  { %5746 = vmatprep.subr.mxu1 %v14840_v55  ;;  %5817 = vmatprep.subr.mxu0 %v14841_v5  ;;  %v14849_v55 = vld [vmem:[#allocation93_spill] sm:$0xff] }
 0x763   :  { %5747 = vmatpush1.msra.mxu1 %v14842_v44  ;;  %5818 = vmatpush1.msra.mxu0 %v14843_v2  ;;  %v14850_v44 = vld [vmem:[#allocation49_spill] sm:$0xff] }
 0x764   :  { %5748 = vmatprep.subr.mxu1 %v14844_v15  ;;  %5819 = vmatprep.subr.mxu0 %v14845_v53  ;;  %v14851_v15 = vld [vmem:[#allocation53_spill] sm:$0xff] }
 0x765   :  { %5749 = vmatpush1.msra.mxu1 %v14846_v33  ;;  %5820 = vmatpush1.msra.mxu0 %v14847_v13 }
 0x766   :  { %5782 = vmatprep.mubr.f32.mxu1 %v14535_v46  ;;  %5853 = vmatprep.mubr.f32.mxu0 %v14535_v46 }
 0x767   :  { %5864 = vmatprep.subr.mxu1 %v14848_v14  ;;  %5935 = vmatprep.subr.mxu0 %v14849_v55 }
 0x7e3   :  { %v5428_v5 = vpop.f32.mrf.mxu1  ;;  %v5499_v53 = vpop.f32.mrf.mxu0 }
 0x7e4   :  { %v5504_v18 = vadd.f32 %v5428_v5, %v14850_v44  ;;  %v5506_v60 = vadd.f32 %v5499_v53, %v14853_v1 }
 0x7e5   :  { %v5430_v2 = vpop.f32.mrf.mxu1  ;;  %v5501_v13 = vpop.f32.mrf.mxu0 }
 0x7e6   :  { %v8240_v16 = vmul.f32 -1.442695, %v5504_v18  ;;  %v5505_v61 = vadd.f32 %v5430_v2, %v14851_v15  ;;  %v5507_v20 = vadd.f32 %v5501_v13, %v14852_v34  ;;  %v14855_v13 = vld [vmem:[#allocation128_spill] sm:$0xff] }
 0x7e8   :  { %8931 = vpow2.f32 %v8240_v16  ;;  %v8241_v33 = vmul.f32 -1.442695, %v5505_v61  ;;  %v8242_v19 = vmul.f32 -1.442695, %v5507_v20 }
 0x7ea   :  { %8933 = vpow2.f32 %v8241_v33 }
 0x7eb   :  { %8935 = vpow2.f32 %v8242_v19 }
 0x7ec   :  { %8937 = vtanh.f32 %v5506_v60 }
 0x7f5   :  { %v8932_v14 = vpop.eup %8931 }
 0x7f6   :  { %v5657_v12 = vadd.f32 1.0, %v8932_v14  ;;  %v12736_v14 = vpop.permute.xlu0 %5706 }
 0x7f7   :  { %v8934_v55 = vpop.eup %8933  ;;  %14856 = vst [vmem:[#allocation49_spill] sm:$0xff] %v12736_v14  ;;  %vm5708_vm4 = vcmp.eq.s32.totalorder %v12736_v14, 1 }
 0x7f8   :  { %8939 = vrcp.f32 %v5657_v12  ;;  %v5663_v5 = vadd.f32 1.0, %v8934_v55  ;;  %v8936_v18 = vpop.eup %8935 }
 0x7f9   :  { %v8938_v44 = vpop.eup %8937  ;;  %v5670_v61 = vadd.f32 1.0, %v8936_v18  ;;  %v14857_v18 = vld [vmem:[#allocation135_spill] sm:$0xff] }
 0x7fa   :  { %8941 = vrcp.f32 %v5663_v5 }
 0x7fb   :  { %8943 = vrcp.f32 %v5670_v61 }
 0x805   :  { %v8940_v2 = vpop.eup %8939 }
 0x806   :  { %v5674_v16 = vmul.f32 %v8940_v2, %v8938_v44  ;;  %v5574_v33 = vpop.f32.mrf.mxu1  ;;  %v5645_v60 = vpop.f32.mrf.mxu0  ;;  %v14858_v2 = vld [vmem:[#allocation134_spill] sm:$0xff] }
 0x807   :  { %v8942_v15 = vpop.eup %8941  ;;  %v5650_v34 = vadd.f32 %v5574_v33, %v14854_v21  ;;  %v5652_v33 = vadd.f32 %v5645_v60, %v14858_v2  ;;  %v14861_v60 = vld [vmem:[#allocation137_spill] sm:$0xff] }
 0x808   :  { %v5673_v20 = vmul.f32 %v8942_v15, %v12379_v0  ;;  %v5576_v53 = vpop.f32.mrf.mxu1  ;;  %v5647_v5 = vpop.f32.mrf.mxu0 }
 0x809   :  { %v8243_v1 = vmul.f32 -1.442695, %v5650_v34  ;;  %v5651_v19 = vadd.f32 %v5576_v53, %v14855_v13  ;;  %v5653_v44 = vadd.f32 %v5647_v5, %v14857_v18  ;;  %v14863_v18 = vld [vmem:[#allocation139_spill] sm:$0xff] }
 0x80a   :  { %v5675_v12 = vadd.f32 %v5674_v16, %v5673_v20  ;;  %v8944_v16 = vpop.eup %8943 }
 0x80b   :  { %8945 = vpow2.f32 %v8243_v1  ;;  %v8244_v55 = vmul.f32 -1.442695, %v5651_v19  ;;  %v8245_v15 = vmul.f32 -1.442695, %v5653_v44  ;;  %v14860_v19 = vld [vmem:[#allocation98_spill] sm:$0xff]  ;;  %v14864_v44 = vld [vmem:[#allocation140_spill] sm:$0xff] }
 0x80c   :  { %8947 = vtanh.f32 %v5675_v12  ;;  %v12742_v21 = vsel %vm5708_vm4, %v5675_v12, %v12379_v0 }
 0x80d   :  { %8949 = vpow2.f32 %v8244_v55  ;;  %v14862_v55 = vld [vmem:[#allocation138_spill] sm:$0xff] }
 0x80e   :  { %8951 = vtanh.f32 %v5652_v33  ;;  %v14865_v33 = vld [vmem:[#allocation141_spill] sm:$0xff] }
 0x80f   :  { %8953 = vpow2.f32 %v8245_v15  ;;  %v14866_v15 = vld [vmem:[#allocation142_spill] sm:$0xff] }
 0x818   :  { %v8946_v61 = vpop.eup %8945 }
 0x819   :  { %v8948_v34 = vpop.eup %8947  ;;  %v5681_v20 = vadd.f32 1.0, %v8946_v61  ;;  %v14867_v61 = vld [vmem:[#allocation143_spill] sm:$0xff] }
 0x81a   :  { %v8950_v53 = vpop.eup %8949  ;;  %v5677_v1 = vmul.f32 %v8948_v34, %v8944_v16  ;;  %v14868_v34 = vld [vmem:[#allocation144_spill] sm:$0xff] }
 0x81b   :  { %8955 = vrcp.f32 %v5681_v20  ;;  %v5687_v13 = vadd.f32 1.0, %v8950_v53  ;;  %v8952_v12 = vpop.eup %8951 }
 0x81c   :  { %v12749_v0 = vsel %vm5708_vm4, %v5677_v1, %v12388_v58  ;;  %v14859_v58 = vld [vmem:[#allocation96_spill] sm:$0xff]  ;;  %v8954_v5 = vpop.eup %8953  ;;  %v14869_v1 = vld [vmem:[#allocation145_spill] sm:$0xff] }
 0x81d   :  { %8957 = vrcp.f32 %v5687_v13  ;;  %5783 = vmatmul.mubr.f32.vlgmr.msra.gmra.mxu1 %v12749_v0  ;;  %5854 = vmatmul.mubr.f32.vlgmr.msra.gmra.mxu0 %v12749_v0  ;;  %v5694_v53 = vadd.f32 1.0, %v8954_v5  ;;  %v14870_v13 = vld [vmem:[#allocation146_spill] sm:$0xff]  ;;  %v14876_v5 = vld [vmem:[#allocation153_spill] sm:$0xff] }
 0x81e   :  { %5865 = vmatpush1.msra.mxu1 %v12393_v37  ;;  %5936 = vmatpush1.msra.mxu0 %v12397_v31 }
 0x81f   :  { %5866 = vmatprep.subr.mxu1 %v12401_v62  ;;  %5937 = vmatprep.subr.mxu0 %v12405_v3  ;;  %8959 = vrcp.f32 %v5694_v53  ;;  %v14884_v53 = vld [vmem:[#allocation161_spill] sm:$0xff] }
 0x820   :  { %5867 = vmatpush1.msra.mxu1 %v12409_v47  ;;  %5938 = vmatpush1.msra.mxu0 %v12413_v6 }
 0x821   :  { %5868 = vmatprep.subr.mxu1 %v12417_v24  ;;  %5939 = vmatprep.subr.mxu0 %v12421_v41 }
 0x822   :  { %5869 = vmatpush1.msra.mxu1 %v12425_v38  ;;  %5940 = vmatpush1.msra.mxu0 %v12429_v8 }
 0x823   :  { %5870 = vmatprep.subr.mxu1 %v12433_v57  ;;  %5941 = vmatprep.subr.mxu0 %v12437_v26 }
 0x824   :  { %5871 = vmatpush1.msra.mxu1 %v12441_v7  ;;  %5942 = vmatpush1.msra.mxu0 %v12445_v39 }
 0x825   :  { %5872 = vmatprep.subr.mxu1 %v14859_v58  ;;  %5943 = vmatprep.subr.mxu0 %v14860_v19 }
 0x826   :  { %5873 = vmatpush1.msra.mxu1 %v14861_v60  ;;  %5944 = vmatpush1.msra.mxu0 %v14862_v55 }
 0x827   :  { %5874 = vmatprep.subr.mxu1 %v14863_v18  ;;  %5945 = vmatprep.subr.mxu0 %v14864_v44  ;;  %v14871_v18 = vld [vmem:[#allocation147_spill] sm:$0xff] }
 0x828   :  { %v8956_v2 = vpop.eup %8955  ;;  %5875 = vmatpush1.msra.mxu1 %v14865_v33  ;;  %5946 = vmatpush1.msra.mxu0 %v14866_v15  ;;  %v14872_v33 = vld [vmem:[#allocation149_spill] sm:$0xff]  ;;  %v14873_v15 = vld [vmem:[#allocation150_spill] sm:$0xff] }
 0x829   :  { %v5698_v16 = vmul.f32 %v8956_v2, %v8952_v12  ;;  %5876 = vmatprep.subr.mxu1 %v14867_v61  ;;  %5947 = vmatprep.subr.mxu0 %v14868_v34  ;;  %v12784_v12 = vpop.permute.xlu1 %5713  ;;  %v14875_v34 = vld [vmem:[#allocation152_spill] sm:$0xff] }
 0x82a   :  { %v8958_v20 = vpop.eup %8957  ;;  %5877 = vmatpush1.msra.mxu1 %v14869_v1  ;;  %5948 = vmatpush1.msra.mxu0 %v14870_v13  ;;  %14874 = vst [vmem:[#allocation53_spill] sm:$0xff] %v12784_v12  ;;  %vm5715_vm7 = vcmp.eq.s32.totalorder %v12784_v12, 1  ;;  %v14877_v13 = vld [vmem:[#allocation154_spill] sm:$0xff]  ;;  %v13230_v12 = vld [vmem:[%s14546_s4 + $0x28] sm:$0xff] }
 0x82b   :  { %v5697_v14 = vmul.f32 %v8958_v20, %v12536_v11  ;;  %5878 = vmatprep.subr.mxu1 %v14871_v18  ;;  %5949 = vmatprep.subr.mxu0 %v12504_v50  ;;  %v14878_v20 = vld [vmem:[#allocation155_spill] sm:$0xff]  ;;  %v14879_v18 = vld [vmem:[#allocation156_spill] sm:$0xff]  ;;  %v14880_v50 = vld [vmem:[#allocation157_spill] sm:$0xff] }
 0x82c   :  { %5879 = vmatpush1.msra.mxu1 %v14872_v33  ;;  %5950 = vmatpush1.msra.mxu0 %v14873_v15  ;;  %v14889_v15 = vld [vmem:[#allocation166_spill] sm:$0xff] }
 0x82d   :  { %v5699_v2 = vadd.f32 %v5698_v16, %v5697_v14  ;;  %5880 = vmatprep.subr.mxu1 %v14875_v34  ;;  %5951 = vmatprep.subr.mxu0 %v14876_v5  ;;  %v14881_v16 = vld [vmem:[#allocation158_spill] sm:$0xff]  ;;  %v14882_v5 = vld [vmem:[#allocation159_spill] sm:$0xff]  ;;  %v14883_v34 = vld [vmem:[#allocation160_spill] sm:$0xff] }
 0x82e   :  { %5881 = vmatpush1.msra.mxu1 %v14877_v13  ;;  %5952 = vmatpush1.msra.mxu0 %v14878_v20  ;;  %v14885_v13 = vld [vmem:[#allocation162_spill] sm:$0xff]  ;;  %v14886_v20 = vld [vmem:[#allocation163_spill] sm:$0xff] }
 0x82f   :  { %5882 = vmatprep.subr.mxu1 %v14879_v18  ;;  %5953 = vmatprep.subr.mxu0 %v14880_v50  ;;  %8961 = vtanh.f32 %v5699_v2  ;;  %v12796_v14 = vsel %vm5715_vm7, %v5699_v2, %v12536_v11  ;;  %v14887_v18 = vld [vmem:[#allocation164_spill] sm:$0xff]  ;;  %v14888_v50 = vld [vmem:[#allocation165_spill] sm:$0xff]  ;;  %v14890_v11 = vld [vmem:[#allocation167_spill] sm:$0xff] }
 0x830   :  { %5883 = vmatpush1.msra.mxu1 %v14881_v16  ;;  %5954 = vmatpush1.msra.mxu0 %v14882_v5  ;;  %v14891_v2 = vld [vmem:[#allocation168_spill] sm:$0xff]  ;;  %v14892_v16 = vld [vmem:[#allocation169_spill] sm:$0xff]  ;;  %v14893_v5 = vld [vmem:[#allocation170_spill] sm:$0xff] }
 0x831   :  { %5884 = vmatprep.subr.mxu1 %v14883_v34  ;;  %5955 = vmatprep.subr.mxu0 %v14884_v53  ;;  %v14894_v34 = vld [vmem:[#allocation171_spill] sm:$0xff]  ;;  %v14895_v53 = vld [vmem:[#allocation172_spill] sm:$0xff] }
 0x832   :  { %5885 = vmatpush1.msra.mxu1 %v14885_v13  ;;  %5956 = vmatpush1.msra.mxu0 %v14886_v20  ;;  %v14896_v13 = vld [vmem:[#allocation173_spill] sm:$0xff]  ;;  %v14897_v20 = vld [vmem:[#allocation174_spill] sm:$0xff] }
 0x833   :  { %5886 = vmatprep.subr.mxu1 %v14887_v18  ;;  %5957 = vmatprep.subr.mxu0 %v14888_v50  ;;  %v14898_v18 = vld [vmem:[#allocation175_spill] sm:$0xff]  ;;  %v14899_v50 = vld [vmem:[#allocation176_spill] sm:$0xff] }
 0x834   :  { %5887 = vmatpush1.msra.mxu1 %v14889_v15  ;;  %5958 = vmatpush1.msra.mxu0 %v14890_v11  ;;  %v14900_v11 = vld [vmem:[#allocation177_spill] sm:$0xff] }
 0x835   :  { %5888 = vmatprep.subr.mxu1 %v14891_v2  ;;  %5959 = vmatprep.subr.mxu0 %v14892_v16  ;;  %v14901_v2 = vld [vmem:[#allocation178_spill] sm:$0xff]  ;;  %v8960_v16 = vpop.eup %8959 }
 0x836   :  { %5889 = vmatpush1.msra.mxu1 %v14893_v5  ;;  %5960 = vmatpush1.msra.mxu0 %v14894_v34  ;;  %v14902_v5 = vld [vmem:[#allocation179_spill] sm:$0xff]  ;;  %v14903_v34 = vld [vmem:[#allocation180_spill] sm:$0xff] }
 0x837   :  { %5890 = vmatprep.subr.mxu1 %v14895_v53  ;;  %5961 = vmatprep.subr.mxu0 %v14896_v13 }
 0x838   :  { %5891 = vmatpush1.msra.mxu1 %v14897_v20  ;;  %5962 = vmatpush1.msra.mxu0 %v14898_v18 }
 0x839   :  { %5892 = vmatprep.subr.mxu1 %v14899_v50  ;;  %5963 = vmatprep.subr.mxu0 %v12623_v49 }
 0x83a   :  { %5893 = vmatpush1.msra.mxu1 %v14900_v11  ;;  %5964 = vmatpush1.msra.mxu0 %v14901_v2 }
 0x83b   :  { %5894 = vmatprep.subr.mxu1 %v14902_v5  ;;  %5965 = vmatprep.subr.mxu0 %v12639_v35 }
 0x83c   :  { %v8962_v53 = vpop.eup %8961  ;;  %5895 = vmatpush1.msra.mxu1 %v14903_v34  ;;  %5928 = vmatprep.mubr.f32.mxu1 %v14535_v46 }
 0x83d   :  { %5966 = vmatpush1.msra.mxu0 %v12648_v29  ;;  %5999 = vmatprep.mubr.f32.mxu0 %v14535_v46  ;;  %v5701_v50 = vmul.f32 %v8962_v53, %v8960_v16  ;;  %v14928_v16 = vld [vmem:[#allocation67_spill] sm:$0xff]  ;;  %v14929_v53 = vld [vmem:[#allocation69_spill] sm:$0xff] }
 0x83e   :  { %6074 = vmatprep.subr.mxu1 %v12089_v52  ;;  %6145 = vmatprep.subr.mxu0 %v12093_v10  ;;  %v14904_v52 = vld [vmem:[#allocation68_spill] sm:$0xff] }
 0x83f   :  { %v12831_v5 = vsel %vm5715_vm7, %v5701_v50, %v12659_v43  ;;  %v14905_v10 = vld [vmem:[#allocation56_spill] sm:$0xff]  ;;  %v14926_v43 = vld [vmem:[#allocation90_spill] sm:$0xff]  ;;  %v14927_v50 = vld [vmem:[#allocation65_spill] sm:$0xff] }
 0x840   :  { %5929 = vmatmul.mubr.f32.vlgmr.msra.gmra.mxu1 %v12831_v5  ;;  %6000 = vmatmul.mubr.f32.vlgmr.msra.gmra.mxu0 %v12831_v5 }
 0x841   :  { %6075 = vmatpush1.msra.mxu1 %v12108_v32  ;;  %6146 = vmatpush1.msra.mxu0 %v12112_v56  ;;  %v14906_v32 = vld [vmem:[#allocation70_spill] sm:$0xff]  ;;  %v14907_v56 = vld [vmem:[#allocation59_spill] sm:$0xff] }
 0x842   :  { %6076 = vmatprep.subr.mxu1 %v12116_v9  ;;  %6147 = vmatprep.subr.mxu0 %v12120_v25  ;;  %v14908_v9 = vld [vmem:[#allocation72_spill] sm:$0xff]  ;;  %v14909_v25 = vld [vmem:[#allocation42_spill] sm:$0xff] }
 0x843   :  { %6077 = vmatpush1.msra.mxu1 %v12124_v36  ;;  %6148 = vmatpush1.msra.mxu0 %v12128_v30  ;;  %v14910_v36 = vld [vmem:[#allocation74_spill] sm:$0xff]  ;;  %v14911_v30 = vld [vmem:[#allocation51_spill] sm:$0xff] }
 0x844   :  { %6078 = vmatprep.subr.mxu1 %v12132_v22  ;;  %6149 = vmatprep.subr.mxu0 %v12136_v4  ;;  %v14912_v22 = vld [vmem:[#allocation76_spill] sm:$0xff]  ;;  %v14913_v4 = vld [vmem:[#allocation43_spill] sm:$0xff] }
 0x845   :  { %6079 = vmatpush1.msra.mxu1 %v12140_v17  ;;  %6150 = vmatpush1.msra.mxu0 %v12144_v27  ;;  %v14914_v17 = vld [vmem:[#allocation78_spill] sm:$0xff]  ;;  %v14915_v27 = vld [vmem:[#allocation52_spill] sm:$0xff] }
 0x846   :  { %6080 = vmatprep.subr.mxu1 %v12148_v28  ;;  %6151 = vmatprep.subr.mxu0 %v12152_v23  ;;  %v14916_v28 = vld [vmem:[#allocation80_spill] sm:$0xff]  ;;  %15018 = vst [vmem:[#allocation52_spill] sm:$0xff] %v13230_v12 }
 0x847   :  { %6081 = vmatpush1.msra.mxu1 %v12156_v40  ;;  %6152 = vmatpush1.msra.mxu0 %v12160_v42  ;;  %v14917_v23 = vld [vmem:[#allocation48_spill] sm:$0xff]  ;;  %v14918_v40 = vld [vmem:[#allocation82_spill] sm:$0xff] }
 0x848   :  { %6082 = vmatprep.subr.mxu1 %v12164_v45  ;;  %6153 = vmatprep.subr.mxu0 %v12168_v63  ;;  %v14919_v42 = vld [vmem:[#allocation58_spill] sm:$0xff]  ;;  %v14920_v45 = vld [vmem:[#allocation84_spill] sm:$0xff] }
 0x849   :  { %6083 = vmatpush1.msra.mxu1 %v12172_v48  ;;  %6154 = vmatpush1.msra.mxu0 %v12176_v54  ;;  %v14921_v63 = vld [vmem:[#allocation62_spill] sm:$0xff]  ;;  %v14923_v54 = vld [vmem:[#allocation40_spill] sm:$0xff] }
 0x84a   :  { %6084 = vmatprep.subr.mxu1 %v12180_v59  ;;  %6155 = vmatprep.subr.mxu0 %v12184_v51  ;;  %v14922_v48 = vld [vmem:[#allocation86_spill] sm:$0xff]  ;;  %v14924_v59 = vld [vmem:[#allocation88_spill] sm:$0xff] }
 0x84b   :  { %6085 = vmatpush1.msra.mxu1 %v14904_v52  ;;  %6156 = vmatpush1.msra.mxu0 %v14905_v10  ;;  %v14925_v51 = vld [vmem:[#allocation64_spill] sm:$0xff]  ;;  %v14930_v52 = vld [vmem:[#allocation94_spill] sm:$0xff]  ;;  %v14931_v10 = vld [vmem:[#allocation71_spill] sm:$0xff] }
 0x84c   :  { %6086 = vmatprep.subr.mxu1 %v14906_v32  ;;  %6157 = vmatprep.subr.mxu0 %v14907_v56  ;;  %v14932_v32 = vld [vmem:[#allocation73_spill] sm:$0xff] }
 0x84d   :  { %6087 = vmatpush1.msra.mxu1 %v14908_v9  ;;  %6158 = vmatpush1.msra.mxu0 %v14909_v25  ;;  %v14933_v56 = vld [vmem:[#allocation97_spill] sm:$0xff]  ;;  %v14934_v9 = vld [vmem:[#allocation75_spill] sm:$0xff] }
 0x84e   :  { %6088 = vmatprep.subr.mxu1 %v14910_v36  ;;  %6159 = vmatprep.subr.mxu0 %v14911_v30  ;;  %v14935_v25 = vld [vmem:[#allocation99_spill] sm:$0xff]  ;;  %v14936_v36 = vld [vmem:[#allocation77_spill] sm:$0xff]  ;;  %v14937_v30 = vld [vmem:[#allocation100_spill] sm:$0xff] }
 0x84f   :  { %6089 = vmatpush1.msra.mxu1 %v14912_v22  ;;  %6160 = vmatpush1.msra.mxu0 %v14913_v4  ;;  %v14938_v22 = vld [vmem:[#allocation79_spill] sm:$0xff]  ;;  %v14939_v4 = vld [vmem:[#allocation101_spill] sm:$0xff] }
 0x850   :  { %6090 = vmatprep.subr.mxu1 %v14914_v17  ;;  %6161 = vmatprep.subr.mxu0 %v14915_v27  ;;  %v14940_v17 = vld [vmem:[#allocation81_spill] sm:$0xff]  ;;  %v14941_v27 = vld [vmem:[#allocation83_spill] sm:$0xff] }
 0x851   :  { %6091 = vmatpush1.msra.mxu1 %v14916_v28  ;;  %6162 = vmatpush1.msra.mxu0 %v14917_v23  ;;  %v14942_v28 = vld [vmem:[#allocation85_spill] sm:$0xff]  ;;  %v14943_v23 = vld [vmem:[#allocation87_spill] sm:$0xff] }
 0x852   :  { %6092 = vmatprep.subr.mxu1 %v14918_v40  ;;  %6163 = vmatprep.subr.mxu0 %v14919_v42  ;;  %v14944_v40 = vld [vmem:[#allocation89_spill] sm:$0xff]  ;;  %v14945_v42 = vld [vmem:[#allocation91_spill] sm:$0xff] }
 0x853   :  { %6093 = vmatpush1.msra.mxu1 %v14920_v45  ;;  %6164 = vmatpush1.msra.mxu0 %v14921_v63  ;;  %v14946_v45 = vld [vmem:[#allocation92_spill] sm:$0xff]  ;;  %v14947_v63 = vld [vmem:[#allocation93_spill] sm:$0xff] }
 0x854   :  { %6094 = vmatprep.subr.mxu1 %v14922_v48  ;;  %6165 = vmatprep.subr.mxu0 %v14923_v54  ;;  %v14948_v54 = vld [vmem:[#allocation41_spill] sm:$0xff] }
 0x855   :  { %6095 = vmatpush1.msra.mxu1 %v14924_v59  ;;  %6166 = vmatpush1.msra.mxu0 %v14925_v51 }
 0x856   :  { %6096 = vmatprep.subr.mxu1 %v14926_v43  ;;  %6167 = vmatprep.subr.mxu0 %v14927_v50  ;;  %v14949_v50 = vld [vmem:[#allocation60_spill] sm:$0xff] }
 0x857   :  { %6097 = vmatpush1.msra.mxu1 %v14928_v16  ;;  %6168 = vmatpush1.msra.mxu0 %v14929_v53 }
 0x858   :  { %6098 = vmatprep.subr.mxu1 %v14930_v52  ;;  %6169 = vmatprep.subr.mxu0 %v14931_v10 }
 0x859   :  { %6099 = vmatpush1.msra.mxu1 %v14932_v32  ;;  %6170 = vmatpush1.msra.mxu0 %v14933_v56  ;;  %v14950_v32 = vld [vmem:[#allocation102_spill] sm:$0xff] }
 0x85a   :  { %6100 = vmatprep.subr.mxu1 %v14934_v9  ;;  %6171 = vmatprep.subr.mxu0 %v14935_v25  ;;  %v14951_v25 = vld [vmem:[#allocation66_spill] sm:$0xff] }
 0x85b   :  { %6101 = vmatpush1.msra.mxu1 %v14936_v36  ;;  %6172 = vmatpush1.msra.mxu0 %v14937_v30 }
 0x85c   :  { %6102 = vmatprep.subr.mxu1 %v14938_v22  ;;  %6173 = vmatprep.subr.mxu0 %v14939_v4 }
 0x85d   :  { %6103 = vmatpush1.msra.mxu1 %v14940_v17  ;;  %6174 = vmatpush1.msra.mxu0 %v14941_v27 }
 0x85e   :  { %6104 = vmatprep.subr.mxu1 %v14942_v28  ;;  %6175 = vmatprep.subr.mxu0 %v14943_v23 }
 0x85f   :  { %6105 = vmatpush1.msra.mxu1 %v14944_v40  ;;  %6176 = vmatpush1.msra.mxu0 %v14945_v42 }
 0x860   :  { %6138 = vmatprep.mubr.f32.mxu1 %v14535_v46  ;;  %6209 = vmatprep.mubr.f32.mxu0 %v14535_v46 }
 0x861   :  { %6220 = vmatprep.subr.mxu1 %v14946_v45  ;;  %6291 = vmatprep.subr.mxu0 %v14947_v63 }
 0x8dd   :  { %v5784_v48 = vpop.f32.mrf.mxu1  ;;  %v5855_v53 = vpop.f32.mrf.mxu0 }
 0x8de   :  { %v5860_v59 = vadd.f32 %v5784_v48, %v14948_v54  ;;  %v5862_v36 = vadd.f32 %v5855_v53, %v14951_v25  ;;  %v14952_v48 = vld [vmem:[#allocation122_spill] sm:$0xff]  ;;  %v14954_v25 = vld [vmem:[#allocation133_spill] sm:$0xff] }
 0x8df   :  { %v5786_v51 = vpop.f32.mrf.mxu1  ;;  %v5857_v10 = vpop.f32.mrf.mxu0 }
 0x8e0   :  { %v8246_v43 = vmul.f32 -1.442695, %v5860_v59  ;;  %v5861_v16 = vadd.f32 %v5786_v51, %v14949_v50  ;;  %v5863_v56 = vadd.f32 %v5857_v10, %v14950_v32  ;;  %v12906_v59 = vpop.permute.xlu0 %6062 }
 0x8e1   :  { %vm6064_vm8 = vcmp.eq.s32.totalorder %v12906_v59, 1 }
 0x8e2   :  { %8963 = vpow2.f32 %v8246_v43  ;;  %v8247_v52 = vmul.f32 -1.442695, %v5861_v16  ;;  %v8248_v9 = vmul.f32 -1.442695, %v5863_v56  ;;  %v14953_v16 = vld [vmem:[#allocation124_spill] sm:$0xff] }
 0x8e4   :  { %8965 = vpow2.f32 %v8247_v52 }
 0x8e5   :  { %8967 = vpow2.f32 %v8248_v9 }
 0x8e6   :  { %8969 = vtanh.f32 %v5862_v36 }
 0x8ef   :  { %v8964_v30 = vpop.eup %8963 }
 0x8f0   :  { %v6013_v22 = vadd.f32 1.0, %v8964_v30  ;;  %v14955_v30 = vld [vmem:[#allocation132_spill] sm:$0xff] }
 0x8f1   :  { %v8966_v4 = vpop.eup %8965 }
 0x8f2   :  { %8971 = vrcp.f32 %v6013_v22  ;;  %v6019_v17 = vadd.f32 1.0, %v8966_v4  ;;  %v8968_v27 = vpop.eup %8967 }
 0x8f3   :  { %v8970_v28 = vpop.eup %8969  ;;  %v6026_v42 = vadd.f32 1.0, %v8968_v27 }
 0x8f4   :  { %8973 = vrcp.f32 %v6019_v17 }
 0x8f5   :  { %8975 = vrcp.f32 %v6026_v42 }
 0x8ff   :  { %v8972_v23 = vpop.eup %8971 }
 0x900   :  { %v6030_v40 = vmul.f32 %v8972_v23, %v8970_v28  ;;  %v5930_v45 = vpop.f32.mrf.mxu1  ;;  %v6001_v10 = vpop.f32.mrf.mxu0 }
 0x901   :  { %v8974_v63 = vpop.eup %8973  ;;  %v6006_v54 = vadd.f32 %v5930_v45, %v14952_v48  ;;  %v6008_v22 = vadd.f32 %v6001_v10, %v14955_v30  ;;  %v14970_v48 = vld [vmem:[#allocation158_spill] sm:$0xff]  ;;  %v14979_v10 = vld [vmem:[#allocation168_spill] sm:$0xff] }
 0x902   :  { %v6029_v51 = vmul.f32 %v8974_v63, %v12742_v21  ;;  %v5932_v43 = vpop.f32.mrf.mxu1  ;;  %v6003_v9 = vpop.f32.mrf.mxu0  ;;  %v14969_v63 = vld [vmem:[#allocation157_spill] sm:$0xff] }
 0x903   :  { %v8249_v50 = vmul.f32 -1.442695, %v6006_v54  ;;  %v6007_v53 = vadd.f32 %v5932_v43, %v14953_v16  ;;  %v6009_v36 = vadd.f32 %v6003_v9, %v14954_v25  ;;  %v8976_v17 = vpop.eup %8975  ;;  %v14971_v54 = vld [vmem:[#allocation159_spill] sm:$0xff]  ;;  %v14973_v43 = vld [vmem:[#allocation161_spill] sm:$0xff]  ;;  %v14981_v9 = vld [vmem:[#allocation170_spill] sm:$0xff] }
 0x904   :  { %v6031_v52 = vadd.f32 %v6030_v40, %v6029_v51  ;;  %v14972_v51 = vld [vmem:[#allocation160_spill] sm:$0xff]  ;;  %v14975_v16 = vld [vmem:[#allocation163_spill] sm:$0xff] }
 0x905   :  { %8977 = vpow2.f32 %v8249_v50  ;;  %v8250_v32 = vmul.f32 -1.442695, %v6007_v53  ;;  %v8251_v4 = vmul.f32 -1.442695, %v6009_v36  ;;  %v14974_v50 = vld [vmem:[#allocation162_spill] sm:$0xff]  ;;  %v14976_v53 = vld [vmem:[#allocation164_spill] sm:$0xff] }
 0x906   :  { %8979 = vtanh.f32 %v6031_v52  ;;  %v12914_v56 = vsel %vm6064_vm8, %v6031_v52, %v12742_v21  ;;  %v14977_v52 = vld [vmem:[#allocation165_spill] sm:$0xff]  ;;  %v14982_v25 = vld [vmem:[#allocation171_spill] sm:$0xff]  ;;  %v14983_v36 = vld [vmem:[#allocation172_spill] sm:$0xff] }
 0x907   :  { %8981 = vpow2.f32 %v8250_v32  ;;  %v14980_v32 = vld [vmem:[#allocation169_spill] sm:$0xff] }
 0x908   :  { %8983 = vtanh.f32 %v6008_v22  ;;  %v14985_v22 = vld [vmem:[#allocation179_spill] sm:$0xff] }
 0x909   :  { %8985 = vpow2.f32 %v8251_v4  ;;  %v13034_v4 = vld [vmem:[%s14546_s4 + $0x1d0] sm:$0xff] }
 0x912   :  { %v8978_v27 = vpop.eup %8977 }
 0x913   :  { %v8980_v28 = vpop.eup %8979  ;;  %v6037_v23 = vadd.f32 1.0, %v8978_v27  ;;  %v13042_v27 = vld [vmem:[%s14546_s4 + $0x1b8] sm:$0xff] }
 0x914   :  { %v8982_v40 = vpop.eup %8981  ;;  %v6033_v42 = vmul.f32 %v8980_v28, %v8976_v17  ;;  %v13038_v17 = vld [vmem:[%s14546_s4 + $0x1a8] sm:$0xff]  ;;  %v13046_v28 = vld [vmem:[%s14546_s4 + $0x1a0] sm:$0xff] }
 0x915   :  { %8987 = vrcp.f32 %v6037_v23  ;;  %v6043_v45 = vadd.f32 1.0, %v8982_v40  ;;  %v13050_v23 = vld [vmem:[%s14546_s4 + $0x1b0] sm:$0xff]  ;;  %v13054_v40 = vld [vmem:[%s14546_s4 + $0x188] sm:$0xff] }
 0x916   :  { %v12921_v21 = vsel %vm6064_vm8, %v6033_v42, %v12749_v0  ;;  %v14962_v0 = vld [vmem:[#allocation148_spill] sm:$0xff]  ;;  %v13058_v42 = vld [vmem:[%s14546_s4 + $0x198] sm:$0xff] }
 0x917   :  { %8989 = vrcp.f32 %v6043_v45  ;;  %6139 = vmatmul.mubr.f32.vlgmr.msra.gmra.mxu1 %v12921_v21  ;;  %6210 = vmatmul.mubr.f32.vlgmr.msra.gmra.mxu0 %v12921_v21  ;;  %v13062_v45 = vld [vmem:[%s14546_s4 + $0x180] sm:$0xff] }
 0x918   :  { %6221 = vmatpush1.msra.mxu1 %v12393_v37  ;;  %6292 = vmatpush1.msra.mxu0 %v12397_v31  ;;  %v8984_v37 = vpop.eup %8983 }
 0x919   :  { %6222 = vmatprep.subr.mxu1 %v12401_v62  ;;  %6293 = vmatprep.subr.mxu0 %v12405_v3  ;;  %v8986_v31 = vpop.eup %8985  ;;  %v14956_v62 = vld [vmem:[#allocation139_spill] sm:$0xff] }
 0x91a   :  { %6223 = vmatpush1.msra.mxu1 %v12409_v47  ;;  %6294 = vmatpush1.msra.mxu0 %v12413_v6  ;;  %v14957_v47 = vld [vmem:[#allocation141_spill] sm:$0xff]  ;;  %v14958_v6 = vld [vmem:[#allocation142_spill] sm:$0xff] }
 0x91b   :  { %6224 = vmatprep.subr.mxu1 %v12417_v24  ;;  %6295 = vmatprep.subr.mxu0 %v12421_v41  ;;  %v14959_v41 = vld [vmem:[#allocation144_spill] sm:$0xff] }
 0x91c   :  { %6225 = vmatpush1.msra.mxu1 %v12425_v38  ;;  %6296 = vmatpush1.msra.mxu0 %v12429_v8  ;;  %v6050_v8 = vadd.f32 1.0, %v8986_v31  ;;  %v13070_v31 = vld [vmem:[%s14546_s4 + $0x168] sm:$0xff] }
 0x91d   :  { %6226 = vmatprep.subr.mxu1 %v12433_v57  ;;  %6297 = vmatprep.subr.mxu0 %v12437_v26  ;;  %v14960_v57 = vld [vmem:[#allocation146_spill] sm:$0xff]  ;;  %v12951_v26 = vpop.permute.xlu1 %6069 }
 0x91e   :  { %6227 = vmatpush1.msra.mxu1 %v12441_v7  ;;  %6298 = vmatpush1.msra.mxu0 %v12445_v39  ;;  %v14961_v39 = vld [vmem:[#allocation147_spill] sm:$0xff]  ;;  %vm6071_vm9 = vcmp.eq.s32.totalorder %v12951_v26, 1  ;;  %8991 = vrcp.f32 %v6050_v8  ;;  %v13102_v8 = vld [vmem:[%s14546_s4 + $0x128] sm:$0xff] }
 0x91f   :  { %6228 = vmatprep.subr.mxu1 %v14859_v58  ;;  %6299 = vmatprep.subr.mxu0 %v14860_v19  ;;  %v14963_v58 = vld [vmem:[#allocation150_spill] sm:$0xff]  ;;  %14986 = vst [vmem:[#allocation61_spill] sm:$0xff] %v13102_v8  ;;  %v13301_v26 = vld [vmem:[%s14547_s11 + $0x1c8] sm:$0xff] }
 0x920   :  { %6229 = vmatpush1.msra.mxu1 %v14861_v60  ;;  %6300 = vmatpush1.msra.mxu0 %v14862_v55  ;;  %v14964_v60 = vld [vmem:[#allocation152_spill] sm:$0xff]  ;;  %v14965_v55 = vld [vmem:[#allocation153_spill] sm:$0xff] }
 0x921   :  { %6230 = vmatprep.subr.mxu1 %v14956_v62  ;;  %6301 = vmatprep.subr.mxu0 %v14864_v44  ;;  %v14966_v44 = vld [vmem:[#allocation154_spill] sm:$0xff] }
 0x922   :  { %v8988_v3 = vpop.eup %8987  ;;  %6231 = vmatpush1.msra.mxu1 %v14957_v47  ;;  %6302 = vmatpush1.msra.mxu0 %v14958_v6  ;;  %v13074_v62 = vld [vmem:[%s14546_s4 + $0x178] sm:$0xff]  ;;  %v13082_v47 = vld [vmem:[%s14546_s4 + $0x170] sm:$0xff]  ;;  %v13086_v6 = vld [vmem:[%s14546_s4 + $0x148] sm:$0xff] }
 0x923   :  { %v6054_v24 = vmul.f32 %v8988_v3, %v8984_v37  ;;  %6232 = vmatprep.subr.mxu1 %v14867_v61  ;;  %6303 = vmatprep.subr.mxu0 %v14959_v41  ;;  %v14967_v61 = vld [vmem:[#allocation155_spill] sm:$0xff]  ;;  %v13066_v37 = vld [vmem:[%s14546_s4 + $0x190] sm:$0xff] }
 0x924   :  { %v8990_v38 = vpop.eup %8989  ;;  %6233 = vmatpush1.msra.mxu1 %v14869_v1  ;;  %6304 = vmatpush1.msra.mxu0 %v14960_v57  ;;  %v14968_v1 = vld [vmem:[#allocation156_spill] sm:$0xff]  ;;  %v13106_v57 = vld [vmem:[%s14546_s4 + $0x138] sm:$0xff] }
 0x925   :  { %v6053_v7 = vmul.f32 %v8990_v38, %v12796_v14  ;;  %6234 = vmatprep.subr.mxu1 %v14961_v39  ;;  %6305 = vmatprep.subr.mxu0 %v14962_v0  ;;  %v13078_v3 = vld [vmem:[%s14546_s4 + $0x160] sm:$0xff]  ;;  %v13098_v38 = vld [vmem:[%s14546_s4 + $0x150] sm:$0xff]  ;;  %14987 = vst [vmem:[#allocation55_spill] sm:$0xff] %v13106_v57  ;;  %v13118_v0 = vld [vmem:[%s14546_s4 + $0x108] sm:$0xff] }
 0x926   :  { %6235 = vmatpush1.msra.mxu1 %v14872_v33  ;;  %6306 = vmatpush1.msra.mxu0 %v14963_v58  ;;  %v13094_v41 = vld [vmem:[%s14546_s4 + $0x140] sm:$0xff]  ;;  %v13114_v39 = vld [vmem:[%s14546_s4 + $0x130] sm:$0xff]  ;;  %14990 = vst [vmem:[#allocation135_spill] sm:$0xff] %v13118_v0  ;;  %v13122_v58 = vld [vmem:[%s14546_s4 + $0x118] sm:$0xff] }
 0x927   :  { %v6055_v19 = vadd.f32 %v6054_v24, %v6053_v7  ;;  %6236 = vmatprep.subr.mxu1 %v14964_v60  ;;  %6307 = vmatprep.subr.mxu0 %v14965_v55  ;;  %v13090_v24 = vld [vmem:[%s14546_s4 + $0x158] sm:$0xff]  ;;  %v13110_v7 = vld [vmem:[%s14546_s4 + $0x120] sm:$0xff]  ;;  %14989 = vst [vmem:[#allocation128_spill] sm:$0xff] %v13114_v39  ;;  %14991 = vst [vmem:[#allocation134_spill] sm:$0xff] %v13122_v58 }
 0x928   :  { %6237 = vmatpush1.msra.mxu1 %v14966_v44  ;;  %6308 = vmatpush1.msra.mxu0 %v14967_v61  ;;  %14988 = vst [vmem:[#allocation126_spill] sm:$0xff] %v13110_v7  ;;  %v13130_v60 = vld [vmem:[%s14546_s4 + $0x110] sm:$0xff]  ;;  %v13134_v55 = vld [vmem:[%s14546_s4 + $0xe8] sm:$0xff]  ;;  %v13138_v44 = vld [vmem:[%s14546_s4 + $0xf8] sm:$0xff] }
 0x929   :  { %6238 = vmatprep.subr.mxu1 %v14968_v1  ;;  %6309 = vmatprep.subr.mxu0 %v14969_v63  ;;  %8993 = vtanh.f32 %v6055_v19  ;;  %v12968_v33 = vsel %vm6071_vm9, %v6055_v19, %v12796_v14  ;;  %v14978_v14 = vld [vmem:[#allocation167_spill] sm:$0xff]  ;;  %14993 = vst [vmem:[#allocation98_spill] sm:$0xff] %v13130_v60  ;;  %14994 = vst [vmem:[#allocation137_spill] sm:$0xff] %v13134_v55  ;;  %v13146_v1 = vld [vmem:[%s14546_s4 + $0xf0] sm:$0xff] }
 0x92a   :  { %6239 = vmatpush1.msra.mxu1 %v14970_v48  ;;  %6310 = vmatpush1.msra.mxu0 %v14971_v54  ;;  %v13126_v19 = vld [vmem:[%s14546_s4 + $0x100] sm:$0xff]  ;;  %14995 = vst [vmem:[#allocation138_spill] sm:$0xff] %v13138_v44  ;;  %14997 = vst [vmem:[#allocation143_spill] sm:$0xff] %v13146_v1  ;;  %v13150_v63 = vld [vmem:[%s14546_s4 + $0xc8] sm:$0xff] }
 0x92b   :  { %6240 = vmatprep.subr.mxu1 %v14972_v51  ;;  %6311 = vmatprep.subr.mxu0 %v14973_v43  ;;  %v8992_v30 = vpop.eup %8991  ;;  %14992 = vst [vmem:[#allocation96_spill] sm:$0xff] %v13126_v19  ;;  %v13142_v61 = vld [vmem:[%s14546_s4 + $0xe0] sm:$0xff]  ;;  %14998 = vst [vmem:[#allocation145_spill] sm:$0xff] %v13150_v63  ;;  %v13154_v48 = vld [vmem:[%s14546_s4 + $0xd8] sm:$0xff] }
 0x92c   :  { %6241 = vmatpush1.msra.mxu1 %v14974_v50  ;;  %6312 = vmatpush1.msra.mxu0 %v14975_v16  ;;  %14996 = vst [vmem:[#allocation140_spill] sm:$0xff] %v13142_v61  ;;  %14999 = vst [vmem:[#allocation149_spill] sm:$0xff] %v13154_v48  ;;  %v13158_v54 = vld [vmem:[%s14546_s4 + $0xc0] sm:$0xff]  ;;  %v13162_v51 = vld [vmem:[%s14546_s4 + $0xd0] sm:$0xff] }
 0x92d   :  { %6242 = vmatprep.subr.mxu1 %v14976_v53  ;;  %6313 = vmatprep.subr.mxu0 %v14977_v52  ;;  %15000 = vst [vmem:[#allocation166_spill] sm:$0xff] %v13158_v54  ;;  %15001 = vst [vmem:[#allocation173_spill] sm:$0xff] %v13162_v51  ;;  %v13166_v43 = vld [vmem:[%s14546_s4 + $0xa8] sm:$0xff]  ;;  %v13170_v50 = vld [vmem:[%s14546_s4 + $0xb8] sm:$0xff] }
 0x92e   :  { %6243 = vmatpush1.msra.mxu1 %v14889_v15  ;;  %6314 = vmatpush1.msra.mxu0 %v14978_v14  ;;  %v14984_v15 = vld [vmem:[#allocation176_spill] sm:$0xff]  ;;  %15002 = vst [vmem:[#allocation174_spill] sm:$0xff] %v13166_v43  ;;  %15003 = vst [vmem:[#allocation175_spill] sm:$0xff] %v13170_v50  ;;  %v13178_v53 = vld [vmem:[%s14546_s4 + $0xb0] sm:$0xff] }
 0x92f   :  { %6244 = vmatprep.subr.mxu1 %v14979_v10  ;;  %6315 = vmatprep.subr.mxu0 %v14980_v32  ;;  %v13174_v16 = vld [vmem:[%s14546_s4 + $0xa0] sm:$0xff]  ;;  %15005 = vst [vmem:[#allocation178_spill] sm:$0xff] %v13178_v53  ;;  %v13182_v52 = vld [vmem:[%s14546_s4 + $0x88] sm:$0xff]  ;;  %v13186_v14 = vld [vmem:[%s14546_s4 + $0x98] sm:$0xff] }
 0x930   :  { %6245 = vmatpush1.msra.mxu1 %v14981_v9  ;;  %6316 = vmatpush1.msra.mxu0 %v14982_v25  ;;  %15004 = vst [vmem:[#allocation177_spill] sm:$0xff] %v13174_v16  ;;  %15006 = vst [vmem:[#allocation180_spill] sm:$0xff] %v13182_v52  ;;  %v13190_v10 = vld [vmem:[%s14546_s4 + $0x80] sm:$0xff]  ;;  %v13194_v32 = vld [vmem:[%s14546_s4 + $0x90] sm:$0xff] }
 0x931   :  { %6246 = vmatprep.subr.mxu1 %v14983_v36  ;;  %6317 = vmatprep.subr.mxu0 %v14896_v13  ;;  %15007 = vst [vmem:[#allocation68_spill] sm:$0xff] %v13186_v14  ;;  %15008 = vst [vmem:[#allocation56_spill] sm:$0xff] %v13190_v10  ;;  %v13198_v9 = vld [vmem:[%s14546_s4 + $0x68] sm:$0xff]  ;;  %v13202_v25 = vld [vmem:[%s14546_s4 + $0x78] sm:$0xff] }
 0x932   :  { %6247 = vmatpush1.msra.mxu1 %v14897_v20  ;;  %6318 = vmatpush1.msra.mxu0 %v14898_v18  ;;  %v12999_v18 = vld [vmem:[%s14546_s4 + $0x1e8] sm:$0xff]  ;;  %v13018_v20 = vld [vmem:[%s14546_s4 + $0x1f0] sm:$0xff]  ;;  %15009 = vst [vmem:[#allocation70_spill] sm:$0xff] %v13194_v32  ;;  %15010 = vst [vmem:[#allocation59_spill] sm:$0xff] %v13198_v9 }
 0x933   :  { %6248 = vmatprep.subr.mxu1 %v14984_v15  ;;  %6319 = vmatprep.subr.mxu0 %v12623_v49  ;;  %15011 = vst [vmem:[#allocation72_spill] sm:$0xff] %v13202_v25  ;;  %v13206_v36 = vld [vmem:[%s14546_s4 + $0x60] sm:$0xff]  ;;  %v13210_v15 = vld [vmem:[%s14546_s4 + $0x70] sm:$0xff] }
 0x934   :  { %6249 = vmatpush1.msra.mxu1 %v14900_v11  ;;  %6320 = vmatpush1.msra.mxu0 %v14901_v2  ;;  %v13022_v11 = vld [vmem:[%s14546_s4 + $0x1c8] sm:$0xff]  ;;  %v13030_v2 = vld [vmem:[%s14546_s4 + $0x1c0] sm:$0xff]  ;;  %15012 = vst [vmem:[#allocation42_spill] sm:$0xff] %v13206_v36  ;;  %15013 = vst [vmem:[#allocation74_spill] sm:$0xff] %v13210_v15 }
 0x935   :  { %6250 = vmatprep.subr.mxu1 %v14985_v22  ;;  %6321 = vmatprep.subr.mxu0 %v12639_v35  ;;  %v13003_v35 = vld [vmem:[%s14546_s4 + $0x1f8] sm:$0xff] }
 0x936   :  { %v8994_v13 = vpop.eup %8993  ;;  %6251 = vmatpush1.msra.mxu1 %v14903_v34  ;;  %6284 = vmatprep.mubr.f32.mxu1 %v14535_v46  ;;  %v13218_v22 = vld [vmem:[%s14546_s4 + $0x58] sm:$0xff] }
 0x937   :  { %6322 = vmatpush1.msra.mxu0 %v12648_v29  ;;  %6355 = vmatprep.mubr.f32.mxu0 %v14535_v46  ;;  %v6057_v49 = vmul.f32 %v8994_v13, %v8992_v30  ;;  %v13014_v29 = vld [vmem:[%s14546_s4 + $0x1e0] sm:$0xff]  ;;  %v13214_v30 = vld [vmem:[%s14546_s4 + $0x48] sm:$0xff]  ;;  %15015 = vst [vmem:[#allocation76_spill] sm:$0xff] %v13218_v22  ;;  %v15083_v59 = vld [vmem:[#allocation166_spill] sm:$0xff] }
 0x938   :  { %6418 = vmatprep.subr.mxu1 %v12999_v18  ;;  %6489 = vmatprep.subr.mxu0 %v13003_v35  ;;  %15014 = vst [vmem:[#allocation51_spill] sm:$0xff] %v13214_v30  ;;  %v13222_v13 = vld [vmem:[%s14546_s4 + $0x40] sm:$0xff] }
 0x939   :  { %v13009_v34 = vsel %vm6071_vm9, %v6057_v49, %v12831_v5  ;;  %v13026_v5 = vld [vmem:[%s14546_s4 + $0x1d8] sm:$0xff]  ;;  %15016 = vst [vmem:[#allocation43_spill] sm:$0xff] %v13222_v13  ;;  %v13226_v49 = vld [vmem:[%s14546_s4 + $0x50] sm:$0xff] }
 0x93a   :  { %6285 = vmatmul.mubr.f32.vlgmr.msra.gmra.mxu1 %v13009_v34  ;;  %6356 = vmatmul.mubr.f32.vlgmr.msra.gmra.mxu0 %v13009_v34  ;;  %15017 = vst [vmem:[#allocation78_spill] sm:$0xff] %v13226_v49 }
 0x93b   :  { %6419 = vmatpush1.msra.mxu1 %v13014_v29  ;;  %6490 = vmatpush1.msra.mxu0 %v13018_v20 }
 0x93c   :  { %6420 = vmatprep.subr.mxu1 %v13022_v11  ;;  %6491 = vmatprep.subr.mxu0 %v13026_v5 }
 0x93d   :  { %6421 = vmatpush1.msra.mxu1 %v13030_v2  ;;  %6492 = vmatpush1.msra.mxu0 %v13034_v4 }
 0x93e   :  { %6422 = vmatprep.subr.mxu1 %v13038_v17  ;;  %6493 = vmatprep.subr.mxu0 %v13042_v27 }
 0x93f   :  { %6423 = vmatpush1.msra.mxu1 %v13046_v28  ;;  %6494 = vmatpush1.msra.mxu0 %v13050_v23 }
 0x940   :  { %6424 = vmatprep.subr.mxu1 %v13054_v40  ;;  %6495 = vmatprep.subr.mxu0 %v13058_v42 }
 0x941   :  { %6425 = vmatpush1.msra.mxu1 %v13062_v45  ;;  %6496 = vmatpush1.msra.mxu0 %v13066_v37 }
 0x942   :  { %6426 = vmatprep.subr.mxu1 %v13070_v31  ;;  %6497 = vmatprep.subr.mxu0 %v13074_v62 }
 0x943   :  { %6427 = vmatpush1.msra.mxu1 %v13078_v3  ;;  %6498 = vmatpush1.msra.mxu0 %v13082_v47 }
 0x944   :  { %6428 = vmatprep.subr.mxu1 %v13086_v6  ;;  %6499 = vmatprep.subr.mxu0 %v13090_v24 }
 0x945   :  { %6429 = vmatpush1.msra.mxu1 %v13094_v41  ;;  %6500 = vmatpush1.msra.mxu0 %v13098_v38 }
 0x946   :  { %6430 = vmatprep.subr.mxu1 %v13102_v8  ;;  %6501 = vmatprep.subr.mxu0 %v13106_v57 }
 0x947   :  { %6431 = vmatpush1.msra.mxu1 %v13110_v7  ;;  %6502 = vmatpush1.msra.mxu0 %v13114_v39 }
 0x948   :  { %6432 = vmatprep.subr.mxu1 %v13118_v0  ;;  %6503 = vmatprep.subr.mxu0 %v13122_v58 }
 0x949   :  { %6433 = vmatpush1.msra.mxu1 %v13126_v19  ;;  %6504 = vmatpush1.msra.mxu0 %v13130_v60 }
 0x94a   :  { %6434 = vmatprep.subr.mxu1 %v13134_v55  ;;  %6505 = vmatprep.subr.mxu0 %v13138_v44 }
 0x94b   :  { %6435 = vmatpush1.msra.mxu1 %v13142_v61  ;;  %6506 = vmatpush1.msra.mxu0 %v13146_v1 }
 0x94c   :  { %6436 = vmatprep.subr.mxu1 %v13150_v63  ;;  %6507 = vmatprep.subr.mxu0 %v13154_v48 }
 0x94d   :  { %6437 = vmatpush1.msra.mxu1 %v13158_v54  ;;  %6508 = vmatpush1.msra.mxu0 %v13162_v51  ;;  %v15032_v54 = vld [vmem:[#allocation118_spill] sm:$0xff] }
 0x94e   :  { %6438 = vmatprep.subr.mxu1 %v13166_v43  ;;  %6509 = vmatprep.subr.mxu0 %v13170_v50 }
 0x94f   :  { %6439 = vmatpush1.msra.mxu1 %v13174_v16  ;;  %6510 = vmatpush1.msra.mxu0 %v13178_v53 }
 0x950   :  { %6440 = vmatprep.subr.mxu1 %v13182_v52  ;;  %6511 = vmatprep.subr.mxu0 %v13186_v14  ;;  %v15030_v52 = vld [vmem:[#allocation106_spill] sm:$0xff] }
 0x951   :  { %6441 = vmatpush1.msra.mxu1 %v13190_v10  ;;  %6512 = vmatpush1.msra.mxu0 %v13194_v32 }
 0x952   :  { %6442 = vmatprep.subr.mxu1 %v13198_v9  ;;  %6513 = vmatprep.subr.mxu0 %v13202_v25  ;;  %v15029_v9 = vld [vmem:[#allocation44_spill] sm:$0xff] }
 0x953   :  { %6443 = vmatpush1.msra.mxu1 %v13206_v36  ;;  %6514 = vmatpush1.msra.mxu0 %v13210_v15  ;;  %v13246_v15 = vld [vmem:[%s14546_s4 + $0x8] sm:$0xff] }
 0x954   :  { %6444 = vmatprep.subr.mxu1 %v13214_v30  ;;  %6515 = vmatprep.subr.mxu0 %v13218_v22  ;;  %v13234_v30 = vld [vmem:[%s14546_s4 + $0x38] sm:$0xff]  ;;  %v13238_v22 = vld [vmem:[%s14546_s4 + $0x20] sm:$0xff]  ;;  %15022 = vst [vmem:[#allocation58_spill] sm:$0xff] %v13246_v15 }
 0x955   :  { %6445 = vmatpush1.msra.mxu1 %v13222_v13  ;;  %6516 = vmatpush1.msra.mxu0 %v13226_v49  ;;  %15019 = vst [vmem:[#allocation80_spill] sm:$0xff] %v13234_v30  ;;  %15020 = vst [vmem:[#allocation48_spill] sm:$0xff] %v13238_v22  ;;  %v13242_v13 = vld [vmem:[%s14546_s4 + $0x30] sm:$0xff]  ;;  %v13250_v49 = vld [vmem:[%s14546_s4 + $0x18] sm:$0xff] }
 0x956   :  { %6446 = vmatprep.subr.mxu1 %v13230_v12  ;;  %6517 = vmatprep.subr.mxu0 %v13234_v30  ;;  %15021 = vst [vmem:[#allocation82_spill] sm:$0xff] %v13242_v13  ;;  %15023 = vst [vmem:[#allocation84_spill] sm:$0xff] %v13250_v49  ;;  %v13254_v12 = vld [vmem:[%s14546_s4] sm:$0xff]  ;;  %v13258_v30 = vld [vmem:[%s14546_s4 + $0x10] sm:$0xff] }
 0x957   :  { %6447 = vmatpush1.msra.mxu1 %v13238_v22  ;;  %6518 = vmatpush1.msra.mxu0 %v13242_v13  ;;  %15024 = vst [vmem:[#allocation62_spill] sm:$0xff] %v13254_v12  ;;  %15025 = vst [vmem:[#allocation86_spill] sm:$0xff] %v13258_v30  ;;  %v13264_v13 = vld [vmem:[%s14547_s11 + $0x1e8] sm:$0xff]  ;;  %v15028_v22 = vld [vmem:[#allocation47_spill] sm:$0xff] }
 0x958   :  { %6448 = vmatprep.subr.mxu1 %v13246_v15  ;;  %6519 = vmatprep.subr.mxu0 %v13250_v49  ;;  %15026 = vst [vmem:[#allocation40_spill] sm:$0xff] %v13264_v13  ;;  %v13268_v15 = vld [vmem:[%s14547_s11 + $0x1f8] sm:$0xff] }
 0x959   :  { %6449 = vmatpush1.msra.mxu1 %v13254_v12  ;;  %6520 = vmatpush1.msra.mxu0 %v13258_v30  ;;  %15027 = vst [vmem:[#allocation88_spill] sm:$0xff] %v13268_v15 }
 0x95a   :  { %6482 = vmatprep.mubr.f32.mxu1 %v14535_v46  ;;  %6553 = vmatprep.mubr.f32.mxu0 %v14535_v46 }
 0x95b   :  { %6564 = vmatprep.subr.mxu1 %v13264_v13  ;;  %6635 = vmatprep.subr.mxu0 %v13268_v15  ;;  %v15031_v13 = vld [vmem:[#allocation104_spill] sm:$0xff] }
 0x9d7   :  { %v6140_v49 = vpop.f32.mrf.mxu1  ;;  %v6211_v30 = vpop.f32.mrf.mxu0 }
 0x9d8   :  { %v6216_v36 = vadd.f32 %v6140_v49, %v15028_v22  ;;  %v6218_v50 = vadd.f32 %v6211_v30, %v15031_v13 }
 0x9d9   :  { %v6142_v12 = vpop.f32.mrf.mxu1  ;;  %v6213_v14 = vpop.f32.mrf.mxu0 }
 0x9da   :  { %v8252_v25 = vmul.f32 -1.442695, %v6216_v36  ;;  %v6217_v32 = vadd.f32 %v6142_v12, %v15029_v9  ;;  %v6219_v53 = vadd.f32 %v6213_v14, %v15030_v52 }
 0x9dc   :  { %8995 = vpow2.f32 %v8252_v25  ;;  %v8253_v10 = vmul.f32 -1.442695, %v6217_v32  ;;  %v8254_v16 = vmul.f32 -1.442695, %v6219_v53 }
 0x9de   :  { %8997 = vpow2.f32 %v8253_v10 }
 0x9df   :  { %8999 = vpow2.f32 %v8254_v16 }
 0x9e0   :  { %9001 = vtanh.f32 %v6218_v50 }
 0x9e9   :  { %v8996_v43 = vpop.eup %8995 }
 0x9ea   :  { %v6369_v51 = vadd.f32 1.0, %v8996_v43  ;;  %v15033_v43 = vld [vmem:[#allocation120_spill] sm:$0xff] }
 0x9eb   :  { %v8998_v15 = vpop.eup %8997 }
 0x9ec   :  { %9003 = vrcp.f32 %v6369_v51  ;;  %v6375_v22 = vadd.f32 1.0, %v8998_v15  ;;  %v9000_v36 = vpop.eup %8999 }
 0x9ed   :  { %v9002_v12 = vpop.eup %9001  ;;  %v6382_v32 = vadd.f32 1.0, %v9000_v36 }
 0x9ee   :  { %9005 = vrcp.f32 %v6375_v22 }
 0x9ef   :  { %9007 = vrcp.f32 %v6382_v32 }
 0x9f9   :  { %v9004_v9 = vpop.eup %9003 }
 0x9fa   :  { %v6386_v25 = vmul.f32 %v9004_v9, %v9002_v12  ;;  %v6286_v10 = vpop.f32.mrf.mxu1  ;;  %v6357_v51 = vpop.f32.mrf.mxu0  ;;  %v15035_v12 = vld [vmem:[#allocation130_spill] sm:$0xff] }
 0x9fb   :  { %v9006_v49 = vpop.eup %9005  ;;  %v6362_v52 = vadd.f32 %v6286_v10, %v15032_v54  ;;  %v15034_v54 = vld [vmem:[#allocation131_spill] sm:$0xff]  ;;  %v6364_v9 = vadd.f32 %v6357_v51, %v15035_v12  ;;  %v13313_v51 = vld [vmem:[%s14547_s11 + $0x1d0] sm:$0xff]  ;;  %v13333_v12 = vld [vmem:[%s14547_s11 + $0x188] sm:$0xff] }
 0x9fc   :  { %v6385_v53 = vmul.f32 %v9006_v49, %v12914_v56  ;;  %v6288_v14 = vpop.f32.mrf.mxu1  ;;  %v6359_v22 = vpop.f32.mrf.mxu0  ;;  %15036 = vst [vmem:[#allocation64_spill] sm:$0xff] %v13333_v12 }
 0x9fd   :  { %v8255_v30 = vmul.f32 -1.442695, %v6362_v52  ;;  %v6363_v16 = vadd.f32 %v6288_v14, %v15033_v43  ;;  %v6365_v36 = vadd.f32 %v6359_v22, %v15034_v54  ;;  %v9008_v49 = vpop.eup %9007  ;;  %v13293_v43 = vld [vmem:[%s14547_s11 + $0x1e0] sm:$0xff]  ;;  %v13321_v22 = vld [vmem:[%s14547_s11 + $0x1b8] sm:$0xff] }
 0x9fe   :  { %v6387_v13 = vadd.f32 %v6386_v25, %v6385_v53  ;;  %v13325_v54 = vld [vmem:[%s14547_s11 + $0x1a0] sm:$0xff] }
 0x9ff   :  { %9009 = vpow2.f32 %v8255_v30  ;;  %v8256_v50 = vmul.f32 -1.442695, %v6363_v16  ;;  %v8257_v10 = vmul.f32 -1.442695, %v6365_v36  ;;  %v13297_v16 = vld [vmem:[%s14547_s11 + $0x1f0] sm:$0xff] }
 0xa00   :  { %9011 = vtanh.f32 %v6387_v13  ;;  %v13281_v15 = vsel %vm6071_vm9, %v6387_v13, %v12914_v56  ;;  %v13309_v13 = vld [vmem:[%s14547_s11 + $0x1c0] sm:$0xff]  ;;  %v13329_v36 = vld [vmem:[%s14547_s11 + $0x1b0] sm:$0xff] }
 0xa01   :  { %9013 = vpow2.f32 %v8256_v50  ;;  %v13317_v50 = vld [vmem:[%s14547_s11 + $0x1a8] sm:$0xff] }
 0xa02   :  { %9015 = vtanh.f32 %v6364_v9  ;;  %v13337_v9 = vld [vmem:[%s14547_s11 + $0x198] sm:$0xff] }
 0xa03   :  { %9017 = vpow2.f32 %v8257_v10  ;;  %15037 = vst [vmem:[#allocation90_spill] sm:$0xff] %v13337_v9  ;;  %v13341_v10 = vld [vmem:[%s14547_s11 + $0x180] sm:$0xff] }
 0xa04   :  { %15038 = vst [vmem:[#allocation65_spill] sm:$0xff] %v13341_v10 }
 0xa0c   :  { %v9010_v25 = vpop.eup %9009 }
 0xa0d   :  { %v9012_v32 = vpop.eup %9011  ;;  %v6393_v52 = vadd.f32 1.0, %v9010_v25  ;;  %v13349_v25 = vld [vmem:[%s14547_s11 + $0x168] sm:$0xff] }
 0xa0e   :  { %v9014_v53 = vpop.eup %9013  ;;  %v6389_v56 = vmul.f32 %v9012_v32, %v9008_v49  ;;  %v13345_v49 = vld [vmem:[%s14547_s11 + $0x190] sm:$0xff]  ;;  %15040 = vst [vmem:[#allocation69_spill] sm:$0xff] %v13349_v25  ;;  %v13353_v32 = vld [vmem:[%s14547_s11 + $0x178] sm:$0xff] }
 0xa0f   :  { %9019 = vrcp.f32 %v6393_v52  ;;  %v6399_v14 = vadd.f32 1.0, %v9014_v53  ;;  %15039 = vst [vmem:[#allocation67_spill] sm:$0xff] %v13345_v49  ;;  %15041 = vst [vmem:[#allocation94_spill] sm:$0xff] %v13353_v32  ;;  %v9016_v52 = vpop.eup %9015  ;;  %v13357_v53 = vld [vmem:[%s14547_s11 + $0x160] sm:$0xff] }
 0xa10   :  { %v13288_v30 = vsel %vm6071_vm9, %v6389_v56, %v12921_v21  ;;  %v13305_v21 = vld [vmem:[%s14547_s11 + $0x1d8] sm:$0xff]  ;;  %15042 = vst [vmem:[#allocation71_spill] sm:$0xff] %v13357_v53  ;;  %v13361_v56 = vld [vmem:[%s14547_s11 + $0x170] sm:$0xff] }
 0xa11   :  { %9021 = vrcp.f32 %v6399_v14  ;;  %6483 = vmatmul.mubr.f32.vlgmr.msra.gmra.mxu1 %v13288_v30  ;;  %6554 = vmatmul.mubr.f32.vlgmr.msra.gmra.mxu0 %v13288_v30  ;;  %15043 = vst [vmem:[#allocation73_spill] sm:$0xff] %v13361_v56  ;;  %v9018_v14 = vpop.eup %9017 }
 0xa12   :  { %6565 = vmatpush1.msra.mxu1 %v13293_v43  ;;  %6636 = vmatpush1.msra.mxu0 %v13297_v16 }
 0xa13   :  { %6566 = vmatprep.subr.mxu1 %v13301_v26  ;;  %6637 = vmatprep.subr.mxu0 %v13305_v21 }
 0xa14   :  { %6567 = vmatpush1.msra.mxu1 %v13309_v13  ;;  %6638 = vmatpush1.msra.mxu0 %v13313_v51 }
 0xa15   :  { %6568 = vmatprep.subr.mxu1 %v13317_v50  ;;  %6639 = vmatprep.subr.mxu0 %v13321_v22 }
 0xa16   :  { %6569 = vmatpush1.msra.mxu1 %v13325_v54  ;;  %6640 = vmatpush1.msra.mxu0 %v13329_v36 }
 0xa17   :  { %6570 = vmatprep.subr.mxu1 %v13333_v12  ;;  %6641 = vmatprep.subr.mxu0 %v13337_v9  ;;  %v13381_v9 = vld [vmem:[%s14547_s11 + $0x128] sm:$0xff]  ;;  %v6406_v12 = vadd.f32 1.0, %v9018_v14  ;;  %v13406_v14 = vld [vmem:[%s14547_s11 + $0x100] sm:$0xff] }
 0xa18   :  { %6571 = vmatpush1.msra.mxu1 %v13341_v10  ;;  %6642 = vmatpush1.msra.mxu0 %v13345_v49  ;;  %v13365_v49 = vld [vmem:[%s14547_s11 + $0x148] sm:$0xff]  ;;  %v13373_v10 = vld [vmem:[%s14547_s11 + $0x140] sm:$0xff]  ;;  %15053 = vst [vmem:[#allocation85_spill] sm:$0xff] %v13406_v14 }
 0xa19   :  { %6572 = vmatprep.subr.mxu1 %v13349_v25  ;;  %6643 = vmatprep.subr.mxu0 %v13353_v32  ;;  %15044 = vst [vmem:[#allocation97_spill] sm:$0xff] %v13365_v49  ;;  %v13369_v25 = vld [vmem:[%s14547_s11 + $0x158] sm:$0xff]  ;;  %15046 = vst [vmem:[#allocation99_spill] sm:$0xff] %v13373_v10  ;;  %9023 = vrcp.f32 %v6406_v12 }
 0xa1a   :  { %6573 = vmatpush1.msra.mxu1 %v13357_v53  ;;  %6644 = vmatpush1.msra.mxu0 %v13361_v56  ;;  %15045 = vst [vmem:[#allocation75_spill] sm:$0xff] %v13369_v25  ;;  %v13377_v53 = vld [vmem:[%s14547_s11 + $0x150] sm:$0xff] }
 0xa1b   :  { %6574 = vmatprep.subr.mxu1 %v13365_v49  ;;  %6645 = vmatprep.subr.mxu0 %v13369_v25  ;;  %15047 = vst [vmem:[#allocation77_spill] sm:$0xff] %v13377_v53  ;;  %v13385_v49 = vld [vmem:[%s14547_s11 + $0x138] sm:$0xff] }
 0xa1c   :  { %v9020_v32 = vpop.eup %9019  ;;  %6575 = vmatpush1.msra.mxu1 %v13373_v10  ;;  %6646 = vmatpush1.msra.mxu0 %v13377_v53  ;;  %15048 = vst [vmem:[#allocation100_spill] sm:$0xff] %v13385_v49  ;;  %v13389_v10 = vld [vmem:[%s14547_s11 + $0x120] sm:$0xff]  ;;  %v13393_v53 = vld [vmem:[%s14547_s11 + $0x130] sm:$0xff] }
 0xa1d   :  { %v6410_v56 = vmul.f32 %v9020_v32, %v9016_v52  ;;  %6576 = vmatprep.subr.mxu1 %v13381_v9  ;;  %6647 = vmatprep.subr.mxu0 %v13385_v49  ;;  %15049 = vst [vmem:[#allocation79_spill] sm:$0xff] %v13389_v10  ;;  %15050 = vst [vmem:[#allocation101_spill] sm:$0xff] %v13393_v53  ;;  %v13398_v52 = vld [vmem:[%s14547_s11 + $0x108] sm:$0xff]  ;;  %v13402_v49 = vld [vmem:[%s14547_s11 + $0x118] sm:$0xff] }
 0xa1e   :  { %v9022_v25 = vpop.eup %9021  ;;  %6577 = vmatpush1.msra.mxu1 %v13389_v10  ;;  %6648 = vmatpush1.msra.mxu0 %v13393_v53  ;;  %15051 = vst [vmem:[#allocation81_spill] sm:$0xff] %v13398_v52  ;;  %15052 = vst [vmem:[#allocation83_spill] sm:$0xff] %v13402_v49  ;;  %v13410_v10 = vld [vmem:[%s14547_s11 + $0x110] sm:$0xff]  ;;  %v13414_v53 = vld [vmem:[%s14547_s11 + $0xe8] sm:$0xff] }
 0xa1f   :  { %v6409_v32 = vmul.f32 %v9022_v25, %v12968_v33  ;;  %6578 = vmatprep.subr.mxu1 %v13398_v52  ;;  %6649 = vmatprep.subr.mxu0 %v13402_v49  ;;  %15054 = vst [vmem:[#allocation87_spill] sm:$0xff] %v13414_v53  ;;  %v13418_v52 = vld [vmem:[%s14547_s11 + $0xf8] sm:$0xff]  ;;  %v13422_v49 = vld [vmem:[%s14547_s11 + $0xe0] sm:$0xff] }
 0xa20   :  { %6579 = vmatpush1.msra.mxu1 %v13406_v14  ;;  %6650 = vmatpush1.msra.mxu0 %v13410_v10  ;;  %15055 = vst [vmem:[#allocation89_spill] sm:$0xff] %v13418_v52  ;;  %15056 = vst [vmem:[#allocation91_spill] sm:$0xff] %v13422_v49  ;;  %v13426_v14 = vld [vmem:[%s14547_s11 + $0xf0] sm:$0xff] }
 0xa21   :  { %v6411_v25 = vadd.f32 %v6410_v56, %v6409_v32  ;;  %6580 = vmatprep.subr.mxu1 %v13414_v53  ;;  %6651 = vmatprep.subr.mxu0 %v13418_v52  ;;  %15057 = vst [vmem:[#allocation92_spill] sm:$0xff] %v13426_v14  ;;  %v13430_v56 = vld [vmem:[%s14547_s11 + $0xc8] sm:$0xff]  ;;  %v13434_v32 = vld [vmem:[%s14547_s11 + $0xd8] sm:$0xff]  ;;  %v13539_v53 = vld [vmem:[%s14547_s11] sm:$0xff] }
 0xa22   :  { %6581 = vmatpush1.msra.mxu1 %v13422_v49  ;;  %6652 = vmatpush1.msra.mxu0 %v13426_v14  ;;  %15058 = vst [vmem:[#allocation93_spill] sm:$0xff] %v13430_v56  ;;  %15059 = vst [vmem:[#allocation41_spill] sm:$0xff] %v13434_v32  ;;  %v13443_v49 = vld [vmem:[%s14547_s11 + $0xc0] sm:$0xff]  ;;  %v13447_v14 = vld [vmem:[%s14547_s11 + $0xd0] sm:$0xff] }
 0xa23   :  { %6582 = vmatprep.subr.mxu1 %v13430_v56  ;;  %6653 = vmatprep.subr.mxu0 %v13434_v32  ;;  %9025 = vtanh.f32 %v6411_v25  ;;  %v13440_v12 = vsel %vm6064_vm8, %v6411_v25, %v12968_v33  ;;  %15060 = vst [vmem:[#allocation60_spill] sm:$0xff] %v13443_v49  ;;  %15061 = vst [vmem:[#allocation102_spill] sm:$0xff] %v13447_v14  ;;  %v13451_v56 = vld [vmem:[%s14547_s11 + $0xa8] sm:$0xff]  ;;  %v13455_v32 = vld [vmem:[%s14547_s11 + $0xb8] sm:$0xff] }
 0xa24   :  { %6583 = vmatpush1.msra.mxu1 %v13443_v49  ;;  %6654 = vmatpush1.msra.mxu0 %v13447_v14  ;;  %15062 = vst [vmem:[#allocation66_spill] sm:$0xff] %v13451_v56  ;;  %15063 = vst [vmem:[#allocation122_spill] sm:$0xff] %v13455_v32  ;;  %v13459_v33 = vld [vmem:[%s14547_s11 + $0xa0] sm:$0xff]  ;;  %v13463_v25 = vld [vmem:[%s14547_s11 + $0xb0] sm:$0xff] }
 0xa25   :  { %6584 = vmatprep.subr.mxu1 %v13451_v56  ;;  %6655 = vmatprep.subr.mxu0 %v13455_v32  ;;  %15064 = vst [vmem:[#allocation124_spill] sm:$0xff] %v13459_v33  ;;  %15065 = vst [vmem:[#allocation133_spill] sm:$0xff] %v13463_v25  ;;  %v13467_v14 = vld [vmem:[%s14547_s11 + $0x88] sm:$0xff]  ;;  %v13471_v56 = vld [vmem:[%s14547_s11 + $0x98] sm:$0xff] }
 0xa26   :  { %6585 = vmatpush1.msra.mxu1 %v13459_v33  ;;  %6656 = vmatpush1.msra.mxu0 %v13463_v25  ;;  %15066 = vst [vmem:[#allocation132_spill] sm:$0xff] %v13467_v14  ;;  %15067 = vst [vmem:[#allocation139_spill] sm:$0xff] %v13471_v56  ;;  %v13475_v32 = vld [vmem:[%s14547_s11 + $0x80] sm:$0xff]  ;;  %v13479_v33 = vld [vmem:[%s14547_s11 + $0x90] sm:$0xff] }
 0xa27   :  { %6586 = vmatprep.subr.mxu1 %v13467_v14  ;;  %6657 = vmatprep.subr.mxu0 %v13471_v56  ;;  %15068 = vst [vmem:[#allocation141_spill] sm:$0xff] %v13475_v32  ;;  %15069 = vst [vmem:[#allocation142_spill] sm:$0xff] %v13479_v33  ;;  %v13483_v25 = vld [vmem:[%s14547_s11 + $0x68] sm:$0xff]  ;;  %v13487_v14 = vld [vmem:[%s14547_s11 + $0x78] sm:$0xff] }
 0xa28   :  { %6587 = vmatpush1.msra.mxu1 %v13475_v32  ;;  %6658 = vmatpush1.msra.mxu0 %v13479_v33  ;;  %15070 = vst [vmem:[#allocation144_spill] sm:$0xff] %v13483_v25  ;;  %15071 = vst [vmem:[#allocation146_spill] sm:$0xff] %v13487_v14  ;;  %v13491_v56 = vld [vmem:[%s14547_s11 + $0x60] sm:$0xff]  ;;  %v13495_v32 = vld [vmem:[%s14547_s11 + $0x70] sm:$0xff] }
 0xa29   :  { %6588 = vmatprep.subr.mxu1 %v13483_v25  ;;  %6659 = vmatprep.subr.mxu0 %v13487_v14  ;;  %15072 = vst [vmem:[#allocation147_spill] sm:$0xff] %v13491_v56  ;;  %15073 = vst [vmem:[#allocation148_spill] sm:$0xff] %v13495_v32  ;;  %v13499_v33 = vld [vmem:[%s14547_s11 + $0x48] sm:$0xff]  ;;  %v13503_v25 = vld [vmem:[%s14547_s11 + $0x58] sm:$0xff] }
 0xa2a   :  { %6589 = vmatpush1.msra.mxu1 %v13491_v56  ;;  %6660 = vmatpush1.msra.mxu0 %v13495_v32  ;;  %15074 = vst [vmem:[#allocation150_spill] sm:$0xff] %v13499_v33  ;;  %15075 = vst [vmem:[#allocation152_spill] sm:$0xff] %v13503_v25  ;;  %v13507_v14 = vld [vmem:[%s14547_s11 + $0x40] sm:$0xff]  ;;  %v13511_v56 = vld [vmem:[%s14547_s11 + $0x50] sm:$0xff] }
 0xa2b   :  { %6590 = vmatprep.subr.mxu1 %v13499_v33  ;;  %6661 = vmatprep.subr.mxu0 %v13503_v25  ;;  %15076 = vst [vmem:[#allocation153_spill] sm:$0xff] %v13507_v14  ;;  %15077 = vst [vmem:[#allocation154_spill] sm:$0xff] %v13511_v56  ;;  %v13515_v32 = vld [vmem:[%s14547_s11 + $0x28] sm:$0xff]  ;;  %v13519_v33 = vld [vmem:[%s14547_s11 + $0x38] sm:$0xff] }
 0xa2c   :  { %6591 = vmatpush1.msra.mxu1 %v13507_v14  ;;  %6662 = vmatpush1.msra.mxu0 %v13511_v56  ;;  %15078 = vst [vmem:[#allocation155_spill] sm:$0xff] %v13515_v32  ;;  %v13523_v25 = vld [vmem:[%s14547_s11 + $0x20] sm:$0xff]  ;;  %v13527_v49 = vld [vmem:[%s14547_s11 + $0x30] sm:$0xff]  ;;  %v9024_v14 = vpop.eup %9023  ;;  %v13531_v52 = vld [vmem:[%s14547_s11 + $0x8] sm:$0xff] }
 0xa2d   :  { %6592 = vmatprep.subr.mxu1 %v13515_v32  ;;  %6663 = vmatprep.subr.mxu0 %v13519_v33  ;;  %15079 = vst [vmem:[#allocation156_spill] sm:$0xff] %v13523_v25  ;;  %15080 = vst [vmem:[#allocation157_spill] sm:$0xff] %v13527_v49  ;;  %v13535_v56 = vld [vmem:[%s14547_s11 + $0x18] sm:$0xff] }
 0xa2e   :  { %6593 = vmatpush1.msra.mxu1 %v13523_v25  ;;  %6664 = vmatpush1.msra.mxu0 %v13527_v49  ;;  %15081 = vst [vmem:[#allocation158_spill] sm:$0xff] %v13531_v52  ;;  %15082 = vst [vmem:[#allocation159_spill] sm:$0xff] %v13535_v56  ;;  %v13544_v25 = vld [vmem:[%s14547_s11 + $0x10] sm:$0xff] }
 0xa2f   :  { %6594 = vmatprep.subr.mxu1 %v13531_v52  ;;  %6665 = vmatprep.subr.mxu0 %v13535_v56 }
 0xa30   :  { %v9026_v32 = vpop.eup %9025  ;;  %6595 = vmatpush1.msra.mxu1 %v13539_v53  ;;  %6628 = vmatprep.mubr.f32.mxu1 %v14535_v46 }
 0xa31   :  { %6666 = vmatpush1.msra.mxu0 %v13544_v25  ;;  %6699 = vmatprep.mubr.f32.mxu0 %v14535_v46  ;;  %v6413_v49 = vmul.f32 %v9026_v32, %v9024_v14  ;;  %v15086_v14 = vld [vmem:[#allocation175_spill] sm:$0xff]  ;;  %v15087_v32 = vld [vmem:[#allocation177_spill] sm:$0xff] }
 0xa32   :  { %6762 = vmatprep.subr.mxu1 %v12999_v18  ;;  %6833 = vmatprep.subr.mxu0 %v13003_v35 }
 0xa33   :  { %v13553_v56 = vsel %vm6064_vm8, %v6413_v49, %v13009_v34  ;;  %v15084_v34 = vld [vmem:[#allocation173_spill] sm:$0xff]  ;;  %v15085_v49 = vld [vmem:[#allocation174_spill] sm:$0xff] }
 0xa34   :  { %6629 = vmatmul.mubr.f32.vlgmr.msra.gmra.mxu1 %v13553_v56  ;;  %6700 = vmatmul.mubr.f32.vlgmr.msra.gmra.mxu0 %v13553_v56 }
 0xa35   :  { %6763 = vmatpush1.msra.mxu1 %v13014_v29  ;;  %6834 = vmatpush1.msra.mxu0 %v13018_v20 }
 0xa36   :  { %6764 = vmatprep.subr.mxu1 %v13022_v11  ;;  %6835 = vmatprep.subr.mxu0 %v13026_v5 }
 0xa37   :  { %6765 = vmatpush1.msra.mxu1 %v13030_v2  ;;  %6836 = vmatpush1.msra.mxu0 %v13034_v4 }
 0xa38   :  { %6766 = vmatprep.subr.mxu1 %v13038_v17  ;;  %6837 = vmatprep.subr.mxu0 %v13042_v27 }
 0xa39   :  { %6767 = vmatpush1.msra.mxu1 %v13046_v28  ;;  %6838 = vmatpush1.msra.mxu0 %v13050_v23 }
 0xa3a   :  { %6768 = vmatprep.subr.mxu1 %v13054_v40  ;;  %6839 = vmatprep.subr.mxu0 %v13058_v42 }
 0xa3b   :  { %6769 = vmatpush1.msra.mxu1 %v13062_v45  ;;  %6840 = vmatpush1.msra.mxu0 %v13066_v37 }
 0xa3c   :  { %6770 = vmatprep.subr.mxu1 %v13070_v31  ;;  %6841 = vmatprep.subr.mxu0 %v13074_v62 }
 0xa3d   :  { %6771 = vmatpush1.msra.mxu1 %v13078_v3  ;;  %6842 = vmatpush1.msra.mxu0 %v13082_v47 }
 0xa3e   :  { %6772 = vmatprep.subr.mxu1 %v13086_v6  ;;  %6843 = vmatprep.subr.mxu0 %v13090_v24 }
 0xa3f   :  { %6773 = vmatpush1.msra.mxu1 %v13094_v41  ;;  %6844 = vmatpush1.msra.mxu0 %v13098_v38 }
 0xa40   :  { %6774 = vmatprep.subr.mxu1 %v13102_v8  ;;  %6845 = vmatprep.subr.mxu0 %v13106_v57  ;;  %v15115_v8 = vld [vmem:[#allocation114_spill] sm:$0xff] }
 0xa41   :  { %6775 = vmatpush1.msra.mxu1 %v13110_v7  ;;  %6846 = vmatpush1.msra.mxu0 %v13114_v39  ;;  %v15114_v39 = vld [vmem:[#allocation108_spill] sm:$0xff] }
 0xa42   :  { %6776 = vmatprep.subr.mxu1 %v13118_v0  ;;  %6847 = vmatprep.subr.mxu0 %v13122_v58 }
 0xa43   :  { %6777 = vmatpush1.msra.mxu1 %v13126_v19  ;;  %6848 = vmatpush1.msra.mxu0 %v13130_v60  ;;  %v15113_v19 = vld [vmem:[#allocation109_spill] sm:$0xff] }
 0xa44   :  { %6778 = vmatprep.subr.mxu1 %v13134_v55  ;;  %6849 = vmatprep.subr.mxu0 %v13138_v44  ;;  %v15088_v55 = vld [vmem:[#allocation178_spill] sm:$0xff]  ;;  %v15089_v44 = vld [vmem:[#allocation180_spill] sm:$0xff] }
 0xa45   :  { %6779 = vmatpush1.msra.mxu1 %v13142_v61  ;;  %6850 = vmatpush1.msra.mxu0 %v13146_v1  ;;  %v15090_v61 = vld [vmem:[#allocation68_spill] sm:$0xff] }
 0xa46   :  { %6780 = vmatprep.subr.mxu1 %v13150_v63  ;;  %6851 = vmatprep.subr.mxu0 %v13154_v48  ;;  %v15091_v1 = vld [vmem:[#allocation56_spill] sm:$0xff]  ;;  %v15092_v63 = vld [vmem:[#allocation70_spill] sm:$0xff]  ;;  %v15093_v48 = vld [vmem:[#allocation59_spill] sm:$0xff] }
 0xa47   :  { %6781 = vmatpush1.msra.mxu1 %v15083_v59  ;;  %6852 = vmatpush1.msra.mxu0 %v15084_v34  ;;  %v15094_v59 = vld [vmem:[#allocation72_spill] sm:$0xff]  ;;  %v15095_v34 = vld [vmem:[#allocation42_spill] sm:$0xff] }
 0xa48   :  { %6782 = vmatprep.subr.mxu1 %v15085_v49  ;;  %6853 = vmatprep.subr.mxu0 %v15086_v14  ;;  %v15096_v49 = vld [vmem:[#allocation74_spill] sm:$0xff]  ;;  %v15097_v14 = vld [vmem:[#allocation51_spill] sm:$0xff] }
 0xa49   :  { %6783 = vmatpush1.msra.mxu1 %v15087_v32  ;;  %6854 = vmatpush1.msra.mxu0 %v15088_v55  ;;  %v15098_v32 = vld [vmem:[#allocation76_spill] sm:$0xff]  ;;  %v15099_v55 = vld [vmem:[#allocation43_spill] sm:$0xff] }
 0xa4a   :  { %6784 = vmatprep.subr.mxu1 %v15089_v44  ;;  %6855 = vmatprep.subr.mxu0 %v15090_v61  ;;  %v15100_v44 = vld [vmem:[#allocation78_spill] sm:$0xff]  ;;  %v15101_v61 = vld [vmem:[#allocation52_spill] sm:$0xff] }
 0xa4b   :  { %6785 = vmatpush1.msra.mxu1 %v15091_v1  ;;  %6856 = vmatpush1.msra.mxu0 %v15092_v63  ;;  %v15102_v1 = vld [vmem:[#allocation80_spill] sm:$0xff] }
 0xa4c   :  { %6786 = vmatprep.subr.mxu1 %v15093_v48  ;;  %6857 = vmatprep.subr.mxu0 %v15094_v59  ;;  %v15103_v63 = vld [vmem:[#allocation48_spill] sm:$0xff]  ;;  %v15104_v48 = vld [vmem:[#allocation82_spill] sm:$0xff] }
 0xa4d   :  { %6787 = vmatpush1.msra.mxu1 %v15095_v34  ;;  %6858 = vmatpush1.msra.mxu0 %v15096_v49  ;;  %v15105_v59 = vld [vmem:[#allocation58_spill] sm:$0xff]  ;;  %v15106_v34 = vld [vmem:[#allocation84_spill] sm:$0xff] }
 0xa4e   :  { %6788 = vmatprep.subr.mxu1 %v15097_v14  ;;  %6859 = vmatprep.subr.mxu0 %v15098_v32  ;;  %v15107_v49 = vld [vmem:[#allocation62_spill] sm:$0xff] }
 0xa4f   :  { %6789 = vmatpush1.msra.mxu1 %v15099_v55  ;;  %6860 = vmatpush1.msra.mxu0 %v15100_v44  ;;  %v15108_v14 = vld [vmem:[#allocation86_spill] sm:$0xff]  ;;  %v15109_v44 = vld [vmem:[#allocation40_spill] sm:$0xff] }
 0xa50   :  { %6790 = vmatprep.subr.mxu1 %v15101_v61  ;;  %6861 = vmatprep.subr.mxu0 %v15102_v1  ;;  %v15110_v61 = vld [vmem:[#allocation88_spill] sm:$0xff] }
 0xa51   :  { %6791 = vmatpush1.msra.mxu1 %v15103_v63  ;;  %6862 = vmatpush1.msra.mxu0 %v15104_v48  ;;  %v15111_v63 = vld [vmem:[#allocation50_spill] sm:$0xff] }
 0xa52   :  { %6792 = vmatprep.subr.mxu1 %v15105_v59  ;;  %6863 = vmatprep.subr.mxu0 %v15106_v34  ;;  %v15112_v59 = vld [vmem:[#allocation46_spill] sm:$0xff] }
 0xa53   :  { %6793 = vmatpush1.msra.mxu1 %v15107_v49  ;;  %6864 = vmatpush1.msra.mxu0 %v15108_v14 }
 0xa54   :  { %6826 = vmatprep.mubr.f32.mxu1 %v14535_v46  ;;  %6897 = vmatprep.mubr.f32.mxu0 %v14535_v46 }
 0xa55   :  { %6908 = vmatprep.subr.mxu1 %v15109_v44  ;;  %6979 = vmatprep.subr.mxu0 %v15110_v61 }
 0xad1   :  { %v6484_v1 = vpop.f32.mrf.mxu1  ;;  %v6555_v34 = vpop.f32.mrf.mxu0 }
 0xad2   :  { %v6560_v55 = vadd.f32 %v6484_v1, %v15111_v63  ;;  %v6562_v7 = vadd.f32 %v6555_v34, %v15114_v39 }
 0xad3   :  { %v6486_v48 = vpop.f32.mrf.mxu1  ;;  %v6557_v14 = vpop.f32.mrf.mxu0 }
 0xad4   :  { %v8258_v32 = vmul.f32 -1.442695, %v6560_v55  ;;  %v6561_v60 = vadd.f32 %v6486_v48, %v15112_v59  ;;  %v6563_v58 = vadd.f32 %v6557_v14, %v15113_v19 }
 0xad6   :  { %9027 = vpow2.f32 %v8258_v32  ;;  %v8259_v49 = vmul.f32 -1.442695, %v6561_v60  ;;  %v8260_v0 = vmul.f32 -1.442695, %v6563_v58 }
 0xad8   :  { %9029 = vpow2.f32 %v8259_v49 }
 0xad9   :  { %9031 = vpow2.f32 %v8260_v0 }
 0xada   :  { %9033 = vtanh.f32 %v6562_v7 }
 0xae3   :  { %v9028_v44 = vpop.eup %9027 }
 0xae4   :  { %v6713_v57 = vadd.f32 1.0, %v9028_v44  ;;  %v15116_v44 = vld [vmem:[#allocation116_spill] sm:$0xff] }
 0xae5   :  { %v9030_v61 = vpop.eup %9029 }
 0xae6   :  { %9035 = vrcp.f32 %v6713_v57  ;;  %v6719_v1 = vadd.f32 1.0, %v9030_v61  ;;  %v9032_v55 = vpop.eup %9031  ;;  %v15125_v61 = vld [vmem:[#allocation94_spill] sm:$0xff] }
 0xae7   :  { %v9034_v63 = vpop.eup %9033  ;;  %v6726_v60 = vadd.f32 1.0, %v9032_v55 }
 0xae8   :  { %9037 = vrcp.f32 %v6719_v1 }
 0xae9   :  { %9039 = vrcp.f32 %v6726_v60 }
 0xaf3   :  { %v9036_v48 = vpop.eup %9035 }
 0xaf4   :  { %v6730_v59 = vmul.f32 %v9036_v48, %v9034_v63  ;;  %v6630_v49 = vpop.f32.mrf.mxu1  ;;  %v6701_v57 = vpop.f32.mrf.mxu0  ;;  %v15119_v48 = vld [vmem:[#allocation127_spill] sm:$0xff] }
 0xaf5   :  { %v9038_v32 = vpop.eup %9037  ;;  %v6706_v19 = vadd.f32 %v6630_v49, %v15115_v8  ;;  %v15118_v8 = vld [vmem:[#allocation129_spill] sm:$0xff]  ;;  %v6708_v49 = vadd.f32 %v6701_v57, %v15119_v48  ;;  %v15123_v57 = vld [vmem:[#allocation67_spill] sm:$0xff] }
 0xaf6   :  { %v6729_v58 = vmul.f32 %v9038_v32, %v13281_v15  ;;  %v6632_v39 = vpop.f32.mrf.mxu1  ;;  %v6703_v55 = vpop.f32.mrf.mxu0 }
 0xaf7   :  { %v8261_v34 = vmul.f32 -1.442695, %v6706_v19  ;;  %v6707_v0 = vadd.f32 %v6632_v39, %v15116_v44  ;;  %v6709_v63 = vadd.f32 %v6703_v55, %v15118_v8  ;;  %v9040_v19 = vpop.eup %9039  ;;  %v15126_v8 = vld [vmem:[#allocation71_spill] sm:$0xff] }
 0xaf8   :  { %v6731_v14 = vadd.f32 %v6730_v59, %v6729_v58 }
 0xaf9   :  { %9041 = vpow2.f32 %v8261_v34  ;;  %v8262_v7 = vmul.f32 -1.442695, %v6707_v0  ;;  %v8263_v32 = vmul.f32 -1.442695, %v6709_v63  ;;  %v15121_v0 = vld [vmem:[#allocation90_spill] sm:$0xff]  ;;  %v15127_v63 = vld [vmem:[#allocation73_spill] sm:$0xff] }
 0xafa   :  { %9043 = vtanh.f32 %v6731_v14  ;;  %v13633_v1 = vsel %vm5715_vm7, %v6731_v14, %v13281_v15  ;;  %v15122_v14 = vld [vmem:[#allocation65_spill] sm:$0xff] }
 0xafb   :  { %9045 = vpow2.f32 %v8262_v7  ;;  %v15124_v7 = vld [vmem:[#allocation69_spill] sm:$0xff] }
 0xafc   :  { %9047 = vtanh.f32 %v6708_v49  ;;  %v15128_v49 = vld [vmem:[#allocation97_spill] sm:$0xff] }
 0xafd   :  { %9049 = vpow2.f32 %v8263_v32  ;;  %v15129_v32 = vld [vmem:[#allocation75_spill] sm:$0xff] }
 0xb06   :  { %v9042_v39 = vpop.eup %9041 }
 0xb07   :  { %v9044_v59 = vpop.eup %9043  ;;  %v6737_v60 = vadd.f32 1.0, %v9042_v39  ;;  %v15130_v39 = vld [vmem:[#allocation99_spill] sm:$0xff] }
 0xb08   :  { %v9046_v58 = vpop.eup %9045  ;;  %v6733_v34 = vmul.f32 %v9044_v59, %v9040_v19  ;;  %v15131_v59 = vld [vmem:[#allocation77_spill] sm:$0xff] }
 0xb09   :  { %9051 = vrcp.f32 %v6737_v60  ;;  %v6743_v44 = vadd.f32 1.0, %v9046_v58  ;;  %v9048_v55 = vpop.eup %9047  ;;  %v15132_v58 = vld [vmem:[#allocation100_spill] sm:$0xff] }
 0xb0a   :  { %v13640_v15 = vsel %vm5715_vm7, %v6733_v34, %v13288_v30  ;;  %v15120_v30 = vld [vmem:[#allocation64_spill] sm:$0xff]  ;;  %v9050_v48 = vpop.eup %9049 }
 0xb0b   :  { %9053 = vrcp.f32 %v6743_v44  ;;  %6827 = vmatmul.mubr.f32.vlgmr.msra.gmra.mxu1 %v13640_v15  ;;  %6898 = vmatmul.mubr.f32.vlgmr.msra.gmra.mxu0 %v13640_v15  ;;  %v6750_v44 = vadd.f32 1.0, %v9050_v48  ;;  %v15140_v48 = vld [vmem:[#allocation91_spill] sm:$0xff] }
 0xb0c   :  { %6909 = vmatpush1.msra.mxu1 %v13293_v43  ;;  %6980 = vmatpush1.msra.mxu0 %v13297_v16 }
 0xb0d   :  { %6910 = vmatprep.subr.mxu1 %v13301_v26  ;;  %6981 = vmatprep.subr.mxu0 %v13305_v21  ;;  %9055 = vrcp.f32 %v6750_v44  ;;  %v15148_v44 = vld [vmem:[#allocation122_spill] sm:$0xff] }
 0xb0e   :  { %6911 = vmatpush1.msra.mxu1 %v13309_v13  ;;  %6982 = vmatpush1.msra.mxu0 %v13313_v51 }
 0xb0f   :  { %6912 = vmatprep.subr.mxu1 %v13317_v50  ;;  %6983 = vmatprep.subr.mxu0 %v13321_v22 }
 0xb10   :  { %6913 = vmatpush1.msra.mxu1 %v13325_v54  ;;  %6984 = vmatpush1.msra.mxu0 %v13329_v36 }
 0xb11   :  { %6914 = vmatprep.subr.mxu1 %v15120_v30  ;;  %6985 = vmatprep.subr.mxu0 %v15121_v0 }
 0xb12   :  { %6915 = vmatpush1.msra.mxu1 %v15122_v14  ;;  %6986 = vmatpush1.msra.mxu0 %v15123_v57 }
 0xb13   :  { %6916 = vmatprep.subr.mxu1 %v15124_v7  ;;  %6987 = vmatprep.subr.mxu0 %v15125_v61  ;;  %v15135_v61 = vld [vmem:[#allocation81_spill] sm:$0xff] }
 0xb14   :  { %6917 = vmatpush1.msra.mxu1 %v15126_v8  ;;  %6988 = vmatpush1.msra.mxu0 %v15127_v63  ;;  %v15133_v8 = vld [vmem:[#allocation79_spill] sm:$0xff]  ;;  %v15134_v63 = vld [vmem:[#allocation101_spill] sm:$0xff] }
 0xb15   :  { %6918 = vmatprep.subr.mxu1 %v15128_v49  ;;  %6989 = vmatprep.subr.mxu0 %v15129_v32  ;;  %v15136_v32 = vld [vmem:[#allocation83_spill] sm:$0xff] }
 0xb16   :  { %v9052_v19 = vpop.eup %9051  ;;  %6919 = vmatpush1.msra.mxu1 %v15130_v39  ;;  %6990 = vmatpush1.msra.mxu0 %v15131_v59  ;;  %v15137_v39 = vld [vmem:[#allocation85_spill] sm:$0xff] }
 0xb17   :  { %v6754_v60 = vmul.f32 %v9052_v19, %v9048_v55  ;;  %6920 = vmatprep.subr.mxu1 %v13381_v9  ;;  %6991 = vmatprep.subr.mxu0 %v15132_v58  ;;  %v15138_v19 = vld [vmem:[#allocation87_spill] sm:$0xff]  ;;  %v15139_v58 = vld [vmem:[#allocation89_spill] sm:$0xff] }
 0xb18   :  { %v9054_v34 = vpop.eup %9053  ;;  %6921 = vmatpush1.msra.mxu1 %v15133_v8  ;;  %6992 = vmatpush1.msra.mxu0 %v15134_v63  ;;  %v15141_v8 = vld [vmem:[#allocation92_spill] sm:$0xff]  ;;  %v15142_v63 = vld [vmem:[#allocation93_spill] sm:$0xff] }
 0xb19   :  { %v6753_v49 = vmul.f32 %v9054_v34, %v13440_v12  ;;  %6922 = vmatprep.subr.mxu1 %v15135_v61  ;;  %6993 = vmatprep.subr.mxu0 %v15136_v32  ;;  %v15143_v34 = vld [vmem:[#allocation41_spill] sm:$0xff]  ;;  %v15192_v32 = vld [vmem:[#allocation72_spill] sm:$0xff] }
 0xb1a   :  { %6923 = vmatpush1.msra.mxu1 %v15137_v39  ;;  %6994 = vmatpush1.msra.mxu0 %v13410_v10 }
 0xb1b   :  { %v6755_v55 = vadd.f32 %v6754_v60, %v6753_v49  ;;  %6924 = vmatprep.subr.mxu1 %v15138_v19  ;;  %6995 = vmatprep.subr.mxu0 %v15139_v58  ;;  %v15145_v49 = vld [vmem:[#allocation60_spill] sm:$0xff]  ;;  %v15146_v60 = vld [vmem:[#allocation102_spill] sm:$0xff]  ;;  %v15153_v19 = vld [vmem:[#allocation141_spill] sm:$0xff] }
 0xb1c   :  { %6925 = vmatpush1.msra.mxu1 %v15140_v48  ;;  %6996 = vmatpush1.msra.mxu0 %v15141_v8  ;;  %v15147_v58 = vld [vmem:[#allocation66_spill] sm:$0xff]  ;;  %v15149_v48 = vld [vmem:[#allocation124_spill] sm:$0xff]  ;;  %v15150_v8 = vld [vmem:[#allocation133_spill] sm:$0xff] }
 0xb1d   :  { %6926 = vmatprep.subr.mxu1 %v15142_v63  ;;  %6997 = vmatprep.subr.mxu0 %v15143_v34  ;;  %9057 = vtanh.f32 %v6755_v55  ;;  %v13684_v39 = vsel %vm5708_vm4, %v6755_v55, %v13440_v12  ;;  %v15151_v63 = vld [vmem:[#allocation132_spill] sm:$0xff]  ;;  %v15152_v34 = vld [vmem:[#allocation139_spill] sm:$0xff]  ;;  %v15154_v12 = vld [vmem:[#allocation142_spill] sm:$0xff] }
 0xb1e   :  { %6927 = vmatpush1.msra.mxu1 %v15145_v49  ;;  %6998 = vmatpush1.msra.mxu0 %v15146_v60  ;;  %v15155_v55 = vld [vmem:[#allocation144_spill] sm:$0xff]  ;;  %v15156_v49 = vld [vmem:[#allocation146_spill] sm:$0xff]  ;;  %v15157_v60 = vld [vmem:[#allocation147_spill] sm:$0xff] }
 0xb1f   :  { %6928 = vmatprep.subr.mxu1 %v15147_v58  ;;  %6999 = vmatprep.subr.mxu0 %v15148_v44  ;;  %v15158_v58 = vld [vmem:[#allocation148_spill] sm:$0xff]  ;;  %v15159_v44 = vld [vmem:[#allocation150_spill] sm:$0xff] }
 0xb20   :  { %6929 = vmatpush1.msra.mxu1 %v15149_v48  ;;  %7000 = vmatpush1.msra.mxu0 %v15150_v8  ;;  %v15160_v48 = vld [vmem:[#allocation152_spill] sm:$0xff]  ;;  %v15161_v8 = vld [vmem:[#allocation153_spill] sm:$0xff] }
 0xb21   :  { %6930 = vmatprep.subr.mxu1 %v15151_v63  ;;  %7001 = vmatprep.subr.mxu0 %v15152_v34  ;;  %v15162_v63 = vld [vmem:[#allocation154_spill] sm:$0xff]  ;;  %v15163_v34 = vld [vmem:[#allocation155_spill] sm:$0xff] }
 0xb22   :  { %6931 = vmatpush1.msra.mxu1 %v15153_v19  ;;  %7002 = vmatpush1.msra.mxu0 %v15154_v12  ;;  %v15164_v12 = vld [vmem:[#allocation156_spill] sm:$0xff] }
 0xb23   :  { %6932 = vmatprep.subr.mxu1 %v15155_v55  ;;  %7003 = vmatprep.subr.mxu0 %v15156_v49  ;;  %v15165_v55 = vld [vmem:[#allocation157_spill] sm:$0xff]  ;;  %v9056_v49 = vpop.eup %9055 }
 0xb24   :  { %6933 = vmatpush1.msra.mxu1 %v15157_v60  ;;  %7004 = vmatpush1.msra.mxu0 %v15158_v58  ;;  %v15166_v58 = vld [vmem:[#allocation159_spill] sm:$0xff] }
 0xb25   :  { %6934 = vmatprep.subr.mxu1 %v15159_v44  ;;  %7005 = vmatprep.subr.mxu0 %v15160_v48 }
 0xb26   :  { %6935 = vmatpush1.msra.mxu1 %v15161_v8  ;;  %7006 = vmatpush1.msra.mxu0 %v15162_v63 }
 0xb27   :  { %6936 = vmatprep.subr.mxu1 %v15163_v34  ;;  %7007 = vmatprep.subr.mxu0 %v13519_v33 }
 0xb28   :  { %6937 = vmatpush1.msra.mxu1 %v15164_v12  ;;  %7008 = vmatpush1.msra.mxu0 %v15165_v55 }
 0xb29   :  { %6938 = vmatprep.subr.mxu1 %v13531_v52  ;;  %7009 = vmatprep.subr.mxu0 %v15166_v58 }
 0xb2a   :  { %v9058_v44 = vpop.eup %9057  ;;  %6939 = vmatpush1.msra.mxu1 %v13539_v53  ;;  %6972 = vmatprep.mubr.f32.mxu1 %v14535_v46 }
 0xb2b   :  { %7010 = vmatpush1.msra.mxu0 %v13544_v25  ;;  %7043 = vmatprep.mubr.f32.mxu0 %v14535_v46  ;;  %v6757_v34 = vmul.f32 %v9058_v44, %v9056_v49  ;;  %v15194_v49 = vld [vmem:[#allocation74_spill] sm:$0xff]  ;;  %v15195_v44 = vld [vmem:[#allocation51_spill] sm:$0xff] }
 0xb2c   :  { %7106 = vmatprep.subr.mxu1 %v12999_v18  ;;  %7177 = vmatprep.subr.mxu0 %v13003_v35  ;;  %v15167_v18 = vld [vmem:[#allocation61_spill] sm:$0xff]  ;;  %v15168_v35 = vld [vmem:[#allocation55_spill] sm:$0xff] }
 0xb2d   :  { %v13719_v52 = vsel %vm5708_vm4, %v6757_v34, %v13553_v56  ;;  %v15191_v56 = vld [vmem:[#allocation59_spill] sm:$0xff]  ;;  %v15193_v34 = vld [vmem:[#allocation42_spill] sm:$0xff] }
 0xb2e   :  { %6973 = vmatmul.mubr.f32.vlgmr.msra.gmra.mxu1 %v13719_v52  ;;  %7044 = vmatmul.mubr.f32.vlgmr.msra.gmra.mxu0 %v13719_v52 }
 0xb2f   :  { %7107 = vmatpush1.msra.mxu1 %v13014_v29  ;;  %7178 = vmatpush1.msra.mxu0 %v13018_v20  ;;  %v15169_v29 = vld [vmem:[#allocation126_spill] sm:$0xff]  ;;  %v15170_v20 = vld [vmem:[#allocation128_spill] sm:$0xff] }
 0xb30   :  { %7108 = vmatprep.subr.mxu1 %v13022_v11  ;;  %7179 = vmatprep.subr.mxu0 %v13026_v5  ;;  %v15171_v11 = vld [vmem:[#allocation135_spill] sm:$0xff]  ;;  %v15172_v5 = vld [vmem:[#allocation134_spill] sm:$0xff] }
 0xb31   :  { %7109 = vmatpush1.msra.mxu1 %v13030_v2  ;;  %7180 = vmatpush1.msra.mxu0 %v13034_v4  ;;  %v15173_v2 = vld [vmem:[#allocation96_spill] sm:$0xff]  ;;  %v15174_v4 = vld [vmem:[#allocation98_spill] sm:$0xff] }
 0xb32   :  { %7110 = vmatprep.subr.mxu1 %v13038_v17  ;;  %7181 = vmatprep.subr.mxu0 %v13042_v27  ;;  %v15175_v17 = vld [vmem:[#allocation137_spill] sm:$0xff]  ;;  %v15176_v27 = vld [vmem:[#allocation138_spill] sm:$0xff] }
 0xb33   :  { %7111 = vmatpush1.msra.mxu1 %v13046_v28  ;;  %7182 = vmatpush1.msra.mxu0 %v13050_v23  ;;  %v15177_v28 = vld [vmem:[#allocation140_spill] sm:$0xff]  ;;  %v15178_v23 = vld [vmem:[#allocation143_spill] sm:$0xff] }
 0xb34   :  { %7112 = vmatprep.subr.mxu1 %v13054_v40  ;;  %7183 = vmatprep.subr.mxu0 %v13058_v42  ;;  %v15179_v40 = vld [vmem:[#allocation145_spill] sm:$0xff] }
 0xb35   :  { %7113 = vmatpush1.msra.mxu1 %v13062_v45  ;;  %7184 = vmatpush1.msra.mxu0 %v13066_v37  ;;  %v15180_v42 = vld [vmem:[#allocation149_spill] sm:$0xff]  ;;  %v15181_v45 = vld [vmem:[#allocation166_spill] sm:$0xff] }
 0xb36   :  { %7114 = vmatprep.subr.mxu1 %v13070_v31  ;;  %7185 = vmatprep.subr.mxu0 %v13074_v62  ;;  %v15182_v37 = vld [vmem:[#allocation173_spill] sm:$0xff]  ;;  %v15183_v31 = vld [vmem:[#allocation174_spill] sm:$0xff]  ;;  %v15184_v62 = vld [vmem:[#allocation175_spill] sm:$0xff] }
 0xb37   :  { %7115 = vmatpush1.msra.mxu1 %v13078_v3  ;;  %7186 = vmatpush1.msra.mxu0 %v13082_v47  ;;  %v15185_v3 = vld [vmem:[#allocation177_spill] sm:$0xff]  ;;  %v15186_v47 = vld [vmem:[#allocation178_spill] sm:$0xff] }
 0xb38   :  { %7116 = vmatprep.subr.mxu1 %v13086_v6  ;;  %7187 = vmatprep.subr.mxu0 %v13090_v24  ;;  %v15187_v6 = vld [vmem:[#allocation180_spill] sm:$0xff] }
 0xb39   :  { %7117 = vmatpush1.msra.mxu1 %v13094_v41  ;;  %7188 = vmatpush1.msra.mxu0 %v13098_v38  ;;  %v15188_v24 = vld [vmem:[#allocation68_spill] sm:$0xff]  ;;  %v15190_v38 = vld [vmem:[#allocation70_spill] sm:$0xff] }
 0xb3a   :  { %7118 = vmatprep.subr.mxu1 %v15167_v18  ;;  %7189 = vmatprep.subr.mxu0 %v15168_v35  ;;  %v15189_v41 = vld [vmem:[#allocation56_spill] sm:$0xff]  ;;  %v15197_v35 = vld [vmem:[#allocation43_spill] sm:$0xff] }
 0xb3b   :  { %7119 = vmatpush1.msra.mxu1 %v15169_v29  ;;  %7190 = vmatpush1.msra.mxu0 %v15170_v20  ;;  %v15196_v18 = vld [vmem:[#allocation76_spill] sm:$0xff]  ;;  %v15198_v29 = vld [vmem:[#allocation78_spill] sm:$0xff] }
 0xb3c   :  { %7120 = vmatprep.subr.mxu1 %v15171_v11  ;;  %7191 = vmatprep.subr.mxu0 %v15172_v5  ;;  %v15199_v20 = vld [vmem:[#allocation52_spill] sm:$0xff] }
 0xb3d   :  { %7121 = vmatpush1.msra.mxu1 %v15173_v2  ;;  %7192 = vmatpush1.msra.mxu0 %v15174_v4  ;;  %v15200_v11 = vld [vmem:[#allocation80_spill] sm:$0xff]  ;;  %v15202_v2 = vld [vmem:[#allocation82_spill] sm:$0xff] }
 0xb3e   :  { %7122 = vmatprep.subr.mxu1 %v15175_v17  ;;  %7193 = vmatprep.subr.mxu0 %v15176_v27  ;;  %v15201_v5 = vld [vmem:[#allocation48_spill] sm:$0xff]  ;;  %v15203_v4 = vld [vmem:[#allocation58_spill] sm:$0xff] }
 0xb3f   :  { %7123 = vmatpush1.msra.mxu1 %v15177_v28  ;;  %7194 = vmatpush1.msra.mxu0 %v15178_v23  ;;  %v15204_v17 = vld [vmem:[#allocation84_spill] sm:$0xff]  ;;  %v15205_v27 = vld [vmem:[#allocation62_spill] sm:$0xff] }
 0xb40   :  { %7124 = vmatprep.subr.mxu1 %v15179_v40  ;;  %7195 = vmatprep.subr.mxu0 %v15180_v42  ;;  %v15206_v28 = vld [vmem:[#allocation86_spill] sm:$0xff]  ;;  %v15207_v23 = vld [vmem:[#allocation40_spill] sm:$0xff] }
 0xb41   :  { %7125 = vmatpush1.msra.mxu1 %v15181_v45  ;;  %7196 = vmatpush1.msra.mxu0 %v15182_v37  ;;  %v15208_v40 = vld [vmem:[#allocation88_spill] sm:$0xff]  ;;  %v15209_v45 = vld [vmem:[#allocation57_spill] sm:$0xff] }
 0xb42   :  { %7126 = vmatprep.subr.mxu1 %v15183_v31  ;;  %7197 = vmatprep.subr.mxu0 %v15184_v62 }
 0xb43   :  { %7127 = vmatpush1.msra.mxu1 %v15185_v3  ;;  %7198 = vmatpush1.msra.mxu0 %v15186_v47  ;;  %v15210_v3 = vld [vmem:[#allocation63_spill] sm:$0xff] }
 0xb44   :  { %7128 = vmatprep.subr.mxu1 %v15187_v6  ;;  %7199 = vmatprep.subr.mxu0 %v15188_v24 }
 0xb45   :  { %7129 = vmatpush1.msra.mxu1 %v15189_v41  ;;  %7200 = vmatpush1.msra.mxu0 %v15190_v38  ;;  %v15211_v38 = vld [vmem:[#allocation113_spill] sm:$0xff] }
 0xb46   :  { %7130 = vmatprep.subr.mxu1 %v15191_v56  ;;  %7201 = vmatprep.subr.mxu0 %v15192_v32 }
 0xb47   :  { %7131 = vmatpush1.msra.mxu1 %v15193_v34  ;;  %7202 = vmatpush1.msra.mxu0 %v15194_v49  ;;  %v15212_v34 = vld [vmem:[#allocation111_spill] sm:$0xff] }
 0xb48   :  { %7132 = vmatprep.subr.mxu1 %v15195_v44  ;;  %7203 = vmatprep.subr.mxu0 %v15196_v18 }
 0xb49   :  { %7133 = vmatpush1.msra.mxu1 %v15197_v35  ;;  %7204 = vmatpush1.msra.mxu0 %v15198_v29 }
 0xb4a   :  { %7134 = vmatprep.subr.mxu1 %v15199_v20  ;;  %7205 = vmatprep.subr.mxu0 %v15200_v11 }
 0xb4b   :  { %7135 = vmatpush1.msra.mxu1 %v15201_v5  ;;  %7206 = vmatpush1.msra.mxu0 %v15202_v2 }
 0xb4c   :  { %7136 = vmatprep.subr.mxu1 %v15203_v4  ;;  %7207 = vmatprep.subr.mxu0 %v15204_v17 }
 0xb4d   :  { %7137 = vmatpush1.msra.mxu1 %v15205_v27  ;;  %7208 = vmatpush1.msra.mxu0 %v15206_v28  ;;  %v15213_v28 = vld [vmem:[#allocation110_spill] sm:$0xff] }
 0xb4e   :  { %7170 = vmatprep.mubr.f32.mxu1 %v14535_v46  ;;  %7241 = vmatprep.mubr.f32.mxu0 %v14535_v46 }
 0xb4f   :  { %7252 = vmatprep.subr.mxu1 %v15207_v23  ;;  %7323 = vmatprep.subr.mxu0 %v15208_v40 }
 0xbcb   :  { %v6828_v42 = vpop.f32.mrf.mxu1  ;;  %v6899_v6 = vpop.f32.mrf.mxu0 }
 0xbcc   :  { %v6904_v37 = vadd.f32 %v6828_v42, %v15209_v45  ;;  %v6906_v49 = vadd.f32 %v6899_v6, %v15212_v34  ;;  %v15243_v6 = vld [vmem:[#allocation139_spill] sm:$0xff] }
 0xbcd   :  { %v6830_v31 = vpop.f32.mrf.mxu1  ;;  %v6901_v41 = vpop.f32.mrf.mxu0 }
 0xbce   :  { %v8264_v62 = vmul.f32 -1.442695, %v6904_v37  ;;  %v6905_v47 = vadd.f32 %v6830_v31, %v15210_v3  ;;  %v6907_v56 = vadd.f32 %v6901_v41, %v15211_v38  ;;  %v15214_v37 = vld [vmem:[#allocation112_spill] sm:$0xff]  ;;  %v15216_v38 = vld [vmem:[#allocation125_spill] sm:$0xff] }
 0xbd0   :  { %9059 = vpow2.f32 %v8264_v62  ;;  %v8265_v24 = vmul.f32 -1.442695, %v6905_v47  ;;  %v8266_v32 = vmul.f32 -1.442695, %v6907_v56 }
 0xbd2   :  { %9061 = vpow2.f32 %v8265_v24 }
 0xbd3   :  { %9063 = vpow2.f32 %v8266_v32  ;;  %v15217_v32 = vld [vmem:[#allocation123_spill] sm:$0xff] }
 0xbd4   :  { %9065 = vtanh.f32 %v6906_v49 }
 0xbdd   :  { %v9060_v44 = vpop.eup %9059 }
 0xbde   :  { %v7057_v18 = vadd.f32 1.0, %v9060_v44 }
 0xbdf   :  { %v9062_v35 = vpop.eup %9061 }
 0xbe0   :  { %9067 = vrcp.f32 %v7057_v18  ;;  %v7063_v29 = vadd.f32 1.0, %v9062_v35  ;;  %v9064_v20 = vpop.eup %9063 }
 0xbe1   :  { %v9066_v11 = vpop.eup %9065  ;;  %v7070_v4 = vadd.f32 1.0, %v9064_v20 }
 0xbe2   :  { %9069 = vrcp.f32 %v7063_v29 }
 0xbe3   :  { %9071 = vrcp.f32 %v7070_v4  ;;  %v15228_v4 = vld [vmem:[#allocation85_spill] sm:$0xff] }
 0xbed   :  { %v9068_v5 = vpop.eup %9067 }
 0xbee   :  { %v7074_v2 = vmul.f32 %v9068_v5, %v9066_v11  ;;  %v6974_v17 = vpop.f32.mrf.mxu1  ;;  %v7045_v3 = vpop.f32.mrf.mxu0 }
 0xbef   :  { %v9070_v27 = vpop.eup %9069  ;;  %v7050_v23 = vadd.f32 %v6974_v17, %v15213_v28  ;;  %v7052_v34 = vadd.f32 %v7045_v3, %v15217_v32  ;;  %v15230_v17 = vld [vmem:[#allocation89_spill] sm:$0xff]  ;;  %v15232_v28 = vld [vmem:[#allocation92_spill] sm:$0xff]  ;;  %v15248_v32 = vld [vmem:[#allocation150_spill] sm:$0xff] }
 0xbf0   :  { %v7073_v40 = vmul.f32 %v9070_v27, %v13633_v1  ;;  %v6976_v42 = vpop.f32.mrf.mxu1  ;;  %v7047_v41 = vpop.f32.mrf.mxu0  ;;  %v15231_v27 = vld [vmem:[#allocation91_spill] sm:$0xff]  ;;  %v15241_v3 = vld [vmem:[#allocation133_spill] sm:$0xff] }
 0xbf1   :  { %v8267_v45 = vmul.f32 -1.442695, %v7050_v23  ;;  %v7051_v31 = vadd.f32 %v6976_v42, %v15214_v37  ;;  %v7053_v56 = vadd.f32 %v7047_v41, %v15216_v38  ;;  %v9072_v44 = vpop.eup %9071  ;;  %v15233_v23 = vld [vmem:[#allocation93_spill] sm:$0xff]  ;;  %v15238_v37 = vld [vmem:[#allocation66_spill] sm:$0xff]  ;;  %v15245_v41 = vld [vmem:[#allocation144_spill] sm:$0xff] }
 0xbf2   :  { %v7075_v62 = vadd.f32 %v7074_v2, %v7073_v40  ;;  %v15227_v2 = vld [vmem:[#allocation83_spill] sm:$0xff]  ;;  %v15234_v40 = vld [vmem:[#allocation41_spill] sm:$0xff]  ;;  %v15246_v38 = vld [vmem:[#allocation146_spill] sm:$0xff] }
 0xbf3   :  { %9073 = vpow2.f32 %v8267_v45  ;;  %v8268_v47 = vmul.f32 -1.442695, %v7051_v31  ;;  %v8269_v49 = vmul.f32 -1.442695, %v7053_v56  ;;  %v15237_v45 = vld [vmem:[#allocation102_spill] sm:$0xff]  ;;  %v15247_v56 = vld [vmem:[#allocation148_spill] sm:$0xff] }
 0xbf4   :  { %9075 = vtanh.f32 %v7075_v62  ;;  %v13799_v24 = vsel %vm5359_vm2, %v7075_v62, %v13633_v1  ;;  %v15239_v31 = vld [vmem:[#allocation122_spill] sm:$0xff]  ;;  %v15240_v62 = vld [vmem:[#allocation124_spill] sm:$0xff] }
 0xbf5   :  { %9077 = vpow2.f32 %v8268_v47  ;;  %v15242_v47 = vld [vmem:[#allocation132_spill] sm:$0xff] }
 0xbf6   :  { %9079 = vtanh.f32 %v7052_v34  ;;  %v15249_v34 = vld [vmem:[#allocation155_spill] sm:$0xff] }
 0xbf7   :  { %9081 = vpow2.f32 %v8269_v49 }
 0xc00   :  { %v9074_v18 = vpop.eup %9073 }
 0xc01   :  { %v9076_v35 = vpop.eup %9075  ;;  %v7081_v29 = vadd.f32 1.0, %v9074_v18  ;;  %v7454_v18 = vld [vmem:[%s15251_s15 + $0x30] sm:$0xff] }
 0xc02   :  { %v9078_v20 = vpop.eup %9077  ;;  %v7077_v11 = vmul.f32 %v9076_v35, %v9072_v44  ;;  %v7455_v44 = vld [vmem:[%s15251_s15 + $0x38] sm:$0xff]  ;;  %v7453_v35 = vld [vmem:[%s15251_s15 + $0x28] sm:$0xff] }
 0xc03   :  { %9083 = vrcp.f32 %v7081_v29  ;;  %v7087_v5 = vadd.f32 1.0, %v9078_v20  ;;  %v7452_v29 = vld [vmem:[%s15251_s15 + $0x20] sm:$0xff]  ;;  %v7451_v20 = vld [vmem:[%s15251_s15 + $0x18] sm:$0xff] }
 0xc04   :  { %v13806_v1 = vsel %vm5359_vm2, %v7077_v11, %v13640_v15  ;;  %v15224_v15 = vld [vmem:[#allocation100_spill] sm:$0xff]  ;;  %v7450_v11 = vld [vmem:[%s15251_s15 + $0x10] sm:$0xff] }
 0xc05   :  { %9085 = vrcp.f32 %v7087_v5  ;;  %7171 = vmatmul.mubr.f32.vlgmr.msra.gmra.mxu1 %v13806_v1  ;;  %7242 = vmatmul.mubr.f32.vlgmr.msra.gmra.mxu0 %v13806_v1  ;;  %v7449_v5 = vld [vmem:[%s15251_s15 + $0x8] sm:$0xff] }
 0xc06   :  { %7253 = vmatpush1.msra.mxu1 %v13293_v43  ;;  %7324 = vmatpush1.msra.mxu0 %v13297_v16  ;;  %v15218_v43 = vld [vmem:[#allocation94_spill] sm:$0xff]  ;;  %v9080_v16 = vpop.eup %9079 }
 0xc07   :  { %7254 = vmatprep.subr.mxu1 %v13301_v26  ;;  %7325 = vmatprep.subr.mxu0 %v13305_v21  ;;  %v15219_v26 = vld [vmem:[#allocation71_spill] sm:$0xff]  ;;  %v15220_v21 = vld [vmem:[#allocation73_spill] sm:$0xff] }
 0xc08   :  { %7255 = vmatpush1.msra.mxu1 %v13309_v13  ;;  %7326 = vmatpush1.msra.mxu0 %v13313_v51  ;;  %v9082_v13 = vpop.eup %9081  ;;  %v15221_v51 = vld [vmem:[#allocation97_spill] sm:$0xff] }
 0xc09   :  { %7256 = vmatprep.subr.mxu1 %v13317_v50  ;;  %7327 = vmatprep.subr.mxu0 %v13321_v22  ;;  %v15222_v50 = vld [vmem:[#allocation75_spill] sm:$0xff] }
 0xc0a   :  { %7257 = vmatpush1.msra.mxu1 %v13325_v54  ;;  %7328 = vmatpush1.msra.mxu0 %v13329_v36  ;;  %v15223_v54 = vld [vmem:[#allocation99_spill] sm:$0xff] }
 0xc0b   :  { %7258 = vmatprep.subr.mxu1 %v15120_v30  ;;  %7329 = vmatprep.subr.mxu0 %v15121_v0  ;;  %v7094_v0 = vadd.f32 1.0, %v9082_v13  ;;  %v7476_v13 = vld [vmem:[%s15251_s15 + $0xe0] sm:$0xff] }
 0xc0c   :  { %7259 = vmatpush1.msra.mxu1 %v15122_v14  ;;  %7330 = vmatpush1.msra.mxu0 %v15123_v57  ;;  %v15225_v14 = vld [vmem:[#allocation79_spill] sm:$0xff]  ;;  %v15226_v57 = vld [vmem:[#allocation101_spill] sm:$0xff] }
 0xc0d   :  { %7260 = vmatprep.subr.mxu1 %v15124_v7  ;;  %7331 = vmatprep.subr.mxu0 %v15218_v43  ;;  %9087 = vrcp.f32 %v7094_v0  ;;  %v7448_v43 = vld [vmem:[%s15251_s15] sm:$0xff] }
 0xc0e   :  { %7261 = vmatpush1.msra.mxu1 %v15219_v26  ;;  %7332 = vmatpush1.msra.mxu0 %v15220_v21  ;;  %v7478_v26 = vld [vmem:[%s15251_s15 + $0xf0] sm:$0xff]  ;;  %v7477_v21 = vld [vmem:[%s15251_s15 + $0xe8] sm:$0xff]  ;;  %v7468_v0 = vld [vmem:[%s15251_s15 + $0xa0] sm:$0xff] }
 0xc0f   :  { %7262 = vmatprep.subr.mxu1 %v15221_v51  ;;  %7333 = vmatprep.subr.mxu0 %v15222_v50  ;;  %v7475_v51 = vld [vmem:[%s15251_s15 + $0xd8] sm:$0xff]  ;;  %v7474_v50 = vld [vmem:[%s15251_s15 + $0xd0] sm:$0xff] }
 0xc10   :  { %v9084_v22 = vpop.eup %9083  ;;  %7263 = vmatpush1.msra.mxu1 %v15223_v54  ;;  %7334 = vmatpush1.msra.mxu0 %v15131_v59  ;;  %v7472_v54 = vld [vmem:[%s15251_s15 + $0xc0] sm:$0xff] }
 0xc11   :  { %v7098_v36 = vmul.f32 %v9084_v22, %v9080_v16  ;;  %7264 = vmatprep.subr.mxu1 %v13381_v9  ;;  %7335 = vmatprep.subr.mxu0 %v15224_v15  ;;  %v15229_v9 = vld [vmem:[#allocation87_spill] sm:$0xff]  ;;  %v7473_v22 = vld [vmem:[%s15251_s15 + $0xc8] sm:$0xff]  ;;  %v7470_v15 = vld [vmem:[%s15251_s15 + $0xb0] sm:$0xff] }
 0xc12   :  { %v9086_v30 = vpop.eup %9085  ;;  %7265 = vmatpush1.msra.mxu1 %v15225_v14  ;;  %7336 = vmatpush1.msra.mxu0 %v15226_v57  ;;  %v7479_v16 = vld [vmem:[%s15251_s15 + $0xf8] sm:$0xff]  ;;  %v7466_v57 = vld [vmem:[%s15251_s15 + $0x90] sm:$0xff] }
 0xc13   :  { %v7097_v7 = vmul.f32 %v9086_v30, %v13684_v39  ;;  %7266 = vmatprep.subr.mxu1 %v15135_v61  ;;  %7337 = vmatprep.subr.mxu0 %v15227_v2  ;;  %v7469_v30 = vld [vmem:[%s15251_s15 + $0xa8] sm:$0xff]  ;;  %v7467_v14 = vld [vmem:[%s15251_s15 + $0x98] sm:$0xff]  ;;  %v7464_v2 = vld [vmem:[%s15251_s15 + $0x80] sm:$0xff] }
 0xc14   :  { %7267 = vmatpush1.msra.mxu1 %v15228_v4  ;;  %7338 = vmatpush1.msra.mxu0 %v13410_v10  ;;  %v15236_v10 = vld [vmem:[#allocation60_spill] sm:$0xff] }
 0xc15   :  { %v7099_v59 = vadd.f32 %v7098_v36, %v7097_v7  ;;  %7268 = vmatprep.subr.mxu1 %v15229_v9  ;;  %7339 = vmatprep.subr.mxu0 %v15230_v17  ;;  %v7471_v36 = vld [vmem:[%s15251_s15 + $0xb8] sm:$0xff]  ;;  %v7465_v7 = vld [vmem:[%s15251_s15 + $0x88] sm:$0xff] }
 0xc16   :  { %7269 = vmatpush1.msra.mxu1 %v15231_v27  ;;  %7340 = vmatpush1.msra.mxu0 %v15232_v28  ;;  %v15253_v28 = vld [vmem:[#allocation103_spill] sm:$0xff] }
 0xc17   :  { %7270 = vmatprep.subr.mxu1 %v15233_v23  ;;  %7341 = vmatprep.subr.mxu0 %v15234_v40  ;;  %9089 = vtanh.f32 %v7099_v59  ;;  %v13850_v42 = vsel %vm5352_vm1, %v7099_v59, %v13684_v39  ;;  %v15244_v39 = vld [vmem:[#allocation142_spill] sm:$0xff]  ;;  %v15252_v59 = vld [vmem:[#allocation39_spill] sm:$0xff] }
 0xc18   :  { %7271 = vmatpush1.msra.mxu1 %v15236_v10  ;;  %7342 = vmatpush1.msra.mxu0 %v15237_v45  ;;  %v15254_v45 = vld [vmem:[#allocation117_spill] sm:$0xff] }
 0xc19   :  { %7272 = vmatprep.subr.mxu1 %v15238_v37  ;;  %7343 = vmatprep.subr.mxu0 %v15239_v31 }
 0xc1a   :  { %7273 = vmatpush1.msra.mxu1 %v15240_v62  ;;  %7344 = vmatpush1.msra.mxu0 %v15241_v3  ;;  %v15255_v62 = vld [vmem:[#allocation115_spill] sm:$0xff] }
 0xc1b   :  { %7274 = vmatprep.subr.mxu1 %v15242_v47  ;;  %7345 = vmatprep.subr.mxu0 %v15243_v6 }
 0xc1c   :  { %7275 = vmatpush1.msra.mxu1 %v15153_v19  ;;  %7346 = vmatpush1.msra.mxu0 %v15244_v39  ;;  %v9088_v19 = vpop.eup %9087 }
 0xc1d   :  { %7276 = vmatprep.subr.mxu1 %v15245_v41  ;;  %7347 = vmatprep.subr.mxu0 %v15246_v38 }
 0xc1e   :  { %7277 = vmatpush1.msra.mxu1 %v15157_v60  ;;  %7348 = vmatpush1.msra.mxu0 %v15247_v56  ;;  %v15250_v60 = vld [vmem:[#allocation158_spill] sm:$0xff] }
 0xc1f   :  { %7278 = vmatprep.subr.mxu1 %v15248_v32  ;;  %7349 = vmatprep.subr.mxu0 %v15160_v48  ;;  %v7458_v48 = vld [vmem:[%s15251_s15 + $0x50] sm:$0xff] }
 0xc20   :  { %7279 = vmatpush1.msra.mxu1 %v15161_v8  ;;  %7350 = vmatpush1.msra.mxu0 %v15162_v63  ;;  %v7460_v63 = vld [vmem:[%s15251_s15 + $0x60] sm:$0xff] }
 0xc21   :  { %7280 = vmatprep.subr.mxu1 %v15249_v34  ;;  %7351 = vmatprep.subr.mxu0 %v13519_v33 }
 0xc22   :  { %7281 = vmatpush1.msra.mxu1 %v15164_v12  ;;  %7352 = vmatpush1.msra.mxu0 %v15165_v55  ;;  %v7457_v12 = vld [vmem:[%s15251_s15 + $0x48] sm:$0xff]  ;;  %v7456_v55 = vld [vmem:[%s15251_s15 + $0x40] sm:$0xff] }
 0xc23   :  { %7282 = vmatprep.subr.mxu1 %v15250_v60  ;;  %7353 = vmatprep.subr.mxu0 %v15166_v58  ;;  %v7459_v58 = vld [vmem:[%s15251_s15 + $0x58] sm:$0xff] }
 0xc24   :  { %v9090_v49 = vpop.eup %9089  ;;  %7283 = vmatpush1.msra.mxu1 %v13539_v53  ;;  %7316 = vmatprep.mubr.f32.mxu1 %v14535_v46  ;;  %v7463_v53 = vld [vmem:[%s15251_s15 + $0x78] sm:$0xff] }
 0xc25   :  { %7354 = vmatpush1.msra.mxu0 %v13544_v25  ;;  %7387 = vmatprep.mubr.f32.mxu0 %v14535_v46  ;;  %v7101_v33 = vmul.f32 %v9090_v49, %v9088_v19  ;;  %v7462_v25 = vld [vmem:[%s15251_s15 + $0x70] sm:$0xff] }
 0xc26   :  { %8735 = vmatprep.subr.mxu0 %v14535_v46  ;;  %8700 = vmatprep.subr.mxu1 %v14535_v46 }
 0xc27   :  { %v13885_v8 = vsel %vm5352_vm1, %v7101_v33, %v13719_v52  ;;  %v7461_v52 = vld [vmem:[%s15251_s15 + $0x68] sm:$0xff] }
 0xc28   :  { %7317 = vmatmul.mubr.f32.vlgmr.msra.gmra.mxu1 %v13885_v8  ;;  %7388 = vmatmul.mubr.f32.vlgmr.msra.gmra.mxu0 %v13885_v8  ;;  %v15256_v33 = vld [vmem:[#allocation105_spill] sm:$0xff] }
 0xc29   :  { %8767 = vmatprep.mubr.msk.f32.mxu0 %vm9637_vm0, %v14535_v46  ;;  %8732 = vmatprep.mubr.msk.f32.mxu1 %vm9637_vm0, %v14535_v46 }
 0xc2a   :  { %8736 = vmatpush3.msra.mxu0 %v7463_v53  ;;  %8701 = vmatpush3.msra.mxu1 %v7479_v16  ;;  %v8090_v16 = vld [vmem:[%s15257_s16] ss:$0 sm:$0xff] }
 0xc2b   :  { %8737 = vmatprep.subr.mxu0 %v14535_v46  ;;  %8702 = vmatprep.subr.mxu1 %v14535_v46 }
 0xc2c   :  { %8738 = vmatpush3.msra.mxu0 %v7462_v25  ;;  %8703 = vmatpush3.msra.mxu1 %v7478_v26 }
 0xc2d   :  { %8739 = vmatprep.subr.mxu0 %v14535_v46  ;;  %8704 = vmatprep.subr.mxu1 %v14535_v46 }
 0xc2e   :  { %8740 = vmatpush3.msra.mxu0 %v7461_v52  ;;  %8705 = vmatpush3.msra.mxu1 %v7477_v21 }
 0xc2f   :  { %8741 = vmatprep.subr.mxu0 %v14535_v46  ;;  %8706 = vmatprep.subr.mxu1 %v14535_v46 }
 0xc30   :  { %8742 = vmatpush3.msra.mxu0 %v7460_v63  ;;  %8707 = vmatpush3.msra.mxu1 %v7476_v13 }
 0xc31   :  { %8743 = vmatprep.subr.mxu0 %v14535_v46  ;;  %8708 = vmatprep.subr.mxu1 %v14535_v46 }
 0xc32   :  { %8744 = vmatpush3.msra.mxu0 %v7459_v58  ;;  %8709 = vmatpush3.msra.mxu1 %v7475_v51  ;;  %v15258_v58 = vld [vmem:[#allocation107_spill] sm:$0xff] }
 0xc33   :  { %8745 = vmatprep.subr.mxu0 %v14535_v46  ;;  %8710 = vmatprep.subr.mxu1 %v14535_v46 }
 0xc34   :  { %8746 = vmatpush3.msra.mxu0 %v7458_v48  ;;  %8711 = vmatpush3.msra.mxu1 %v7474_v50  ;;  %v15262_v50 = vld [vmem:[#allocation38_spill] sm:$0xff] }
 0xc35   :  { %8747 = vmatprep.subr.mxu0 %v14535_v46  ;;  %8712 = vmatprep.subr.mxu1 %v14535_v46 }
 0xc36   :  { %8748 = vmatpush3.msra.mxu0 %v7457_v12  ;;  %8713 = vmatpush3.msra.mxu1 %v7473_v22  ;;  %v505_v22 = vadd.f32 %v8090_v16, %v15262_v50  ;;  %v8281_v16 = vld [vmem:[#allocation17] ss:$0 sm:$0xff]  ;;  %v8283_v50 = vld [vmem:[#allocation2] ss:$0 sm:$0xff] }
 0xc37   :  { %8749 = vmatprep.subr.mxu0 %v14535_v46  ;;  %8714 = vmatprep.subr.mxu1 %v14535_v46 }
 0xc38   :  { %8750 = vmatpush3.msra.mxu0 %v7456_v55  ;;  %8715 = vmatpush3.msra.mxu1 %v7472_v54 }
 0xc39   :  { %8751 = vmatprep.subr.mxu0 %v14535_v46  ;;  %8716 = vmatprep.subr.mxu1 %v14535_v46 }
 0xc3a   :  { %8752 = vmatpush3.msra.mxu0 %v7455_v44  ;;  %8717 = vmatpush3.msra.mxu1 %v7471_v36  ;;  %v7630_v36 = vld [vmem:[%s15260_s18 + $0x8] sm:$0xff] }
 0xc3b   :  { %8753 = vmatprep.subr.mxu0 %v14535_v46  ;;  %8718 = vmatprep.subr.mxu1 %v14535_v46 }
 0xc3c   :  { %8754 = vmatpush3.msra.mxu0 %v7454_v18  ;;  %8719 = vmatpush3.msra.mxu1 %v7470_v15 }
 0xc3d   :  { %8755 = vmatprep.subr.mxu0 %v14535_v46  ;;  %8720 = vmatprep.subr.mxu1 %v14535_v46 }
 0xc3e   :  { %8756 = vmatpush3.msra.mxu0 %v7453_v35  ;;  %8721 = vmatpush3.msra.mxu1 %v7469_v30  ;;  %v15259_v35 = vld [vmem:[#allocation121_spill] sm:$0xff] }
 0xc3f   :  { %8757 = vmatprep.subr.mxu0 %v14535_v46  ;;  %8722 = vmatprep.subr.mxu1 %v14535_v46 }
 0xc40   :  { %8758 = vmatpush3.msra.mxu0 %v7452_v29  ;;  %8723 = vmatpush3.msra.mxu1 %v7468_v0  ;;  %v7629_v0 = vld [vmem:[%s15260_s18] sm:$0xff] }
 0xc41   :  { %8759 = vmatprep.subr.mxu0 %v14535_v46  ;;  %8724 = vmatprep.subr.mxu1 %v14535_v46 }
 0xc42   :  { %8760 = vmatpush3.msra.mxu0 %v7451_v20  ;;  %8725 = vmatpush3.msra.mxu1 %v7467_v14  ;;  %v15261_v20 = vld [vmem:[#allocation119_spill] sm:$0xff]  ;;  %v508_v14 = vmax.f32 %v505_v22, 0.0 }
 0xc43   :  { %8761 = vmatprep.subr.mxu0 %v14535_v46  ;;  %8726 = vmatprep.subr.mxu1 %v14535_v46 }
 0xc44   :  { %8762 = vmatpush3.msra.mxu0 %v7450_v11  ;;  %8727 = vmatpush3.msra.mxu1 %v7466_v57 }
 0xc45   :  { %8763 = vmatprep.subr.mxu0 %v14535_v46  ;;  %8728 = vmatprep.subr.mxu1 %v14535_v46 }
 0xc46   :  { %8764 = vmatpush3.msra.mxu0 %v7449_v5  ;;  %8729 = vmatpush3.msra.mxu1 %v7465_v7 }
 0xc47   :  { %8765 = vmatprep.subr.mxu0 %v14535_v46  ;;  %8730 = vmatprep.subr.mxu1 %v14535_v46 }
 0xc48   :  { %8766 = vmatpush3.msra.mxu0 %v7448_v43  ;;  %8731 = vmatpush3.msra.mxu1 %v7464_v2 }
 0xc49   :  { %8777 = vmatprep.subr.mxu0 %v14535_v46  ;;  %8770 = vmatprep.subr.mxu1 %v14535_v46 }
 0xcc5   :  { %v7172_v4 = vpop.f32.mrf.mxu1  ;;  %v7243_v40 = vpop.f32.mrf.mxu0 }
 0xcc6   :  { %v7248_v9 = vadd.f32 %v7172_v4, %v15252_v59  ;;  %v7250_v3 = vadd.f32 %v7243_v40, %v15255_v62  ;;  %v7632_v40 = vld [vmem:[%s15260_s18 + $0x18] sm:$0xff] }
 0xcc7   :  { %v7174_v17 = vpop.f32.mrf.mxu1  ;;  %v7245_v10 = vpop.f32.mrf.mxu0  ;;  %v7871_v62 = vld [vmem:[%s15265_s22 + $0x38] sm:$0xff] }
 0xcc8   :  { %v8270_v27 = vmul.f32 -1.442695, %v7248_v9  ;;  %v7249_v23 = vadd.f32 %v7174_v17, %v15253_v28  ;;  %v7251_v37 = vadd.f32 %v7245_v10, %v15254_v45  ;;  %v7631_v45 = vld [vmem:[%s15260_s18 + $0x10] sm:$0xff] }
 0xcca   :  { %9091 = vpow2.f32 %v8270_v27  ;;  %v8271_v61 = vmul.f32 -1.442695, %v7249_v23  ;;  %v8272_v31 = vmul.f32 -1.442695, %v7251_v37 }
 0xccc   :  { %9093 = vpow2.f32 %v8271_v61 }
 0xccd   :  { %9095 = vpow2.f32 %v8272_v31  ;;  %v7633_v31 = vld [vmem:[%s15260_s18 + $0x20] sm:$0xff] }
 0xcce   :  { %9097 = vtanh.f32 %v7250_v3  ;;  %v7870_v3 = vld [vmem:[%s15265_s22 + $0x30] sm:$0xff] }
 0xcd7   :  { %v9092_v47 = vpop.eup %9091 }
 0xcd8   :  { %v7401_v6 = vadd.f32 1.0, %v9092_v47  ;;  %v7869_v47 = vld [vmem:[%s15265_s22 + $0x28] sm:$0xff] }
 0xcd9   :  { %v9094_v39 = vpop.eup %9093 }
 0xcda   :  { %9099 = vrcp.f32 %v7401_v6  ;;  %v7407_v41 = vadd.f32 1.0, %v9094_v39  ;;  %v9096_v38 = vpop.eup %9095  ;;  %v7868_v6 = vld [vmem:[%s15265_s22 + $0x20] sm:$0xff] }
 0xcdb   :  { %v9098_v56 = vpop.eup %9097  ;;  %v7414_v19 = vadd.f32 1.0, %v9096_v38 }
 0xcdc   :  { %9101 = vrcp.f32 %v7407_v41 }
 0xcdd   :  { %9103 = vrcp.f32 %v7414_v19 }
 0xce7   :  { %v9100_v32 = vpop.eup %9099 }
 0xce8   :  { %v7418_v34 = vmul.f32 %v9100_v32, %v9098_v56  ;;  %v7318_v60 = vpop.f32.mrf.mxu1  ;;  %v7389_v55 = vpop.f32.mrf.mxu0 }
 0xce9   :  { %v9102_v49 = vpop.eup %9101  ;;  %v7394_v53 = vadd.f32 %v7318_v60, %v15256_v33  ;;  %v7396_v11 = vadd.f32 %v7389_v55, %v15261_v20  ;;  %v7956_v55 = vld [vmem:[%s9788_s13 + $0x18] sm:$0xff] }
 0xcea   :  { %v7417_v25 = vmul.f32 %v9102_v49, %v13799_v24  ;;  %v7320_v52 = vpop.f32.mrf.mxu1  ;;  %v7391_v18 = vpop.f32.mrf.mxu0 }
 0xceb   :  { %v8273_v63 = vmul.f32 -1.442695, %v7394_v53  ;;  %v7395_v48 = vadd.f32 %v7320_v52, %v15258_v58  ;;  %v7397_v29 = vadd.f32 %v7391_v18, %v15259_v35  ;;  %v9104_v24 = vpop.eup %9103  ;;  %v7866_v58 = vld [vmem:[%s15265_s22 + $0x10] sm:$0xff] }
 0xcec   :  { %v7419_v12 = vadd.f32 %v7418_v34, %v7417_v25  ;;  %v8276_v34 = vld [vmem:[#allocation14] ss:$0 sm:$0xff]  ;;  %v8280_v18 = vld [vmem:[#allocation16] ss:$0 sm:$0xff] }
 0xced   :  { %9105 = vpow2.f32 %v8273_v63  ;;  %v8274_v44 = vmul.f32 -1.442695, %v7395_v48  ;;  %v8275_v5 = vmul.f32 -1.442695, %v7397_v29  ;;  %v7867_v63 = vld [vmem:[%s15265_s22 + $0x18] sm:$0xff]  ;;  %v7865_v48 = vld [vmem:[%s15265_s22 + $0x8] sm:$0xff] }
 0xcee   :  { %9107 = vtanh.f32 %v7419_v12  ;;  %v7864_v12 = vld [vmem:[%s15265_s22] sm:$0xff] }
 0xcef   :  { %9109 = vpow2.f32 %v8274_v44 }
 0xcf0   :  { %9111 = vtanh.f32 %v7396_v11 }
 0xcf1   :  { %9113 = vpow2.f32 %v8275_v5  ;;  %v7955_v5 = vld [vmem:[%s9788_s13 + $0x10] sm:$0xff] }
 0xcfa   :  { %v9106_v43 = vpop.eup %9105 }
 0xcfb   :  { %v9108_v26 = vpop.eup %9107  ;;  %v7425_v21 = vadd.f32 1.0, %v9106_v43  ;;  %v7953_v43 = vld [vmem:[%s9788_s13] sm:$0xff] }
 0xcfc   :  { %v9110_v13 = vpop.eup %9109  ;;  %v7421_v51 = vmul.f32 %v9108_v26, %v9104_v24  ;;  %v7954_v24 = vld [vmem:[%s9788_s13 + $0x8] sm:$0xff] }
 0xcfd   :  { %9115 = vrcp.f32 %v7425_v21  ;;  %v7431_v54 = vadd.f32 1.0, %v9110_v13 }
 0xcfe   :  { %v7446_v30 = vsel %vm5003_vm15, %v7421_v51, %v13806_v1  ;;  %v9112_v1 = vpop.eup %9111 }
 0xcff   :  { %9117 = vrcp.f32 %v7431_v54  ;;  %8768 = vmatmul.mubr.f32.vlgmr.msra.gmra.mxu0 %v7446_v30  ;;  %v9114_v57 = vpop.eup %9113 }
 0xd00   :  { %8778 = vmatpush3.msra.mxu0 %v7630_v36  ;;  %8781 = vmatprep.mubr.msk.f32.mxu0 %vm9637_vm0, %v14535_v46  ;;  %v7438_v59 = vadd.f32 1.0, %v9114_v57 }
 0xd01   :  { %8779 = vmatprep.subr.mxu0 %v14535_v46 }
 0xd02   :  { %8780 = vmatpush3.msra.mxu0 %v7629_v0  ;;  %9119 = vrcp.f32 %v7438_v59 }
 0xd03   :  { %8782 = vmatmul.mubr.msk.f32.vlgmr.msra.gmra.mxu0 %vm543_vm5, %v508_v14  ;;  %8791 = vmatprep.subr.mxu0 %v14535_v46 }
 0xd04   :  { %8807 = vmatprep.mubr.msk.f32.mxu0 %vm9637_vm0, %v14535_v46  ;;  %8792 = vmatpush3.msra.mxu0 %v7871_v62 }
 0xd05   :  { %8793 = vmatprep.subr.mxu0 %v14535_v46 }
 0xd06   :  { %8794 = vmatpush3.msra.mxu0 %v7870_v3 }
 0xd07   :  { %8795 = vmatprep.subr.mxu0 %v14535_v46 }
 0xd08   :  { %8796 = vmatpush3.msra.mxu0 %v7869_v47 }
 0xd09   :  { %8797 = vmatprep.subr.mxu0 %v14535_v46 }
 0xd0a   :  { %v9116_v7 = vpop.eup %9115  ;;  %8798 = vmatpush3.msra.mxu0 %v7868_v6 }
 0xd0b   :  { %v7442_v2 = vmul.f32 %v9116_v7, %v9112_v1  ;;  %8799 = vmatprep.subr.mxu0 %v14535_v46 }
 0xd0c   :  { %v9118_v4 = vpop.eup %9117  ;;  %8800 = vmatpush3.msra.mxu0 %v7867_v63 }
 0xd0d   :  { %v7441_v9 = vmul.f32 %v9118_v4, %v13850_v42  ;;  %v15266_v42 = vld [vmem:[#allocation45_spill] sm:$0xff]  ;;  %8801 = vmatprep.subr.mxu0 %v14535_v46 }
 0xd0e   :  { %v3983_v37 = vmax.f32 %v15266_v42, 0.0  ;;  %8802 = vmatpush3.msra.mxu0 %v7866_v58 }
 0xd0f   :  { %v7443_v17 = vadd.f32 %v7442_v2, %v7441_v9  ;;  %v9120_v27 = vpop.eup %9119  ;;  %8803 = vmatprep.subr.mxu0 %v14535_v46 }
 0xd10   :  { %8804 = vmatpush3.msra.mxu0 %v7865_v48 }
 0xd11   :  { %9121 = vtanh.f32 %v7443_v17  ;;  %8805 = vmatprep.subr.mxu0 %v14535_v46 }
 0xd12   :  { %8806 = vmatpush3.msra.mxu0 %v7864_v12 }
 0xd1e   :  { %v9122_v28 = vpop.eup %9121 }
 0xd1f   :  { %v7445_v23 = vmul.f32 %v9122_v28, %v9120_v27 }
 0xd21   :  { %v7447_v10 = vsel %vm4996_vm14, %v7445_v23, %v13885_v8  ;;  %v7634_v8 = vld [vmem:[%s15260_s18 + $0x28] sm:$0xff] }
 0xd22   :  { %8733 = vmatmul.mubr.f32.vlgmr.msra.gmra.mxu1 %v7447_v10 }
 0xd23   :  { %8771 = vmatpush3.msra.mxu1 %v7632_v40  ;;  %8774 = vmatprep.mubr.msk.f32.mxu1 %vm9637_vm0, %v14535_v46 }
 0xd24   :  { %8772 = vmatprep.subr.mxu1 %v14535_v46 }
 0xd25   :  { %8773 = vmatpush3.msra.mxu1 %v7631_v45 }
 0xd26   :  { %8775 = vmatmul.mubr.msk.f32.vlgmr.msra.gmra.mxu1 %vm543_vm5, %v3983_v37  ;;  %8784 = vmatprep.subr.mxu1 %v14535_v46 }
 0xd27   :  { %8788 = vmatprep.mubr.msk.f32.mxu1 %vm9637_vm0, %v14535_v46  ;;  %8785 = vmatpush3.msra.mxu1 %v7634_v8 }
 0xd28   :  { %8786 = vmatprep.subr.mxu1 %v14535_v46 }
 0xd29   :  { %8787 = vmatpush3.msra.mxu1 %v7633_v31 }
 0xd2a   :  { %8810 = vmatprep.subr.mxu1 %v14535_v46 }
 0xdbf   :  { %v7616_v39 = vpop.f32.mrf.mxu0 }
 0xdc1   :  { %v8769_v41 = vpop.f32.mrf.mxu0 }
 0xdc3   :  { %v7777_v38 = vpop.f32.mrf.mxu0 }
 0xdc5   :  { %v8783_v56 = vpop.f32.mrf.mxu0 }
 0xde2   :  { %v7546_v32 = vpop.f32.mrf.mxu1 }
 0xde3   :  { %v7617_v19 = vadd.f32 %v7616_v39, %v7546_v32 }
 0xde4   :  { %v8734_v60 = vpop.f32.mrf.mxu1 }
 0xde5   :  { %v7627_v49 = vadd.f32 %v8276_v34, %v7617_v19 }
 0xde6   :  { %v7704_v33 = vpop.f32.mrf.mxu1 }
 0xde7   :  { %v7628_v53 = vmax.f32 %v7627_v49, 0.0  ;;  %v7778_v25 = vadd.f32 %v7777_v38, %v7704_v33 }
 0xde8   :  { %v8776_v52 = vpop.f32.mrf.mxu1 }
 0xde9   :  { %8789 = vmatmul.mubr.msk.f32.vlgmr.msra.gmra.mxu1 %vm543_vm5, %v7628_v53 }
 0xdea   :  { %8818 = vmatprep.mubr.msk.f32.mxu1 %vm9637_vm0, %v14535_v46  ;;  %8811 = vmatpush3.msra.mxu1 %v7956_v55  ;;  %vm8043_vm0 = vcmask 7168  }
 0xdeb   :  { %8812 = vmatprep.subr.mxu1 %v14535_v46 }
 0xdec   :  { %8813 = vmatpush3.msra.mxu1 %v7955_v5 }
 0xded   :  { %8814 = vmatprep.subr.mxu1 %v14535_v46 }
 0xdee   :  { %8815 = vmatpush3.msra.mxu1 %v7954_v24 }
 0xdef   :  { %8816 = vmatprep.subr.mxu1 %v14535_v46 }
 0xdf0   :  { %8817 = vmatpush3.msra.mxu1 %v7953_v43 }
 0xea9   :  { %v7850_v44 = vpop.f32.mrf.mxu1 }
 0xeaa   :  { %v7854_v35 = vadd.f32 %v7850_v44, %v7778_v25 }
 0xeab   :  { %v8790_v29 = vpop.f32.mrf.mxu1 }
 0xeac   :  { %v7862_v20 = vadd.f32 %v8280_v18, %v7854_v35 }
 0xeae   :  { %v7863_v11 = vmax.f32 %v7862_v20, 0.0 }
 0xeb0   :  { %8808 = vmatmul.mubr.msk.f32.vlgmr.msra.gmra.mxu0 %vm348_vm3, %v7863_v11 }
 0xf70   :  { %v7948_v26 = vpop.f32.mrf.mxu0 }
 0xf71   :  { %v7949_v21 = vadd.f32 %v8281_v16, %v7948_v26 }
 0xf72   :  { %v8809_v13 = vpop.f32.mrf.mxu0 }
 0xf73   :  { %v7952_v51 = vmax.f32 %v7949_v21, 0.0 }
 0xf75   :  { %8819 = vmatmul.mubr.msk.f32.vlgmr.msra.gmra.mxu1 %vm434_vm6, %v7952_v51 }
0x1035   :  { %v8033_v22 = vpop.f32.mrf.mxu1 }
0x1036   :  { %v8034_v54 = vadd.f32 %v8283_v50, %v8033_v22 }
0x1037   :  { %v8820_v36 = vpop.f32.mrf.mxu1 }
0x1038   :  { %v8285_v15 = vmul.f32 -1.442695, %v8034_v54 }
0x103a   :  { %9123 = vpow2.f32 %v8285_v15 }
0x1047   :  { %v9124_v30 = vpop.eup %9123 }
0x1048   :  { %v8040_v0 = vadd.f32 1.0, %v9124_v30 }
0x104a   :  { %9125 = vrcp.f32 %v8040_v0 }
0x1057   :  { %v9126_v46 = vpop.eup %9125 }
0x1058   :  { %8044 = vst.msk [vmem:[%s9796_s12] sm:$0xff] %vm8043_vm0, %v9126_v46 }
0x1059   :  { %8049 = vsyncpa [#allocation4], 1 }
0x105a   :  { %8050 = vsyncpa [#allocation6], 1 }
0x105b   :  { %8051 = vsyncpa [#allocation9], 1 }
0x105c   :  { %8052 = vsyncpa [#allocation12], 1 }
0x105d   :  { %8053 = vsyncpa [#allocation15], 1 }
0x105e   :  { %8054 = vsyncpa [#allocation18], 1 }

</bundles_post_ra>
